<compile_context>
chip_gen: v7x
topology: tpu7x:2x2x1
jax: 0.10.0
libtpu: 0.0.40
codegen_flags: <defaults>
</compile_context>

<pallas_src>
import jax
import jax.numpy as jnp
from jax.experimental import pallas as pl
from jax.experimental.pallas import tpu as pltpu


VMEM_LIMIT = 32 * 1024 * 1024  # v7x-safe (64 MiB physical); blocks here are far smaller


def _round_up(x, m):
    return (x + m - 1) // m * m


# ----------------------------------------------------------------------------
# Kernel 1: tiled pointwise 1x1 conv + folded-BN + ReLU (head16)
# ----------------------------------------------------------------------------
def _pw_relu_kernel(x_ref, w_ref, b_ref, o_ref):
    acc = jnp.dot(x_ref[...], w_ref[...], preferred_element_type=jnp.float32)
    acc = jnp.maximum(acc + b_ref[...], 0.0)
    o_ref[...] = acc.astype(o_ref.dtype)


def pointwise_conv_bn_relu(x2, w, bias, *, tile_m=512):
    """x2: (M, Cin) bf16, w: (Cin, Cout) bf16 (BN scale folded), bias: (1, Cout) f32."""
    M, Cin = x2.shape
    Cout = w.shape[1]
    TM = min(tile_m, _round_up(M, 16))
    Mp = _round_up(M, TM)
    if Mp != M:
        x2 = jnp.pad(x2, ((0, Mp - M), (0, 0)))
    out = pl.pallas_call(
        _pw_relu_kernel,
        out_shape=jax.ShapeDtypeStruct((Mp, Cout), jnp.bfloat16),
        grid=(Mp // TM,),
        in_specs=[
            pl.BlockSpec((TM, Cin), lambda i: (i, 0)),
            pl.BlockSpec((Cin, Cout), lambda i: (0, 0)),
            pl.BlockSpec((1, Cout), lambda i: (0, 0)),
        ],
        out_specs=pl.BlockSpec((TM, Cout), lambda i: (i, 0)),
        compiler_params=pltpu.CompilerParams(
            dimension_semantics=("parallel",),
            vmem_limit_bytes=VMEM_LIMIT),
    )(x2, w, bias)
    return out[:M]


# ----------------------------------------------------------------------------
# Kernel 2: fused head8 (1x1+BN+ReLU, masked) + residual add + conv8 (3x3+BN+ReLU)
# ----------------------------------------------------------------------------
def _make_head_conv3x3_kernel(n_rows_out, row_pitch):
    """x_ref:(1,L,Cin) zero-padded flat rows (pitch W+2); res_ref:(1,L,Cmid) residual
    already zero on pad pixels; mask zeroes relu(bias) on pad pixels; 9 conv taps are
    contiguous row slices of a VMEM scratch feeding accumulated bf16 MXU matmuls."""
    def kernel(x_ref, res_ref, wpw_ref, bpw_ref, mask_ref, w9_ref, bcv_ref,
               o_ref, src_scr):
        pw = jnp.dot(x_ref[0], wpw_ref[...], preferred_element_type=jnp.float32)
        pw = jnp.maximum(pw + bpw_ref[...], 0.0) * mask_ref[...]
        src_scr[...] = (pw + res_ref[0].astype(jnp.float32)).astype(jnp.bfloat16)
        acc = None
        for ky in range(3):
            for kx in range(3):
                off = ky * row_pitch + kx
                tap = src_scr[off:off + n_rows_out, :]
                part = jnp.dot(tap, w9_ref[ky * 3 + kx],
                               preferred_element_type=jnp.float32)
                acc = part if acc is None else acc + part
        o_ref[0] = jnp.maximum(acc + bcv_ref[...], 0.0).astype(o_ref.dtype)
    return kernel


def fused_head8_residual_conv8(x8, res_pad, w_head, b_head, w9, b_conv):
    """x8: (N,H,W,Cin) raw feature; res_pad: (N,L,Cmid) pre-padded residual (bf16)."""
    N, H, W, Cin = x8.shape
    Cmid = w_head.shape[1]
    Cout = w9.shape[-1]
    Wp = W + 2
    L = (H + 3) * Wp          # 1 top pad row, 2 bottom (covers junk-column tap overrun)
    Lo = H * Wp
    xpad = jnp.pad(x8, ((0, 0), (1, 2), (1, 1), (0, 0))).reshape(N, L, Cin)
    xpad = xpad.astype(jnp.bfloat16)
    mask = jnp.pad(jnp.ones((H, W), jnp.float32), ((1, 2), (1, 1))).reshape(L, 1)
    out = pl.pallas_call(
        _make_head_conv3x3_kernel(Lo, Wp),
        out_shape=jax.ShapeDtypeStruct((N, Lo, Cout), jnp.bfloat16),
        grid=(N,),
        in_specs=[
            pl.BlockSpec((1, L, Cin), lambda n: (n, 0, 0)),
            pl.BlockSpec((1, L, Cmid), lambda n: (n, 0, 0)),
            pl.BlockSpec((Cin, Cmid), lambda n: (0, 0)),
            pl.BlockSpec((1, Cmid), lambda n: (0, 0)),
            pl.BlockSpec((L, 1), lambda n: (0, 0)),
            pl.BlockSpec((9, Cmid, Cout), lambda n: (0, 0, 0)),
            pl.BlockSpec((1, Cout), lambda n: (0, 0)),
        ],
        out_specs=pl.BlockSpec((1, Lo, Cout), lambda n: (n, 0, 0)),
        scratch_shapes=[pltpu.VMEM((L, Cmid), jnp.bfloat16)],
        compiler_params=pltpu.CompilerParams(
            dimension_semantics=("parallel",),
            vmem_limit_bytes=VMEM_LIMIT),
    )(xpad, res_pad, w_head, b_head, mask, w9, b_conv)
    return out.reshape(N, H, Wp, Cout)[:, :, :W, :]   # drop 2 junk cols per image row


# ----------------------------------------------------------------------------
# Kernel 3: fused head4 + channel-concat + conv4 (3x3+BN+ReLU) + classifier
# ----------------------------------------------------------------------------
def _make_cat_conv3x3_cls_kernel(n_rows_out, row_pitch):
    """conv4 taps are split into the 128-ch (z_ref) and 16-ch (in-kernel head4) channel
    groups, so torch.cat never materializes; the 1x1 classifier runs in the epilogue on
    data still in vregs, emitting a lane-dense (rows, 128) output."""
    def kernel(z_ref, x_ref, wh_ref, bh_ref, mask_ref, w9a_ref, w9b_ref,
               bcv_ref, wcls_ref, bcls_ref, o_ref, pw_scr):
        pw = jnp.dot(x_ref[0], wh_ref[...], preferred_element_type=jnp.float32)
        pw = jnp.maximum(pw + bh_ref[...], 0.0) * mask_ref[...]
        pw_scr[...] = pw.astype(jnp.bfloat16)
        acc = None
        for ky in range(3):
            for kx in range(3):
                off = ky * row_pitch + kx
                t = ky * 3 + kx
                part = jnp.dot(z_ref[0, off:off + n_rows_out, :], w9a_ref[t],
                               preferred_element_type=jnp.float32)
                part = part + jnp.dot(pw_scr[off:off + n_rows_out, :], w9b_ref[t],
                                      preferred_element_type=jnp.float32)
                acc = part if acc is None else acc + part
        z = jnp.maximum(acc + bcv_ref[...], 0.0).astype(jnp.bfloat16)
        out = jnp.dot(z, wcls_ref[...], preferred_element_type=jnp.float32)
        o_ref[0] = (out + bcls_ref[...]).astype(o_ref.dtype)
    return kernel


def fused_head4_cat_conv4_cls(z_pad, x4, w_head, b_head, w9a, w9b, b_conv,
                              w_cls, b_cls):
    """z_pad: (N,L,128) pre-padded upsampled conv8 output (bf16); x4: (N,H,W,C4) raw
    quarter-res feature.  Returns (N,H,W,Ccls_padded) float32."""
    N, H, W, Cin = x4.shape
    Chead = w_head.shape[1]
    Cz = w9a.shape[1]
    Cout = w9a.shape[-1]
    Ccls = w_cls.shape[-1]
    Wp = W + 2
    L = (H + 3) * Wp
    Lo = H * Wp
    xpad = jnp.pad(x4, ((0, 0), (1, 2), (1, 1), (0, 0))).reshape(N, L, Cin)
    xpad = xpad.astype(jnp.bfloat16)
    mask = jnp.pad(jnp.ones((H, W), jnp.float32), ((1, 2), (1, 1))).reshape(L, 1)
    out = pl.pallas_call(
        _make_cat_conv3x3_cls_kernel(Lo, Wp),
        out_shape=jax.ShapeDtypeStruct((N, Lo, Ccls), jnp.float32),
        grid=(N,),
        in_specs=[
            pl.BlockSpec((1, L, Cz), lambda n: (n, 0, 0)),
            pl.BlockSpec((1, L, Cin), lambda n: (n, 0, 0)),
            pl.BlockSpec((Cin, Chead), lambda n: (0, 0)),
            pl.BlockSpec((1, Chead), lambda n: (0, 0)),
            pl.BlockSpec((L, 1), lambda n: (0, 0)),
            pl.BlockSpec((9, Cz, Cout), lambda n: (0, 0, 0)),
            pl.BlockSpec((9, Chead, Cout), lambda n: (0, 0, 0)),
            pl.BlockSpec((1, Cout), lambda n: (0, 0)),
            pl.BlockSpec((Cout, Ccls), lambda n: (0, 0)),
            pl.BlockSpec((1, Ccls), lambda n: (0, 0)),
        ],
        out_specs=pl.BlockSpec((1, Lo, Ccls), lambda n: (n, 0, 0)),
        scratch_shapes=[pltpu.VMEM((L, Chead), jnp.bfloat16)],
        compiler_params=pltpu.CompilerParams(
            dimension_semantics=("parallel",),
            vmem_limit_bytes=VMEM_LIMIT),
    )(z_pad, xpad, w_head, b_head, mask, w9a, w9b, b_conv, w_cls, b_cls)
    return out.reshape(N, H, Wp, Ccls)[:, :, :W, :]


# ----------------------------------------------------------------------------
# Bilinear upsample (align_corners=False) as dense interpolation matmuls that emit
# the zero-padded, row-flattened layout the fused 3x3 kernels consume directly.
# ----------------------------------------------------------------------------
def _resize_axis_weights(in_size, out_size):
    dst = jnp.arange(out_size, dtype=jnp.float32)
    src = jnp.clip((dst + 0.5) * (in_size / out_size) - 0.5, 0.0, float(in_size - 1))
    i0 = jnp.minimum(jnp.floor(src).astype(jnp.int32), in_size - 1)
    i1 = jnp.minimum(i0 + 1, in_size - 1)
    frac = src - i0.astype(jnp.float32)
    return i0, i1, 1.0 - frac                      # weight for i0


def _padded_interp_matrix(in_size, out_size, pad_before, pad_after):
    i0, i1, w0 = _resize_axis_weights(in_size, out_size)
    rows = jnp.arange(out_size)
    m = jnp.zeros((out_size, in_size), jnp.float32)
    m = m.at[rows, i0].add(w0)
    m = m.at[rows, i1].add(1.0 - w0)
    return jnp.pad(m, ((pad_before, pad_after), (0, 0)))   # zero pad rows/cols


def padded_bilinear_resize(x, out_h, out_w):
    """NHWC -> (N, (out_h+3)*(out_w+2), C) bf16, matching F.interpolate(bilinear,
    align_corners=False) on the valid pixels and exactly zero on the conv padding."""
    ah = _padded_interp_matrix(x.shape[1], out_h, 1, 2)
    aw = _padded_interp_matrix(x.shape[2], out_w, 1, 1)
    t = jnp.einsum('ip,npqc->niqc', ah, x.astype(jnp.float32))
    y = jnp.einsum('jq,niqc->nijc', aw, t)
    n, hp, wp, c = y.shape
    return y.reshape(n, hp * wp, c).astype(jnp.bfloat16)


# ----------------------------------------------------------------------------
# Parameter construction (deterministic, synthetic; BN = inference running stats)
# ----------------------------------------------------------------------------
class ParamGen:
    def __init__(self, seed):
        self.key = jax.random.PRNGKey(seed)
        self.i = 0

    def _next(self):
        self.i += 1
        return jax.random.fold_in(self.key, self.i)

    def normal(self, shape, std=0.05):
        return (std * jax.random.normal(self._next(), shape)).astype(jnp.float32)

    def uniform(self, shape, lo, hi):
        return jax.random.uniform(self._next(), shape, jnp.float32, lo, hi)


def make_bn(gen, c, eps=1e-5):
    gamma = gen.uniform((c,), 0.8, 1.2)
    beta = gen.normal((c,), 0.05)
    mean = gen.normal((c,), 0.05)
    var = gen.uniform((c,), 0.5, 1.5)
    scale = gamma / jnp.sqrt(var + eps)
    bias = beta - mean * scale
    return scale, bias


def make_decoder_params(gen, channels, num_classes):
    c4, c8, c16 = channels["4"], channels["8"], channels["16"]

    def conv1x1(cin, cout):                                   # torch (cout,cin,1,1) -> (cin,cout)
        return gen.normal((cin, cout), 1.0 / float(cin) ** 0.5)

    def conv3x3(cin, cout):                                   # torch (cout,cin,3,3) -> (9,cin,cout)
        w_t = gen.normal((cout, cin, 3, 3), 1.0 / float(9 * cin) ** 0.5)
        return jnp.transpose(w_t, (2, 3, 1, 0)).reshape(9, cin, cout)

    return {
        "head16": {"w": conv1x1(c16, 256), "bn": make_bn(gen, 256)},
        "head8":  {"w": conv1x1(c8, 256),  "bn": make_bn(gen, 256)},
        "head4":  {"w": conv1x1(c4, 16),   "bn": make_bn(gen, 16)},
        "conv8":  {"w": conv3x3(256, 128), "bn": make_bn(gen, 128)},
        "conv4":  {"w": conv3x3(128 + 16, 128), "bn": make_bn(gen, 128)},
        # classifier: 1x1 conv WITH bias, no BN, no activation
        "cls": {"w": conv1x1(128, num_classes),
                "b": gen.normal((num_classes,), 0.05)},
    }


# ----------------------------------------------------------------------------
# Forward pass (Exp2_Decoder29)
# ----------------------------------------------------------------------------
@jax.jit
def exp2_decoder29_forward(x4_nchw, x8_nchw, x16_nchw, p):
    # NCHW -> NHWC once at the module boundary; stay lane-dense NHWC throughout.
    x4 = jnp.transpose(x4_nchw, (0, 2, 3, 1))
    x8 = jnp.transpose(x8_nchw, (0, 2, 3, 1))
    x16 = jnp.transpose(x16_nchw, (0, 2, 3, 1))
    N, H16, W16, C16 = x16.shape
    H8, W8 = x8.shape[1], x8.shape[2]
    H4, W4 = x4.shape[1], x4.shape[2]

    # Fold BN scale into the conv weights; bf16 MXU operands (f32 accumulation).
    s16, bn16 = p["head16"]["bn"]
    w16 = (p["head16"]["w"] * s16[None, :]).astype(jnp.bfloat16)
    s8, bn8 = p["head8"]["bn"]
    w8 = (p["head8"]["w"] * s8[None, :]).astype(jnp.bfloat16)
    s4, bn4 = p["head4"]["bn"]
    w4 = (p["head4"]["w"] * s4[None, :]).astype(jnp.bfloat16)
    sc8, bc8 = p["conv8"]["bn"]
    w9_8 = (p["conv8"]["w"] * sc8[None, None, :]).astype(jnp.bfloat16)
    sc4, bc4 = p["conv4"]["bn"]
    w9_4 = (p["conv4"]["w"] * sc4[None, None, :]).astype(jnp.bfloat16)
    # conv4 consumes cat([upsampled conv8 (128ch), head4 (16ch)]) -> split its taps.
    w9_4a, w9_4b = w9_4[:, :128, :], w9_4[:, 128:, :]
    # classifier: pad Cout up to a lane-dense multiple of 128 (sliced back afterwards).
    n_cls = p["cls"]["w"].shape[1]
    cls_p = _round_up(n_cls, 128)
    w_cls = jnp.pad(p["cls"]["w"], ((0, 0), (0, cls_p - n_cls))).astype(jnp.bfloat16)
    b_cls = jnp.pad(p["cls"]["b"], (0, cls_p - n_cls)).reshape(1, cls_p)

    # head16: 1x1 + BN + ReLU (tiled pointwise matmul kernel).
    y16 = pointwise_conv_bn_relu(
        x16.reshape(N * H16 * W16, C16).astype(jnp.bfloat16),
        w16, bn16.reshape(1, -1))
    y16 = y16.reshape(N, H16, W16, -1)

    # x16 -> x8 bilinear upsample emitted directly in conv8's padded flat layout.
    up16_pad = padded_bilinear_resize(y16, H8, W8)

    # Fused head8 (+ residual add) + conv8 (3x3) + BN + ReLU.
    z8 = fused_head8_residual_conv8(x8, up16_pad, w8, bn8.reshape(1, -1),
                                    w9_8, bc8.reshape(1, -1))

    # x8 -> x4 bilinear upsample, again directly in conv4's padded flat layout.
    z8u_pad = padded_bilinear_resize(z8, H4, W4)

    # Fused head4 + concat + conv4 (3x3) + BN + ReLU + classifier.
    out = fused_head4_cat_conv4_cls(z8u_pad, x4, w4, bn4.reshape(1, -1),
                                    w9_4a, w9_4b, bc4.reshape(1, -1), w_cls, b_cls)
    out = out[..., :n_cls]                                   # drop lane padding
    return jnp.transpose(out, (0, 3, 1, 2))                  # back to NCHW


# ----------------------------------------------------------------------------
# Main
# ----------------------------------------------------------------------------
if __name__ == "__main__":
    N = 2
    num_classes = 19
    channels = {"4": 32, "8": 64, "16": 128}
    H4, W4 = 16, 16
    H8, W8 = 8, 8
    H16, W16 = 4, 4

    key = jax.random.PRNGKey(0)
    k4, k8, k16 = jax.random.split(key, 3)
    x4 = jax.random.normal(k4, (N, channels["4"], H4, W4), jnp.float32)     # NCHW
    x8 = jax.random.normal(k8, (N, channels["8"], H8, W8), jnp.float32)
    x16 = jax.random.normal(k16, (N, channels["16"], H16, W16), jnp.float32)

    params = make_decoder_params(ParamGen(0), channels, num_classes)

    out = exp2_decoder29_forward(x4, x8, x16, params)
    out = jax.block_until_ready(out)

    assert out.shape == (N, num_classes, H4, W4), out.shape
    assert bool(jnp.all(jnp.isfinite(out)))
    print("KERNEL_OK")
</pallas_src>

<mosaic_0001>
module attributes {stable_mosaic.version = 11 : i64} {
  func.func private @main(%arg0: i32) attributes {dimension_semantics = [#tpu.dimension_semantics<core_parallel>], iteration_bounds = array<i64: 2>, tpu.core_type = #tpu.core_type<sc_scalar_subcore>, window_params = []} {
    return
  }
}

module attributes {stable_mosaic.version = 11 : i64} {
  func.func private @main(%arg0: i32) attributes {dimension_semantics = [#tpu.dimension_semantics<core_parallel>], iteration_bounds = array<i64: 2>, tpu.core_type = #tpu.core_type<sc_scalar_subcore>, window_params = []} {
    return
  }
}

module attributes {stable_mosaic.version = 11 : i64} {
  func.func @_pw_relu_kernel(%arg0: i32, %arg1: memref<32x128xbf16, #tpu.memory_space<vmem>>, %arg2: memref<128x256xbf16, #tpu.memory_space<vmem>>, %arg3: memref<1x256xf32, #tpu.memory_space<vmem>>, %arg4: memref<32x256xbf16, #tpu.memory_space<vmem>>) attributes {dimension_semantics = [#tpu.dimension_semantics<parallel>], iteration_bounds = array<i64: 1>, scalar_prefetch = 0 : i64, scratch_operands = 0 : i64, tpu.core_type = #tpu.core_type<tc>, window_params = [{transform_indices = @transform_0, window_bounds = array<i64: 32, 128>}, {pipeline_mode = #tpu.pipeline_mode<synchronous>, transform_indices = @transform_1, window_bounds = array<i64: 128, 256>}, {pipeline_mode = #tpu.pipeline_mode<synchronous>, transform_indices = @transform_2, window_bounds = array<i64: 1, 256>}, {transform_indices = @transform_3, window_bounds = array<i64: 32, 256>}]} {
    %c0 = arith.constant 0 : index
    %c0_0 = arith.constant 0 : index
    %0 = vector.load %arg1[%c0, %c0_0] : memref<32x128xbf16, #tpu.memory_space<vmem>>, vector<32x128xbf16>
    %c0_1 = arith.constant 0 : index
    %c0_2 = arith.constant 0 : index
    %1 = vector.load %arg2[%c0_1, %c0_2] : memref<128x256xbf16, #tpu.memory_space<vmem>>, vector<128x256xbf16>
    %cst = arith.constant dense<0.000000e+00> : vector<32x256xf32>
    %2 = tpu.matmul %0, %1, %cst {dimension_numbers = #tpu.dot_dimension_numbers<[1], [0], [0], [1], [0, 0, 1, 1], [], []>} : vector<32x128xbf16>, vector<128x256xbf16>, vector<32x256xf32> -> vector<32x256xf32>
    %c0_3 = arith.constant 0 : index
    %c0_4 = arith.constant 0 : index
    %3 = vector.load %arg3[%c0_3, %c0_4] : memref<1x256xf32, #tpu.memory_space<vmem>>, vector<1x256xf32>
    %4 = vector.broadcast %3 : vector<1x256xf32> to vector<32x256xf32>
    %5 = arith.addf %2, %4 : vector<32x256xf32>
    %cst_5 = arith.constant 0.000000e+00 : f32
    %6 = vector.broadcast %cst_5 : f32 to vector<32x256xf32>
    %7 = arith.maximumf %5, %6 : vector<32x256xf32>
    %8 = arith.truncf %7 : vector<32x256xf32> to vector<32x256xbf16>
    %c0_6 = arith.constant 0 : index
    %c0_7 = arith.constant 0 : index
    %9 = vector.load %arg4[%c0_6, %c0_7] : memref<32x256xbf16, #tpu.memory_space<vmem>>, vector<32x256xbf16>
    tpu.vector_store %arg4[%c0_6, %c0_7], %8 {strides = array<i32>} : memref<32x256xbf16, #tpu.memory_space<vmem>>, vector<32x256xbf16>,
    return
  }
  func.func @transform_0(%arg0: i32) -> (i32, i32) {
    %c0_i32 = arith.constant 0 : i32
    %c0_i32_0 = arith.constant 0 : i32
    return %arg0, %c0_i32 : i32, i32
  }
  func.func @transform_1(%arg0: i32) -> (i32, i32) {
    %c0_i32 = arith.constant 0 : i32
    %c0_i32_0 = arith.constant 0 : i32
    %c0_i32_1 = arith.constant 0 : i32
    return %c0_i32, %c0_i32_0 : i32, i32
  }
  func.func @transform_2(%arg0: i32) -> (i32, i32) {
    %c0_i32 = arith.constant 0 : i32
    %c0_i32_0 = arith.constant 0 : i32
    %c0_i32_1 = arith.constant 0 : i32
    return %c0_i32, %c0_i32_0 : i32, i32
  }
  func.func @transform_3(%arg0: i32) -> (i32, i32) {
    %c0_i32 = arith.constant 0 : i32
    %c0_i32_0 = arith.constant 0 : i32
    return %arg0, %c0_i32 : i32, i32
  }
}

module attributes {stable_mosaic.version = 11 : i64} {
  func.func @kernel(%arg0: i32, %arg1: memref<1x110x64xbf16, #tpu.memory_space<vmem>>, %arg2: memref<1x110x256xbf16, #tpu.memory_space<vmem>>, %arg3: memref<64x256xbf16, #tpu.memory_space<vmem>>, %arg4: memref<1x256xf32, #tpu.memory_space<vmem>>, %arg5: memref<110x1xf32, #tpu.memory_space<vmem>>, %arg6: memref<9x256x128xbf16, #tpu.memory_space<vmem>>, %arg7: memref<1x128xf32, #tpu.memory_space<vmem>>, %arg8: memref<1x80x128xbf16, #tpu.memory_space<vmem>>, %arg9: memref<110x256xbf16, #tpu.memory_space<vmem>>) attributes {dimension_semantics = [#tpu.dimension_semantics<parallel>], iteration_bounds = array<i64: 2>, scalar_prefetch = 0 : i64, scratch_operands = 1 : i64, tpu.core_type = #tpu.core_type<tc>, window_params = [{transform_indices = @transform_0, window_bounds = array<i64: 1, 110, 64>}, {transform_indices = @transform_1, window_bounds = array<i64: 1, 110, 256>}, {pipeline_mode = #tpu.pipeline_mode<synchronous>, transform_indices = @transform_2, window_bounds = array<i64: 64, 256>}, {pipeline_mode = #tpu.pipeline_mode<synchronous>, transform_indices = @transform_3, window_bounds = array<i64: 1, 256>}, {pipeline_mode = #tpu.pipeline_mode<synchronous>, transform_indices = @transform_4, window_bounds = array<i64: 110, 1>}, {pipeline_mode = #tpu.pipeline_mode<synchronous>, transform_indices = @transform_5, window_bounds = array<i64: 9, 256, 128>}, {pipeline_mode = #tpu.pipeline_mode<synchronous>, transform_indices = @transform_6, window_bounds = array<i64: 1, 128>}, {transform_indices = @transform_7, window_bounds = array<i64: 1, 80, 128>}]} {
    %c0 = arith.constant 0 : index
    %c0_0 = arith.constant 0 : index
    %c0_1 = arith.constant 0 : index
    %0 = vector.load %arg1[%c0, %c0_0, %c0_1] : memref<1x110x64xbf16, #tpu.memory_space<vmem>>, vector<1x110x64xbf16>
    %1 = vector.shape_cast %0 : vector<1x110x64xbf16> to vector<110x64xbf16>
    %c0_2 = arith.constant 0 : index
    %c0_3 = arith.constant 0 : index
    %2 = vector.load %arg3[%c0_2, %c0_3] : memref<64x256xbf16, #tpu.memory_space<vmem>>, vector<64x256xbf16>
    %cst = arith.constant dense<0.000000e+00> : vector<110x256xf32>
    %3 = tpu.matmul %1, %2, %cst {dimension_numbers = #tpu.dot_dimension_numbers<[1], [0], [0], [1], [0, 0, 1, 1], [], []>} : vector<110x64xbf16>, vector<64x256xbf16>, vector<110x256xf32> -> vector<110x256xf32>
    %c0_4 = arith.constant 0 : index
    %c0_5 = arith.constant 0 : index
    %4 = vector.load %arg4[%c0_4, %c0_5] : memref<1x256xf32, #tpu.memory_space<vmem>>, vector<1x256xf32>
    %5 = vector.broadcast %4 : vector<1x256xf32> to vector<110x256xf32>
    %6 = arith.addf %3, %5 : vector<110x256xf32>
    %cst_6 = arith.constant 0.000000e+00 : f32
    %7 = vector.broadcast %cst_6 : f32 to vector<110x256xf32>
    %8 = arith.maximumf %6, %7 : vector<110x256xf32>
    %c0_7 = arith.constant 0 : index
    %c0_8 = arith.constant 0 : index
    %9 = vector.load %arg5[%c0_7, %c0_8] : memref<110x1xf32, #tpu.memory_space<vmem>>, vector<110x1xf32>
    %10 = vector.broadcast %9 : vector<110x1xf32> to vector<110x256xf32>
    %11 = arith.mulf %8, %10 : vector<110x256xf32>
    %c0_9 = arith.constant 0 : index
    %c0_10 = arith.constant 0 : index
    %c0_11 = arith.constant 0 : index
    %12 = vector.load %arg2[%c0_9, %c0_10, %c0_11] : memref<1x110x256xbf16, #tpu.memory_space<vmem>>, vector<1x110x256xbf16>
    %13 = vector.shape_cast %12 : vector<1x110x256xbf16> to vector<110x256xbf16>
    %14 = arith.extf %13 : vector<110x256xbf16> to vector<110x256xf32>
    %15 = arith.addf %11, %14 : vector<110x256xf32>
    %16 = arith.truncf %15 : vector<110x256xf32> to vector<110x256xbf16>
    %c0_12 = arith.constant 0 : index
    %c0_13 = arith.constant 0 : index
    %17 = vector.load %arg9[%c0_12, %c0_13] : memref<110x256xbf16, #tpu.memory_space<vmem>>, vector<110x256xbf16>
    tpu.vector_store %arg9[%c0_12, %c0_13], %16 {strides = array<i32>} : memref<110x256xbf16, #tpu.memory_space<vmem>>, vector<110x256xbf16>,
    %c0_14 = arith.constant 0 : index
    %c0_15 = arith.constant 0 : index
    %18 = vector.load %arg9[%c0_14, %c0_15] : memref<110x256xbf16, #tpu.memory_space<vmem>>, vector<80x256xbf16>
    %c0_16 = arith.constant 0 : index
    %c0_17 = arith.constant 0 : index
    %c0_18 = arith.constant 0 : index
    %19 = vector.load %arg6[%c0_16, %c0_17, %c0_18] : memref<9x256x128xbf16, #tpu.memory_space<vmem>>, vector<1x256x128xbf16>
    %20 = vector.shape_cast %19 : vector<1x256x128xbf16> to vector<256x128xbf16>
    %cst_19 = arith.constant dense<0.000000e+00> : vector<80x128xf32>
    %21 = tpu.matmul %18, %20, %cst_19 {dimension_numbers = #tpu.dot_dimension_numbers<[1], [0], [0], [1], [0, 0, 1, 1], [], []>} : vector<80x256xbf16>, vector<256x128xbf16>, vector<80x128xf32> -> vector<80x128xf32>
    %c1 = arith.constant 1 : index
    %c0_20 = arith.constant 0 : index
    %22 = vector.load %arg9[%c1, %c0_20] : memref<110x256xbf16, #tpu.memory_space<vmem>>, vector<80x256xbf16>
    %c1_21 = arith.constant 1 : index
    %c0_22 = arith.constant 0 : index
    %c0_23 = arith.constant 0 : index
    %23 = vector.load %arg6[%c1_21, %c0_22, %c0_23] : memref<9x256x128xbf16, #tpu.memory_space<vmem>>, vector<1x256x128xbf16>
    %24 = vector.shape_cast %23 : vector<1x256x128xbf16> to vector<256x128xbf16>
    %cst_24 = arith.constant dense<0.000000e+00> : vector<80x128xf32>
    %25 = tpu.matmul %22, %24, %cst_24 {dimension_numbers = #tpu.dot_dimension_numbers<[1], [0], [0], [1], [0, 0, 1, 1], [], []>} : vector<80x256xbf16>, vector<256x128xbf16>, vector<80x128xf32> -> vector<80x128xf32>
    %26 = arith.addf %21, %25 : vector<80x128xf32>
    %c2 = arith.constant 2 : index
    %c0_25 = arith.constant 0 : index
    %27 = vector.load %arg9[%c2, %c0_25] : memref<110x256xbf16, #tpu.memory_space<vmem>>, vector<80x256xbf16>
    %c2_26 = arith.constant 2 : index
    %c0_27 = arith.constant 0 : index
    %c0_28 = arith.constant 0 : index
    %28 = vector.load %arg6[%c2_26, %c0_27, %c0_28] : memref<9x256x128xbf16, #tpu.memory_space<vmem>>, vector<1x256x128xbf16>
    %29 = vector.shape_cast %28 : vector<1x256x128xbf16> to vector<256x128xbf16>
    %cst_29 = arith.constant dense<0.000000e+00> : vector<80x128xf32>
    %30 = tpu.matmul %27, %29, %cst_29 {dimension_numbers = #tpu.dot_dimension_numbers<[1], [0], [0], [1], [0, 0, 1, 1], [], []>} : vector<80x256xbf16>, vector<256x128xbf16>, vector<80x128xf32> -> vector<80x128xf32>
    %31 = arith.addf %26, %30 : vector<80x128xf32>
    %c10 = arith.constant 10 : index
    %c0_30 = arith.constant 0 : index
    %32 = vector.load %arg9[%c10, %c0_30] : memref<110x256xbf16, #tpu.memory_space<vmem>>, vector<80x256xbf16>
    %c3 = arith.constant 3 : index
    %c0_31 = arith.constant 0 : index
    %c0_32 = arith.constant 0 : index
    %33 = vector.load %arg6[%c3, %c0_31, %c0_32] : memref<9x256x128xbf16, #tpu.memory_space<vmem>>, vector<1x256x128xbf16>
    %34 = vector.shape_cast %33 : vector<1x256x128xbf16> to vector<256x128xbf16>
    %cst_33 = arith.constant dense<0.000000e+00> : vector<80x128xf32>
    %35 = tpu.matmul %32, %34, %cst_33 {dimension_numbers = #tpu.dot_dimension_numbers<[1], [0], [0], [1], [0, 0, 1, 1], [], []>} : vector<80x256xbf16>, vector<256x128xbf16>, vector<80x128xf32> -> vector<80x128xf32>
    %36 = arith.addf %31, %35 : vector<80x128xf32>
    %c11 = arith.constant 11 : index
    %c0_34 = arith.constant 0 : index
    %37 = vector.load %arg9[%c11, %c0_34] : memref<110x256xbf16, #tpu.memory_space<vmem>>, vector<80x256xbf16>
    %c4 = arith.constant 4 : index
    %c0_35 = arith.constant 0 : index
    %c0_36 = arith.constant 0 : index
    %38 = vector.load %arg6[%c4, %c0_35, %c0_36] : memref<9x256x128xbf16, #tpu.memory_space<vmem>>, vector<1x256x128xbf16>
    %39 = vector.shape_cast %38 : vector<1x256x128xbf16> to vector<256x128xbf16>
    %cst_37 = arith.constant dense<0.000000e+00> : vector<80x128xf32>
    %40 = tpu.matmul %37, %39, %cst_37 {dimension_numbers = #tpu.dot_dimension_numbers<[1], [0], [0], [1], [0, 0, 1, 1], [], []>} : vector<80x256xbf16>, vector<256x128xbf16>, vector<80x128xf32> -> vector<80x128xf32>
    %41 = arith.addf %36, %40 : vector<80x128xf32>
    %c12 = arith.constant 12 : index
    %c0_38 = arith.constant 0 : index
    %42 = vector.load %arg9[%c12, %c0_38] : memref<110x256xbf16, #tpu.memory_space<vmem>>, vector<80x256xbf16>
    %c5 = arith.constant 5 : index
    %c0_39 = arith.constant 0 : index
    %c0_40 = arith.constant 0 : index
    %43 = vector.load %arg6[%c5, %c0_39, %c0_40] : memref<9x256x128xbf16, #tpu.memory_space<vmem>>, vector<1x256x128xbf16>
    %44 = vector.shape_cast %43 : vector<1x256x128xbf16> to vector<256x128xbf16>
    %cst_41 = arith.constant dense<0.000000e+00> : vector<80x128xf32>
    %45 = tpu.matmul %42, %44, %cst_41 {dimension_numbers = #tpu.dot_dimension_numbers<[1], [0], [0], [1], [0, 0, 1, 1], [], []>} : vector<80x256xbf16>, vector<256x128xbf16>, vector<80x128xf32> -> vector<80x128xf32>
    %46 = arith.addf %41, %45 : vector<80x128xf32>
    %c20 = arith.constant 20 : index
    %c0_42 = arith.constant 0 : index
    %47 = vector.load %arg9[%c20, %c0_42] : memref<110x256xbf16, #tpu.memory_space<vmem>>, vector<80x256xbf16>
    %c6 = arith.constant 6 : index
    %c0_43 = arith.constant 0 : index
    %c0_44 = arith.constant 0 : index
    %48 = vector.load %arg6[%c6, %c0_43, %c0_44] : memref<9x256x128xbf16, #tpu.memory_space<vmem>>, vector<1x256x128xbf16>
    %49 = vector.shape_cast %48 : vector<1x256x128xbf16> to vector<256x128xbf16>
    %cst_45 = arith.constant dense<0.000000e+00> : vector<80x128xf32>
    %50 = tpu.matmul %47, %49, %cst_45 {dimension_numbers = #tpu.dot_dimension_numbers<[1], [0], [0], [1], [0, 0, 1, 1], [], []>} : vector<80x256xbf16>, vector<256x128xbf16>, vector<80x128xf32> -> vector<80x128xf32>
    %51 = arith.addf %46, %50 : vector<80x128xf32>
    %c21 = arith.constant 21 : index
    %c0_46 = arith.constant 0 : index
    %52 = vector.load %arg9[%c21, %c0_46] : memref<110x256xbf16, #tpu.memory_space<vmem>>, vector<80x256xbf16>
    %c7 = arith.constant 7 : index
    %c0_47 = arith.constant 0 : index
    %c0_48 = arith.constant 0 : index
    %53 = vector.load %arg6[%c7, %c0_47, %c0_48] : memref<9x256x128xbf16, #tpu.memory_space<vmem>>, vector<1x256x128xbf16>
    %54 = vector.shape_cast %53 : vector<1x256x128xbf16> to vector<256x128xbf16>
    %cst_49 = arith.constant dense<0.000000e+00> : vector<80x128xf32>
    %55 = tpu.matmul %52, %54, %cst_49 {dimension_numbers = #tpu.dot_dimension_numbers<[1], [0], [0], [1], [0, 0, 1, 1], [], []>} : vector<80x256xbf16>, vector<256x128xbf16>, vector<80x128xf32> -> vector<80x128xf32>
    %56 = arith.addf %51, %55 : vector<80x128xf32>
    %c22 = arith.constant 22 : index
    %c0_50 = arith.constant 0 : index
    %57 = vector.load %arg9[%c22, %c0_50] : memref<110x256xbf16, #tpu.memory_space<vmem>>, vector<80x256xbf16>
    %c8 = arith.constant 8 : index
    %c0_51 = arith.constant 0 : index
    %c0_52 = arith.constant 0 : index
    %58 = vector.load %arg6[%c8, %c0_51, %c0_52] : memref<9x256x128xbf16, #tpu.memory_space<vmem>>, vector<1x256x128xbf16>
    %59 = vector.shape_cast %58 : vector<1x256x128xbf16> to vector<256x128xbf16>
    %cst_53 = arith.constant dense<0.000000e+00> : vector<80x128xf32>
    %60 = tpu.matmul %57, %59, %cst_53 {dimension_numbers = #tpu.dot_dimension_numbers<[1], [0], [0], [1], [0, 0, 1, 1], [], []>} : vector<80x256xbf16>, vector<256x128xbf16>, vector<80x128xf32> -> vector<80x128xf32>
    %61 = arith.addf %56, %60 : vector<80x128xf32>
    %c0_54 = arith.constant 0 : index
    %c0_55 = arith.constant 0 : index
    %62 = vector.load %arg7[%c0_54, %c0_55] : memref<1x128xf32, #tpu.memory_space<vmem>>, vector<1x128xf32>
    %63 = vector.broadcast %62 : vector<1x128xf32> to vector<80x128xf32>
    %64 = arith.addf %61, %63 : vector<80x128xf32>
    %cst_56 = arith.constant 0.000000e+00 : f32
    %65 = vector.broadcast %cst_56 : f32 to vector<80x128xf32>
    %66 = arith.maximumf %64, %65 : vector<80x128xf32>
    %67 = arith.truncf %66 : vector<80x128xf32> to vector<80x128xbf16>
    %c0_57 = arith.constant 0 : index
    %c0_58 = arith.constant 0 : index
    %c0_59 = arith.constant 0 : index
    %68 = vector.load %arg8[%c0_57, %c0_58, %c0_59] : memref<1x80x128xbf16, #tpu.memory_space<vmem>>, vector<1x80x128xbf16>
    %69 = vector.shape_cast %68 : vector<1x80x128xbf16> to vector<80x128xbf16>
    %70 = vector.shape_cast %67 : vector<80x128xbf16> to vector<1x80x128xbf16>
    tpu.vector_store %arg8[%c0_57, %c0_58, %c0_59], %70 {strides = array<i32>} : memref<1x80x128xbf16, #tpu.memory_space<vmem>>, vector<1x80x128xbf16>,
    return
  }
  func.func @transform_0(%arg0: i32) -> (i32, i32, i32) {
    %c0_i32 = arith.constant 0 : i32
    %c0_i32_0 = arith.constant 0 : i32
    %c0_i32_1 = arith.constant 0 : i32
    return %arg0, %c0_i32, %c0_i32_0 : i32, i32, i32
  }
  func.func @transform_1(%arg0: i32) -> (i32, i32, i32) {
    %c0_i32 = arith.constant 0 : i32
    %c0_i32_0 = arith.constant 0 : i32
    %c0_i32_1 = arith.constant 0 : i32
    return %arg0, %c0_i32, %c0_i32_0 : i32, i32, i32
  }
  func.func @transform_2(%arg0: i32) -> (i32, i32) {
    %c0_i32 = arith.constant 0 : i32
    %c0_i32_0 = arith.constant 0 : i32
    %c0_i32_1 = arith.constant 0 : i32
    return %c0_i32, %c0_i32_0 : i32, i32
  }
  func.func @transform_3(%arg0: i32) -> (i32, i32) {
    %c0_i32 = arith.constant 0 : i32
    %c0_i32_0 = arith.constant 0 : i32
    %c0_i32_1 = arith.constant 0 : i32
    return %c0_i32, %c0_i32_0 : i32, i32
  }
  func.func @transform_4(%arg0: i32) -> (i32, i32) {
    %c0_i32 = arith.constant 0 : i32
    %c0_i32_0 = arith.constant 0 : i32
    %c0_i32_1 = arith.constant 0 : i32
    return %c0_i32, %c0_i32_0 : i32, i32
  }
  func.func @transform_5(%arg0: i32) -> (i32, i32, i32) {
    %c0_i32 = arith.constant 0 : i32
    %c0_i32_0 = arith.constant 0 : i32
    %c0_i32_1 = arith.constant 0 : i32
    %c0_i32_2 = arith.constant 0 : i32
    return %c0_i32, %c0_i32_0, %c0_i32_1 : i32, i32, i32
  }
  func.func @transform_6(%arg0: i32) -> (i32, i32) {
    %c0_i32 = arith.constant 0 : i32
    %c0_i32_0 = arith.constant 0 : i32
    %c0_i32_1 = arith.constant 0 : i32
    return %c0_i32, %c0_i32_0 : i32, i32
  }
  func.func @transform_7(%arg0: i32) -> (i32, i32, i32) {
    %c0_i32 = arith.constant 0 : i32
    %c0_i32_0 = arith.constant 0 : i32
    %c0_i32_1 = arith.constant 0 : i32
    return %arg0, %c0_i32, %c0_i32_0 : i32, i32, i32
  }
}

module attributes {stable_mosaic.version = 11 : i64} {
  func.func @kernel(%arg0: i32, %arg1: memref<1x342x128xbf16, #tpu.memory_space<vmem>>, %arg2: memref<1x342x32xbf16, #tpu.memory_space<vmem>>, %arg3: memref<32x16xbf16, #tpu.memory_space<vmem>>, %arg4: memref<1x16xf32, #tpu.memory_space<vmem>>, %arg5: memref<342x1xf32, #tpu.memory_space<vmem>>, %arg6: memref<9x128x128xbf16, #tpu.memory_space<vmem>>, %arg7: memref<9x16x128xbf16, #tpu.memory_space<vmem>>, %arg8: memref<1x128xf32, #tpu.memory_space<vmem>>, %arg9: memref<128x128xbf16, #tpu.memory_space<vmem>>, %arg10: memref<1x128xf32, #tpu.memory_space<vmem>>, %arg11: memref<1x288x128xf32, #tpu.memory_space<vmem>>, %arg12: memref<342x16xbf16, #tpu.memory_space<vmem>>) attributes {dimension_semantics = [#tpu.dimension_semantics<parallel>], iteration_bounds = array<i64: 2>, scalar_prefetch = 0 : i64, scratch_operands = 1 : i64, tpu.core_type = #tpu.core_type<tc>, window_params = [{transform_indices = @transform_0, window_bounds = array<i64: 1, 342, 128>}, {transform_indices = @transform_1, window_bounds = array<i64: 1, 342, 32>}, {pipeline_mode = #tpu.pipeline_mode<synchronous>, transform_indices = @transform_2, window_bounds = array<i64: 32, 16>}, {pipeline_mode = #tpu.pipeline_mode<synchronous>, transform_indices = @transform_3, window_bounds = array<i64: 1, 16>}, {pipeline_mode = #tpu.pipeline_mode<synchronous>, transform_indices = @transform_4, window_bounds = array<i64: 342, 1>}, {pipeline_mode = #tpu.pipeline_mode<synchronous>, transform_indices = @transform_5, window_bounds = array<i64: 9, 128, 128>}, {pipeline_mode = #tpu.pipeline_mode<synchronous>, transform_indices = @transform_6, window_bounds = array<i64: 9, 16, 128>}, {pipeline_mode = #tpu.pipeline_mode<synchronous>, transform_indices = @transform_7, window_bounds = array<i64: 1, 128>}, {pipeline_mode = #tpu.pipeline_mode<synchronous>, transform_indices = @transform_8, window_bounds = array<i64: 128, 128>}, {pipeline_mode = #tpu.pipeline_mode<synchronous>, transform_indices = @transform_9, window_bounds = array<i64: 1, 128>}, {transform_indices = @transform_10, window_bounds = array<i64: 1, 288, 128>}]} {
    %c0 = arith.constant 0 : index
    %c0_0 = arith.constant 0 : index
    %c0_1 = arith.constant 0 : index
    %0 = vector.load %arg2[%c0, %c0_0, %c0_1] : memref<1x342x32xbf16, #tpu.memory_space<vmem>>, vector<1x342x32xbf16>
    %1 = vector.shape_cast %0 : vector<1x342x32xbf16> to vector<342x32xbf16>
    %c0_2 = arith.constant 0 : index
    %c0_3 = arith.constant 0 : index
    %2 = vector.load %arg3[%c0_2, %c0_3] : memref<32x16xbf16, #tpu.memory_space<vmem>>, vector<32x16xbf16>
    %cst = arith.constant dense<0.000000e+00> : vector<342x16xf32>
    %3 = tpu.matmul %1, %2, %cst {dimension_numbers = #tpu.dot_dimension_numbers<[1], [0], [0], [1], [0, 0, 1, 1], [], []>} : vector<342x32xbf16>, vector<32x16xbf16>, vector<342x16xf32> -> vector<342x16xf32>
    %c0_4 = arith.constant 0 : index
    %c0_5 = arith.constant 0 : index
    %4 = vector.load %arg4[%c0_4, %c0_5] : memref<1x16xf32, #tpu.memory_space<vmem>>, vector<1x16xf32>
    %5 = vector.broadcast %4 : vector<1x16xf32> to vector<342x16xf32>
    %6 = arith.addf %3, %5 : vector<342x16xf32>
    %cst_6 = arith.constant 0.000000e+00 : f32
    %7 = vector.broadcast %cst_6 : f32 to vector<342x16xf32>
    %8 = arith.maximumf %6, %7 : vector<342x16xf32>
    %c0_7 = arith.constant 0 : index
    %c0_8 = arith.constant 0 : index
    %9 = vector.load %arg5[%c0_7, %c0_8] : memref<342x1xf32, #tpu.memory_space<vmem>>, vector<342x1xf32>
    %10 = vector.broadcast %9 : vector<342x1xf32> to vector<342x16xf32>
    %11 = arith.mulf %8, %10 : vector<342x16xf32>
    %12 = arith.truncf %11 : vector<342x16xf32> to vector<342x16xbf16>
    %c0_9 = arith.constant 0 : index
    %c0_10 = arith.constant 0 : index
    %13 = vector.load %arg12[%c0_9, %c0_10] : memref<342x16xbf16, #tpu.memory_space<vmem>>, vector<342x16xbf16>
    tpu.vector_store %arg12[%c0_9, %c0_10], %12 {strides = array<i32>} : memref<342x16xbf16, #tpu.memory_space<vmem>>, vector<342x16xbf16>,
    %c0_11 = arith.constant 0 : index
    %c0_12 = arith.constant 0 : index
    %c0_13 = arith.constant 0 : index
    %14 = vector.load %arg1[%c0_11, %c0_12, %c0_13] : memref<1x342x128xbf16, #tpu.memory_space<vmem>>, vector<1x288x128xbf16>
    %15 = vector.shape_cast %14 : vector<1x288x128xbf16> to vector<288x128xbf16>
    %c0_14 = arith.constant 0 : index
    %c0_15 = arith.constant 0 : index
    %c0_16 = arith.constant 0 : index
    %16 = vector.load %arg6[%c0_14, %c0_15, %c0_16] : memref<9x128x128xbf16, #tpu.memory_space<vmem>>, vector<1x128x128xbf16>
    %17 = vector.shape_cast %16 : vector<1x128x128xbf16> to vector<128x128xbf16>
    %cst_17 = arith.constant dense<0.000000e+00> : vector<288x128xf32>
    %18 = tpu.matmul %15, %17, %cst_17 {dimension_numbers = #tpu.dot_dimension_numbers<[1], [0], [0], [1], [0, 0, 1, 1], [], []>} : vector<288x128xbf16>, vector<128x128xbf16>, vector<288x128xf32> -> vector<288x128xf32>
    %c0_18 = arith.constant 0 : index
    %c0_19 = arith.constant 0 : index
    %19 = vector.load %arg12[%c0_18, %c0_19] : memref<342x16xbf16, #tpu.memory_space<vmem>>, vector<288x16xbf16>
    %c0_20 = arith.constant 0 : index
    %c0_21 = arith.constant 0 : index
    %c0_22 = arith.constant 0 : index
    %20 = vector.load %arg7[%c0_20, %c0_21, %c0_22] : memref<9x16x128xbf16, #tpu.memory_space<vmem>>, vector<1x16x128xbf16>
    %21 = vector.shape_cast %20 : vector<1x16x128xbf16> to vector<16x128xbf16>
    %cst_23 = arith.constant dense<0.000000e+00> : vector<288x128xf32>
    %22 = tpu.matmul %19, %21, %cst_23 {dimension_numbers = #tpu.dot_dimension_numbers<[1], [0], [0], [1], [0, 0, 1, 1], [], []>} : vector<288x16xbf16>, vector<16x128xbf16>, vector<288x128xf32> -> vector<288x128xf32>
    %23 = arith.addf %18, %22 : vector<288x128xf32>
    %c0_24 = arith.constant 0 : index
    %c1 = arith.constant 1 : index
    %c0_25 = arith.constant 0 : index
    %24 = vector.load %arg1[%c0_24, %c1, %c0_25] : memref<1x342x128xbf16, #tpu.memory_space<vmem>>, vector<1x288x128xbf16>
    %25 = vector.shape_cast %24 : vector<1x288x128xbf16> to vector<288x128xbf16>
    %c1_26 = arith.constant 1 : index
    %c0_27 = arith.constant 0 : index
    %c0_28 = arith.constant 0 : index
    %26 = vector.load %arg6[%c1_26, %c0_27, %c0_28] : memref<9x128x128xbf16, #tpu.memory_space<vmem>>, vector<1x128x128xbf16>
    %27 = vector.shape_cast %26 : vector<1x128x128xbf16> to vector<128x128xbf16>
    %cst_29 = arith.constant dense<0.000000e+00> : vector<288x128xf32>
    %28 = tpu.matmul %25, %27, %cst_29 {dimension_numbers = #tpu.dot_dimension_numbers<[1], [0], [0], [1], [0, 0, 1, 1], [], []>} : vector<288x128xbf16>, vector<128x128xbf16>, vector<288x128xf32> -> vector<288x128xf32>
    %c1_30 = arith.constant 1 : index
    %c0_31 = arith.constant 0 : index
    %29 = vector.load %arg12[%c1_30, %c0_31] : memref<342x16xbf16, #tpu.memory_space<vmem>>, vector<288x16xbf16>
    %c1_32 = arith.constant 1 : index
    %c0_33 = arith.constant 0 : index
    %c0_34 = arith.constant 0 : index
    %30 = vector.load %arg7[%c1_32, %c0_33, %c0_34] : memref<9x16x128xbf16, #tpu.memory_space<vmem>>, vector<1x16x128xbf16>
    %31 = vector.shape_cast %30 : vector<1x16x128xbf16> to vector<16x128xbf16>
    %cst_35 = arith.constant dense<0.000000e+00> : vector<288x128xf32>
    %32 = tpu.matmul %29, %31, %cst_35 {dimension_numbers = #tpu.dot_dimension_numbers<[1], [0], [0], [1], [0, 0, 1, 1], [], []>} : vector<288x16xbf16>, vector<16x128xbf16>, vector<288x128xf32> -> vector<288x128xf32>
    %33 = arith.addf %28, %32 : vector<288x128xf32>
    %34 = arith.addf %23, %33 : vector<288x128xf32>
    %c0_36 = arith.constant 0 : index
    %c2 = arith.constant 2 : index
    %c0_37 = arith.constant 0 : index
    %35 = vector.load %arg1[%c0_36, %c2, %c0_37] : memref<1x342x128xbf16, #tpu.memory_space<vmem>>, vector<1x288x128xbf16>
    %36 = vector.shape_cast %35 : vector<1x288x128xbf16> to vector<288x128xbf16>
    %c2_38 = arith.constant 2 : index
    %c0_39 = arith.constant 0 : index
    %c0_40 = arith.constant 0 : index
    %37 = vector.load %arg6[%c2_38, %c0_39, %c0_40] : memref<9x128x128xbf16, #tpu.memory_space<vmem>>, vector<1x128x128xbf16>
    %38 = vector.shape_cast %37 : vector<1x128x128xbf16> to vector<128x128xbf16>
    %cst_41 = arith.constant dense<0.000000e+00> : vector<288x128xf32>
    %39 = tpu.matmul %36, %38, %cst_41 {dimension_numbers = #tpu.dot_dimension_numbers<[1], [0], [0], [1], [0, 0, 1, 1], [], []>} : vector<288x128xbf16>, vector<128x128xbf16>, vector<288x128xf32> -> vector<288x128xf32>
    %c2_42 = arith.constant 2 : index
    %c0_43 = arith.constant 0 : index
    %40 = vector.load %arg12[%c2_42, %c0_43] : memref<342x16xbf16, #tpu.memory_space<vmem>>, vector<288x16xbf16>
    %c2_44 = arith.constant 2 : index
    %c0_45 = arith.constant 0 : index
    %c0_46 = arith.constant 0 : index
    %41 = vector.load %arg7[%c2_44, %c0_45, %c0_46] : memref<9x16x128xbf16, #tpu.memory_space<vmem>>, vector<1x16x128xbf16>
    %42 = vector.shape_cast %41 : vector<1x16x128xbf16> to vector<16x128xbf16>
    %cst_47 = arith.constant dense<0.000000e+00> : vector<288x128xf32>
    %43 = tpu.matmul %40, %42, %cst_47 {dimension_numbers = #tpu.dot_dimension_numbers<[1], [0], [0], [1], [0, 0, 1, 1], [], []>} : vector<288x16xbf16>, vector<16x128xbf16>, vector<288x128xf32> -> vector<288x128xf32>
    %44 = arith.addf %39, %43 : vector<288x128xf32>
    %45 = arith.addf %34, %44 : vector<288x128xf32>
    %c0_48 = arith.constant 0 : index
    %c18 = arith.constant 18 : index
    %c0_49 = arith.constant 0 : index
    %46 = vector.load %arg1[%c0_48, %c18, %c0_49] : memref<1x342x128xbf16, #tpu.memory_space<vmem>>, vector<1x288x128xbf16>
    %47 = vector.shape_cast %46 : vector<1x288x128xbf16> to vector<288x128xbf16>
    %c3 = arith.constant 3 : index
    %c0_50 = arith.constant 0 : index
    %c0_51 = arith.constant 0 : index
    %48 = vector.load %arg6[%c3, %c0_50, %c0_51] : memref<9x128x128xbf16, #tpu.memory_space<vmem>>, vector<1x128x128xbf16>
    %49 = vector.shape_cast %48 : vector<1x128x128xbf16> to vector<128x128xbf16>
    %cst_52 = arith.constant dense<0.000000e+00> : vector<288x128xf32>
    %50 = tpu.matmul %47, %49, %cst_52 {dimension_numbers = #tpu.dot_dimension_numbers<[1], [0], [0], [1], [0, 0, 1, 1], [], []>} : vector<288x128xbf16>, vector<128x128xbf16>, vector<288x128xf32> -> vector<288x128xf32>
    %c18_53 = arith.constant 18 : index
    %c0_54 = arith.constant 0 : index
    %51 = vector.load %arg12[%c18_53, %c0_54] : memref<342x16xbf16, #tpu.memory_space<vmem>>, vector<288x16xbf16>
    %c3_55 = arith.constant 3 : index
    %c0_56 = arith.constant 0 : index
    %c0_57 = arith.constant 0 : index
    %52 = vector.load %arg7[%c3_55, %c0_56, %c0_57] : memref<9x16x128xbf16, #tpu.memory_space<vmem>>, vector<1x16x128xbf16>
    %53 = vector.shape_cast %52 : vector<1x16x128xbf16> to vector<16x128xbf16>
    %cst_58 = arith.constant dense<0.000000e+00> : vector<288x128xf32>
    %54 = tpu.matmul %51, %53, %cst_58 {dimension_numbers = #tpu.dot_dimension_numbers<[1], [0], [0], [1], [0, 0, 1, 1], [], []>} : vector<288x16xbf16>, vector<16x128xbf16>, vector<288x128xf32> -> vector<288x128xf32>
    %55 = arith.addf %50, %54 : vector<288x128xf32>
    %56 = arith.addf %45, %55 : vector<288x128xf32>
    %c0_59 = arith.constant 0 : index
    %c19 = arith.constant 19 : index
    %c0_60 = arith.constant 0 : index
    %57 = vector.load %arg1[%c0_59, %c19, %c0_60] : memref<1x342x128xbf16, #tpu.memory_space<vmem>>, vector<1x288x128xbf16>
    %58 = vector.shape_cast %57 : vector<1x288x128xbf16> to vector<288x128xbf16>
    %c4 = arith.constant 4 : index
    %c0_61 = arith.constant 0 : index
    %c0_62 = arith.constant 0 : index
    %59 = vector.load %arg6[%c4, %c0_61, %c0_62] : memref<9x128x128xbf16, #tpu.memory_space<vmem>>, vector<1x128x128xbf16>
    %60 = vector.shape_cast %59 : vector<1x128x128xbf16> to vector<128x128xbf16>
    %cst_63 = arith.constant dense<0.000000e+00> : vector<288x128xf32>
    %61 = tpu.matmul %58, %60, %cst_63 {dimension_numbers = #tpu.dot_dimension_numbers<[1], [0], [0], [1], [0, 0, 1, 1], [], []>} : vector<288x128xbf16>, vector<128x128xbf16>, vector<288x128xf32> -> vector<288x128xf32>
    %c19_64 = arith.constant 19 : index
    %c0_65 = arith.constant 0 : index
    %62 = vector.load %arg12[%c19_64, %c0_65] : memref<342x16xbf16, #tpu.memory_space<vmem>>, vector<288x16xbf16>
    %c4_66 = arith.constant 4 : index
    %c0_67 = arith.constant 0 : index
    %c0_68 = arith.constant 0 : index
    %63 = vector.load %arg7[%c4_66, %c0_67, %c0_68] : memref<9x16x128xbf16, #tpu.memory_space<vmem>>, vector<1x16x128xbf16>
    %64 = vector.shape_cast %63 : vector<1x16x128xbf16> to vector<16x128xbf16>
    %cst_69 = arith.constant dense<0.000000e+00> : vector<288x128xf32>
    %65 = tpu.matmul %62, %64, %cst_69 {dimension_numbers = #tpu.dot_dimension_numbers<[1], [0], [0], [1], [0, 0, 1, 1], [], []>} : vector<288x16xbf16>, vector<16x128xbf16>, vector<288x128xf32> -> vector<288x128xf32>
    %66 = arith.addf %61, %65 : vector<288x128xf32>
    %67 = arith.addf %56, %66 : vector<288x128xf32>
    %c0_70 = arith.constant 0 : index
    %c20 = arith.constant 20 : index
    %c0_71 = arith.constant 0 : index
    %68 = vector.load %arg1[%c0_70, %c20, %c0_71] : memref<1x342x128xbf16, #tpu.memory_space<vmem>>, vector<1x288x128xbf16>
    %69 = vector.shape_cast %68 : vector<1x288x128xbf16> to vector<288x128xbf16>
    %c5 = arith.constant 5 : index
    %c0_72 = arith.constant 0 : index
    %c0_73 = arith.constant 0 : index
    %70 = vector.load %arg6[%c5, %c0_72, %c0_73] : memref<9x128x128xbf16, #tpu.memory_space<vmem>>, vector<1x128x128xbf16>
    %71 = vector.shape_cast %70 : vector<1x128x128xbf16> to vector<128x128xbf16>
    %cst_74 = arith.constant dense<0.000000e+00> : vector<288x128xf32>
    %72 = tpu.matmul %69, %71, %cst_74 {dimension_numbers = #tpu.dot_dimension_numbers<[1], [0], [0], [1], [0, 0, 1, 1], [], []>} : vector<288x128xbf16>, vector<128x128xbf16>, vector<288x128xf32> -> vector<288x128xf32>
    %c20_75 = arith.constant 20 : index
    %c0_76 = arith.constant 0 : index
    %73 = vector.load %arg12[%c20_75, %c0_76] : memref<342x16xbf16, #tpu.memory_space<vmem>>, vector<288x16xbf16>
    %c5_77 = arith.constant 5 : index
    %c0_78 = arith.constant 0 : index
    %c0_79 = arith.constant 0 : index
    %74 = vector.load %arg7[%c5_77, %c0_78, %c0_79] : memref<9x16x128xbf16, #tpu.memory_space<vmem>>, vector<1x16x128xbf16>
    %75 = vector.shape_cast %74 : vector<1x16x128xbf16> to vector<16x128xbf16>
    %cst_80 = arith.constant dense<0.000000e+00> : vector<288x128xf32>
    %76 = tpu.matmul %73, %75, %cst_80 {dimension_numbers = #tpu.dot_dimension_numbers<[1], [0], [0], [1], [0, 0, 1, 1], [], []>} : vector<288x16xbf16>, vector<16x128xbf16>, vector<288x128xf32> -> vector<288x128xf32>
    %77 = arith.addf %72, %76 : vector<288x128xf32>
    %78 = arith.addf %67, %77 : vector<288x128xf32>
    %c0_81 = arith.constant 0 : index
    %c36 = arith.constant 36 : index
    %c0_82 = arith.constant 0 : index
    %79 = vector.load %arg1[%c0_81, %c36, %c0_82] : memref<1x342x128xbf16, #tpu.memory_space<vmem>>, vector<1x288x128xbf16>
    %80 = vector.shape_cast %79 : vector<1x288x128xbf16> to vector<288x128xbf16>
    %c6 = arith.constant 6 : index
    %c0_83 = arith.constant 0 : index
    %c0_84 = arith.constant 0 : index
    %81 = vector.load %arg6[%c6, %c0_83, %c0_84] : memref<9x128x128xbf16, #tpu.memory_space<vmem>>, vector<1x128x128xbf16>
    %82 = vector.shape_cast %81 : vector<1x128x128xbf16> to vector<128x128xbf16>
    %cst_85 = arith.constant dense<0.000000e+00> : vector<288x128xf32>
    %83 = tpu.matmul %80, %82, %cst_85 {dimension_numbers = #tpu.dot_dimension_numbers<[1], [0], [0], [1], [0, 0, 1, 1], [], []>} : vector<288x128xbf16>, vector<128x128xbf16>, vector<288x128xf32> -> vector<288x128xf32>
    %c36_86 = arith.constant 36 : index
    %c0_87 = arith.constant 0 : index
    %84 = vector.load %arg12[%c36_86, %c0_87] : memref<342x16xbf16, #tpu.memory_space<vmem>>, vector<288x16xbf16>
    %c6_88 = arith.constant 6 : index
    %c0_89 = arith.constant 0 : index
    %c0_90 = arith.constant 0 : index
    %85 = vector.load %arg7[%c6_88, %c0_89, %c0_90] : memref<9x16x128xbf16, #tpu.memory_space<vmem>>, vector<1x16x128xbf16>
    %86 = vector.shape_cast %85 : vector<1x16x128xbf16> to vector<16x128xbf16>
    %cst_91 = arith.constant dense<0.000000e+00> : vector<288x128xf32>
    %87 = tpu.matmul %84, %86, %cst_91 {dimension_numbers = #tpu.dot_dimension_numbers<[1], [0], [0], [1], [0, 0, 1, 1], [], []>} : vector<288x16xbf16>, vector<16x128xbf16>, vector<288x128xf32> -> vector<288x128xf32>
    %88 = arith.addf %83, %87 : vector<288x128xf32>
    %89 = arith.addf %78, %88 : vector<288x128xf32>
    %c0_92 = arith.constant 0 : index
    %c37 = arith.constant 37 : index
    %c0_93 = arith.constant 0 : index
    %90 = vector.load %arg1[%c0_92, %c37, %c0_93] : memref<1x342x128xbf16, #tpu.memory_space<vmem>>, vector<1x288x128xbf16>
    %91 = vector.shape_cast %90 : vector<1x288x128xbf16> to vector<288x128xbf16>
    %c7 = arith.constant 7 : index
    %c0_94 = arith.constant 0 : index
    %c0_95 = arith.constant 0 : index
    %92 = vector.load %arg6[%c7, %c0_94, %c0_95] : memref<9x128x128xbf16, #tpu.memory_space<vmem>>, vector<1x128x128xbf16>
    %93 = vector.shape_cast %92 : vector<1x128x128xbf16> to vector<128x128xbf16>
    %cst_96 = arith.constant dense<0.000000e+00> : vector<288x128xf32>
    %94 = tpu.matmul %91, %93, %cst_96 {dimension_numbers = #tpu.dot_dimension_numbers<[1], [0], [0], [1], [0, 0, 1, 1], [], []>} : vector<288x128xbf16>, vector<128x128xbf16>, vector<288x128xf32> -> vector<288x128xf32>
    %c37_97 = arith.constant 37 : index
    %c0_98 = arith.constant 0 : index
    %95 = vector.load %arg12[%c37_97, %c0_98] : memref<342x16xbf16, #tpu.memory_space<vmem>>, vector<288x16xbf16>
    %c7_99 = arith.constant 7 : index
    %c0_100 = arith.constant 0 : index
    %c0_101 = arith.constant 0 : index
    %96 = vector.load %arg7[%c7_99, %c0_100, %c0_101] : memref<9x16x128xbf16, #tpu.memory_space<vmem>>, vector<1x16x128xbf16>
    %97 = vector.shape_cast %96 : vector<1x16x128xbf16> to vector<16x128xbf16>
    %cst_102 = arith.constant dense<0.000000e+00> : vector<288x128xf32>
    %98 = tpu.matmul %95, %97, %cst_102 {dimension_numbers = #tpu.dot_dimension_numbers<[1], [0], [0], [1], [0, 0, 1, 1], [], []>} : vector<288x16xbf16>, vector<16x128xbf16>, vector<288x128xf32> -> vector<288x128xf32>
    %99 = arith.addf %94, %98 : vector<288x128xf32>
    %100 = arith.addf %89, %99 : vector<288x128xf32>
    %c0_103 = arith.constant 0 : index
    %c38 = arith.constant 38 : index
    %c0_104 = arith.constant 0 : index
    %101 = vector.load %arg1[%c0_103, %c38, %c0_104] : memref<1x342x128xbf16, #tpu.memory_space<vmem>>, vector<1x288x128xbf16>
    %102 = vector.shape_cast %101 : vector<1x288x128xbf16> to vector<288x128xbf16>
    %c8 = arith.constant 8 : index
    %c0_105 = arith.constant 0 : index
    %c0_106 = arith.constant 0 : index
    %103 = vector.load %arg6[%c8, %c0_105, %c0_106] : memref<9x128x128xbf16, #tpu.memory_space<vmem>>, vector<1x128x128xbf16>
    %104 = vector.shape_cast %103 : vector<1x128x128xbf16> to vector<128x128xbf16>
    %cst_107 = arith.constant dense<0.000000e+00> : vector<288x128xf32>
    %105 = tpu.matmul %102, %104, %cst_107 {dimension_numbers = #tpu.dot_dimension_numbers<[1], [0], [0], [1], [0, 0, 1, 1], [], []>} : vector<288x128xbf16>, vector<128x128xbf16>, vector<288x128xf32> -> vector<288x128xf32>
    %c38_108 = arith.constant 38 : index
    %c0_109 = arith.constant 0 : index
    %106 = vector.load %arg12[%c38_108, %c0_109] : memref<342x16xbf16, #tpu.memory_space<vmem>>, vector<288x16xbf16>
    %c8_110 = arith.constant 8 : index
    %c0_111 = arith.constant 0 : index
    %c0_112 = arith.constant 0 : index
    %107 = vector.load %arg7[%c8_110, %c0_111, %c0_112] : memref<9x16x128xbf16, #tpu.memory_space<vmem>>, vector<1x16x128xbf16>
    %108 = vector.shape_cast %107 : vector<1x16x128xbf16> to vector<16x128xbf16>
    %cst_113 = arith.constant dense<0.000000e+00> : vector<288x128xf32>
    %109 = tpu.matmul %106, %108, %cst_113 {dimension_numbers = #tpu.dot_dimension_numbers<[1], [0], [0], [1], [0, 0, 1, 1], [], []>} : vector<288x16xbf16>, vector<16x128xbf16>, vector<288x128xf32> -> vector<288x128xf32>
    %110 = arith.addf %105, %109 : vector<288x128xf32>
    %111 = arith.addf %100, %110 : vector<288x128xf32>
    %c0_114 = arith.constant 0 : index
    %c0_115 = arith.constant 0 : index
    %112 = vector.load %arg8[%c0_114, %c0_115] : memref<1x128xf32, #tpu.memory_space<vmem>>, vector<1x128xf32>
    %113 = vector.broadcast %112 : vector<1x128xf32> to vector<288x128xf32>
    %114 = arith.addf %111, %113 : vector<288x128xf32>
    %cst_116 = arith.constant 0.000000e+00 : f32
    %115 = vector.broadcast %cst_116 : f32 to vector<288x128xf32>
    %116 = arith.maximumf %114, %115 : vector<288x128xf32>
    %117 = arith.truncf %116 : vector<288x128xf32> to vector<288x128xbf16>
    %c0_117 = arith.constant 0 : index
    %c0_118 = arith.constant 0 : index
    %118 = vector.load %arg9[%c0_117, %c0_118] : memref<128x128xbf16, #tpu.memory_space<vmem>>, vector<128x128xbf16>
    %cst_119 = arith.constant dense<0.000000e+00> : vector<288x128xf32>
    %119 = tpu.matmul %117, %118, %cst_119 {dimension_numbers = #tpu.dot_dimension_numbers<[1], [0], [0], [1], [0, 0, 1, 1], [], []>} : vector<288x128xbf16>, vector<128x128xbf16>, vector<288x128xf32> -> vector<288x128xf32>
    %c0_120 = arith.constant 0 : index
    %c0_121 = arith.constant 0 : index
    %120 = vector.load %arg10[%c0_120, %c0_121] : memref<1x128xf32, #tpu.memory_space<vmem>>, vector<1x128xf32>
    %121 = vector.broadcast %120 : vector<1x128xf32> to vector<288x128xf32>
    %122 = arith.addf %119, %121 : vector<288x128xf32>
    %c0_122 = arith.constant 0 : index
    %c0_123 = arith.constant 0 : index
    %c0_124 = arith.constant 0 : index
    %123 = vector.load %arg11[%c0_122, %c0_123, %c0_124] : memref<1x288x128xf32, #tpu.memory_space<vmem>>, vector<1x288x128xf32>
    %124 = vector.shape_cast %123 : vector<1x288x128xf32> to vector<288x128xf32>
    %125 = vector.shape_cast %122 : vector<288x128xf32> to vector<1x288x128xf32>
    tpu.vector_store %arg11[%c0_122, %c0_123, %c0_124], %125 {strides = array<i32>} : memref<1x288x128xf32, #tpu.memory_space<vmem>>, vector<1x288x128xf32>,
    return
  }
  func.func @transform_0(%arg0: i32) -> (i32, i32, i32) {
    %c0_i32 = arith.constant 0 : i32
    %c0_i32_0 = arith.constant 0 : i32
    %c0_i32_1 = arith.constant 0 : i32
    return %arg0, %c0_i32, %c0_i32_0 : i32, i32, i32
  }
  func.func @transform_1(%arg0: i32) -> (i32, i32, i32) {
    %c0_i32 = arith.constant 0 : i32
    %c0_i32_0 = arith.constant 0 : i32
    %c0_i32_1 = arith.constant 0 : i32
    return %arg0, %c0_i32, %c0_i32_0 : i32, i32, i32
  }
  func.func @transform_2(%arg0: i32) -> (i32, i32) {
    %c0_i32 = arith.constant 0 : i32
    %c0_i32_0 = arith.constant 0 : i32
    %c0_i32_1 = arith.constant 0 : i32
    return %c0_i32, %c0_i32_0 : i32, i32
  }
  func.func @transform_3(%arg0: i32) -> (i32, i32) {
    %c0_i32 = arith.constant 0 : i32
    %c0_i32_0 = arith.constant 0 : i32
    %c0_i32_1 = arith.constant 0 : i32
    return %c0_i32, %c0_i32_0 : i32, i32
  }
  func.func @transform_4(%arg0: i32) -> (i32, i32) {
    %c0_i32 = arith.constant 0 : i32
    %c0_i32_0 = arith.constant 0 : i32
    %c0_i32_1 = arith.constant 0 : i32
    return %c0_i32, %c0_i32_0 : i32, i32
  }
  func.func @transform_5(%arg0: i32) -> (i32, i32, i32) {
    %c0_i32 = arith.constant 0 : i32
    %c0_i32_0 = arith.constant 0 : i32
    %c0_i32_1 = arith.constant 0 : i32
    %c0_i32_2 = arith.constant 0 : i32
    return %c0_i32, %c0_i32_0, %c0_i32_1 : i32, i32, i32
  }
  func.func @transform_6(%arg0: i32) -> (i32, i32, i32) {
    %c0_i32 = arith.constant 0 : i32
    %c0_i32_0 = arith.constant 0 : i32
    %c0_i32_1 = arith.constant 0 : i32
    %c0_i32_2 = arith.constant 0 : i32
    return %c0_i32, %c0_i32_0, %c0_i32_1 : i32, i32, i32
  }
  func.func @transform_7(%arg0: i32) -> (i32, i32) {
    %c0_i32 = arith.constant 0 : i32
    %c0_i32_0 = arith.constant 0 : i32
    %c0_i32_1 = arith.constant 0 : i32
    return %c0_i32, %c0_i32_0 : i32, i32
  }
  func.func @transform_8(%arg0: i32) -> (i32, i32) {
    %c0_i32 = arith.constant 0 : i32
    %c0_i32_0 = arith.constant 0 : i32
    %c0_i32_1 = arith.constant 0 : i32
    return %c0_i32, %c0_i32_0 : i32, i32
  }
  func.func @transform_9(%arg0: i32) -> (i32, i32) {
    %c0_i32 = arith.constant 0 : i32
    %c0_i32_0 = arith.constant 0 : i32
    %c0_i32_1 = arith.constant 0 : i32
    return %c0_i32, %c0_i32_0 : i32, i32
  }
  func.func @transform_10(%arg0: i32) -> (i32, i32, i32) {
    %c0_i32 = arith.constant 0 : i32
    %c0_i32_0 = arith.constant 0 : i32
    %c0_i32_1 = arith.constant 0 : i32
    return %arg0, %c0_i32, %c0_i32_0 : i32, i32, i32
  }
}

</mosaic_0001>

<bundles_post_ra>
// kernel: exp2_decoder29_forward.3
= control target key start
LH: loop header
LB: loop body
LE: loop exit
PB: predicated region body
PF: predicated region fallthrough
CT: control target
= control target key end

     0   :  { %v301_v1 = vmov 0   ;;  %v37_v19 = vlaneseq  ;;  %s391_s1 = inlined_call_operand.vmem [shape: bf16[128,256], index: 1, kind: input, shape index: {}]   ;;  %s392_s0 = inlined_call_operand.vmem [shape: bf16[32,128], index: 0, kind: input, shape index: {}]   ;;  %s393_s2 = inlined_call_operand.vmem [shape: f32[1,256], index: 2, kind: input, shape index: {}]   ;;  %s394_s3 = inlined_call_operand.vmem [shape: bf16[32,256], index: 3, kind: output, shape index: {}]  }
   0x1   :  { %v275_v0 = vld [vmem:[%s391_s1 + $0x4] ss:$8 sps:$4 sm:$0xff]   ;;  %171 = vmatprep.mubr.bf16.mxu0 %v301_v1  ;;  %181 = vmatprep.mubr.bf16.mxu1 %v301_v1  ;;  %v277_v2 = vld [vmem:[%s391_s1] ss:$8 sps:$4 sm:$0xff]   ;;  %v278_v3 = vld [vmem:[%s391_s1 + $0x14] ss:$8 sps:$4 sm:$0xff]  }
   0x2   :  { %139 = vmatprep.subr.bf16.mxu0 %v275_v0  ;;  %258 = vmatprep.subr.bf16.mxu1 %v275_v0  ;;  %v280_v4 = vld [vmem:[%s391_s1 + $0x10] ss:$8 sps:$4 sm:$0xff]   ;;  %v281_v5 = vld [vmem:[%s391_s1 + $0x24] ss:$8 sps:$4 sm:$0xff]   ;;  %v283_v6 = vld [vmem:[%s391_s1 + $0x20] ss:$8 sps:$4 sm:$0xff]  }
   0x3   :  { %140 = vmatpush1.bf16.msra.mxu0 %v277_v2  ;;  %266 = vmatpush1.bf16.msra.mxu1 %v277_v2  ;;  %v284_v7 = vld [vmem:[%s391_s1 + $0x34] ss:$8 sps:$4 sm:$0xff]   ;;  %v286_v8 = vld [vmem:[%s391_s1 + $0x30] ss:$8 sps:$4 sm:$0xff]   ;;  %v287_v9 = vld [vmem:[%s391_s1 + $0x44] ss:$8 sps:$4 sm:$0xff]  }
   0x4   :  { %141 = vmatprep.subr.bf16.mxu0 %v278_v3  ;;  %259 = vmatprep.subr.bf16.mxu1 %v278_v3  ;;  %v289_v10 = vld [vmem:[%s391_s1 + $0x40] ss:$8 sps:$4 sm:$0xff]   ;;  %v290_v11 = vld [vmem:[%s391_s1 + $0x54] ss:$8 sps:$4 sm:$0xff]   ;;  %v292_v12 = vld [vmem:[%s391_s1 + $0x50] ss:$8 sps:$4 sm:$0xff]  }
   0x5   :  { %v293_v13 = vld [vmem:[%s391_s1 + $0x64] ss:$8 sps:$4 sm:$0xff]   ;;  %v295_v14 = vld [vmem:[%s391_s1 + $0x60] ss:$8 sps:$4 sm:$0xff]   ;;  %v296_v15 = vld [vmem:[%s391_s1 + $0x74] ss:$8 sps:$4 sm:$0xff]  }
   0x6   :  { %v298_v16 = vld [vmem:[%s391_s1 + $0x70] ss:$8 sps:$4 sm:$0xff]   ;;  %v299_v17 = vld [vmem:[%s392_s0] sm:$0xff]   ;;  %v300_v18 = vld [vmem:[%s392_s0 + $0x8] sm:$0xff]   ;;  %v38_v20 = vshrl.u32 %v37_v19, 7 }
   0x7   :  { %142 = vmatpush1.bf16.msra.mxu0 %v280_v4  ;;  %267 = vmatpush1.bf16.msra.mxu1 %v280_v4  ;;  %v35_v22 = vld [vmem:[%s393_s2] sm:$0x3] }
   0x8   :  { %143 = vmatprep.subr.bf16.mxu0 %v281_v5  ;;  %260 = vmatprep.subr.bf16.mxu1 %v281_v5  ;;  %v39_v21 = vsub.s32 0, %v38_v20  ;;  %v43_v23 = vsub.s32 1, %v38_v20 }
   0xa   :  { %v40_v24 = vrot.slane %v35_v22, %v39_v21  ;;  %v44_v25 = vrot.slane %v35_v22, %v43_v23 }
   0xb   :  { %144 = vmatpush1.bf16.msra.mxu0 %v283_v6  ;;  %268 = vmatpush1.bf16.msra.mxu1 %v283_v6 }
   0xc   :  { %145 = vmatprep.subr.bf16.mxu0 %v284_v7  ;;  %261 = vmatprep.subr.bf16.mxu1 %v284_v7 }
   0xf   :  { %146 = vmatpush1.bf16.msra.mxu0 %v286_v8  ;;  %269 = vmatpush1.bf16.msra.mxu1 %v286_v8 }
  0x10   :  { %147 = vmatprep.subr.bf16.mxu0 %v287_v9  ;;  %262 = vmatprep.subr.bf16.mxu1 %v287_v9 }
  0x13   :  { %148 = vmatpush1.bf16.msra.mxu0 %v289_v10  ;;  %270 = vmatpush1.bf16.msra.mxu1 %v289_v10 }
  0x14   :  { %149 = vmatprep.subr.bf16.mxu0 %v290_v11  ;;  %263 = vmatprep.subr.bf16.mxu1 %v290_v11 }
  0x17   :  { %150 = vmatpush1.bf16.msra.mxu0 %v292_v12  ;;  %271 = vmatpush1.bf16.msra.mxu1 %v292_v12 }
  0x18   :  { %151 = vmatprep.subr.bf16.mxu0 %v293_v13  ;;  %264 = vmatprep.subr.bf16.mxu1 %v293_v13 }
  0x1b   :  { %152 = vmatpush1.bf16.msra.mxu0 %v295_v14  ;;  %272 = vmatpush1.bf16.msra.mxu1 %v295_v14 }
  0x1c   :  { %153 = vmatprep.subr.bf16.mxu0 %v296_v15  ;;  %265 = vmatprep.subr.bf16.mxu1 %v296_v15 }
  0x1f   :  { %154 = vmatpush1.bf16.msra.mxu0 %v298_v16  ;;  %273 = vmatpush1.bf16.msra.mxu1 %v298_v16 }
  0x22   :  { %172 = vmatmul.mubr.bf16.vlgmr.msra.gmra.mrb[0].mxu0 %v299_v17  ;;  %182 = vmatmul.mubr.bf16.vlgmr.msra.gmra.mrb[0].mxu1 %v300_v18 }
  0xf5   :  { %v173_v26 = vpop.f32.mrb[0].mxu0  ;;  %v183_v27 = vpop.f32.mrb[0].mxu1 }
  0xf6   :  { %v174_v28 = vadd.f32 %v173_v26, %v40_v24  ;;  %v184_v29 = vadd.f32 %v183_v27, %v40_v24  ;;  %v175_v30 = vpop.f32.mrb[1].mxu0  ;;  %v185_v31 = vpop.f32.mrb[1].mxu1 }
  0xf7   :  { %v176_v32 = vadd.f32 %v175_v30, %v44_v25  ;;  %v186_v33 = vadd.f32 %v185_v31, %v44_v25  ;;  %v177_v34 = vpop.f32.mrb[2].mxu0  ;;  %v187_v35 = vpop.f32.mrb[2].mxu1 }
  0xf8   :  { %v192_v36 = vmax.f32 %v174_v28, 0.0  ;;  %v196_v37 = vmax.f32 %v184_v29, 0.0  ;;  %v178_v38 = vadd.f32 %v177_v34, %v40_v24  ;;  %v188_v39 = vadd.f32 %v187_v35, %v40_v24  ;;  %v179_v40 = vpop.f32.mrb[3].mxu0  ;;  %v189_v41 = vpop.f32.mrb[3].mxu1 }
  0xf9   :  { %v193_v42 = vmax.f32 %v176_v32, 0.0  ;;  %v197_v43 = vmax.f32 %v186_v33, 0.0  ;;  %v180_v44 = vadd.f32 %v179_v40, %v44_v25  ;;  %v190_v45 = vadd.f32 %v189_v41, %v44_v25 }
  0xfa   :  { %v194_v46 = vmax.f32 %v178_v38, 0.0  ;;  %v198_v47 = vmax.f32 %v188_v39, 0.0 }
  0xfb   :  { %v254_v48 = vpack.c.bf16 %v193_v42, %v192_v36  ;;  %v256_v49 = vpack.c.bf16 %v197_v43, %v196_v37  ;;  %v195_v50 = vmax.f32 %v180_v44, 0.0  ;;  %v199_v51 = vmax.f32 %v190_v45, 0.0 }
  0xfd   :  { %224 = vst [vmem:[%s394_s3] sm:$0xff] %v254_v48  ;;  %226 = vst [vmem:[%s394_s3 + $0x10] sm:$0xff] %v256_v49  ;;  %v255_v52 = vpack.c.bf16 %v195_v50, %v194_v46  ;;  %v257_v53 = vpack.c.bf16 %v199_v51, %v198_v47 }
  0xff   :  { %225 = vst [vmem:[%s394_s3 + $0x8] sm:$0xff] %v255_v52  ;;  %227 = vst [vmem:[%s394_s3 + $0x18] sm:$0xff] %v257_v53 }

// kernel: exp2_decoder29_forward.4
= control target key start
LH: loop header
LB: loop body
LE: loop exit
PB: predicated region body
PF: predicated region fallthrough
CT: control target
= control target key end

     0   :  { %s4817_s24 = smov 0   ;;  %s6154_s0 = inlined_call_operand.vmem [shape: bf16[2,110,64], index: 0, kind: input, shape index: {}]   ;;  %s6155_s1 = inlined_call_operand.vmem [shape: bf16[2,110,256], index: 1, kind: input, shape index: {}]   ;;  %s6156_s2 = inlined_call_operand.vmem [shape: bf16[64,256], index: 2, kind: input, shape index: {}]   ;;  %s6157_s3 = inlined_call_operand.vmem [shape: f32[1,256], index: 3, kind: input, shape index: {}]   ;;  %s6158_s4 = inlined_call_operand.vmem [shape: f32[110,1], index: 4, kind: input, shape index: {}]   ;;  %s6159_s5 = inlined_call_operand.vmem [shape: bf16[9,256,128], index: 5, kind: input, shape index: {}]   ;;  %s6160_s6 = inlined_call_operand.vmem [shape: f32[1,128], index: 6, kind: input, shape index: {}]   ;;  %s6161_s7 = inlined_call_operand.vmem [shape: bf16[2,80,128], index: 7, kind: output, shape index: {}]  }
   0x1 LB: > { %s3577_s25 = sadd.s32 4294967295, %s4774_s24   ;;  %p3581_p0 = scmp.ge.s32.totalorder %s4774_s24, 1  ;;  %s4774_s24 = sphi %s4817_s24, %s17_s24  }
   0x2   : > { %p247_p1 = scmp.lt.s32.totalorder %s4774_s24, 3 }
   0x4   : > { %p248_p2 = pnand %p3581_p0, %p247_p1 }
   0x5   : > { %v4561_v0 = vld [vmem:[%s6156_s2 + $0x4] ss:$8 sps:$4 sm:$0xff] (!%p248_p2)   ;;  %p284_p3 = scmp.lt.s32.totalorder (!%p248_p2), %s3577_s25, 1  ;;  %v4563_v1 = vld [vmem:[%s6156_s2] ss:$8 sps:$4 sm:$0xff] (!%p248_p2)   ;;  %v4776_v2 = vmov (!%p248_p2), 0  }
   0x6   : > { %251 = sbr.rel (%p248_p2) target bundleno = 688 (0x2b0), region = 48  ;;  %463 = vmatprep.mubr.bf16.mxu0 (!%p248_p2), %v4776_v2  ;;  %4559 = vset.pattern.permute.xlu0 (!%p248_p2), %v4776_v2  ;;  %v4564_v3 = vld [vmem:[%s6156_s2 + $0x14] ss:$8 sps:$4 sm:$0xff] (!%p248_p2)   ;;  %v4566_v4 = vld [vmem:[%s6156_s2 + $0x10] ss:$8 sps:$4 sm:$0xff] (!%p248_p2)   ;;  %v562_v6 = vld [vmem:[%s6158_s4] sm:$0xff] (!%p248_p2) }
   0x7   : > { %431 = vmatprep.subr.bf16.mxu0 (!%p248_p2), %v4561_v0  ;;  %4560 = vset.pattern.permute.xlu1 (!%p248_p2), %v4776_v2  ;;  %v4567_v5 = vld [vmem:[%s6156_s2 + $0x24] ss:$8 sps:$4 sm:$0xff] (!%p248_p2)   ;;  %v564_v7 = vld [vmem:[%s6158_s4 + $0x10] sm:$0xff] (!%p248_p2)  ;;  %v4569_v8 = vld [vmem:[%s6156_s2 + $0x20] ss:$8 sps:$4 sm:$0xff] (!%p248_p2)   ;;  %vm409_vm0 = vcmask (!%p248_p2), 523264   ;;  %v324_v0 = vlaneseq (!%p248_p2) }
   0x8   : > { %432 = vmatpush1.bf16.msra.mxu0 (!%p248_p2), %v4563_v1  ;;  %578 = vperm.xlu0 (!%p248_p2), %4559, %v562_v6   ;;  %v563_v9 = vld [vmem:[%s6158_s4 + $0x8] sm:$0xff] (!%p248_p2)  ;;  %v565_v10 = vld [vmem:[%s6158_s4 + $0x18] sm:$0xff] (!%p248_p2)  ;;  %v566_v13 = vld [vmem:[%s6158_s4 + $0x20] sm:$0xff] (!%p248_p2)  ;;  %vm963_vm1 = vsmask.f32 (!%p248_p2), 7424  ;;  %vm1449_vm2 = vcmask (!%p248_p2), 1046528  }
   0x9   : > { %433 = vmatprep.subr.bf16.mxu0 (!%p248_p2), %v4564_v3  ;;  %588 = vperm.xlu1 (!%p248_p2), %4560, %v564_v7   ;;  %v4570_v11 = vld [vmem:[%s6156_s2 + $0x34] ss:$8 sps:$4 sm:$0xff] (!%p248_p2)   ;;  %v4572_v12 = vld [vmem:[%s6156_s2 + $0x30] ss:$8 sps:$4 sm:$0xff] (!%p248_p2)   ;;  %v567_v15 = vld [vmem:[%s6158_s4 + $0x28] sm:$0xff] (!%p248_p2)  ;;  %v325_v1 = vshrl.u32 (!%p248_p2), %v324_v0, 7 }
   0xa   : > { %v568_v16 = vld [vmem:[%s6158_s4 + $0x30] sm:$0xff] (!%p248_p2)  ;;  %v569_v17 = vld [vmem:[%s6158_s4 + $0x38] sm:$0xff] (!%p248_p2)  ;;  %v570_v18 = vld [vmem:[%s6158_s4 + $0x40] sm:$0xff] (!%p248_p2)  ;;  %vm2335_vm3 = vcmask (!%p248_p2), 1045504   ;;  %vm2000_vm4 = vsmask.f32 (!%p248_p2), 6400 }
   0xb   : > { %v4580_v19 = vld [vmem:[%s6159_s5 + $0x40] sm:$0xff] (!%p248_p2)   ;;  %v4582_v21 = vld [vmem:[%s6159_s5 + $0x48] sm:$0xff] (!%p248_p2)   ;;  %v572_v24 = vld [vmem:[%s6158_s4 + $0x50] sm:$0xff] (!%p248_p2)  ;;  %vm3221_vm5 = vcmask (!%p248_p2), 1044480   ;;  %vm2886_vm6 = vsmask.f32 (!%p248_p2), 5376 }
   0xc   : > { %434 = vmatpush1.bf16.msra.mxu0 (!%p248_p2), %v4566_v4  ;;  %583 = vperm.xlu0 (!%p248_p2), %4559, %v563_v9   ;;  %v4581_v20 = vld [vmem:[%s6159_s5] sm:$0xff] (!%p248_p2)   ;;  %v571_v23 = vld [vmem:[%s6158_s4 + $0x48] sm:$0xff] (!%p248_p2)  ;;  %v573_v26 = vld [vmem:[%s6158_s4 + $0x58] sm:$0xff] (!%p248_p2)  ;;  %v330_v4 = vsub.s32 (!%p248_p2), 1, %v325_v1 }
   0xd   : > { %s6163_s25 = smov (!%p284_p3, %s3577_s25), 1  ;;  %435 = vmatprep.subr.bf16.mxu0 %v4567_v5  ;;  %593 = vperm.xlu1 %4560, %v565_v10   ;;  %v4583_v25 = vld [vmem:[%s6159_s5 + $0x8] sm:$0xff]   ;;  %v574_v27 = vld [vmem:[%s6158_s4 + $0x60] sm:$0xff]  ;;  %v4584_v34 = vld [vmem:[%s6159_s5 + $0x50] sm:$0xff]  }
   0xe   : > { %s4547_s13 = smul.u32 56, %s6163_s25  ;;  %v575_v28 = vld [vmem:[%s6158_s4 + $0x68] sm:$0x3f]  ;;  %v4585_v35 = vld [vmem:[%s6159_s5 + $0x10] sm:$0xff]   ;;  %v4587_v36 = vld [vmem:[%s6159_s5 + $0x58] sm:$0xff]  }
   0xf   : > { %v4586_v37 = vld [vmem:[%s6159_s5 + $0xc0] sm:$0xff]   ;;  %v4589_v38 = vld [vmem:[%s6159_s5 + $0x18] sm:$0xff]   ;;  %v4590_v41 = vld [vmem:[%s6159_s5 + $0xc8] sm:$0xff]   ;;  %s4548_s15 = smul.u32 112, %s6163_s25 }
  0x10   : > { %s4858_s22 = scalar_lea.vmem %s6154_s0, %s4547_s13  ;;  %436 = vmatpush1.bf16.msra.mxu0 %v4569_v8  ;;  %598 = vperm.xlu0 %4559, %v566_v13   ;;  %v4588_v39 = vld [vmem:[%s6159_s5 + $0x80] sm:$0xff]   ;;  %v4592_v43 = vld [vmem:[%s6159_s5 + $0x88] sm:$0xff]   ;;  %v4594_v45 = vld [vmem:[%s6159_s5 + $0xd0] sm:$0xff]   ;;  %s4549_s12 = smul.u32 40, %s6163_s25 }
  0x11   : > { %437 = vmatprep.subr.bf16.mxu0 %v4570_v11  ;;  %v4573_v14 = vld [vmem:[%s4858_s22] sm:$0xff]   ;;  %603 = vperm.xlu1 %4560, %v567_v15   ;;  %v4574_v22 = vld [vmem:[%s4858_s22 + $0x8] sm:$0xff]   ;;  %v4575_v29 = vld [vmem:[%s4858_s22 + $0x10] sm:$0xff]   ;;  %s5031_s20 = scalar_lea.vmem %s6155_s1, %s4548_s15 }
  0x12   : > { %v4576_v30 = vld [vmem:[%s4858_s22 + $0x18] sm:$0xff]   ;;  %v4577_v31 = vld [vmem:[%s4858_s22 + $0x20] sm:$0xff]   ;;  %v4578_v32 = vld [vmem:[%s4858_s22 + $0x28] sm:$0xff]   ;;  %4133 = vmatprep.subr.bf16.mxu1 %v4586_v37  ;;  %s6133_s15 = scalar_lea.vmem %s6161_s7, %s4549_s12 }
  0x13   : > { %v4579_v33 = vld [vmem:[%s4858_s22 + $0x30] sm:$0x7f]   ;;  %4134 = vmatpush3.bf16.msra.mxu1 %v4588_v39  ;;  %v4591_v40 = vld [vmem:[%s6159_s5 + $0x60] sm:$0xff]   ;;  %v4595_v44 = vld [vmem:[%s6159_s5 + $0x68] sm:$0xff]  }
  0x14   : > { %438 = vmatpush1.bf16.msra.mxu0 %v4572_v12  ;;  %608 = vperm.xlu0 %4559, %v568_v16   ;;  %v4593_v42 = vld [vmem:[%s6159_s5 + $0x20] sm:$0xff]   ;;  %v4597_v46 = vld [vmem:[%s6159_s5 + $0x28] sm:$0xff]   ;;  %v4596_v47 = vld [vmem:[%s6159_s5 + $0x90] sm:$0xff]  }
  0x15   : > { %613 = vperm.xlu1 %4560, %v569_v17   ;;  %4179 = vmatprep.subr.bf16.mxu0 %v4580_v19  ;;  %v4599_v48 = vld [vmem:[%s6159_s5 + $0x70] sm:$0xff]   ;;  %v4598_v49 = vld [vmem:[%s6159_s5 + $0xd8] sm:$0xff]   ;;  %v4602_v53 = vld [vmem:[%s6159_s5 + $0xe0] sm:$0xff]  }
  0x16   : > { %4135 = vmatprep.subr.bf16.mxu1 %v4590_v41  ;;  %v4601_v50 = vld [vmem:[%s6159_s5 + $0x30] sm:$0xff]   ;;  %v4600_v51 = vld [vmem:[%s6159_s5 + $0x98] sm:$0xff]   ;;  %v4604_v55 = vld [vmem:[%s6159_s5 + $0xa0] sm:$0xff]  }
  0x17   : > { %3600 = vmatmul.mubr.msk.bf16.vlgmr.msra.gmra.mrb[0].mxu0 %vm409_vm0, %v4573_v14  ;;  %4136 = vmatpush3.bf16.msra.mxu1 %v4592_v43  ;;  %v4603_v52 = vld [vmem:[%s6159_s5 + $0x78] sm:$0xff]   ;;  %v4606_v56 = vld [vmem:[%s6159_s5 + $0xe8] sm:$0xff]   ;;  %v4608_v58 = vld [vmem:[%s6159_s5 + $0xf0] sm:$0xff]  }
  0x18   : > { %473 = vmatprep.mubr.bf16.mxu0 %v4776_v2  ;;  %4180 = vmatpush3.bf16.msra.mxu0 %v4581_v20  ;;  %v4605_v54 = vld [vmem:[%s6159_s5 + $0x38] sm:$0xff]   ;;  %v4607_v57 = vld [vmem:[%s6159_s5 + $0xa8] sm:$0xff]   ;;  %v4609_v59 = vld [vmem:[%s6159_s5 + $0xb0] sm:$0xff]  }
  0x19   : > { %618 = vperm.xlu0 %4559, %v570_v18   ;;  %4181 = vmatprep.subr.bf16.mxu0 %v4582_v21  ;;  %v4611_v60 = vld [vmem:[%s6159_s5 + $0x1c0] sm:$0xff]   ;;  %v4610_v61 = vld [vmem:[%s6159_s5 + $0xf8] sm:$0xff]   ;;  %v675_v8 = vld [vmem:[%s5031_s20 + $0x8] sm:$0xff] }
  0x1a   : > { %623 = vperm.xlu1 %4560, %v571_v23   ;;  %4137 = vmatprep.subr.bf16.mxu1 %v4594_v45  ;;  %v4612_v62 = vld [vmem:[%s6159_s5 + $0xb8] sm:$0xff]   ;;  %v4614_v63 = vld [vmem:[%s6159_s5 + $0x140] sm:$0xff]   ;;  %v5040_v9 = vld [vmem:[%s5031_s20 + $0x10] sm:$0xff]  ;;  %v690_v20 = vunpack.c.l.bf16 %v675_v8  ;;  %v691_v21 = vunpack.c.h.bf16 %v675_v8 }
  0x1b   : > { %4138 = vmatpush3.bf16.msra.mxu1 %v4596_v47  ;;  %v322_v3 = vld [vmem:[%s6157_s3] sm:$0x3]  ;;  %v5043_v12 = vld [vmem:[%s5031_s20 + $0x18] sm:$0xff]  ;;  %v5052_v23 = vld [vmem:[%s5031_s20 + $0x28] sm:$0xff] }
  0x1c   : > { %4182 = vmatpush3.bf16.msra.mxu0 %v4583_v25  ;;  %4139 = vmatprep.subr.bf16.mxu1 %v4598_v49  ;;  %v674_v6 = vld [vmem:[%s5031_s20] sm:$0xff]  ;;  %v5036_v7 = vrot.slane %v322_v3, %v330_v4  ;;  %v699_v43 = vunpack.c.h.bf16 %v5052_v23  ;;  %v5074_v45 = vld [vmem:[%s5031_s20 + $0x48] sm:$0xff] }
  0x1d   : > { %628 = vperm.xlu0 %4559, %v572_v24   ;;  %4183 = vmatprep.subr.bf16.mxu0 %v4584_v34  ;;  %v688_v14 = vunpack.c.l.bf16 %v674_v6  ;;  %v689_v16 = vunpack.c.h.bf16 %v674_v6  ;;  %v5047_v17 = vld [vmem:[%s5031_s20 + $0x20] sm:$0xff]  ;;  %v5064_v34 = vld [vmem:[%s5031_s20 + $0x38] sm:$0xff] }
  0x1e   : > { %633 = vperm.xlu1 %4560, %v573_v26   ;;  %v697_v37 = vunpack.c.h.bf16 %v5047_v17  ;;  %v5069_v39 = vld [vmem:[%s5031_s20 + $0x40] sm:$0xff]  ;;  %v702_v49 = vunpack.c.l.bf16 %v5064_v34 }
  0x1f   : > { %3601 = vmatmul.mubr.msk.bf16.gmra.mrb[4].mxu0 %vm409_vm0, %v4574_v22  ;;  %4140 = vmatpush3.bf16.msra.mxu1 %v4600_v51  ;;  %v692_v22 = vunpack.c.l.bf16 %v5040_v9  ;;  %v5092_v4 = vld [vmem:[%s5031_s20 + $0x60] sm:$0xff] }
  0x20   : > { %483 = vmatprep.mubr.bf16.mxu0 %v4776_v2  ;;  %4184 = vmatpush3.bf16.msra.mxu0 %v4585_v35 }
  0x21   : > { %638 = vperm.xlu0 %4559, %v574_v27   ;;  %4185 = vmatprep.subr.bf16.mxu0 %v4587_v36  ;;  %v693_v27 = vunpack.c.h.bf16 %v5040_v9 }
  0x22   : > { %643 = vperm.xlu1 %4560, %v575_v28   ;;  %4141 = vmatprep.subr.bf16.mxu1 %v4602_v53  ;;  %v694_v28 = vunpack.c.l.bf16 %v5043_v12 }
  0x23   : > { %4142 = vmatpush3.bf16.msra.mxu1 %v4604_v55  ;;  %v704_v55 = vunpack.c.l.bf16 %v5069_v39 }
  0x24   : > { %4186 = vmatpush3.bf16.msra.mxu0 %v4589_v38  ;;  %4143 = vmatprep.subr.bf16.mxu1 %v4606_v56  ;;  %v698_v38 = vunpack.c.l.bf16 %v5052_v23  ;;  %v5081_v56 = vld [vmem:[%s5031_s20 + $0x50] sm:$0xff]  ;;  %v4616_v23 = vld [vmem:[%s6159_s5 + $0x100] sm:$0xff]  }
  0x25   : > { %4187 = vmatprep.subr.bf16.mxu0 %v4591_v40 }
  0x27   : > { %3602 = vmatmul.mubr.msk.bf16.gmra.mrb[8].mxu0 %vm409_vm0, %v4575_v29  ;;  %4144 = vmatpush3.bf16.msra.mxu1 %v4607_v57  ;;  %v5058_v29 = vld [vmem:[%s5031_s20 + $0x30] sm:$0xff] }
  0x28   : > { %493 = vmatprep.mubr.bf16.mxu0 %v4776_v2  ;;  %4188 = vmatpush3.bf16.msra.mxu0 %v4593_v42 }
  0x29   : > { %4189 = vmatprep.subr.bf16.mxu0 %v4595_v44  ;;  %4145 = vmatprep.subr.bf16.mxu1 %v4608_v58  ;;  %v700_v44 = vunpack.c.l.bf16 %v5058_v29 }
  0x2b   : > { %4146 = vmatpush3.bf16.msra.mxu1 %v4609_v59 }
  0x2c   : > { %4190 = vmatpush3.bf16.msra.mxu0 %v4597_v46  ;;  %4147 = vmatprep.subr.bf16.mxu1 %v4610_v61  ;;  %v706_v61 = vunpack.c.l.bf16 %v5074_v45 }
  0x2d   : > { %4191 = vmatprep.subr.bf16.mxu0 %v4599_v48  ;;  %v701_v48 = vunpack.c.h.bf16 %v5058_v29 }
  0x2f   : > { %3603 = vmatmul.mubr.msk.bf16.gmra.mrb[12].mxu0 %vm409_vm0, %v4576_v30  ;;  %4148 = vmatpush3.bf16.msra.mxu1 %v4612_v62  ;;  %v5087_v62 = vld [vmem:[%s5031_s20 + $0x58] sm:$0xff] }
  0x30   : > { %503 = vmatprep.mubr.bf16.mxu0 %v4776_v2  ;;  %4192 = vmatpush3.bf16.msra.mxu0 %v4601_v50 }
  0x31   : > { %4193 = vmatprep.subr.bf16.mxu0 %v4603_v52  ;;  %4225 = vmatprep.subr.bf16.mxu1 %v4614_v63 }
  0x34   : > { %4194 = vmatpush3.bf16.msra.mxu0 %v4605_v54  ;;  %v703_v54 = vunpack.c.h.bf16 %v5064_v34  ;;  %v4625_v34 = vld [vmem:[%s6159_s5 + $0x110] sm:$0xff]  }
  0x35   : > { %4271 = vmatprep.subr.bf16.mxu0 %v4611_v60  ;;  %v705_v60 = vunpack.c.h.bf16 %v5069_v39 }
  0x37   : > { %3604 = vmatmul.mubr.msk.bf16.gmra.mrb[16].mxu0 %vm409_vm0, %v4577_v31 }
  0x38   : > { %513 = vmatprep.mubr.bf16.mxu0 %v4776_v2 }
  0x3f   : > { %3605 = vmatmul.mubr.msk.bf16.gmra.mrb[20].mxu0 %vm409_vm0, %v4578_v32  ;;  %v695_v32 = vunpack.c.h.bf16 %v5043_v12 }
  0x40   : > { %523 = vmatprep.mubr.bf16.mxu0 %v4776_v2  ;;  %v326_v2 = vsub.s32 0, %v325_v1 }
  0x42   : > { %v5033_v5 = vrot.slane %v322_v3, %v326_v2  ;;  %v707_v3 = vunpack.c.h.bf16 %v5074_v45 }
  0x47   : > { %3606 = vmatmul.mubr.msk.bf16.gmra.mrb[24].mxu0 %vm409_vm0, %v4579_v33  ;;  %v696_v33 = vunpack.c.l.bf16 %v5047_v17 }
  0x87   : > { %v579_v10 = vpop.permute.xlu0 %578 }
  0x88   : > { %v589_v50 = vpop.permute.xlu1 %588 }
  0x8b   : > { %v584_v40 = vpop.permute.xlu0 %583 }
  0xea   : > { %v465_v11 = vpop.f32.mrb[0].mxu0 }
  0xeb   : > { %v466_v13 = vadd.f32 %v465_v11, %v5033_v5  ;;  %v467_v15 = vpop.f32.mrb[1].mxu0  ;;  %v708_v11 = vunpack.c.l.bf16 %v5081_v56 }
  0xec   : > { %v468_v18 = vadd.f32 %v467_v15, %v5036_v7  ;;  %v469_v19 = vpop.f32.mrb[2].mxu0 }
  0xed   : > { %v534_v24 = vmax.f32 %v466_v13, 0.0  ;;  %v470_v25 = vadd.f32 %v469_v19, %v5033_v5  ;;  %v471_v26 = vpop.f32.mrb[3].mxu0  ;;  %v709_v13 = vunpack.c.h.bf16 %v5081_v56 }
  0xee   : > { %v535_v30 = vmax.f32 %v468_v18, 0.0  ;;  %v472_v31 = vadd.f32 %v471_v26, %v5036_v7  ;;  %v710_v18 = vunpack.c.l.bf16 %v5087_v62 }
  0xef   : > { %v646_v35 = vmul.f32 %v579_v10, %v534_v24  ;;  %v536_v36 = vmax.f32 %v470_v25, 0.0  ;;  %v712_v24 = vunpack.c.l.bf16 %v5092_v4  ;;  %v594_v25 = vpop.permute.xlu1 %593 }
  0xf0   : > { %v647_v41 = vmul.f32 %v579_v10, %v535_v30  ;;  %v537_v42 = vmax.f32 %v472_v31, 0.0 }
  0xf1   : > { %v716_v46 = vadd.f32 %v688_v14, %v646_v35  ;;  %v648_v47 = vmul.f32 %v584_v40, %v536_v36  ;;  %v4613_v36 = vld [vmem:[%s6159_s5 + $0x180] sm:$0xff]  }
  0xf2   : > { %v717_v51 = vadd.f32 %v689_v16, %v647_v41  ;;  %v649_v52 = vmul.f32 %v584_v40, %v537_v42  ;;  %v475_v53 = vpop.f32.mrb[4].mxu0  ;;  %v4615_v42 = vld [vmem:[%s6159_s5 + $0x1c8] sm:$0xff]  }
  0xf3   : > { %v718_v57 = vadd.f32 %v690_v20, %v648_v47  ;;  %v476_v58 = vadd.f32 %v475_v53, %v5033_v5  ;;  %v477_v59 = vpop.f32.mrb[5].mxu0  ;;  %v713_v47 = vunpack.c.h.bf16 %v5092_v4 }
  0xf4   : > { %v4080_v63 = vpack.c.bf16 %v717_v51, %v716_v46  ;;  %v719_v0 = vadd.f32 %v691_v21, %v649_v52  ;;  %v478_v1 = vadd.f32 %v477_v59, %v5036_v7  ;;  %v479_v2 = vpop.f32.mrb[6].mxu0  ;;  %v711_v21 = vunpack.c.h.bf16 %v5087_v62 }
  0xf5   : > { %v538_v6 = vmax.f32 %v476_v58, 0.0  ;;  %v480_v8 = vadd.f32 %v479_v2, %v5033_v5  ;;  %v481_v10 = vpop.f32.mrb[7].mxu0  ;;  %v4750_v31 = vpack.c.bf16 %v718_v57, %v716_v46  ;;  %v4618_v2 = vld [vmem:[%s6159_s5 + $0x1d0] sm:$0xff]  }
  0xf6   : > { %828 = vst [vmem:[#allocation2] sm:$0xff] %v4080_v63  ;;  %v5097_v14 = vpack.c.bf16 %v719_v0, %v718_v57  ;;  %v539_v15 = vmax.f32 %v478_v1, 0.0  ;;  %v482_v16 = vadd.f32 %v481_v10, %v5036_v7  ;;  %v4751_v35 = vpack.c.bf16 %v719_v0, %v717_v51 }
  0xf7   : > { %v650_v19 = vmul.f32 %v589_v50, %v538_v6  ;;  %v540_v20 = vmax.f32 %v480_v8, 0.0  ;;  %v967_v59 = vshll.u32 %v4750_v31, 16  ;;  %v965_v12 = vshrl.u32 %v4750_v31, 16 }
  0xf8   : > { %829 = vst [vmem:[#allocation2 + $0x8] sm:$0xff] %v5097_v14  ;;  %v651_v26 = vmul.f32 %v589_v50, %v539_v15  ;;  %v541_v30 = vmax.f32 %v482_v16, 0.0  ;;  %1369 = vmatprep.mubr.bf16.mxu0 %v4751_v35  ;;  %v979_v51 = vshll.u32 %v4751_v35, 16  ;;  %v977_v58 = vshrl.u32 %v4751_v35, 16  ;;  %v599_v16 = vpop.permute.xlu0 %598 }
  0xf9   : > { %v720_v40 = vadd.f32 %v692_v22, %v650_v19  ;;  %v652_v41 = vmul.f32 %v594_v25, %v540_v20  ;;  %1370 = vmatmul.mubr.bf16.vlgmr.msra.gmra.mrb[28].mxu0 %v4750_v31 }
  0xfa   : > { %v721_v50 = vadd.f32 %v693_v27, %v651_v26  ;;  %v653_v52 = vmul.f32 %v594_v25, %v541_v30  ;;  %v485_v46 = vpop.f32.mrb[8].mxu0  ;;  %4272 = vmatpush3.bf16.msra.mxu0 %v4613_v36  ;;  %v981_v1 = vrot.slane %v979_v51, 1 }
  0xfb   : > { %v5117_v53 = vadd.f32 %v694_v28, %v652_v41  ;;  %v486_v22 = vadd.f32 %v485_v46, %v5033_v5  ;;  %v487_v57 = vpop.f32.mrb[9].mxu0  ;;  %v4617_v28 = vld [vmem:[%s6159_s5 + $0x188] sm:$0xff]   ;;  %4273 = vmatprep.subr.bf16.mxu0 %v4615_v42  ;;  %v604_v42 = vpop.permute.xlu1 %603 }
  0xfc   : > { %v5120_v63 = vpack.c.bf16 %v721_v50, %v720_v40  ;;  %v5124_v9 = vadd.f32 %v695_v32, %v653_v52  ;;  %v488_v27 = vadd.f32 %v487_v57, %v5036_v7  ;;  %v489_v0 = vpop.f32.mrb[10].mxu0  ;;  %v969_v32 = vrot.slane %v967_v59, 1  ;;  %v4620_v57 = vld [vmem:[%s6159_s5 + $0x190] sm:$0xff]  }
  0xfd   : > { %v542_v6 = vmax.f32 %v486_v22, 0.0  ;;  %v490_v8 = vadd.f32 %v489_v0, %v5033_v5  ;;  %v491_v10 = vpop.f32.mrb[11].mxu0  ;;  %v5134_v15 = vld [vmem:[#allocation2] sm:$0xee]  ;;  %v982_v26 = vor.u32 %v981_v1, %v977_v58  ;;  %v5146_v22 = vpack.c.bf16 %v5117_v53, %v720_v40 }
  0xfe   : > { %830 = vst [vmem:[#allocation2 + $0x10] sm:$0xff] %v5120_v63  ;;  %v4083_v19 = vpack.c.bf16 %v5124_v9, %v5117_v53  ;;  %v543_v20 = vmax.f32 %v488_v27, 0.0  ;;  %v492_v25 = vadd.f32 %v491_v10, %v5036_v7  ;;  %v970_v36 = vor.u32 %v969_v32, %v965_v12  ;;  %4274 = vmatpush3.bf16.msra.mxu0 %v4617_v28  ;;  %v4622_v27 = vld [vmem:[%s6159_s5 + $0x1d8] sm:$0xff]  }
  0xff   : > { %v654_v30 = vmul.f32 %v599_v16, %v542_v6  ;;  %v544_v35 = vmax.f32 %v490_v8, 0.0  ;;  %v1661_v41 = vld [vmem:[#allocation2 + $0x8] sm:$0xee]  ;;  %v3729_v31 = vcombine.low %v5134_v15, %v5097_v14  ;;  %v5143_v51 = vpack.c.bf16 %v5124_v9, %v721_v50  ;;  %4275 = vmatprep.subr.bf16.mxu0 %v4618_v2 }
 0x100   : > { %831 = vst [vmem:[#allocation2 + $0x18] sm:$0xff] %v4083_v19  ;;  %v655_v52 = vmul.f32 %v599_v16, %v543_v20  ;;  %v545_v46 = vmax.f32 %v492_v25, 0.0  ;;  %v5159_v50 = vcombine.low %v1661_v41, %v5120_v63  ;;  %v5162_v40 = vcombine.high %v1661_v41, %v5120_v63  ;;  %v4623_v20 = vld [vmem:[%s6159_s5 + $0x198] sm:$0xff]  }
 0x101   : > { %v5153_v58 = vadd.f32 %v696_v33, %v654_v30  ;;  %v656_v59 = vmul.f32 %v604_v42, %v544_v35  ;;  %1377 = vmatprep.mubr.bf16.mxu0 %v5143_v51  ;;  %v984_v33 = vshll.u32 %v5143_v51, 16  ;;  %v972_v2 = vshll.u32 %v5146_v22, 16 }
 0x102   : > { %v5166_v0 = vadd.f32 %v697_v37, %v655_v52  ;;  %v657_v1 = vmul.f32 %v604_v42, %v545_v46  ;;  %v495_v28 = vpop.f32.mrb[12].mxu0  ;;  %1378 = vmatmul.mubr.bf16.gmra.mrb[32].mxu0 %v5146_v22  ;;  %v996_v17 = vshrl.u32 %v5143_v51, 16  ;;  %v988_v37 = vshrl.u32 %v5146_v22, 16  ;;  %v609_v52 = vpop.permute.xlu0 %608 }
 0x103   : > { %v5173_v6 = vadd.f32 %v698_v38, %v656_v59  ;;  %v496_v8 = vadd.f32 %v495_v28, %v5033_v5  ;;  %v497_v10 = vpop.f32.mrb[13].mxu0  ;;  %v986_v19 = vrot.slane %v984_v33, 1  ;;  %4276 = vmatpush3.bf16.msra.mxu0 %v4620_v57  ;;  %v974_v41 = vrot.slane %v972_v2, 1 }
 0x104   : > { %v4084_v12 = vpack.c.bf16 %v5166_v0, %v5153_v58  ;;  %v5183_v32 = vadd.f32 %v699_v43, %v657_v1  ;;  %v498_v16 = vadd.f32 %v497_v10, %v5036_v7  ;;  %v499_v38 = vpop.f32.mrb[14].mxu0  ;;  %4277 = vmatprep.subr.bf16.mxu0 %v4622_v27  ;;  %v4626_v43 = vld [vmem:[%s6159_s5 + $0x1e0] sm:$0xff]   ;;  %v1753_v42 = vrot.slane %v5162_v40, 1  ;;  %v4619_v27 = vld [vmem:[%s6159_s5 + $0x148] sm:$0xff]   ;;  %v614_v10 = vpop.permute.xlu1 %613 }
 0x105   : > { %v546_v25 = vmax.f32 %v496_v8, 0.0  ;;  %v500_v30 = vadd.f32 %v499_v38, %v5033_v5  ;;  %v501_v35 = vpop.f32.mrb[15].mxu0  ;;  %v987_v1 = vsel %vm963_vm1, %v982_v26, %v986_v19  ;;  %v975_v2 = vsel %vm963_vm1, %v970_v36, %v974_v41 }
 0x106   : > { %832 = vst [vmem:[#allocation2 + $0x20] sm:$0xff] %v4084_v12  ;;  %v4085_v46 = vpack.c.bf16 %v5183_v32, %v5173_v6  ;;  %v547_v57 = vmax.f32 %v498_v16, 0.0  ;;  %v502_v59 = vadd.f32 %v501_v35, %v5036_v7  ;;  %1190 = vmatprep.mubr.bf16.mxu1 %v987_v1  ;;  %v998_v8 = vor.u32 %v996_v17, %v986_v19  ;;  %v4621_v19 = vld [vmem:[%s6159_s5 + $0x108] sm:$0xff]  }
 0x107   : > { %v658_v28 = vmul.f32 %v609_v52, %v546_v25  ;;  %v548_v33 = vmax.f32 %v500_v30, 0.0  ;;  %1191 = vmatmul.mubr.bf16.vlgmr.msra.gmra.mrb[0].mxu1 %v975_v2  ;;  %v5207_v16 = vpack.c.bf16 %v5183_v32, %v5166_v0  ;;  %v5211_v26 = vpack.c.bf16 %v5173_v6, %v5153_v58  ;;  %4278 = vmatpush3.bf16.msra.mxu0 %v4623_v20  ;;  %v4627_v25 = vld [vmem:[%s6159_s5 + $0x1a0] sm:$0xff]   ;;  %v4630_v20 = vld [vmem:[%s6159_s5 + $0x1e8] sm:$0xff]  }
 0x108   : > { %833 = vst [vmem:[#allocation2 + $0x28] sm:$0xff] %v4085_v46  ;;  %v659_v12 = vmul.f32 %v609_v52, %v547_v57  ;;  %v549_v38 = vmax.f32 %v502_v59, 0.0  ;;  %4226 = vmatpush3.bf16.msra.mxu1 %v4616_v23  ;;  %v990_v30 = vor.u32 %v988_v37, %v974_v41  ;;  %4279 = vmatprep.subr.bf16.mxu0 %v4626_v43  ;;  %v1750_v35 = vrot.slane %v5159_v50, 1  ;;  %v4624_v41 = vld [vmem:[%s6159_s5 + $0x150] sm:$0xff]   ;;  %v4631_v2 = vld [vmem:[%s6159_s5 + $0x1a8] sm:$0xff]  }
 0x109   : > { %v5218_v36 = vadd.f32 %v700_v44, %v658_v28  ;;  %v660_v17 = vmul.f32 %v614_v10, %v548_v33  ;;  %1385 = vmatprep.mubr.bf16.mxu0 %v5207_v16  ;;  %4227 = vmatprep.subr.bf16.mxu1 %v4619_v27  ;;  %v1000_v23 = vshll.u32 %v5207_v16, 16  ;;  %v992_v37 = vshll.u32 %v5211_v26, 16 }
 0x10a   : > { %v5229_v52 = vadd.f32 %v701_v48, %v659_v12  ;;  %v661_v44 = vmul.f32 %v614_v10, %v549_v38  ;;  %v505_v46 = vpop.f32.mrb[16].mxu0  ;;  %1386 = vmatmul.mubr.bf16.gmra.mrb[36].mxu0 %v5211_v26  ;;  %v1012_v57 = vshrl.u32 %v5207_v16, 16  ;;  %v1004_v59 = vshrl.u32 %v5211_v26, 16 }
 0x10b   : > { %v5239_v43 = vadd.f32 %v702_v49, %v660_v17  ;;  %v506_v29 = vadd.f32 %v505_v46, %v5033_v5  ;;  %v507_v48 = vpop.f32.mrb[17].mxu0  ;;  %v1002_v33 = vrot.slane %v1000_v23, 1  ;;  %4280 = vmatpush3.bf16.msra.mxu0 %v4627_v25  ;;  %v994_v17 = vrot.slane %v992_v37, 1 }
 0x10c   : > { %v4086_v1 = vpack.c.bf16 %v5229_v52, %v5218_v36  ;;  %v5249_v27 = vadd.f32 %v703_v54, %v661_v44  ;;  %v508_v28 = vadd.f32 %v507_v48, %v5036_v7  ;;  %v509_v49 = vpop.f32.mrb[18].mxu0  ;;  %4228 = vmatpush3.bf16.msra.mxu1 %v4621_v19  ;;  %4281 = vmatprep.subr.bf16.mxu0 %v4630_v20  ;;  %v4633_v54 = vld [vmem:[%s6159_s5 + $0x1f0] sm:$0xff]   ;;  %v619_v44 = vpop.permute.xlu0 %618  ;;  %v4628_v20 = vld [vmem:[%s6159_s5 + $0x158] sm:$0xff]   ;;  %v1454_v4 = vrot.slane %v5143_v51, 1 }
 0x10d   : > { %v550_v10 = vmax.f32 %v506_v29, 0.0  ;;  %v510_v12 = vadd.f32 %v509_v49, %v5033_v5  ;;  %v511_v38 = vpop.f32.mrb[19].mxu0  ;;  %v5264_v25 = vpack.c.bf16 %v5153_v58, %v5117_v53  ;;  %v1003_v37 = vsel %vm963_vm1, %v998_v8, %v1002_v33  ;;  %4229 = vmatprep.subr.bf16.mxu1 %v4624_v41 }
 0x10e   : > { %834 = vst [vmem:[#allocation2 + $0x30] sm:$0xff] %v4086_v1  ;;  %v4087_v46 = vpack.c.bf16 %v5249_v27, %v5239_v43  ;;  %v551_v19 = vmax.f32 %v508_v28, 0.0  ;;  %v512_v23 = vadd.f32 %v511_v38, %v5036_v7  ;;  %1198 = vmatprep.mubr.bf16.mxu1 %v1003_v37  ;;  %v995_v53 = vsel %vm963_vm1, %v990_v30, %v994_v17  ;;  %v624_v1 = vpop.permute.xlu1 %623 }
 0x10f   : > { %v662_v29 = vmul.f32 %v619_v44, %v550_v10  ;;  %v552_v48 = vmax.f32 %v510_v12, 0.0  ;;  %v1014_v58 = vor.u32 %v1012_v57, %v1002_v33  ;;  %1199 = vmatmul.mubr.bf16.gmra.mrb[4].mxu1 %v995_v53  ;;  %v5276_v8 = vpack.c.bf16 %v5249_v27, %v5229_v52  ;;  %4282 = vmatpush3.bf16.msra.mxu0 %v4631_v2  ;;  %v4635_v10 = vld [vmem:[%s6159_s5 + $0x1b0] sm:$0xff]   ;;  %v4629_v33 = vld [vmem:[%s6159_s5 + $0x118] sm:$0xff]   ;;  %v4634_v53 = vld [vmem:[%s6159_s5 + $0x120] sm:$0xff]  }
 0x110   : > { %835 = vst [vmem:[#allocation2 + $0x38] sm:$0xff] %v4087_v46  ;;  %v663_v49 = vmul.f32 %v619_v44, %v551_v19  ;;  %v553_v28 = vmax.f32 %v512_v23, 0.0  ;;  %v5280_v41 = vpack.c.bf16 %v5239_v43, %v5218_v36  ;;  %4230 = vmatpush3.bf16.msra.mxu1 %v4625_v34  ;;  %v1006_v12 = vor.u32 %v1004_v59, %v994_v17  ;;  %v4636_v2 = vld [vmem:[%s6159_s5 + $0x1f8] sm:$0xff]   ;;  %v4632_v17 = vld [vmem:[%s6159_s5 + $0x160] sm:$0xff]  }
 0x111   : > { %v5287_v30 = vadd.f32 %v704_v55, %v662_v29  ;;  %v664_v57 = vmul.f32 %v624_v1, %v552_v48  ;;  %4283 = vmatprep.subr.bf16.mxu0 %v4633_v54  ;;  %v1751_v38 = vrot.slane %v5264_v25, 1  ;;  %1393 = vmatprep.mubr.bf16.mxu0 %v5276_v8  ;;  %v1016_v34 = vshll.u32 %v5276_v8, 16 }
 0x112   : > { %v5298_v44 = vadd.f32 %v705_v60, %v663_v49  ;;  %v665_v55 = vmul.f32 %v624_v1, %v553_v28  ;;  %v515_v46 = vpop.f32.mrb[20].mxu0  ;;  %4231 = vmatprep.subr.bf16.mxu1 %v4628_v20  ;;  %v1008_v59 = vshll.u32 %v5280_v41, 16  ;;  %1394 = vmatmul.mubr.bf16.gmra.mrb[40].mxu0 %v5280_v41  ;;  %v5314_v19 = vpack.c.bf16 %v5166_v0, %v5124_v9  ;;  %v4638_v9 = vld [vmem:[%s6159_s5 + $0x1b8] sm:$0xff]   ;;  %v4646_v28 = vld [vmem:[%s6159_s5 + $0x2c0] sm:$0xff]  }
 0x113   : > { %v5308_v54 = vadd.f32 %v706_v61, %v664_v57  ;;  %v516_v39 = vadd.f32 %v515_v46, %v5033_v5  ;;  %v517_v60 = vpop.f32.mrb[21].mxu0  ;;  %v1028_v23 = vshrl.u32 %v5276_v8, 16  ;;  %v1018_v48 = vrot.slane %v1016_v34, 1  ;;  %4284 = vmatpush3.bf16.msra.mxu0 %v4635_v10  ;;  %v629_v57 = vpop.permute.xlu0 %628 }
 0x114   : > { %v4088_v37 = vpack.c.bf16 %v5298_v44, %v5287_v30  ;;  %v5321_v20 = vadd.f32 %v707_v3, %v665_v55  ;;  %v518_v61 = vadd.f32 %v517_v60, %v5036_v7  ;;  %v519_v29 = vpop.f32.mrb[22].mxu0  ;;  %4232 = vmatpush3.bf16.msra.mxu1 %v4629_v33  ;;  %v1010_v45 = vrot.slane %v1008_v59, 1  ;;  %4285 = vmatprep.subr.bf16.mxu0 %v4636_v2  ;;  %v4637_v33 = vld [vmem:[%s6159_s5 + $0x168] sm:$0xff]  }
 0x115   : > { %v554_v0 = vmax.f32 %v516_v39, 0.0  ;;  %v520_v1 = vadd.f32 %v519_v29, %v5033_v5  ;;  %v521_v49 = vpop.f32.mrb[23].mxu0  ;;  %v1754_v3 = vrot.slane %v5314_v19, 1  ;;  %v1019_v34 = vsel %vm963_vm1, %v1014_v58, %v1018_v48  ;;  %4233 = vmatprep.subr.bf16.mxu1 %v4632_v17 }
 0x116   : > { %836 = vst [vmem:[#allocation2 + $0x40] sm:$0xff] %v4088_v37  ;;  %v4089_v10 = vpack.c.bf16 %v5321_v20, %v5308_v54  ;;  %v555_v55 = vmax.f32 %v518_v61, 0.0  ;;  %v522_v46 = vadd.f32 %v521_v49, %v5036_v7  ;;  %1206 = vmatprep.mubr.bf16.mxu1 %v1019_v34  ;;  %v1011_v39 = vsel %vm963_vm1, %v1006_v12, %v1010_v45  ;;  %v634_v37 = vpop.permute.xlu1 %633  ;;  %v4639_v49 = vld [vmem:[%s6159_s5 + $0x128] sm:$0xff]  }
 0x117   : > { %v666_v2 = vmul.f32 %v629_v57, %v554_v0  ;;  %v556_v59 = vmax.f32 %v520_v1, 0.0  ;;  %v1755_v60 = vsel %vm1449_vm2, %v1753_v42, %v1754_v3  ;;  %1207 = vmatmul.mubr.bf16.gmra.mrb[8].mxu1 %v1011_v39  ;;  %v5350_v17 = vpack.c.bf16 %v5321_v20, %v5298_v44  ;;  %4286 = vmatpush3.bf16.msra.mxu0 %v4638_v9 }
 0x118   : > { %837 = vst [vmem:[#allocation2 + $0x48] sm:$0xff] %v4089_v10  ;;  %v667_v61 = vmul.f32 %v629_v57, %v555_v55  ;;  %v557_v58 = vmax.f32 %v522_v46, 0.0  ;;  %v5354_v29 = vpack.c.bf16 %v5308_v54, %v5287_v30  ;;  %4234 = vmatpush3.bf16.msra.mxu1 %v4634_v53  ;;  %v1030_v42 = vor.u32 %v1028_v23, %v1018_v48  ;;  %v4641_v23 = vld [vmem:[%s6159_s5 + $0x170] sm:$0xff]  }
 0x119   : > { %v5358_v12 = vadd.f32 %v708_v11, %v666_v2  ;;  %v668_v0 = vmul.f32 %v634_v37, %v556_v59  ;;  %v1020_v1 = vshrl.u32 %v5280_v41, 16  ;;  %4363 = vmatprep.subr.bf16.mxu0 %v4646_v28  ;;  %1401 = vmatprep.mubr.bf16.mxu0 %v5350_v17  ;;  %v1032_v11 = vshll.u32 %v5350_v17, 16 }
 0x11a   : > { %v5366_v57 = vadd.f32 %v709_v13, %v667_v61  ;;  %v669_v10 = vmul.f32 %v634_v37, %v557_v58  ;;  %v525_v9 = vpop.f32.mrb[24].mxu0  ;;  %v1024_v53 = vshll.u32 %v5354_v29, 16  ;;  %4235 = vmatprep.subr.bf16.mxu1 %v4637_v33  ;;  %1402 = vmatmul.mubr.bf16.gmra.mrb[44].mxu0 %v5354_v29  ;;  %v1752_v55 = vsel %vm1449_vm2, %v1750_v35, %v1751_v38  ;;  %v4642_v35 = vld [vmem:[%s6159_s5 + $0x130] sm:$0xff]   ;;  %v639_v37 = vpop.permute.xlu0 %638 }
 0x11b   : > { %v738_v48 = vadd.f32 %v710_v18, %v668_v0  ;;  %v526_v56 = vadd.f32 %v525_v9, %v5033_v5  ;;  %v527_v13 = vpop.f32.mrb[25].mxu0  ;;  %v1022_v28 = vor.u32 %v1020_v1, %v1010_v45  ;;  %1910 = vmatprep.mubr.bf16.mxu0 %v1755_v60  ;;  %v1034_v5 = vrot.slane %v1032_v11, 1  ;;  %v4644_v60 = vld [vmem:[%s6159_s5 + $0x178] sm:$0xff]   ;;  %v644_v58 = vpop.permute.xlu1 %643 }
 0x11c   : > { %v4090_v46 = vpack.c.bf16 %v5366_v57, %v5358_v12  ;;  %v739_v34 = vadd.f32 %v711_v21, %v669_v10  ;;  %v528_v18 = vadd.f32 %v527_v13, %v5036_v7  ;;  %v529_v33 = vpop.f32.mrb[26].mxu0  ;;  %v1026_v45 = vrot.slane %v1024_v53, 1  ;;  %4236 = vmatpush3.bf16.msra.mxu1 %v4639_v49  ;;  %v4645_v11 = vld [vmem:[%s6159_s5 + $0x138] sm:$0xff]   ;;  %v4647_v53 = vld [vmem:[%s6159_s5 + $0x280] sm:$0xff]   ;;  %v2296_v58 = vld [vmem:[#allocation2 + $0x8] sm:$0xcc] }
 0x11d   : > { %v558_v2 = vmax.f32 %v526_v56, 0.0  ;;  %v531_v59 = vpop.f32.mrb[27].mxu0  ;;  %v5390_v39 = vpack.c.bf16 %v5229_v52, %v5183_v32  ;;  %v1035_v7 = vsel %vm963_vm1, %v1030_v42, %v1034_v5  ;;  %4237 = vmatprep.subr.bf16.mxu1 %v4641_v23  ;;  %v1044_v1 = vshrl.u32 %v5350_v17, 16  ;;  %v4649_v56 = vld [vmem:[%s6159_s5 + $0x2c8] sm:$0xff]  }
 0x11e   : > { %838 = vst [vmem:[#allocation2 + $0x50] sm:$0xff] %v4090_v46  ;;  %v4091_v62 = vpack.c.bf16 %v739_v34, %v738_v48  ;;  %v559_v21 = vmax.f32 %v528_v18, 0.0  ;;  %1214 = vmatprep.mubr.bf16.mxu1 %v1035_v7  ;;  %v1027_v32 = vsel %vm963_vm1, %v1022_v28, %v1026_v45  ;;  %v1036_v49 = vshrl.u32 %v5354_v29, 16 }
 0x11f   : > { %v670_v61 = vmul.f32 %v639_v37, %v558_v2  ;;  %v1758_v52 = vrot.slane %v5390_v39, 1  ;;  %1215 = vmatmul.mubr.bf16.gmra.mrb[12].mxu1 %v1027_v32  ;;  %v3730_v9 = vcombine.high %v5134_v15, %v5097_v14  ;;  %v1450_v13 = vrot.slane %v3729_v31, 1  ;;  %v4651_v15 = vld [vmem:[%s6159_s5 + $0x288] sm:$0xff]  }
 0x120   : > { %839 = vst [vmem:[#allocation2 + $0x58] sm:$0xff] %v4091_v62  ;;  %v671_v0 = vmul.f32 %v639_v37, %v559_v21  ;;  %4238 = vmatpush3.bf16.msra.mxu1 %v4642_v35  ;;  %v1038_v48 = vor.u32 %v1036_v49, %v1026_v45  ;;  %v5430_v46 = vpack.c.bf16 %v5218_v36, %v5173_v6  ;;  %v1451_v14 = vrot.slane %v5146_v22, 1  ;;  %v4652_v22 = vld [vmem:[%s6159_s5 + $0x2d0] sm:$0xff]   ;;  %v4657_v49 = vld [vmem:[%s6159_s5 + $0x298] sm:$0xff]  }
 0x121   : > { %v740_v42 = vadd.f32 %v712_v24, %v670_v61  ;;  %v1759_v10 = vsel %vm1449_vm2, %v1754_v3, %v1758_v52  ;;  %v1046_v24 = vor.u32 %v1044_v1, %v1034_v5  ;;  %4239 = vmatprep.subr.bf16.mxu1 %v4644_v60  ;;  %v4648_v3 = vld [vmem:[%s6159_s5 + $0x240] sm:$0xff]   ;;  %v1453_v28 = vrot.slane %v3730_v9, 1  ;;  %v4654_v62 = vld [vmem:[%s6159_s5 + $0x290] sm:$0xff]  }
 0x122   : > { %v741_v23 = vadd.f32 %v713_v47, %v671_v0  ;;  %1911 = vmatmul.mubr.bf16.vlgmr.msra.gmra.mrb[48].mxu0 %v1752_v55  ;;  %v5434_v34 = vpack.c.bf16 %v5298_v44, %v5249_v27  ;;  %v1458_v31 = vrot.slane %v5207_v16, 1  ;;  %v5444_v51 = vpack.c.bf16 %v5287_v30, %v5239_v43  ;;  %v4660_v9 = vld [vmem:[%s6159_s5 + $0x2e0] sm:$0xff]  }
 0x123   : > { %1918 = vmatprep.mubr.bf16.mxu0 %v1759_v10  ;;  %v1455_v55 = vsel %vm1449_vm2, %v1453_v28, %v1454_v4  ;;  %4364 = vmatpush3.bf16.msra.mxu0 %v4647_v53  ;;  %v1756_v27 = vrot.slane %v5430_v46, 1  ;;  %v5456_v16 = vsel %vm1449_vm2, %v1450_v13, %v1451_v14  ;;  %v5469_v59 = vpack.c.bf16 %v5366_v57, %v5321_v20  ;;  %v4656_v57 = vld [vmem:[%s6159_s5 + $0x2d8] sm:$0xff]  }
 0x124   : > { %v4092_v47 = vpack.c.bf16 %v741_v23, %v740_v42  ;;  %4240 = vmatpush3.bf16.msra.mxu1 %v4645_v11  ;;  %4365 = vmatprep.subr.bf16.mxu0 %v4649_v56  ;;  %v1762_v44 = vrot.slane %v5434_v34, 1  ;;  %v5459_v43 = vsel %vm1449_vm2, %v1454_v4, %v1458_v31  ;;  %v1760_v30 = vrot.slane %v5444_v51, 1 }
 0x125   : > { %v884_v18 = vld [vmem:[#allocation2 + $0x50] sm:$0x11]  ;;  %4317 = vmatprep.subr.bf16.mxu1 %v4648_v3  ;;  %v1757_v2 = vsel %vm1449_vm2, %v1751_v38, %v1756_v27  ;;  %v1456_v21 = vrot.slane %v5211_v26, 1  ;;  %v1462_v7 = vrot.slane %v5276_v8, 1  ;;  %v1766_v20 = vrot.slane %v5469_v59, 1 }
 0x126   : > { %840 = vst [vmem:[#allocation2 + $0x60] sm:$0xff] %v4092_v47  ;;  %v5446_v6 = vcombine.high %v884_v18, %v884_v18  ;;  %v5448_v36 = vcombine.low %v884_v18, %v884_v18  ;;  %v1763_v35 = vsel %vm1449_vm2, %v1758_v52, %v1762_v44  ;;  %v1761_v37 = vsel %vm1449_vm2, %v1756_v27, %v1760_v30  ;;  %v4665_v18 = vld [vmem:[%s6159_s5 + $0x2e8] sm:$0xff]   ;;  %v4650_v27 = vld [vmem:[%s6159_s5 + $0x200] sm:$0xff]  }
 0x127   : > { %v5471_v45 = vld [vmem:[#allocation2 + $0x58] sm:$0x11]  ;;  %4366 = vmatpush3.bf16.msra.mxu0 %v4651_v15  ;;  %v5486_v61 = vpack.c.bf16 %v5358_v12, %v5308_v54  ;;  %v5489_v32 = vsel %vm1449_vm2, %v1451_v14, %v1456_v21  ;;  %v5492_v26 = vsel %vm1449_vm2, %v1458_v31, %v1462_v7  ;;  %v1460_v52 = vrot.slane %v5280_v41, 1 }
 0x128   : > { %v1048_v33 = vshll.u32 %v5446_v6, 16  ;;  %v1040_v5 = vshll.u32 %v5448_v36, 16  ;;  %4367 = vmatprep.subr.bf16.mxu0 %v4652_v22  ;;  %v3790_v8 = vcombine.high %v5471_v45, %v5471_v45  ;;  %v1767_v54 = vsel %vm1449_vm2, %v1762_v44, %v1766_v20 }
 0x129   : > { %v1764_v12 = vrot.slane %v5486_v61, 1  ;;  %v5505_v42 = vsel %vm1449_vm2, %v1456_v21, %v1460_v52  ;;  %v1466_v41 = vrot.slane %v5350_v17, 1  ;;  %v3889_v11 = vcombine.low %v2296_v58, %v5120_v63  ;;  %v4666_v21 = vld [vmem:[%s6159_s5 + $0x2a8] sm:$0xff]  }
 0x12a   : > { %v1050_v38 = vrot.slane %v1048_v33, 1  ;;  %v1042_v60 = vrot.slane %v1040_v5, 1  ;;  %1919 = vmatmul.mubr.bf16.gmra.mrb[52].mxu0 %v1757_v2  ;;  %v3890_v53 = vcombine.high %v2296_v58, %v5120_v63  ;;  %v2340_v23 = vrot.slane %v5314_v19, 2  ;;  %v4662_v63 = vld [vmem:[%s6159_s5 + $0x2a0] sm:$0xff]   ;;  %v4653_v5 = vld [vmem:[%s6159_s5 + $0x248] sm:$0xff]  }
 0x12b   : > { %1926 = vmatprep.mubr.bf16.mxu0 %v1763_v35  ;;  %4368 = vmatpush3.bf16.msra.mxu0 %v4654_v62  ;;  %v5511_v10 = vsel %vm1449_vm2, %v1760_v30, %v1764_v12  ;;  %v1464_v3 = vrot.slane %v5354_v29, 1  ;;  %v2336_v56 = vrot.slane %v3889_v11, 2  ;;  %v2337_v28 = vrot.slane %v5264_v25, 2  ;;  %v5746_v29 = vld [vmem:[#allocation2 + $0x24] ss:$8 sps:$4 sm:$0xff]  }
 0x12c   : > { %v1051_v0 = vsel %vm963_vm1, %v1046_v24, %v1050_v38  ;;  %v1043_v1 = vsel %vm963_vm1, %v1038_v48, %v1042_v60  ;;  %4369 = vmatprep.subr.bf16.mxu0 %v4656_v57  ;;  %v1770_v24 = vrot.slane %v3790_v8, 1  ;;  %v5522_v48 = vsel %vm1449_vm2, %v1462_v7, %v1466_v41 }
 0x12d   : > { %1222 = vmatprep.mubr.bf16.mxu1 %v1051_v0  ;;  %v2339_v13 = vrot.slane %v3890_v53, 2  ;;  %v5532_v4 = vsel %vm1449_vm2, %v1460_v52, %v1464_v3  ;;  %v2344_v47 = vrot.slane %v5390_v39, 2  ;;  %v5544_v15 = vsel %vm2335_vm3, %v2336_v56, %v2337_v28  ;;  %v4671_v53 = vld [vmem:[%s6159_s5 + $0x2b0] sm:$0xff]  }
 0x12e   : > { %1223 = vmatmul.mubr.bf16.gmra.mrb[16].mxu1 %v1043_v1  ;;  %v2019_v31 = vshrl.u32 %v5162_v40, 16  ;;  %v1771_v22 = vsel %vm1449_vm2, %v1766_v20, %v1770_v24  ;;  %v2022_v30 = vshll.u32 %v5162_v40, 16  ;;  %v2027_v33 = vshrl.u32 %v5314_v19, 16 }
 0x12f   : > { %1610 = vmatprep.mubr.bf16.mxu1 %v1455_v55  ;;  %4370 = vmatpush3.bf16.msra.mxu0 %v4657_v49  ;;  %v3789_v55 = vcombine.low %v5471_v45, %v5471_v45  ;;  %v5541_v14 = vsel %vm2335_vm3, %v2339_v13, %v2340_v23  ;;  %v5552_v44 = vsel %vm2335_vm3, %v2340_v23, %v2344_v47  ;;  %v2030_v35 = vshll.u32 %v5314_v19, 16  ;;  %v4669_v19 = vld [vmem:[%s6159_s5 + $0x2f0] sm:$0xff]   ;;  %v4672_v13 = vld [vmem:[%s6159_s5 + $0x2f8] sm:$0xff]  }
 0x130   : > { %4371 = vmatprep.subr.bf16.mxu0 %v4660_v9  ;;  %v2021_v2 = vrot.slane %v2019_v31, 1  ;;  %v2342_v62 = vrot.slane %v5430_v46, 2  ;;  %v2024_v40 = vrot.slane %v2022_v30, 2  ;;  %v2029_v7 = vrot.slane %v2027_v33, 1 }
 0x131   : > { %v2002_v38 = vshrl.u32 %v5159_v50, 16  ;;  %v2005_v60 = vshll.u32 %v5159_v50, 16  ;;  %v2032_v20 = vrot.slane %v2030_v35, 2  ;;  %v2010_v52 = vshrl.u32 %v5264_v25, 16  ;;  %v4655_v50 = vld [vmem:[%s6159_s5 + $0x208] sm:$0xff]  }
 0x132   : > { %1927 = vmatmul.mubr.bf16.gmra.mrb[56].mxu0 %v1761_v37  ;;  %v2348_v37 = vrot.slane %v5434_v34, 2  ;;  %v5572_v57 = vsel %vm2335_vm3, %v2337_v28, %v2342_v62  ;;  %v2013_v1 = vshll.u32 %v5264_v25, 16  ;;  %v2045_v11 = vshrl.u32 %v5390_v39, 16 }
 0x133   : > { %1934 = vmatprep.mubr.bf16.mxu0 %v1767_v54  ;;  %4372 = vmatpush3.bf16.msra.mxu0 %v4662_v63  ;;  %v2004_v58 = vrot.slane %v2002_v38, 1  ;;  %v2007_v0 = vrot.slane %v2005_v60, 2  ;;  %v4658_v54 = vld [vmem:[%s6159_s5 + $0x250] sm:$0xff]   ;;  %v2033_v49 = vor.u32 %v2032_v20, %v2029_v7  ;;  %v2012_v9 = vrot.slane %v2010_v52, 1  ;;  %v4664_v60 = vld [vmem:[%s6159_s5 + $0x218] sm:$0xff]   ;;  %v4668_v52 = vld [vmem:[%s6159_s5 + $0x260] sm:$0xff]  }
 0x134   : > { %4373 = vmatprep.subr.bf16.mxu0 %v4665_v18  ;;  %v5575_v8 = vsel %vm2335_vm3, %v2344_v47, %v2348_v37  ;;  %v2015_v24 = vrot.slane %v2013_v1, 2  ;;  %v2346_v25 = vrot.slane %v5444_v51, 2  ;;  %v2352_v56 = vrot.slane %v5469_v59, 2  ;;  %v4659_v18 = vld [vmem:[%s6159_s5 + $0x210] sm:$0xff]  }
 0x135   : > { %v2008_v23 = vor.u32 %v2007_v0, %v2004_v58  ;;  %v2036_v47 = vshrl.u32 %v5430_v46, 16  ;;  %v2039_v33 = vshll.u32 %v5430_v46, 16  ;;  %v4674_v46 = vld [vmem:[%s6159_s5 + $0x2b8] sm:$0xff]   ;;  %v2054_v38 = vshrl.u32 %v5444_v51, 16 }
 0x136   : > { %1611 = vmatmul.mubr.bf16.vlgmr.msra.gmra.mrb[20].mxu1 %v5456_v16  ;;  %v2025_v16 = vor.u32 %v2024_v40, %v2021_v2  ;;  %v2016_v31 = vor.u32 %v2015_v24, %v2012_v9  ;;  %v5610_v30 = vsel %vm2335_vm3, %v2348_v37, %v2352_v56  ;;  %v2350_v40 = vrot.slane %v5486_v61, 2 }
 0x137   : > { %4318 = vmatpush3.bf16.msra.mxu1 %v4650_v27  ;;  %1618 = vmatprep.mubr.bf16.mxu1 %v5459_v43  ;;  %v2048_v43 = vshll.u32 %v5390_v39, 16  ;;  %v2047_v39 = vrot.slane %v2045_v11, 1  ;;  %v5605_v27 = vsel %vm2335_vm3, %v2342_v62, %v2346_v25  ;;  %v2038_v35 = vrot.slane %v2036_v47, 1  ;;  %v4670_v11 = vld [vmem:[%s6159_s5 + $0x220] sm:$0xff]   ;;  %v4676_v47 = vld [vmem:[%s6159_s5 + $0x270] sm:$0xff]  }
 0x138   : > { %4319 = vmatprep.subr.bf16.mxu1 %v4653_v5  ;;  %4374 = vmatpush3.bf16.msra.mxu0 %v4666_v21  ;;  %v5597_v28 = vsel %vm2000_vm4, %v2025_v16, %v2033_v49  ;;  %v4663_v5 = vld [vmem:[%s6159_s5 + $0x258] sm:$0xff]   ;;  %v2066_v62 = vshll.u32 %v5434_v34, 16  ;;  %v1768_v21 = vrot.slane %v3789_v55, 1  ;;  %v2041_v37 = vrot.slane %v2039_v33, 2  ;;  %v4677_v33 = vld [vmem:[%s6159_s5 + $0x230] sm:$0xff]  }
 0x139   : > { %4375 = vmatprep.subr.bf16.mxu0 %v4669_v19  ;;  %v2050_v63 = vrot.slane %v2048_v43, 2  ;;  %v5643_v19 = vsel %vm2335_vm3, %v2346_v25, %v2350_v40  ;;  %v2057_v20 = vshll.u32 %v5444_v51, 16  ;;  %v2081_v16 = vshrl.u32 %v5469_v59, 16 }
 0x13a   : > { %1935 = vmatmul.mubr.bf16.gmra.mrb[60].mxu0 %v5511_v10  ;;  %v2063_v10 = vshrl.u32 %v5434_v34, 16  ;;  %v4680_v34 = vld [vmem:[%s6159_s5 + $0x3c0] sm:$0xff]   ;;  %v2068_v7 = vrot.slane %v2066_v62, 2  ;;  %v2084_v58 = vshll.u32 %v5469_v59, 16  ;;  %v1769_v51 = vsel %vm1449_vm2, %v1764_v12, %v1768_v21  ;;  %v4673_v12 = vld [vmem:[%s6159_s5 + $0x268] sm:$0xff]   ;;  %v4691_v21 = vld [vmem:[%s6159_s5 + $0x398] sm:$0xff]  }
 0x13b   : > { %4320 = vmatpush3.bf16.msra.mxu1 %v4655_v50  ;;  %1942 = vmatprep.mubr.bf16.mxu0 %v1771_v22  ;;  %v2051_v2 = vor.u32 %v2050_v63, %v2047_v39  ;;  %v5625_v22 = vsel %vm2000_vm4, %v2008_v23, %v2016_v31  ;;  %v2059_v1 = vrot.slane %v2057_v20, 2  ;;  %v2072_v23 = vshrl.u32 %v5486_v61, 16  ;;  %v4675_v39 = vld [vmem:[%s6159_s5 + $0x228] sm:$0xff]   ;;  %v1961_v62 = vld [vmem:[#allocation2 + $0x58] sm:$0x33] }
 0x13c   : > { %4321 = vmatprep.subr.bf16.mxu1 %v4658_v54  ;;  %4376 = vmatpush3.bf16.msra.mxu0 %v4671_v53  ;;  %v2065_v55 = vrot.slane %v2063_v10, 1  ;;  %v2086_v9 = vrot.slane %v2084_v58, 2  ;;  %v2075_v24 = vshll.u32 %v5486_v61, 16  ;;  %v1468_v17 = vrot.slane %v5448_v36, 1  ;;  %v4690_v10 = vld [vmem:[%s6159_s5 + $0x3d8] sm:$0xff]   ;;  %v4712_v61 = vld [vmem:[%s6159_s5 + $0x368] sm:$0xff]  }
 0x13d   : > { %4377 = vmatprep.subr.bf16.mxu0 %v4672_v13  ;;  %v5633_v45 = vsel %vm2000_vm4, %v2033_v49, %v2051_v2  ;;  %v2083_v49 = vrot.slane %v2081_v16, 1  ;;  %v2916_v20 = vshll.u32 %v5746_v29, 16  ;;  %v5784_v16 = vld [vmem:[#allocation2 + $0x30] ss:$8 sps:$4 sm:$0xff]   ;;  %v5786_v58 = vld [vmem:[#allocation2 + $0x44] ss:$8 sps:$4 sm:$0xff]  }
 0x13e   : > { %1619 = vmatmul.mubr.bf16.gmra.mrb[24].mxu1 %v5489_v32  ;;  %v2042_v32 = vor.u32 %v2041_v37, %v2038_v35  ;;  %v2069_v50 = vor.u32 %v2068_v7, %v2065_v55  ;;  %v2077_v63 = vrot.slane %v2075_v24, 2  ;;  %v4679_v35 = vld [vmem:[%s6159_s5 + $0x238] sm:$0xff]   ;;  %v1469_v36 = vsel %vm1449_vm2, %v1464_v3, %v1468_v17  ;;  %v4696_v3 = vld [vmem:[%s6159_s5 + $0x3a0] sm:$0xff]   ;;  %v4699_v37 = vld [vmem:[%s6159_s5 + $0x3e8] sm:$0xff]  }
 0x13f   : > { %1626 = vmatprep.mubr.bf16.mxu1 %v5492_v26  ;;  %4322 = vmatpush3.bf16.msra.mxu1 %v4659_v18  ;;  %v2056_v26 = vrot.slane %v2054_v38, 1  ;;  %v5667_v53 = vor.u32 %v2086_v9, %v2083_v49  ;;  %v4687_v38 = vld [vmem:[%s6159_s5 + $0x348] sm:$0xff]   ;;  %v2918_v59 = vrot.slane %v2916_v20, 3 }
 0x140   : > { %4323 = vmatprep.subr.bf16.mxu1 %v4663_v5  ;;  %4378 = vmatpush3.bf16.msra.mxu0 %v4674_v46  ;;  %v5652_v0 = vsel %vm2000_vm4, %v2016_v31, %v2042_v32  ;;  %v5658_v54 = vsel %vm2000_vm4, %v2051_v2, %v2069_v50  ;;  %v1470_v31 = vrot.slane %v5446_v6, 1  ;;  %v4678_v6 = vld [vmem:[%s6159_s5 + $0x278] sm:$0xff]   ;;  %v4694_v46 = vld [vmem:[%s6159_s5 + $0x3e0] sm:$0xff]  }
 0x141   : > { %4455 = vmatprep.subr.bf16.mxu0 %v4680_v34  ;;  %v2060_v43 = vor.u32 %v2059_v1, %v2056_v26  ;;  %v5677_v13 = vsel %vm2000_vm4, %v2069_v50, %v5667_v53  ;;  %v2547_v34 = vld [vmem:[#allocation2 + $0x10] sm:$0xcc]  ;;  %v2847_v1 = vld [vmem:[#allocation2 + $0x60] sm:$0x77] }
 0x142   : > { %1943 = vmatmul.mubr.bf16.gmra.mrb[64].mxu0 %v1769_v51  ;;  %v1471_v2 = vsel %vm1449_vm2, %v1466_v41, %v1470_v31  ;;  %v4688_v41 = vld [vmem:[%s6159_s5 + $0x390] sm:$0xff]  }
 0x143   : > { %4324 = vmatpush3.bf16.msra.mxu1 %v4664_v60  ;;  %2496 = vmatprep.mubr.bf16.mxu0 %v5541_v14  ;;  %v5672_v25 = vsel %vm2000_vm4, %v2042_v32, %v2060_v43  ;;  %v2074_v14 = vrot.slane %v2072_v23, 1  ;;  %v5766_v60 = vld [vmem:[#allocation2 + $0x20] ss:$8 sps:$4 sm:$0xff]   ;;  %v2913_v32 = vshrl.u32 %v5746_v29, 16  ;;  %v4703_v50 = vld [vmem:[%s6159_s5 + $0x3f0] sm:$0xff]  }
 0x144   : > { %4325 = vmatprep.subr.bf16.mxu1 %v4668_v52  ;;  %v4700_v52 = vld [vmem:[%s6159_s5 + $0x3a8] sm:$0xff]   ;;  %v5781_v26 = vld [vmem:[#allocation2 + $0x34] ss:$8 sps:$4 sm:$0xff]   ;;  %v3223_v24 = vrot.slane %v5766_v60, 3 }
 0x145   : > { %v5689_v18 = vor.u32 %v2077_v63, %v2074_v14  ;;  %v5804_v23 = vld [vmem:[#allocation2 + $0x54] ss:$8 sps:$4 sm:$0xff]   ;;  %v5813_v63 = vld [vmem:[#allocation2 + $0x50] ss:$8 sps:$4 sm:$0xff]   ;;  %v3230_v31 = vrot.slane %v5781_v26, 3 }
 0x146   : > { %1627 = vmatmul.mubr.bf16.gmra.mrb[28].mxu1 %v5505_v42  ;;  %v4681_v42 = vld [vmem:[%s6159_s5 + $0x380] sm:$0xff]  }
 0x147   : > { %1634 = vmatprep.mubr.bf16.mxu1 %v5522_v48  ;;  %4326 = vmatpush3.bf16.msra.mxu1 %v4670_v11  ;;  %v4683_v48 = vld [vmem:[%s6159_s5 + $0x3c8] sm:$0xff]   ;;  %v5701_v5 = vsel %vm2000_vm4, %v2060_v43, %v5689_v18  ;;  %v5799_v43 = vld [vmem:[#allocation2 + $0x10] sm:$0x88] }
 0x148   : > { %4327 = vmatprep.subr.bf16.mxu1 %v4673_v12  ;;  %v5797_v11 = vld [vmem:[#allocation2 + $0x40] ss:$8 sps:$4 sm:$0xff]   ;;  %v2915_v12 = vrot.slane %v2913_v32, 2 }
 0x14a   : > { %2497 = vmatmul.mubr.bf16.vlgmr.msra.gmra.mrb[68].mxu0 %v5544_v15  ;;  %v4685_v15 = vld [vmem:[%s6159_s5 + $0x388] sm:$0xff]  }
 0x14b   : > { %4328 = vmatpush3.bf16.msra.mxu1 %v4675_v39  ;;  %2504 = vmatprep.mubr.bf16.mxu0 %v5552_v44  ;;  %v4686_v44 = vld [vmem:[%s6159_s5 + $0x3d0] sm:$0xff]  }
 0x14c   : > { %4329 = vmatprep.subr.bf16.mxu1 %v4676_v47  ;;  %4456 = vmatpush3.bf16.msra.mxu0 %v4681_v42  ;;  %v4705_v39 = vld [vmem:[%s6159_s5 + $0x3b0] sm:$0xff]   ;;  %v5815_v47 = vcombine.high %v2847_v1, %v2847_v1  ;;  %v3226_v42 = vrot.slane %v5746_v29, 3 }
 0x14d   : > { %4457 = vmatprep.subr.bf16.mxu0 %v4683_v48  ;;  %v4711_v48 = vld [vmem:[%s6159_s5 + $0x3f8] sm:$0xff]  }
 0x14e   : > { %1635 = vmatmul.mubr.bf16.gmra.mrb[32].mxu1 %v5532_v4  ;;  %v4682_v4 = vld [vmem:[%s6159_s5 + $0x340] sm:$0xff]   ;;  %v5833_v17 = vsel %vm3221_vm5, %v3226_v42, %v3230_v31 }
 0x14f   : > { %1642 = vmatprep.mubr.bf16.mxu1 %v1471_v2  ;;  %4330 = vmatpush3.bf16.msra.mxu1 %v4677_v33  ;;  %v5822_v33 = vcombine.low %v2847_v1, %v2847_v1  ;;  %v3234_v2 = vrot.slane %v5786_v58, 3 }
 0x150   : > { %4331 = vmatprep.subr.bf16.mxu1 %v4678_v6  ;;  %4458 = vmatpush3.bf16.msra.mxu0 %v4685_v15  ;;  %v3228_v15 = vrot.slane %v5784_v16, 3 }
 0x151   : > { %4459 = vmatprep.subr.bf16.mxu0 %v4686_v44  ;;  %v4693_v44 = vld [vmem:[%s6159_s5 + $0x310] sm:$0xff]   ;;  %v3240_v20 = vrot.slane %v5822_v33, 3 }
 0x152   : > { %2505 = vmatmul.mubr.bf16.gmra.mrb[72].mxu0 %v5572_v57  ;;  %v5742_v57 = vcombine.high %v1961_v62, %v1961_v62 }
 0x153   : > { %4332 = vmatpush3.bf16.msra.mxu1 %v4679_v35  ;;  %2512 = vmatprep.mubr.bf16.mxu0 %v5575_v8  ;;  %v5744_v8 = vld [vmem:[#allocation2 + $0x18] sm:$0xff] }
 0x154   : > { %4409 = vmatprep.subr.bf16.mxu1 %v4682_v4  ;;  %4460 = vmatpush3.bf16.msra.mxu0 %v4688_v41  ;;  %v2356_v55 = vrot.slane %v5742_v57, 2  ;;  %v5760_v7 = vcombine.high %v2547_v34, %v5744_v8  ;;  %v5793_v49 = vcombine.low %v2547_v34, %v5744_v8  ;;  %v3232_v41 = vrot.slane %v5797_v11, 3 }
 0x155   : > { %4461 = vmatprep.subr.bf16.mxu0 %v4690_v10  ;;  %v4697_v10 = vld [vmem:[%s6159_s5 + $0x358] sm:$0xff]   ;;  %v3236_v34 = vrot.slane %v5813_v63, 3 }
 0x156   : > { %1643 = vmatmul.mubr.bf16.gmra.mrb[36].mxu1 %v1469_v36  ;;  %v2357_v51 = vsel %vm2335_vm3, %v2352_v56, %v2356_v55  ;;  %v2905_v9 = vshrl.u32 %v5760_v7, 16  ;;  %v4049_v56 = vcombine.low %v5799_v43, %v5744_v8  ;;  %v2896_v55 = vshrl.u32 %v5766_v60, 16 }
 0x157   : > { %2245 = vmatprep.mubr.bf16.mxu1 %v5597_v28  ;;  %v4684_v28 = vld [vmem:[%s6159_s5 + $0x300] sm:$0xff]  }
 0x158   : > { %4462 = vmatpush3.bf16.msra.mxu0 %v4691_v21  ;;  %v3222_v6 = vrot.slane %v4049_v56, 3  ;;  %v2907_v35 = vrot.slane %v2905_v9, 2  ;;  %v3238_v21 = vrot.slane %v5804_v23, 3  ;;  %v2891_v9 = vshll.u32 %v5793_v49, 16 }
 0x159   : > { %4463 = vmatprep.subr.bf16.mxu0 %v4694_v46  ;;  %v4713_v46 = vld [vmem:[%s6159_s5 + $0x3b8] sm:$0xff]   ;;  %v2102_v56 = vshll.u32 %v5742_v57, 16 }
 0x15a   : > { %2513 = vmatmul.mubr.bf16.gmra.mrb[76].mxu0 %v5605_v27  ;;  %v4689_v27 = vld [vmem:[%s6159_s5 + $0x308] sm:$0xff]   ;;  %v5842_v36 = vsel %vm3221_vm5, %v3222_v6, %v3223_v24  ;;  %v5863_v32 = vsel %vm3221_vm5, %v3234_v2, %v3238_v21 }
 0x15b   : > { %2520 = vmatprep.mubr.bf16.mxu0 %v5610_v30  ;;  %v5776_v30 = vcombine.low %v1961_v62, %v1961_v62  ;;  %v5839_v62 = vor.u32 %v2918_v59, %v2915_v12  ;;  %v2099_v12 = vshrl.u32 %v5742_v57, 16  ;;  %v2893_v57 = vrot.slane %v2891_v9, 3 }
 0x15c   : > { %4464 = vmatpush3.bf16.msra.mxu0 %v4696_v3  ;;  %v5852_v3 = vsel %vm3221_vm5, %v3230_v31, %v3234_v2  ;;  %v4704_v31 = vld [vmem:[%s6159_s5 + $0x320] sm:$0xff]   ;;  %v2104_v2 = vrot.slane %v2102_v56, 2  ;;  %v2943_v56 = vshll.u32 %v5797_v11, 16 }
 0x15d   : > { %4465 = vmatprep.subr.bf16.mxu0 %v4699_v37  ;;  %v2354_v14 = vrot.slane %v5776_v30, 2  ;;  %v5855_v37 = vsel %vm3221_vm5, %v3228_v15, %v3232_v41 }
 0x15e   : > { %2246 = vmatmul.mubr.bf16.vlgmr.msra.gmra.mrb[40].mxu1 %v5625_v22  ;;  %v2908_v22 = vshll.u32 %v5760_v7, 16 }
 0x15f   : > { %4410 = vmatpush3.bf16.msra.mxu1 %v4684_v28  ;;  %2253 = vmatprep.mubr.bf16.mxu1 %v5633_v45  ;;  %v4692_v45 = vld [vmem:[%s6159_s5 + $0x350] sm:$0xff]   ;;  %v3242_v28 = vrot.slane %v5815_v47, 3  ;;  %v2355_v59 = vsel %vm2335_vm3, %v2350_v40, %v2354_v14  ;;  %v2101_v14 = vrot.slane %v2099_v12, 1 }
 0x160   : > { %4411 = vmatprep.subr.bf16.mxu1 %v4687_v38  ;;  %4466 = vmatpush3.bf16.msra.mxu0 %v4700_v52  ;;  %v2910_v4 = vrot.slane %v2908_v22, 3  ;;  %v2899_v38 = vshll.u32 %v5766_v60, 16  ;;  %v2931_v52 = vshrl.u32 %v5781_v26, 16  ;;  %v5884_v22 = vsel %vm3221_vm5, %v3236_v34, %v3240_v20 }
 0x161   : > { %4467 = vmatprep.subr.bf16.mxu0 %v4703_v50  ;;  %v5873_v50 = vsel %vm3221_vm5, %v3232_v41, %v3236_v34  ;;  %v5876_v1 = vsel %vm3221_vm5, %v3238_v21, %v3242_v28  ;;  %v4714_v41 = vld [vmem:[%s6159_s5 + $0x328] sm:$0xff]   ;;  %v2949_v21 = vshrl.u32 %v5786_v58, 16  ;;  %v4717_v34 = vld [vmem:[%s6159_s5 + $0x370] sm:$0xff]   ;;  %v2090_v28 = vshrl.u32 %v5776_v30, 16 }
 0x162   : > { %2521 = vmatmul.mubr.bf16.gmra.mrb[80].mxu0 %v5643_v19  ;;  %v5845_v19 = vsel %vm3221_vm5, %v3223_v24, %v3228_v15  ;;  %v2898_v24 = vrot.slane %v2896_v55, 2  ;;  %v2933_v6 = vrot.slane %v2931_v52, 2  ;;  %v2105_v55 = vor.u32 %v2104_v2, %v2101_v14 }
 0x163   : > { %4412 = vmatpush3.bf16.msra.mxu1 %v4689_v27  ;;  %2528 = vmatprep.mubr.bf16.mxu0 %v2357_v51  ;;  %v4698_v27 = vld [vmem:[%s6159_s5 + $0x318] sm:$0xff]   ;;  %v2888_v51 = vshrl.u32 %v5793_v49, 16  ;;  %v2092_v9 = vrot.slane %v2090_v28, 1  ;;  %v2644_v28 = vrot.slane %v5781_v26, 2 }
 0x164   : > { %4413 = vmatprep.subr.bf16.mxu1 %v4692_v45  ;;  %4468 = vmatpush3.bf16.msra.mxu0 %v4705_v39  ;;  %v2911_v45 = vor.u32 %v2910_v4, %v2907_v35  ;;  %v2901_v39 = vrot.slane %v2899_v38, 3  ;;  %v2922_v35 = vshrl.u32 %v5784_v16, 16  ;;  %v2925_v4 = vshll.u32 %v5784_v16, 16 }
 0x165   : > { %4469 = vmatprep.subr.bf16.mxu0 %v4711_v48  ;;  %v2890_v40 = vrot.slane %v2888_v51, 2  ;;  %v2106_v12 = vsel %vm2000_vm4, %v5667_v53, %v2105_v55  ;;  %v4724_v53 = vld [vmem:[%s6159_s5 + $0x440] sm:$0xff]  }
 0x166   : > { %2254 = vmatmul.mubr.bf16.gmra.mrb[44].mxu1 %v5652_v0  ;;  %v2934_v0 = vshll.u32 %v5781_v26, 16  ;;  %v2920_v48 = vsel %vm2886_vm6, %v2911_v45, %v5839_v62  ;;  %v2924_v20 = vrot.slane %v2922_v35, 2  ;;  %v2639_v35 = vrot.slane %v5760_v7, 2 }
 0x167   : > { %2261 = vmatprep.mubr.bf16.mxu1 %v5658_v54  ;;  %4414 = vmatpush3.bf16.msra.mxu1 %v4693_v44  ;;  %v4702_v54 = vld [vmem:[%s6159_s5 + $0x360] sm:$0xff]   ;;  %v2902_v44 = vor.u32 %v2901_v39, %v2898_v24  ;;  %v4720_v24 = vld [vmem:[%s6159_s5 + $0x338] sm:$0xff]   ;;  %v2637_v7 = vrot.slane %v5766_v60, 2  ;;  %v4729_v60 = vld [vmem:[%s6159_s5 + $0x448] sm:$0xff]  }
 0x168   : > { %4415 = vmatprep.subr.bf16.mxu1 %v4697_v10  ;;  %4470 = vmatpush3.bf16.msra.mxu0 %v4713_v46  ;;  %v2936_v15 = vrot.slane %v2934_v0, 3  ;;  %v2952_v46 = vshll.u32 %v5786_v58, 16  ;;  %v4718_v0 = vld [vmem:[%s6159_s5 + $0x330] sm:$0xff]  }
 0x16a   : > { %2529 = vmatmul.mubr.bf16.gmra.mrb[84].mxu0 %v2355_v59  ;;  %v2937_v10 = vor.u32 %v2936_v15, %v2933_v6  ;;  %v2954_v51 = vrot.slane %v2952_v46, 3  ;;  %v2940_v59 = vshrl.u32 %v5797_v11, 16  ;;  %v2640_v6 = vrot.slane %v5746_v29, 2 }
 0x16b   : > { %4416 = vmatpush3.bf16.msra.mxu1 %v4698_v27  ;;  %3131 = vmatprep.mubr.bf16.mxu0 %v2920_v48  ;;  %v2927_v27 = vrot.slane %v2925_v4, 3  ;;  %v2970_v48 = vshll.u32 %v5804_v23, 16  ;;  %v2961_v46 = vshll.u32 %v5813_v63, 16 }
 0x16c   : > { %4417 = vmatprep.subr.bf16.mxu1 %v4702_v54  ;;  %v2938_v52 = vsel %vm2886_vm6, %v5839_v62, %v2937_v10  ;;  %v2951_v54 = vrot.slane %v2949_v21, 2 }
 0x16d   : > { %v2928_v62 = vor.u32 %v2927_v27, %v2924_v20  ;;  %v2972_v2 = vrot.slane %v2970_v48, 3  ;;  %v2963_v55 = vrot.slane %v2961_v46, 3  ;;  %v4725_v20 = vld [vmem:[%s6159_s5 + $0x400] sm:$0xff]   ;;  %v4748_v46 = vld [vmem:[%s6159_s5 + $0x478] sm:$0xff]  }
 0x16e   : > { %2262 = vmatmul.mubr.bf16.gmra.mrb[48].mxu1 %v5672_v25  ;;  %v2894_v25 = vor.u32 %v2893_v57, %v2890_v40  ;;  %v2955_v39 = vor.u32 %v2954_v51, %v2951_v54  ;;  %v2945_v40 = vrot.slane %v2943_v56, 3  ;;  %v2976_v54 = vshrl.u32 %v5822_v33, 16 }
 0x16f   : > { %2269 = vmatprep.mubr.bf16.mxu1 %v5677_v13  ;;  %4418 = vmatpush3.bf16.msra.mxu1 %v4704_v31  ;;  %v2093_v13 = vshll.u32 %v5776_v30, 16  ;;  %v4719_v30 = vld [vmem:[%s6159_s5 + $0x378] sm:$0xff]   ;;  %v2967_v31 = vshrl.u32 %v5804_v23, 16  ;;  %v2929_v15 = vsel %vm2886_vm6, %v2902_v44, %v2928_v62  ;;  %v2979_v51 = vshll.u32 %v5822_v33, 16 }
 0x170   : > { %4419 = vmatprep.subr.bf16.mxu1 %v4712_v61  ;;  %v2903_v38 = vsel %vm2886_vm6, %v2894_v25, %v2902_v44  ;;  %v2942_v61 = vrot.slane %v2940_v59, 2  ;;  %v2956_v57 = vsel %vm2886_vm6, %v2937_v10, %v2955_v39  ;;  %v2958_v44 = vshrl.u32 %v5813_v63, 16 }
 0x171   : > { %v2095_v45 = vrot.slane %v2093_v13, 2  ;;  %v2969_v14 = vrot.slane %v2967_v31, 2  ;;  %v2985_v10 = vshrl.u32 %v5815_v47, 16  ;;  %v2978_v56 = vrot.slane %v2976_v54, 2 }
 0x172   : > { %3132 = vmatmul.mubr.bf16.vlgmr.msra.gmra.mrb[88].mxu0 %v2903_v38  ;;  %v2946_v21 = vor.u32 %v2945_v40, %v2942_v61  ;;  %v2960_v13 = vrot.slane %v2958_v44, 2  ;;  %v2636_v38 = vrot.slane %v5793_v49, 2  ;;  %v2981_v33 = vrot.slane %v2979_v51, 3  ;;  %v4739_v40 = vld [vmem:[%s6159_s5 + $0x420] sm:$0xff]   ;;  %v4744_v44 = vld [vmem:[%s6159_s5 + $0x430] sm:$0xff]  }
 0x173   : > { %4420 = vmatpush3.bf16.msra.mxu1 %v4714_v41  ;;  %3139 = vmatprep.mubr.bf16.mxu0 %v2938_v52  ;;  %v2641_v41 = vsel %vm2335_vm3, %v2639_v35, %v2640_v6  ;;  %v2973_v25 = vor.u32 %v2972_v2, %v2969_v14  ;;  %v2987_v52 = vrot.slane %v2985_v10, 2  ;;  %v4740_v14 = vld [vmem:[%s6159_s5 + $0x468] sm:$0xff]  }
 0x174   : > { %4421 = vmatprep.subr.bf16.mxu1 %v4717_v34  ;;  %v2988_v34 = vshll.u32 %v5815_v47, 16  ;;  %v2638_v26 = vsel %vm2335_vm3, %v2636_v38, %v2637_v7  ;;  %v2645_v47 = vsel %vm2335_vm3, %v2640_v6, %v2644_v28  ;;  %v2964_v49 = vor.u32 %v2963_v55, %v2960_v13  ;;  %v4742_v35 = vld [vmem:[%s6159_s5 + $0x428] sm:$0xff]  }
 0x175   : > { %v2974_v27 = vsel %vm2886_vm6, %v2955_v39, %v2973_v25  ;;  %v2982_v48 = vor.u32 %v2981_v33, %v2978_v56  ;;  %v2646_v6 = vrot.slane %v5797_v11, 2 }
 0x176   : > { %2270 = vmatmul.mubr.bf16.gmra.mrb[52].mxu1 %v5701_v5  ;;  %v2096_v5 = vor.u32 %v2095_v45, %v2092_v9  ;;  %v4731_v45 = vld [vmem:[%s6159_s5 + $0x450] sm:$0xff]   ;;  %v2965_v59 = vsel %vm2886_vm6, %v2946_v21, %v2964_v49 }
 0x177   : > { %2277 = vmatprep.mubr.bf16.mxu1 %v2106_v12  ;;  %4422 = vmatpush3.bf16.msra.mxu1 %v4718_v0  ;;  %v2990_v0 = vrot.slane %v2988_v34, 3  ;;  %v2642_v12 = vrot.slane %v5784_v16, 2  ;;  %v4735_v16 = vld [vmem:[%s6159_s5 + $0x458] sm:$0xff]   ;;  %v2983_v61 = vsel %vm2886_vm6, %v2964_v49, %v2982_v48 }
 0x178   : > { %4423 = vmatprep.subr.bf16.mxu1 %v4719_v30  ;;  %v2097_v4 = vsel %vm2000_vm4, %v5689_v18, %v2096_v5  ;;  %v2947_v18 = vsel %vm2886_vm6, %v2928_v62, %v2946_v21  ;;  %v4730_v30 = vld [vmem:[%s6159_s5 + $0x408] sm:$0xff]   ;;  %v2648_v62 = vrot.slane %v5786_v58, 2  ;;  %v4738_v5 = vld [vmem:[%s6159_s5 + $0x460] sm:$0xff]  }
 0x179   : > { %v2991_v9 = vor.u32 %v2990_v0, %v2987_v52  ;;  %v2643_v58 = vsel %vm2335_vm3, %v2637_v7, %v2642_v12  ;;  %v2647_v2 = vsel %vm2335_vm3, %v2642_v12, %v2646_v6  ;;  %v4050_v7 = vcombine.high %v5799_v43, %v5744_v8 }
 0x17a   : > { %3140 = vmatmul.mubr.bf16.gmra.mrb[92].mxu0 %v2929_v15  ;;  %v2649_v31 = vsel %vm2335_vm3, %v2644_v28, %v2648_v62  ;;  %v2652_v15 = vrot.slane %v5804_v23, 2 }
 0x17b   : > { %4424 = vmatpush3.bf16.msra.mxu1 %v4720_v24  ;;  %3147 = vmatprep.mubr.bf16.mxu0 %v2956_v57  ;;  %v4732_v24 = vld [vmem:[%s6159_s5 + $0x410] sm:$0xff]   ;;  %v2992_v39 = vsel %vm2886_vm6, %v2973_v25, %v2991_v9  ;;  %v2557_v57 = vld [vmem:[#allocation2 + $0x60] sm:$0x33] }
 0x17c   : > { %4501 = vmatprep.subr.bf16.mxu1 %v4724_v53  ;;  %v4736_v53 = vld [vmem:[%s6159_s5 + $0x418] sm:$0xff]   ;;  %v2653_v11 = vsel %vm2335_vm3, %v2648_v62, %v2652_v15  ;;  %v3950_v23 = vcombine.high %v2557_v57, %v2557_v57  ;;  %v3949_v10 = vcombine.low %v2557_v57, %v2557_v57 }
 0x17e   : > { %2278 = vmatmul.mubr.bf16.gmra.mrb[56].mxu1 %v2097_v4  ;;  %v4743_v4 = vld [vmem:[%s6159_s5 + $0x470] sm:$0xff]   ;;  %v2656_v21 = vrot.slane %v3950_v23, 2  ;;  %v2654_v28 = vrot.slane %v3949_v10, 2 }
 0x17f   : > { %2796 = vmatprep.mubr.bf16.mxu1 %v2641_v41  ;;  %v2650_v41 = vrot.slane %v5813_v63, 2  ;;  %v4749_v63 = vld [vmem:[%s6159_s5 + $0x438] sm:$0xff]  }
 0x180   : > { %v2657_v34 = vsel %vm2335_vm3, %v2652_v15, %v2656_v21 }
 0x181   : > { %v2651_v25 = vsel %vm2335_vm3, %v2646_v6, %v2650_v41  ;;  %v2655_v13 = vsel %vm2335_vm3, %v2650_v41, %v2654_v28 }
 0x182   : > { %3148 = vmatmul.mubr.bf16.gmra.mrb[96].mxu0 %v2947_v18  ;;  %v3225_v18 = vrot.slane %v4050_v7, 3 }
 0x183   : > { %3155 = vmatprep.mubr.bf16.mxu0 %v2974_v27 }
 0x184   : > { %v3227_v55 = vsel %vm3221_vm5, %v3225_v18, %v3226_v42 }
 0x186   : > { %2797 = vmatmul.mubr.bf16.vlgmr.msra.gmra.mrb[60].mxu1 %v2638_v26 }
 0x187   : > { %4502 = vmatpush3.bf16.msra.mxu1 %v4725_v20  ;;  %2804 = vmatprep.mubr.bf16.mxu1 %v2645_v47 }
 0x188   : > { %4503 = vmatprep.subr.bf16.mxu1 %v4729_v60 }
 0x18a   : > { %3156 = vmatmul.mubr.bf16.gmra.mrb[100].mxu0 %v2965_v59 }
 0x18b   : > { %4504 = vmatpush3.bf16.msra.mxu1 %v4730_v30  ;;  %3163 = vmatprep.mubr.bf16.mxu0 %v2992_v39 }
 0x18c   : > { %4505 = vmatprep.subr.bf16.mxu1 %v4731_v45 }
 0x18e   : > { %2805 = vmatmul.mubr.bf16.gmra.mrb[64].mxu1 %v2643_v58 }
 0x18f   : > { %2812 = vmatprep.mubr.bf16.mxu1 %v2649_v31  ;;  %4506 = vmatpush3.bf16.msra.mxu1 %v4732_v24 }
 0x190   : > { %4507 = vmatprep.subr.bf16.mxu1 %v4735_v16 }
 0x192   : > { %3164 = vmatmul.mubr.bf16.gmra.mrb[104].mxu0 %v2983_v61 }
 0x193   : > { %4508 = vmatpush3.bf16.msra.mxu1 %v4736_v53 }
 0x194   : > { %4509 = vmatprep.subr.bf16.mxu1 %v4738_v5 }
 0x196   : > { %2813 = vmatmul.mubr.bf16.gmra.mrb[68].mxu1 %v2647_v2 }
 0x197   : > { %2820 = vmatprep.mubr.bf16.mxu1 %v2653_v11  ;;  %4510 = vmatpush3.bf16.msra.mxu1 %v4739_v40 }
 0x198   : > { %4511 = vmatprep.subr.bf16.mxu1 %v4740_v14 }
 0x19b   : > { %4512 = vmatpush3.bf16.msra.mxu1 %v4742_v35 }
 0x19c   : > { %4513 = vmatprep.subr.bf16.mxu1 %v4743_v4 }
 0x19e   : > { %2821 = vmatmul.mubr.bf16.gmra.mrb[72].mxu1 %v2651_v25 }
 0x19f   : > { %2828 = vmatprep.mubr.bf16.mxu1 %v2657_v34  ;;  %4514 = vmatpush3.bf16.msra.mxu1 %v4744_v44 }
 0x1a0   : > { %4515 = vmatprep.subr.bf16.mxu1 %v4748_v46 }
 0x1a3   : > { %4516 = vmatpush3.bf16.msra.mxu1 %v4749_v63 }
 0x1a6   : > { %2829 = vmatmul.mubr.bf16.gmra.mrb[76].mxu1 %v2655_v13 }
 0x1a7   : > { %3382 = vmatprep.mubr.bf16.mxu1 %v3227_v55 }
 0x1ae   : > { %3383 = vmatmul.mubr.bf16.vlgmr.msra.gmra.mrb[80].mxu1 %v5842_v36 }
 0x1af   : > { %3390 = vmatprep.mubr.bf16.mxu1 %v5833_v17 }
 0x1b6   : > { %3391 = vmatmul.mubr.bf16.gmra.mrb[84].mxu1 %v5845_v19 }
 0x1b7   : > { %3398 = vmatprep.mubr.bf16.mxu1 %v5852_v3 }
 0x1be   : > { %3399 = vmatmul.mubr.bf16.gmra.mrb[88].mxu1 %v5855_v37 }
 0x1bf   : > { %3406 = vmatprep.mubr.bf16.mxu1 %v5863_v32 }
 0x1c6   : > { %3407 = vmatmul.mubr.bf16.gmra.mrb[92].mxu1 %v5873_v50 }
 0x1c7   : > { %3414 = vmatprep.mubr.bf16.mxu1 %v5876_v1 }
 0x1cc   : > { %v4195_v8 = vpop.f32.mrb[28].mxu0 }
 0x1cd   : > { %v4196_v29 = vpop.f32.mrb[29].mxu0 }
 0x1ce   : > { %3415 = vmatmul.mubr.bf16.gmra.mrb[96].mxu1 %v5884_v22  ;;  %v4197_v43 = vadd.f32 %v4196_v29, %v4195_v8  ;;  %v4198_v42 = vpop.f32.mrb[30].mxu0 }
 0x1cf   : > { %v4199_v36 = vpop.f32.mrb[31].mxu0 }
 0x1d0   : > { %v4200_v17 = vadd.f32 %v4199_v36, %v4198_v42 }
 0x1d5   : > { %v4201_v38 = vpop.f32.mrb[32].mxu0 }
 0x1d6   : > { %v4202_v19 = vpop.f32.mrb[33].mxu0 }
 0x1d7   : > { %v4203_v20 = vadd.f32 %v4202_v19, %v4201_v38  ;;  %v4204_v3 = vpop.f32.mrb[34].mxu0 }
 0x1d8   : > { %v4205_v27 = vpop.f32.mrb[35].mxu0 }
 0x1d9   : > { %v4206_v37 = vadd.f32 %v4205_v27, %v4204_v3 }
 0x1da   : > { %v4149_v52 = vpop.f32.mrb[0].mxu1 }
 0x1db   : > { %v4150_v32 = vpop.f32.mrb[1].mxu1 }
 0x1dc   : > { %v4151_v0 = vadd.f32 %v4150_v32, %v4149_v52  ;;  %v4152_v50 = vpop.f32.mrb[2].mxu1 }
 0x1dd   : > { %v4153_v60 = vpop.f32.mrb[3].mxu1  ;;  %v4207_v1 = vpop.f32.mrb[36].mxu0 }
 0x1de   : > { %v6029_v26 = vadd.f32 %v4197_v43, %v4151_v0  ;;  %v4154_v22 = vadd.f32 %v4153_v60, %v4152_v50  ;;  %v4208_v47 = vpop.f32.mrb[37].mxu0 }
 0x1df   : > { %v4209_v49 = vadd.f32 %v4208_v47, %v4207_v1  ;;  %v4210_v54 = vpop.f32.mrb[38].mxu0 }
 0x1e0   : > { %v6031_v51 = vadd.f32 %v4200_v17, %v4154_v22  ;;  %v4211_v30 = vpop.f32.mrb[39].mxu0 }
 0x1e1   : > { %v4212_v9 = vadd.f32 %v4211_v30, %v4210_v54 }
 0x1e2   : > { %v4155_v45 = vpop.f32.mrb[4].mxu1 }
 0x1e3   : > { %v4156_v12 = vpop.f32.mrb[5].mxu1 }
 0x1e4   : > { %v4157_v62 = vadd.f32 %v4156_v12, %v4155_v45  ;;  %v4158_v59 = vpop.f32.mrb[6].mxu1 }
 0x1e5   : > { %v4159_v56 = vpop.f32.mrb[7].mxu1  ;;  %v4213_v33 = vpop.f32.mrb[40].mxu0 }
 0x1e6   : > { %v6033_v24 = vadd.f32 %v4203_v20, %v4157_v62  ;;  %v4160_v39 = vadd.f32 %v4159_v56, %v4158_v59  ;;  %v4214_v16 = vpop.f32.mrb[41].mxu0 }
 0x1e7   : > { %v4215_v58 = vadd.f32 %v4214_v16, %v4213_v33  ;;  %v4216_v31 = vpop.f32.mrb[42].mxu0 }
 0x1e8   : > { %v6035_v48 = vadd.f32 %v4206_v37, %v4160_v39  ;;  %v4217_v53 = vpop.f32.mrb[43].mxu0 }
 0x1e9   : > { %v4218_v5 = vadd.f32 %v4217_v53, %v4216_v31 }
 0x1ea   : > { %v4161_v6 = vpop.f32.mrb[8].mxu1 }
 0x1eb   : > { %v4162_v15 = vpop.f32.mrb[9].mxu1 }
 0x1ec   : > { %v4163_v61 = vadd.f32 %v4162_v15, %v4161_v6  ;;  %v4164_v40 = vpop.f32.mrb[10].mxu1 }
 0x1ed   : > { %v4165_v57 = vpop.f32.mrb[11].mxu1  ;;  %v4219_v14 = vpop.f32.mrb[44].mxu0 }
 0x1ee   : > { %v6037_v2 = vadd.f32 %v4209_v49, %v4163_v61  ;;  %v4166_v11 = vadd.f32 %v4165_v57, %v4164_v40  ;;  %v4220_v23 = vpop.f32.mrb[45].mxu0 }
 0x1ef   : > { %v4221_v35 = vadd.f32 %v4220_v23, %v4219_v14  ;;  %v4222_v4 = vpop.f32.mrb[46].mxu0 }
 0x1f0   : > { %v6039_v41 = vadd.f32 %v4212_v9, %v4166_v11  ;;  %v4223_v21 = vpop.f32.mrb[47].mxu0 }
 0x1f1   : > { %v4224_v44 = vadd.f32 %v4223_v21, %v4222_v4 }
 0x1f2   : > { %v4167_v46 = vpop.f32.mrb[12].mxu1 }
 0x1f3   : > { %v4168_v25 = vpop.f32.mrb[13].mxu1 }
 0x1f4   : > { %v4169_v10 = vadd.f32 %v4168_v25, %v4167_v46  ;;  %v4170_v34 = vpop.f32.mrb[14].mxu1 }
 0x1f5   : > { %v4171_v63 = vpop.f32.mrb[15].mxu1  ;;  %v4287_v7 = vpop.f32.mrb[48].mxu0 }
 0x1f6   : > { %v6041_v28 = vadd.f32 %v4215_v58, %v4169_v10  ;;  %v4172_v18 = vadd.f32 %v4171_v63, %v4170_v34  ;;  %v4288_v13 = vpop.f32.mrb[49].mxu0 }
 0x1f7   : > { %v4289_v55 = vadd.f32 %v4288_v13, %v4287_v7  ;;  %v4290_v8 = vpop.f32.mrb[50].mxu0 }
 0x1f8   : > { %v6043_v29 = vadd.f32 %v4218_v5, %v4172_v18  ;;  %v4291_v43 = vpop.f32.mrb[51].mxu0 }
 0x1f9   : > { %v4292_v42 = vadd.f32 %v4291_v43, %v4290_v8 }
 0x1fd   : > { %v4293_v36 = vpop.f32.mrb[52].mxu0 }
 0x1fe   : > { %v4294_v17 = vpop.f32.mrb[53].mxu0 }
 0x1ff   : > { %v4295_v38 = vadd.f32 %v4294_v17, %v4293_v36  ;;  %v4296_v19 = vpop.f32.mrb[54].mxu0 }
 0x200   : > { %v4297_v3 = vpop.f32.mrb[55].mxu0 }
 0x201   : > { %v4173_v20 = vpop.f32.mrb[16].mxu1  ;;  %v4298_v37 = vadd.f32 %v4297_v3, %v4296_v19 }
 0x202   : > { %v4174_v27 = vpop.f32.mrb[17].mxu1 }
 0x203   : > { %v4175_v52 = vadd.f32 %v4174_v27, %v4173_v20  ;;  %v4176_v32 = vpop.f32.mrb[18].mxu1 }
 0x204   : > { %v4177_v0 = vpop.f32.mrb[19].mxu1 }
 0x205   : > { %v6045_v50 = vadd.f32 %v4221_v35, %v4175_v52  ;;  %v4178_v60 = vadd.f32 %v4177_v0, %v4176_v32  ;;  %v4299_v1 = vpop.f32.mrb[56].mxu0 }
 0x206   : > { %v4300_v47 = vpop.f32.mrb[57].mxu0 }
 0x207   : > { %v6047_v22 = vadd.f32 %v4224_v44, %v4178_v60  ;;  %v4301_v49 = vadd.f32 %v4300_v47, %v4299_v1  ;;  %v4302_v54 = vpop.f32.mrb[58].mxu0 }
 0x208   : > { %v4303_v9 = vpop.f32.mrb[59].mxu0 }
 0x209   : > { %v4241_v30 = vpop.f32.mrb[20].mxu1  ;;  %v4304_v12 = vadd.f32 %v4303_v9, %v4302_v54 }
 0x20a   : > { %v4242_v45 = vpop.f32.mrb[21].mxu1 }
 0x20b   : > { %v4243_v62 = vadd.f32 %v4242_v45, %v4241_v30  ;;  %v4244_v59 = vpop.f32.mrb[22].mxu1 }
 0x20c   : > { %v4245_v56 = vpop.f32.mrb[23].mxu1 }
 0x20d   : > { %v1651_v33 = vadd.f32 %v4243_v62, %v6029_v26  ;;  %v4246_v39 = vadd.f32 %v4245_v56, %v4244_v59  ;;  %v4305_v16 = vpop.f32.mrb[60].mxu0 }
 0x20e   : > { %v4306_v31 = vpop.f32.mrb[61].mxu0 }
 0x20f   : > { %v1652_v58 = vadd.f32 %v4246_v39, %v6031_v51  ;;  %v6051_v53 = vadd.f32 %v4289_v55, %v1651_v33  ;;  %v4307_v5 = vadd.f32 %v4306_v31, %v4305_v16  ;;  %v4308_v6 = vpop.f32.mrb[62].mxu0 }
 0x210   : > { %v4309_v61 = vpop.f32.mrb[63].mxu0 }
 0x211   : > { %v4247_v15 = vpop.f32.mrb[24].mxu1  ;;  %v6053_v40 = vadd.f32 %v4292_v42, %v1652_v58  ;;  %v4310_v14 = vadd.f32 %v4309_v61, %v4308_v6 }
 0x212   : > { %v4248_v57 = vpop.f32.mrb[25].mxu1 }
 0x213   : > { %v4249_v11 = vadd.f32 %v4248_v57, %v4247_v15  ;;  %v4250_v23 = vpop.f32.mrb[26].mxu1 }
 0x214   : > { %v4251_v35 = vpop.f32.mrb[27].mxu1 }
 0x215   : > { %v1653_v26 = vadd.f32 %v4249_v11, %v6033_v24  ;;  %v4252_v4 = vadd.f32 %v4251_v35, %v4250_v23  ;;  %v4311_v21 = vpop.f32.mrb[64].mxu0 }
 0x216   : > { %v4312_v44 = vpop.f32.mrb[65].mxu0 }
 0x217   : > { %v1654_v51 = vadd.f32 %v4252_v4, %v6035_v48  ;;  %v6057_v46 = vadd.f32 %v4295_v38, %v1653_v26  ;;  %v4313_v25 = vadd.f32 %v4312_v44, %v4311_v21  ;;  %v4314_v10 = vpop.f32.mrb[66].mxu0 }
 0x218   : > { %v4315_v63 = vpop.f32.mrb[67].mxu0 }
 0x219   : > { %v4253_v34 = vpop.f32.mrb[28].mxu1  ;;  %v6059_v7 = vadd.f32 %v4298_v37, %v1654_v51  ;;  %v4316_v13 = vadd.f32 %v4315_v63, %v4314_v10 }
 0x21a   : > { %v4254_v18 = vpop.f32.mrb[29].mxu1 }
 0x21b   : > { %v4255_v55 = vadd.f32 %v4254_v18, %v4253_v34  ;;  %v4256_v8 = vpop.f32.mrb[30].mxu1 }
 0x21c   : > { %v4257_v43 = vpop.f32.mrb[31].mxu1 }
 0x21d   : > { %v1655_v24 = vadd.f32 %v4255_v55, %v6037_v2  ;;  %v4258_v42 = vadd.f32 %v4257_v43, %v4256_v8  ;;  %v4379_v36 = vpop.f32.mrb[68].mxu0 }
 0x21e   : > { %v4380_v17 = vpop.f32.mrb[69].mxu0 }
 0x21f   : > { %v1656_v48 = vadd.f32 %v4258_v42, %v6039_v41  ;;  %v6063_v38 = vadd.f32 %v4301_v49, %v1655_v24  ;;  %v4381_v19 = vadd.f32 %v4380_v17, %v4379_v36  ;;  %v4382_v20 = vpop.f32.mrb[70].mxu0 }
 0x220   : > { %v4383_v27 = vpop.f32.mrb[71].mxu0 }
 0x221   : > { %v4259_v3 = vpop.f32.mrb[32].mxu1  ;;  %v6065_v37 = vadd.f32 %v4304_v12, %v1656_v48  ;;  %v4384_v32 = vadd.f32 %v4383_v27, %v4382_v20 }
 0x222   : > { %v4260_v52 = vpop.f32.mrb[33].mxu1 }
 0x223   : > { %v4261_v0 = vadd.f32 %v4260_v52, %v4259_v3  ;;  %v4262_v60 = vpop.f32.mrb[34].mxu1 }
 0x224   : > { %v4263_v1 = vpop.f32.mrb[35].mxu1 }
 0x225   : > { %v1657_v2 = vadd.f32 %v4261_v0, %v6041_v28  ;;  %v4264_v47 = vadd.f32 %v4263_v1, %v4262_v60  ;;  %v4385_v54 = vpop.f32.mrb[72].mxu0 }
 0x226   : > { %v4386_v30 = vpop.f32.mrb[73].mxu0 }
 0x227   : > { %v1658_v41 = vadd.f32 %v4264_v47, %v6043_v29  ;;  %v6069_v49 = vadd.f32 %v4307_v5, %v1657_v2  ;;  %v4387_v9 = vadd.f32 %v4386_v30, %v4385_v54  ;;  %v4388_v45 = vpop.f32.mrb[74].mxu0 }
 0x228   : > { %v4389_v59 = vpop.f32.mrb[75].mxu0 }
 0x229   : > { %v4265_v62 = vpop.f32.mrb[36].mxu1  ;;  %v6071_v12 = vadd.f32 %v4310_v14, %v1658_v41  ;;  %v4390_v33 = vadd.f32 %v4389_v59, %v4388_v45 }
 0x22a   : > { %v4266_v56 = vpop.f32.mrb[37].mxu1 }
 0x22b   : > { %v4267_v39 = vadd.f32 %v4266_v56, %v4265_v62  ;;  %v4268_v16 = vpop.f32.mrb[38].mxu1 }
 0x22c   : > { %v4269_v58 = vpop.f32.mrb[39].mxu1 }
 0x22d   : > { %v1659_v28 = vadd.f32 %v4267_v39, %v6045_v50  ;;  %v4270_v31 = vadd.f32 %v4269_v58, %v4268_v16  ;;  %v4391_v6 = vpop.f32.mrb[76].mxu0 }
 0x22e   : > { %v4392_v15 = vpop.f32.mrb[77].mxu0 }
 0x22f   : > { %v1660_v29 = vadd.f32 %v4270_v31, %v6047_v22  ;;  %v6075_v5 = vadd.f32 %v4313_v25, %v1659_v28  ;;  %v4393_v61 = vadd.f32 %v4392_v15, %v4391_v6  ;;  %v4394_v57 = vpop.f32.mrb[78].mxu0 }
 0x230   : > { %v4395_v23 = vpop.f32.mrb[79].mxu0 }
 0x231   : > { %v4333_v11 = vpop.f32.mrb[40].mxu1  ;;  %v6077_v14 = vadd.f32 %v4316_v13, %v1660_v29  ;;  %v4396_v26 = vadd.f32 %v4395_v23, %v4394_v57 }
 0x232   : > { %v4334_v35 = vpop.f32.mrb[41].mxu1 }
 0x233   : > { %v4335_v4 = vadd.f32 %v4334_v35, %v4333_v11  ;;  %v4336_v21 = vpop.f32.mrb[42].mxu1 }
 0x234   : > { %v4337_v51 = vpop.f32.mrb[43].mxu1 }
 0x235   : > { %v2286_v50 = vadd.f32 %v4335_v4, %v6051_v53  ;;  %v4338_v44 = vadd.f32 %v4337_v51, %v4336_v21  ;;  %v4397_v10 = vpop.f32.mrb[80].mxu0 }
 0x236   : > { %v4398_v34 = vpop.f32.mrb[81].mxu0 }
 0x237   : > { %v2287_v22 = vadd.f32 %v4338_v44, %v6053_v40  ;;  %v6081_v25 = vadd.f32 %v4381_v19, %v2286_v50  ;;  %v4399_v63 = vadd.f32 %v4398_v34, %v4397_v10  ;;  %v4400_v18 = vpop.f32.mrb[82].mxu0 }
 0x238   : > { %v4401_v8 = vpop.f32.mrb[83].mxu0 }
 0x239   : > { %v4339_v55 = vpop.f32.mrb[44].mxu1  ;;  %v6083_v13 = vadd.f32 %v4384_v32, %v2287_v22  ;;  %v4402_v24 = vadd.f32 %v4401_v8, %v4400_v18 }
 0x23a   : > { %v4340_v43 = vpop.f32.mrb[45].mxu1 }
 0x23b   : > { %v4341_v42 = vadd.f32 %v4340_v43, %v4339_v55  ;;  %v4342_v36 = vpop.f32.mrb[46].mxu1 }
 0x23c   : > { %v4343_v48 = vpop.f32.mrb[47].mxu1 }
 0x23d   : > { %v2288_v53 = vadd.f32 %v4341_v42, %v6057_v46  ;;  %v4344_v17 = vadd.f32 %v4343_v48, %v4342_v36  ;;  %v4403_v20 = vpop.f32.mrb[84].mxu0 }
 0x23e   : > { %v4404_v3 = vpop.f32.mrb[85].mxu0 }
 0x23f   : > { %v2289_v40 = vadd.f32 %v4344_v17, %v6059_v7  ;;  %v6087_v19 = vadd.f32 %v4387_v9, %v2288_v53  ;;  %v4405_v27 = vadd.f32 %v4404_v3, %v4403_v20  ;;  %v4406_v52 = vpop.f32.mrb[86].mxu0 }
 0x240   : > { %v4407_v60 = vpop.f32.mrb[87].mxu0 }
 0x241   : > { %v4345_v0 = vpop.f32.mrb[48].mxu1  ;;  %v6089_v32 = vadd.f32 %v4390_v33, %v2289_v40  ;;  %v4408_v2 = vadd.f32 %v4407_v60, %v4406_v52 }
 0x242   : > { %v4346_v1 = vpop.f32.mrb[49].mxu1 }
 0x243   : > { %v4347_v47 = vadd.f32 %v4346_v1, %v4345_v0  ;;  %v4348_v54 = vpop.f32.mrb[50].mxu1 }
 0x244   : > { %v4349_v41 = vpop.f32.mrb[51].mxu1 }
 0x245   : > { %v2290_v46 = vadd.f32 %v4347_v47, %v6063_v38  ;;  %v4350_v30 = vadd.f32 %v4349_v41, %v4348_v54  ;;  %v4471_v45 = vpop.f32.mrb[88].mxu0 }
 0x246   : > { %v4472_v62 = vpop.f32.mrb[89].mxu0 }
 0x247   : > { %v2291_v7 = vadd.f32 %v4350_v30, %v6065_v37  ;;  %v6093_v9 = vadd.f32 %v4393_v61, %v2290_v46  ;;  %v4473_v59 = vadd.f32 %v4472_v62, %v4471_v45  ;;  %v4474_v56 = vpop.f32.mrb[90].mxu0 }
 0x248   : > { %v4475_v16 = vpop.f32.mrb[91].mxu0 }
 0x249   : > { %v4351_v39 = vpop.f32.mrb[52].mxu1  ;;  %v6095_v33 = vadd.f32 %v4396_v26, %v2291_v7  ;;  %v4476_v28 = vadd.f32 %v4475_v16, %v4474_v56 }
 0x24a   : > { %v4352_v58 = vpop.f32.mrb[53].mxu1 }
 0x24b   : > { %v4353_v31 = vadd.f32 %v4352_v58, %v4351_v39  ;;  %v4354_v6 = vpop.f32.mrb[54].mxu1 }
 0x24c   : > { %v4355_v29 = vpop.f32.mrb[55].mxu1 }
 0x24d   : > { %v2292_v38 = vadd.f32 %v4353_v31, %v6069_v49  ;;  %v4356_v15 = vadd.f32 %v4355_v29, %v4354_v6  ;;  %v4477_v57 = vpop.f32.mrb[92].mxu0 }
 0x24e   : > { %v4478_v11 = vpop.f32.mrb[93].mxu0 }
 0x24f   : > { %v2293_v37 = vadd.f32 %v4356_v15, %v6071_v12  ;;  %v6099_v61 = vadd.f32 %v4399_v63, %v2292_v38  ;;  %v4479_v23 = vadd.f32 %v4478_v11, %v4477_v57  ;;  %v4480_v35 = vpop.f32.mrb[94].mxu0 }
 0x250   : > { %v4481_v21 = vpop.f32.mrb[95].mxu0 }
 0x251   : > { %v4357_v4 = vpop.f32.mrb[56].mxu1  ;;  %v6101_v26 = vadd.f32 %v4402_v24, %v2293_v37  ;;  %v4482_v50 = vadd.f32 %v4481_v21, %v4480_v35 }
 0x252   : > { %v4358_v51 = vpop.f32.mrb[57].mxu1 }
 0x253   : > { %v4359_v44 = vadd.f32 %v4358_v51, %v4357_v4  ;;  %v4360_v10 = vpop.f32.mrb[58].mxu1 }
 0x254   : > { %v4361_v22 = vpop.f32.mrb[59].mxu1 }
 0x255   : > { %v2294_v49 = vadd.f32 %v4359_v44, %v6075_v5  ;;  %v4362_v34 = vadd.f32 %v4361_v22, %v4360_v10  ;;  %v4483_v18 = vpop.f32.mrb[96].mxu0 }
 0x256   : > { %v4484_v55 = vpop.f32.mrb[97].mxu0 }
 0x257   : > { %v2295_v12 = vadd.f32 %v4362_v34, %v6077_v14  ;;  %v6105_v63 = vadd.f32 %v4405_v27, %v2294_v49  ;;  %v4485_v8 = vadd.f32 %v4484_v55, %v4483_v18  ;;  %v4486_v43 = vpop.f32.mrb[98].mxu0 }
 0x258   : > { %v4487_v36 = vpop.f32.mrb[99].mxu0 }
 0x259   : > { %v4425_v42 = vpop.f32.mrb[60].mxu1  ;;  %v2546_v24 = vadd.f32 %v4408_v2, %v2295_v12  ;;  %v4488_v53 = vadd.f32 %v4487_v36, %v4486_v43 }
 0x25a   : > { %v4426_v48 = vpop.f32.mrb[61].mxu1 }
 0x25b   : > { %v4427_v17 = vadd.f32 %v4426_v48, %v4425_v42  ;;  %v4428_v20 = vpop.f32.mrb[62].mxu1 }
 0x25c   : > { %v4429_v40 = vpop.f32.mrb[63].mxu1 }
 0x25d   : > { %v2837_v3 = vadd.f32 %v4427_v17, %v6081_v25  ;;  %v4430_v5 = vadd.f32 %v4429_v40, %v4428_v20  ;;  %v4489_v52 = vpop.f32.mrb[100].mxu0  ;;  %v6125_v40 = vld [vmem:[%s6160_s6] ss:$0 sm:$0xff] }
 0x25e   : > { %v4490_v14 = vpop.f32.mrb[101].mxu0 }
 0x25f   : > { %v2838_v0 = vadd.f32 %v4430_v5, %v6083_v13  ;;  %v3172_v60 = vadd.f32 %v4473_v59, %v2837_v3  ;;  %v4491_v27 = vadd.f32 %v4490_v14, %v4489_v52  ;;  %v4492_v1 = vpop.f32.mrb[102].mxu0 }
 0x260   : > { %v4493_v54 = vpop.f32.mrb[103].mxu0 }
 0x261   : > { %v4431_v47 = vpop.f32.mrb[64].mxu1  ;;  %v3173_v41 = vadd.f32 %v4476_v28, %v2838_v0  ;;  %v4494_v2 = vadd.f32 %v4493_v54, %v4492_v1 }
 0x262   : > { %v4432_v46 = vpop.f32.mrb[65].mxu1 }
 0x263   : > { %v4433_v30 = vadd.f32 %v4432_v46, %v4431_v47  ;;  %v4434_v45 = vpop.f32.mrb[66].mxu1 }
 0x264   : > { %v4435_v7 = vpop.f32.mrb[67].mxu1 }
 0x265   : > { %v2839_v62 = vadd.f32 %v4433_v30, %v6087_v19  ;;  %v4436_v56 = vadd.f32 %v4435_v7, %v4434_v45  ;;  %v4495_v25 = vpop.f32.mrb[104].mxu0 }
 0x266   : > { %v4496_v16 = vpop.f32.mrb[105].mxu0 }
 0x267   : > { %v2840_v39 = vadd.f32 %v4436_v56, %v6089_v32  ;;  %v3174_v13 = vadd.f32 %v4479_v23, %v2839_v62  ;;  %v4497_v58 = vadd.f32 %v4496_v16, %v4495_v25  ;;  %v4498_v59 = vpop.f32.mrb[106].mxu0 }
 0x268   : > { %v4499_v6 = vpop.f32.mrb[107].mxu0 }
 0x269   : > { %v4437_v31 = vpop.f32.mrb[68].mxu1  ;;  %v3175_v29 = vadd.f32 %v4482_v50, %v2840_v39  ;;  %v4500_v28 = vadd.f32 %v4499_v6, %v4498_v59 }
 0x26a   : > { %v4438_v38 = vpop.f32.mrb[69].mxu1 }
 0x26b   : > { %v4439_v15 = vadd.f32 %v4438_v38, %v4437_v31  ;;  %v4440_v57 = vpop.f32.mrb[70].mxu1 }
 0x26c   : > { %v4441_v37 = vpop.f32.mrb[71].mxu1 }
 0x26d   : > { %v2841_v11 = vadd.f32 %v4439_v15, %v6093_v9  ;;  %v4442_v35 = vadd.f32 %v4441_v37, %v4440_v57 }
 0x26f   : > { %v2842_v19 = vadd.f32 %v4442_v35, %v6095_v33  ;;  %v3176_v4 = vadd.f32 %v4485_v8, %v2841_v11 }
 0x271   : > { %v4443_v21 = vpop.f32.mrb[72].mxu1  ;;  %v3177_v32 = vadd.f32 %v4488_v53, %v2842_v19 }
 0x272   : > { %v4444_v51 = vpop.f32.mrb[73].mxu1 }
 0x273   : > { %v4445_v23 = vadd.f32 %v4444_v51, %v4443_v21  ;;  %v4446_v44 = vpop.f32.mrb[74].mxu1 }
 0x274   : > { %v4447_v10 = vpop.f32.mrb[75].mxu1 }
 0x275   : > { %v2843_v22 = vadd.f32 %v4445_v23, %v6099_v61  ;;  %v4448_v50 = vadd.f32 %v4447_v10, %v4446_v44 }
 0x277   : > { %v2844_v49 = vadd.f32 %v4448_v50, %v6101_v26  ;;  %v3178_v34 = vadd.f32 %v4491_v27, %v2843_v22 }
 0x279   : > { %v4449_v18 = vpop.f32.mrb[76].mxu1  ;;  %v6115_v12 = vadd.f32 %v4494_v2, %v2844_v49 }
 0x27a   : > { %v4450_v9 = vpop.f32.mrb[77].mxu1 }
 0x27b   : > { %v4451_v55 = vadd.f32 %v4450_v9, %v4449_v18  ;;  %v4452_v43 = vpop.f32.mrb[78].mxu1 }
 0x27c   : > { %v4453_v33 = vpop.f32.mrb[79].mxu1 }
 0x27d   : > { %v2845_v8 = vadd.f32 %v4451_v55, %v6105_v63  ;;  %v4454_v42 = vadd.f32 %v4453_v33, %v4452_v43 }
 0x27f   : > { %v2846_v36 = vadd.f32 %v4454_v42, %v2546_v24  ;;  %v6118_v48 = vadd.f32 %v4497_v58, %v2845_v8 }
 0x281   : > { %v4517_v53 = vpop.f32.mrb[80].mxu1  ;;  %v6120_v61 = vadd.f32 %v4500_v28, %v2846_v36 }
 0x282   : > { %v4518_v17 = vpop.f32.mrb[81].mxu1 }
 0x283   : > { %v4519_v26 = vadd.f32 %v4518_v17, %v4517_v53  ;;  %v4520_v20 = vpop.f32.mrb[82].mxu1 }
 0x284   : > { %v4521_v3 = vpop.f32.mrb[83].mxu1 }
 0x285   : > { %v3423_v5 = vadd.f32 %v4519_v26, %v3172_v60  ;;  %v4522_v52 = vadd.f32 %v4521_v3, %v4520_v20 }
 0x287   : > { %v3440_v63 = vadd.f32 %v6125_v40, %v3423_v5  ;;  %v3424_v0 = vadd.f32 %v4522_v52, %v3173_v41 }
 0x289   : > { %v3441_v24 = vadd.f32 %v6125_v40, %v3424_v0  ;;  %v4523_v14 = vpop.f32.mrb[84].mxu1  ;;  %v3450_v1 = vmax.f32 %v3440_v63, 0.0 }
 0x28a   : > { %v4524_v27 = vpop.f32.mrb[85].mxu1 }
 0x28b   : > { %v3451_v47 = vmax.f32 %v3441_v24, 0.0  ;;  %v4525_v54 = vadd.f32 %v4524_v27, %v4523_v14  ;;  %v4526_v46 = vpop.f32.mrb[86].mxu1 }
 0x28c   : > { %v4527_v60 = vpop.f32.mrb[87].mxu1 }
 0x28d   : > { %v4107_v2 = vpack.c.bf16 %v3451_v47, %v3450_v1  ;;  %v3425_v30 = vadd.f32 %v4525_v54, %v3174_v13  ;;  %v4528_v41 = vadd.f32 %v4527_v60, %v4526_v46 }
 0x28f   : > { %4108 = vst [vmem:[%s6133_s15] sm:$0xff] %v4107_v2   ;;  %v3442_v45 = vadd.f32 %v6125_v40, %v3425_v30  ;;  %v3426_v7 = vadd.f32 %v4528_v41, %v3175_v29 }
 0x291   : > { %v3443_v62 = vadd.f32 %v6125_v40, %v3426_v7  ;;  %v4529_v56 = vpop.f32.mrb[88].mxu1  ;;  %v3452_v39 = vmax.f32 %v3442_v45, 0.0 }
 0x292   : > { %v4530_v25 = vpop.f32.mrb[89].mxu1 }
 0x293   : > { %v3453_v16 = vmax.f32 %v3443_v62, 0.0  ;;  %v4531_v58 = vadd.f32 %v4530_v25, %v4529_v56  ;;  %v4532_v59 = vpop.f32.mrb[90].mxu1 }
 0x294   : > { %v4533_v31 = vpop.f32.mrb[91].mxu1 }
 0x295   : > { %v4112_v6 = vpack.c.bf16 %v3453_v16, %v3452_v39  ;;  %v3427_v38 = vadd.f32 %v4531_v58, %v3176_v4  ;;  %v4534_v28 = vadd.f32 %v4533_v31, %v4532_v59 }
 0x297   : > { %4129 = vst [vmem:[%s6133_s15 + $0x8] sm:$0xff] %v4112_v6   ;;  %v3444_v13 = vadd.f32 %v6125_v40, %v3427_v38  ;;  %v3428_v15 = vadd.f32 %v4534_v28, %v3177_v32 }
 0x299   : > { %v3445_v57 = vadd.f32 %v6125_v40, %v3428_v15  ;;  %v4535_v29 = vpop.f32.mrb[92].mxu1  ;;  %v3454_v11 = vmax.f32 %v3444_v13, 0.0 }
 0x29a   : > { %v4536_v37 = vpop.f32.mrb[93].mxu1 }
 0x29b   : > { %v3455_v35 = vmax.f32 %v3445_v57, 0.0  ;;  %v4537_v19 = vadd.f32 %v4536_v37, %v4535_v29  ;;  %v4538_v21 = vpop.f32.mrb[94].mxu1 }
 0x29c   : > { %v4539_v51 = vpop.f32.mrb[95].mxu1 }
 0x29d   : > { %v4117_v23 = vpack.c.bf16 %v3455_v35, %v3454_v11  ;;  %v3429_v44 = vadd.f32 %v4537_v19, %v3178_v34  ;;  %v4540_v10 = vadd.f32 %v4539_v51, %v4538_v21 }
 0x29f   : > { %4130 = vst [vmem:[%s6133_s15 + $0x10] sm:$0xff] %v4117_v23   ;;  %v3446_v4 = vadd.f32 %v6125_v40, %v3429_v44  ;;  %v3430_v22 = vadd.f32 %v4540_v10, %v6115_v12 }
 0x2a1   : > { %v3447_v32 = vadd.f32 %v6125_v40, %v3430_v22  ;;  %v4541_v50 = vpop.f32.mrb[96].mxu1  ;;  %v3456_v18 = vmax.f32 %v3446_v4, 0.0 }
 0x2a2   : > { %v4542_v49 = vpop.f32.mrb[97].mxu1 }
 0x2a3   : > { %v3457_v9 = vmax.f32 %v3447_v32, 0.0  ;;  %v4543_v55 = vadd.f32 %v4542_v49, %v4541_v50  ;;  %v4544_v43 = vpop.f32.mrb[98].mxu1 }
 0x2a4   : > { %v4545_v33 = vpop.f32.mrb[99].mxu1 }
 0x2a5   : > { %v4122_v8 = vpack.c.bf16 %v3457_v9, %v3456_v18  ;;  %v3431_v34 = vadd.f32 %v4543_v55, %v6118_v48  ;;  %v4546_v42 = vadd.f32 %v4545_v33, %v4544_v43 }
 0x2a7   : > { %4131 = vst [vmem:[%s6133_s15 + $0x18] sm:$0xff] %v4122_v8   ;;  %v3448_v36 = vadd.f32 %v6125_v40, %v3431_v34  ;;  %v3432_v53 = vadd.f32 %v4546_v42, %v6120_v61 }
 0x2a9   : > { %v3449_v12 = vadd.f32 %v6125_v40, %v3432_v53  ;;  %v3458_v17 = vmax.f32 %v3448_v36, 0.0 }
 0x2ab   : > { %v3459_v26 = vmax.f32 %v3449_v12, 0.0 }
 0x2ad   : > { %v4127_v20 = vpack.c.bf16 %v3459_v26, %v3458_v17 }
 0x2af   : > { %4132 = vst [vmem:[%s6133_s15 + $0x20] sm:$0xff] %v4127_v20  }
 0x2b0 PF: > { %s17_s24 = sadd.s32 1, %s4774_s24  }
 0x2b1   : > { %p14_p4 = scmp.ge.s32.totalorder %s17_s24, 4  }
 0x2b3   :  { %16 = sbr.rel (!%p14_p4) target bundleno = 1 (0x1), region = 89 }

// kernel: exp2_decoder29_forward.5
= control target key start
LH: loop header
LB: loop body
LE: loop exit
PB: predicated region body
PF: predicated region fallthrough
CT: control target
= control target key end

     0   :  { %s12155_s13 = smov 0   ;;  %s14523_s0 = inlined_call_operand.vmem [shape: bf16[2,342,128], index: 0, kind: input, shape index: {}]   ;;  %s14524_s1 = inlined_call_operand.vmem [shape: bf16[2,342,32], index: 1, kind: input, shape index: {}]   ;;  %s14525_s2 = inlined_call_operand.vmem [shape: bf16[32,16], index: 2, kind: input, shape index: {}]   ;;  %s14526_s3 = inlined_call_operand.vmem [shape: f32[1,16], index: 3, kind: input, shape index: {}]   ;;  %s14527_s4 = inlined_call_operand.vmem [shape: f32[342,1], index: 4, kind: input, shape index: {}]   ;;  %s14528_s5 = inlined_call_operand.vmem [shape: bf16[9,128,128], index: 5, kind: input, shape index: {}]   ;;  %s14529_s6 = inlined_call_operand.vmem [shape: bf16[9,16,128], index: 6, kind: input, shape index: {}]   ;;  %s14530_s7 = inlined_call_operand.vmem [shape: f32[1,128], index: 7, kind: input, shape index: {}]   ;;  %s14531_s8 = inlined_call_operand.vmem [shape: bf16[128,128], index: 8, kind: input, shape index: {}]   ;;  %s14532_s9 = inlined_call_operand.vmem [shape: f32[1,128], index: 9, kind: input, shape index: {}]   ;;  %s14533_s10 = inlined_call_operand.vmem [shape: f32[2,288,128], index: 10, kind: output, shape index: {}]  }
   0x1 LB: > { %s9051_s14 = sadd.s32 4294967295, %s12097_s13   ;;  %p9055_p0 = scmp.ge.s32.totalorder %s12097_s13, 1  ;;  %s12097_s13 = sphi %s12155_s13, %s20_s13  }
   0x2   : > { %p322_p1 = scmp.lt.s32.totalorder %s12097_s13, 3 }
   0x4   : > { %p323_p2 = pnand %p9055_p0, %p322_p1 }
   0x6   : > { %326 = sbr.rel (%p323_p2) target bundleno = 1491 (0x5d3), region = 60 }
   0xd   : > { %v11743_v0 = vld [vmem:[%s14525_s2] sm:$0xff]   ;;  %p365_p3 = scmp.lt.s32.totalorder %s9051_s14, 1  ;;  %v11744_v1 = vld [vmem:[%s14525_s2 + $0x8] sm:$0xff]   ;;  %v907_v2 = vld [vmem:[%s14527_s4 + $0x110] sm:$0xff]  ;;  %v12099_v3 = vmov 0   ;;  %vm555_vm0 = vcmask 261120  }
   0xe   : > { %10206 = vmatprep.subr.bf16.mxu0 %v11743_v0  ;;  %11741 = vset.pattern.permute.xlu0 %v12099_v3  ;;  %v909_v4 = vld [vmem:[%s14527_s4 + $0x120] sm:$0xff]  ;;  %v908_v5 = vld [vmem:[%s14527_s4 + $0x118] sm:$0xff]  ;;  %v910_v6 = vld [vmem:[%s14527_s4 + $0x128] sm:$0xff]  ;;  %vm1347_vm1 = vcmask 125952   ;;  %vm1578_vm2 = vcmask 130048   ;;  %vm3261_vm3 = vcmask 1046528  }
   0xf   : > { %s14638_s14 = smov (!%p365_p3, %s9051_s14), 1  ;;  %10207 = vmatpush3.bf16.msra.mxu0 %v11743_v0  ;;  %1088 = vperm.xlu0 %11741, %v907_v2   ;;  %v911_v8 = vld [vmem:[%s14527_s4 + $0x130] sm:$0xff]  ;;  %v876_v12 = vld [vmem:[%s14527_s4 + $0x18] sm:$0xff]  ;;  %v877_v13 = vld [vmem:[%s14527_s4 + $0x20] sm:$0xff]  ;;  %vm4750_vm4 = vsmask.f32 6400 }
  0x10   : > { %10208 = vmatprep.subr.bf16.mxu0 %v11744_v1  ;;  %s11730_s23 = smul.u32 172, %s14638_s14  ;;  %11742 = vset.pattern.permute.xlu1 %v12099_v3  ;;  %v875_v11 = vld [vmem:[%s14527_s4 + $0x10] sm:$0xff]  ;;  %v878_v16 = vld [vmem:[%s14527_s4 + $0x28] sm:$0xff]  ;;  %v880_v18 = vld [vmem:[%s14527_s4 + $0x38] sm:$0xff]  ;;  %vm2330_vm5 = vsmask.f32 7424 }
  0x11   : > { %1098 = vperm.xlu1 %11742, %v909_v4   ;;  %v879_v17 = vld [vmem:[%s14527_s4 + $0x30] sm:$0xff]  ;;  %v881_v20 = vld [vmem:[%s14527_s4 + $0x40] sm:$0xff]  ;;  %v882_v22 = vld [vmem:[%s14527_s4 + $0x48] sm:$0xff]  ;;  %vm5635_vm6 = vcmask 1045504   ;;  %vm7124_vm7 = vsmask.f32 5376 }
  0x12   : > { %s12186_s28 = scalar_lea.vmem %s14524_s1, %s11730_s23  ;;  %v883_v23 = vld [vmem:[%s14527_s4 + $0x50] sm:$0xff]  ;;  %v884_v24 = vld [vmem:[%s14527_s4 + $0x58] sm:$0xff]  ;;  %v885_v27 = vld [vmem:[%s14527_s4 + $0x60] sm:$0xff]  ;;  %s12271_s19 = scalar_lea.vmem %s14523_s0, %s11730_s23  ;;  %vm8009_vm8 = vcmask 1044480  }
  0x13   : > { %10209 = vmatpush3.bf16.msra.mxu0 %v11744_v1  ;;  %v11745_v7 = vld [vmem:[%s12186_s28] sm:$0xff]   ;;  %v11746_v9 = vld [vmem:[%s12186_s28 + $0x8] sm:$0xff]   ;;  %1093 = vperm.xlu0 %11741, %v908_v5   ;;  %v11747_v10 = vld [vmem:[%s12186_s28 + $0x10] sm:$0xff]   ;;  %s11731_s23 = smul.u32 288, %s14638_s14 }
  0x14   : > { %10210 = vmatprep.mubr.msk.bf16.mxu0 %vm555_vm0, %v11745_v7  ;;  %v11748_v14 = vld [vmem:[%s12186_s28 + $0x18] sm:$0xff]   ;;  %v11749_v15 = vld [vmem:[%s12186_s28 + $0x20] sm:$0xff]   ;;  %v11750_v19 = vld [vmem:[%s12186_s28 + $0x28] sm:$0xff]  }
  0x15   : > { %1103 = vperm.xlu1 %11742, %v910_v6   ;;  %v11751_v21 = vld [vmem:[%s12186_s28 + $0x30] sm:$0xff]   ;;  %v11752_v25 = vld [vmem:[%s12186_s28 + $0x38] sm:$0xff]   ;;  %v11753_v26 = vld [vmem:[%s12186_s28 + $0x40] sm:$0xff]   ;;  %s14446_s12 = scalar_lea.vmem %s14533_s10, %s11731_s23 }
  0x16   : > { %10211 = vmatmul.mubr.msk.bf16.vlgmr.msra.gmra.mrb[0].mxu0 %vm555_vm0, %v11746_v9  ;;  %v886_v28 = vld [vmem:[%s14527_s4 + $0x68] sm:$0xff]  ;;  %v887_v29 = vld [vmem:[%s14527_s4 + $0x70] sm:$0xff]  ;;  %v888_v32 = vld [vmem:[%s14527_s4 + $0x78] sm:$0xff] }
  0x17   : > { %10214 = vmatprep.mubr.msk.bf16.mxu0 %vm555_vm0, %v11747_v10  ;;  %1108 = vperm.xlu0 %11741, %v911_v8   ;;  %v11754_v30 = vld [vmem:[%s12186_s28 + $0x48] sm:$0xff]   ;;  %v11755_v31 = vld [vmem:[%s12186_s28 + $0x50] sm:$0xff]   ;;  %v889_v33 = vld [vmem:[%s14527_s4 + $0x80] sm:$0xff] }
  0x18   : > { %v890_v34 = vld [vmem:[%s14527_s4 + $0x88] sm:$0xff]  ;;  %v891_v35 = vld [vmem:[%s14527_s4 + $0x90] sm:$0xff]  ;;  %v892_v36 = vld [vmem:[%s14527_s4 + $0x98] sm:$0xff] }
  0x19   : > { %928 = vperm.xlu1 %11742, %v875_v11   ;;  %v11756_v37 = vld [vmem:[%s12186_s28 + $0x58] sm:$0xff]   ;;  %v11757_v38 = vld [vmem:[%s12186_s28 + $0x60] sm:$0xff]   ;;  %v894_v40 = vld [vmem:[%s14527_s4 + $0xa8] sm:$0xff] }
  0x1a   : > { %v893_v39 = vld [vmem:[%s14527_s4 + $0xa0] sm:$0xff]  ;;  %v895_v41 = vld [vmem:[%s14527_s4 + $0xb0] sm:$0xff]  ;;  %v896_v42 = vld [vmem:[%s14527_s4 + $0xb8] sm:$0xff] }
  0x1b   : > { %933 = vperm.xlu0 %11741, %v876_v12   ;;  %v11758_v43 = vld [vmem:[%s12186_s28 + $0x68] sm:$0xff]   ;;  %v11759_v44 = vld [vmem:[%s12186_s28 + $0x70] sm:$0xff]   ;;  %v897_v45 = vld [vmem:[%s14527_s4 + $0xc0] sm:$0xff] }
  0x1c   : > { %v898_v46 = vld [vmem:[%s14527_s4 + $0xc8] sm:$0xff]  ;;  %v899_v47 = vld [vmem:[%s14527_s4 + $0xd0] sm:$0xff]  ;;  %v900_v48 = vld [vmem:[%s14527_s4 + $0xd8] sm:$0xff] }
  0x1d   : > { %938 = vperm.xlu1 %11742, %v877_v13   ;;  %v11760_v49 = vld [vmem:[%s12186_s28 + $0x78] sm:$0xff]   ;;  %v11761_v50 = vld [vmem:[%s12186_s28 + $0x80] sm:$0xff]   ;;  %v902_v52 = vld [vmem:[%s14527_s4 + $0xe8] sm:$0xff] }
  0x1e   : > { %10215 = vmatmul.mubr.msk.bf16.gmra.mrb[4].mxu0 %vm555_vm0, %v11748_v14  ;;  %v901_v51 = vld [vmem:[%s14527_s4 + $0xe0] sm:$0xff]  ;;  %v903_v53 = vld [vmem:[%s14527_s4 + $0xf0] sm:$0xff]  ;;  %v904_v54 = vld [vmem:[%s14527_s4 + $0xf8] sm:$0xff] }
  0x1f   : > { %10218 = vmatprep.mubr.msk.bf16.mxu0 %vm555_vm0, %v11749_v15  ;;  %943 = vperm.xlu0 %11741, %v878_v16   ;;  %v11762_v55 = vld [vmem:[%s12186_s28 + $0x88] sm:$0xff]   ;;  %v11763_v56 = vld [vmem:[%s12186_s28 + $0x90] sm:$0xff]   ;;  %v905_v57 = vld [vmem:[%s14527_s4 + $0x100] sm:$0xff] }
  0x20   : > { %v906_v58 = vld [vmem:[%s14527_s4 + $0x108] sm:$0xff]  ;;  %v873_v59 = vld [vmem:[%s14527_s4] sm:$0xff]  ;;  %v11764_v61 = vld [vmem:[%s12186_s28 + $0x98] sm:$0xff]  }
  0x21   : > { %948 = vperm.xlu1 %11742, %v879_v17   ;;  %v874_v60 = vld [vmem:[%s14527_s4 + $0x8] sm:$0xff]  ;;  %v11765_v62 = vld [vmem:[%s12186_s28 + $0xa0] sm:$0xff]   ;;  %v912_v63 = vld [vmem:[%s14527_s4 + $0x138] sm:$0xff] }
  0x22   : > { %v913_v0 = vld [vmem:[%s14527_s4 + $0x140] sm:$0xff]  ;;  %v914_v1 = vld [vmem:[%s14527_s4 + $0x148] sm:$0xff]  ;;  %v915_v2 = vld [vmem:[%s14527_s4 + $0x150] sm:$0x3f] }
  0x23   : > { %953 = vperm.xlu0 %11741, %v880_v18   ;;  %v11766_v3 = vld [vmem:[%s12186_s28 + $0xa8] ss:$0 sps:$4 sm:$0x77]   ;;  %v11767_v4 = vld [vmem:[%s14529_s6] sm:$0xff]  }
  0x24   : > { %10254 = vmatprep.subr.bf16.mxu0 %v11767_v4  ;;  %v12385_v17 = vld [vmem:[%s14528_s5] sm:$0xff]  }
  0x25   : > { %958 = vperm.xlu1 %11742, %v881_v20   ;;  %10255 = vmatpush3.bf16.msra.mxu0 %v11767_v4 }
  0x26   : > { %10219 = vmatmul.mubr.msk.bf16.gmra.mrb[8].mxu0 %vm555_vm0, %v11750_v19  ;;  %10292 = vmatprep.subr.bf16.mxu0 %v12385_v17 }
  0x27   : > { %10222 = vmatprep.mubr.msk.bf16.mxu0 %vm555_vm0, %v11751_v21  ;;  %963 = vperm.xlu0 %11741, %v882_v22  }
  0x29   : > { %968 = vperm.xlu1 %11742, %v883_v23  }
  0x2b   : > { %973 = vperm.xlu0 %11741, %v884_v24  }
  0x2d   : > { %978 = vperm.xlu1 %11742, %v885_v27  }
  0x2e   : > { %10223 = vmatmul.mubr.msk.bf16.gmra.mrb[12].mxu0 %vm555_vm0, %v11752_v25 }
  0x2f   : > { %10226 = vmatprep.mubr.msk.bf16.mxu0 %vm555_vm0, %v11753_v26  ;;  %983 = vperm.xlu0 %11741, %v886_v28  }
  0x31   : > { %988 = vperm.xlu1 %11742, %v887_v29  }
  0x33   : > { %993 = vperm.xlu0 %11741, %v888_v32  }
  0x35   : > { %998 = vperm.xlu1 %11742, %v889_v33   ;;  %v12422_v33 = vld [vmem:[%s14529_s6 + $0x20] sm:$0xff]  }
  0x36   : > { %10227 = vmatmul.mubr.msk.bf16.gmra.mrb[16].mxu0 %vm555_vm0, %v11754_v30 }
  0x37   : > { %10230 = vmatprep.mubr.msk.bf16.mxu0 %vm555_vm0, %v11755_v31  ;;  %1003 = vperm.xlu0 %11741, %v890_v34   ;;  %v11794_v31 = vld [vmem:[%s14529_s6 + $0x18] sm:$0xff]  }
  0x38   : > { %11116 = vmatprep.subr.bf16.mxu1 %v11794_v31 }
  0x39   : > { %1008 = vperm.xlu1 %11742, %v891_v35   ;;  %11117 = vmatpush3.bf16.msra.mxu1 %v11794_v31 }
  0x3a   : > { %10614 = vmatprep.subr.bf16.mxu1 %v12422_v33 }
  0x3b   : > { %1013 = vperm.xlu0 %11741, %v892_v36  }
  0x3d   : > { %1018 = vperm.xlu1 %11742, %v893_v39  }
  0x3e   : > { %10231 = vmatmul.mubr.msk.bf16.gmra.mrb[20].mxu0 %vm555_vm0, %v11756_v37 }
  0x3f   : > { %10234 = vmatprep.mubr.msk.bf16.mxu0 %vm555_vm0, %v11757_v38  ;;  %1023 = vperm.xlu0 %11741, %v894_v40  }
  0x41   : > { %1028 = vperm.xlu1 %11742, %v895_v41  }
  0x43   : > { %1033 = vperm.xlu0 %11741, %v896_v42  }
  0x45   : > { %1038 = vperm.xlu1 %11742, %v897_v45  }
  0x46   : > { %10235 = vmatmul.mubr.msk.bf16.gmra.mrb[24].mxu0 %vm555_vm0, %v11758_v43 }
  0x47   : > { %10238 = vmatprep.mubr.msk.bf16.mxu0 %vm555_vm0, %v11759_v44  ;;  %1043 = vperm.xlu0 %11741, %v898_v46   ;;  %v12448_v44 = vld [vmem:[%s14526_s3] ss:$0 sm:$0xff] }
  0x49   : > { %1048 = vperm.xlu1 %11742, %v899_v47  }
  0x4b   : > { %1053 = vperm.xlu0 %11741, %v900_v48  }
  0x4d   : > { %1058 = vperm.xlu1 %11742, %v901_v51  }
  0x4e   : > { %10239 = vmatmul.mubr.msk.bf16.gmra.mrb[28].mxu0 %vm555_vm0, %v11760_v49 }
  0x4f   : > { %10242 = vmatprep.mubr.msk.bf16.mxu0 %vm555_vm0, %v11761_v50  ;;  %1063 = vperm.xlu0 %11741, %v902_v52  }
  0x51   : > { %1068 = vperm.xlu1 %11742, %v903_v53  }
  0x53   : > { %1073 = vperm.xlu0 %11741, %v904_v54  }
  0x55   : > { %1078 = vperm.xlu1 %11742, %v905_v57  }
  0x56   : > { %10243 = vmatmul.mubr.msk.bf16.gmra.mrb[32].mxu0 %vm555_vm0, %v11762_v55 }
  0x57   : > { %10246 = vmatprep.mubr.msk.bf16.mxu0 %vm555_vm0, %v11763_v56  ;;  %1083 = vperm.xlu0 %11741, %v906_v58  }
  0x59   : > { %918 = vperm.xlu1 %11742, %v873_v59  }
  0x5b   : > { %923 = vperm.xlu0 %11741, %v874_v60  }
  0x5d   : > { %1113 = vperm.xlu1 %11742, %v912_v63  }
  0x5e   : > { %10247 = vmatmul.mubr.msk.bf16.gmra.mrb[36].mxu0 %vm555_vm0, %v11764_v61 }
  0x5f   : > { %10250 = vmatprep.mubr.msk.bf16.mxu0 %vm555_vm0, %v11765_v62  ;;  %1118 = vperm.xlu0 %11741, %v913_v0  }
  0x61   : > { %1123 = vperm.xlu1 %11742, %v914_v1  }
  0x63   : > { %1128 = vperm.xlu0 %11741, %v915_v2  }
  0x66   : > { %10251 = vmatmul.mubr.msk.bf16.gmra.mrb[40].mxu0 %vm555_vm0, %v11766_v3 }
  0x8e   : > { %v12362_v5 = vpop.permute.xlu0 %1088 }
  0x90   : > { %v12364_v6 = vpop.permute.xlu1 %1098 }
  0x92   : > { %v12366_v7 = vpop.permute.xlu0 %1093 }
  0x94   : > { %v12368_v8 = vpop.permute.xlu1 %1103 }
  0x96   : > { %v12370_v9 = vpop.permute.xlu0 %1108 }
  0x98   : > { %v929_v10 = vpop.permute.xlu1 %928 }
  0x9a   : > { %v934_v11 = vpop.permute.xlu0 %933 }
  0x9c   : > { %v12372_v12 = vpop.permute.xlu1 %938 }
  0x9e   : > { %v12374_v13 = vpop.permute.xlu0 %943 }
  0xa0   : > { %v12376_v14 = vpop.permute.xlu1 %948 }
  0xa2   : > { %v12378_v15 = vpop.permute.xlu0 %953 }
  0xa4   : > { %v12380_v16 = vpop.permute.xlu1 %958 }
  0xa6   : > { %v12387_v18 = vpop.permute.xlu0 %963 }
  0xa8   : > { %v12390_v19 = vpop.permute.xlu1 %968 }
  0xaa   : > { %v12392_v20 = vpop.permute.xlu0 %973 }
  0xac   : > { %v12394_v21 = vpop.permute.xlu1 %978 }
  0xae   : > { %v12396_v22 = vpop.permute.xlu0 %983 }
  0xb0   : > { %v12398_v23 = vpop.permute.xlu1 %988 }
  0xb2   : > { %v12400_v24 = vpop.permute.xlu0 %993 }
  0xb4   : > { %v12402_v25 = vpop.permute.xlu1 %998 }
  0xb6   : > { %v12404_v26 = vpop.permute.xlu0 %1003 }
  0xb8   : > { %v12406_v27 = vpop.permute.xlu1 %1008 }
  0xba   : > { %v12408_v28 = vpop.permute.xlu0 %1013 }
  0xbc   : > { %v12410_v29 = vpop.permute.xlu1 %1018 }
  0xbe   : > { %v12412_v30 = vpop.permute.xlu0 %1023 }
  0xc0   : > { %v12417_v32 = vpop.permute.xlu1 %1028 }
  0xc2   : > { %v12424_v34 = vpop.permute.xlu0 %1033 }
  0xc4   : > { %v12427_v35 = vpop.permute.xlu1 %1038 }
  0xc6   : > { %v12429_v36 = vpop.permute.xlu0 %1043 }
  0xc8   : > { %v12431_v37 = vpop.permute.xlu1 %1048 }
  0xca   : > { %v12433_v38 = vpop.permute.xlu0 %1053 }
  0xcc   : > { %v12435_v39 = vpop.permute.xlu1 %1058 }
  0xce   : > { %v12437_v40 = vpop.permute.xlu0 %1063 }
  0xd0   : > { %v12439_v41 = vpop.permute.xlu1 %1068 }
  0xd2   : > { %v12441_v42 = vpop.permute.xlu0 %1073 }
  0xd4   : > { %v12443_v43 = vpop.permute.xlu1 %1078 }
  0xd6   : > { %v12450_v45 = vpop.permute.xlu0 %1083 }
  0xd8   : > { %v919_v54 = vpop.permute.xlu1 %918 }
  0xda   : > { %v924_v59 = vpop.permute.xlu0 %923 }
  0xe9   : > { %v10212_v46 = vpop.f32.mrb[0].mxu0 }
  0xea   : > { %v665_v47 = vadd.f32 %v10212_v46, %v12448_v44  ;;  %v656_v48 = vpop.f32.mrb[1].mxu0 }
  0xeb   : > { %v657_v49 = vadd.f32 %v12448_v44, %v656_v48  ;;  %v10213_v50 = vpop.f32.mrb[2].mxu0 }
  0xec   : > { %v832_v51 = vmax.f32 %v665_v47, 0.0  ;;  %v668_v52 = vadd.f32 %v10213_v50, %v12448_v44  ;;  %v659_v53 = vpop.f32.mrb[3].mxu0 }
  0xed   : > { %v830_v55 = vmax.f32 %v657_v49, 0.0  ;;  %v660_v56 = vadd.f32 %v12448_v44, %v659_v53 }
  0xee   : > { %v1133_v57 = vmul.f32 %v929_v10, %v832_v51  ;;  %v833_v58 = vmax.f32 %v668_v52, 0.0 }
  0xef   : > { %v831_v60 = vmax.f32 %v660_v56, 0.0  ;;  %v1131_v61 = vmul.f32 %v919_v54, %v830_v55 }
  0xf0   : > { %v9710_v62 = vpack.c.bf16 %v1133_v57, %v1133_v57  ;;  %v1134_v63 = vmul.f32 %v934_v11, %v833_v58 }
  0xf1   : > { %v9708_v0 = vpack.c.bf16 %v1131_v61, %v1131_v61  ;;  %v1132_v1 = vmul.f32 %v924_v59, %v831_v60  ;;  %v10216_v2 = vpop.f32.mrb[4].mxu0 }
  0xf2   : > { %1350 = vst.msk [vmem:[#allocation2 + $0x8] sm:$0xf] %vm1347_vm1, %v9710_v62  ;;  %v9711_v3 = vpack.c.bf16 %v1134_v63, %v1134_v63  ;;  %v681_v4 = vadd.f32 %v10216_v2, %v12448_v44  ;;  %v672_v31 = vpop.f32.mrb[5].mxu0 }
  0xf3   : > { %1348 = vst.msk [vmem:[#allocation2] sm:$0xf] %vm1347_vm1, %v9708_v0  ;;  %v9709_v46 = vpack.c.bf16 %v1132_v1, %v1132_v1  ;;  %v673_v10 = vadd.f32 %v12448_v44, %v672_v31  ;;  %v10217_v47 = vpop.f32.mrb[6].mxu0 }
  0xf4   : > { %1351 = vst.msk [vmem:[#allocation2 + $0xc] sm:$0xf] %vm1347_vm1, %v9711_v3  ;;  %v836_v48 = vmax.f32 %v681_v4, 0.0  ;;  %v684_v11 = vadd.f32 %v10217_v47, %v12448_v44  ;;  %v675_v49 = vpop.f32.mrb[7].mxu0 }
  0xf5   : > { %1349 = vst.msk [vmem:[#allocation2 + $0x4] sm:$0xf] %vm1347_vm1, %v9709_v46  ;;  %v834_v50 = vmax.f32 %v673_v10, 0.0  ;;  %v676_v51 = vadd.f32 %v12448_v44, %v675_v49  ;;  %v11781_v46 = vld [vmem:[%s14528_s5 + $0x8] sm:$0xff]  }
  0xf6   : > { %v1137_v52 = vmul.f32 %v12376_v14, %v836_v48  ;;  %v837_v53 = vmax.f32 %v684_v11, 0.0 }
  0xf7   : > { %v1135_v54 = vmul.f32 %v12372_v12, %v834_v50  ;;  %v835_v55 = vmax.f32 %v676_v51, 0.0 }
  0xf8   : > { %v9714_v56 = vpack.c.bf16 %v1137_v52, %v1137_v52  ;;  %v1138_v57 = vmul.f32 %v12378_v15, %v837_v53 }
  0xf9   : > { %v9712_v58 = vpack.c.bf16 %v1135_v54, %v1135_v54  ;;  %v1136_v59 = vmul.f32 %v12374_v13, %v835_v55  ;;  %v10220_v60 = vpop.f32.mrb[8].mxu0 }
  0xfa   : > { %1354 = vst.msk [vmem:[#allocation2 + $0x18] sm:$0xf] %vm1347_vm1, %v9714_v56  ;;  %v9715_v61 = vpack.c.bf16 %v1138_v57, %v1138_v57  ;;  %v697_v62 = vadd.f32 %v10220_v60, %v12448_v44  ;;  %v688_v63 = vpop.f32.mrb[9].mxu0 }
  0xfb   : > { %1352 = vst.msk [vmem:[#allocation2 + $0x10] sm:$0xf] %vm1347_vm1, %v9712_v58  ;;  %v9713_v14 = vpack.c.bf16 %v1136_v59, %v1136_v59  ;;  %v689_v0 = vadd.f32 %v12448_v44, %v688_v63  ;;  %v10221_v12 = vpop.f32.mrb[10].mxu0  ;;  %v11769_v31 = vld [vmem:[#allocation2 + $0x8] sm:$0xff]   ;;  %v11785_v63 = vld [vmem:[%s14528_s5 + $0x18] sm:$0xff]  }
  0xfc   : > { %1355 = vst.msk [vmem:[#allocation2 + $0x1c] sm:$0xf] %vm1347_vm1, %v9715_v61  ;;  %v840_v15 = vmax.f32 %v697_v62, 0.0  ;;  %v700_v1 = vadd.f32 %v10221_v12, %v12448_v44  ;;  %v691_v13 = vpop.f32.mrb[11].mxu0  ;;  %v11768_v2 = vld [vmem:[#allocation2] sm:$0xff]  }
  0xfd   : > { %1353 = vst.msk [vmem:[#allocation2 + $0x14] sm:$0xf] %vm1347_vm1, %v9713_v14  ;;  %v838_v3 = vmax.f32 %v689_v0, 0.0  ;;  %v692_v4 = vadd.f32 %v12448_v44, %v691_v13  ;;  %10256 = vmatprep.mubr.msk.bf16.mxu0 %vm1578_vm2, %v11768_v2 }
  0xfe   : > { %v1141_v10 = vmul.f32 %v12390_v19, %v840_v15  ;;  %v841_v47 = vmax.f32 %v700_v1, 0.0  ;;  %10257 = vmatmul.mubr.msk.bf16.vlgmr.msra.gmra.mrb[44].mxu0 %vm1578_vm2, %v11769_v31  ;;  %v11784_v19 = vld [vmem:[%s14528_s5 + $0x10] sm:$0xff]  }
  0xff   : > { %v1139_v48 = vmul.f32 %v12380_v16, %v838_v3  ;;  %v839_v11 = vmax.f32 %v692_v4, 0.0  ;;  %10293 = vmatpush3.bf16.msra.mxu0 %v12385_v17 }
 0x100   : > { %v9718_v49 = vpack.c.bf16 %v1141_v10, %v1141_v10  ;;  %v1142_v50 = vmul.f32 %v12392_v20, %v841_v47  ;;  %10294 = vmatprep.subr.bf16.mxu0 %v11781_v46 }
 0x101   : > { %v9716_v51 = vpack.c.bf16 %v1139_v48, %v1139_v48  ;;  %v1140_v52 = vmul.f32 %v12387_v18, %v839_v11  ;;  %v10224_v53 = vpop.f32.mrb[12].mxu0 }
 0x102   : > { %1358 = vst.msk [vmem:[#allocation2 + $0x28] sm:$0xf] %vm1347_vm1, %v9718_v49  ;;  %v9719_v16 = vpack.c.bf16 %v1142_v50, %v1142_v50  ;;  %v713_v54 = vadd.f32 %v10224_v53, %v12448_v44  ;;  %v704_v55 = vpop.f32.mrb[13].mxu0  ;;  %v11789_v50 = vld [vmem:[%s14528_s5 + $0x28] sm:$0xff]  }
 0x103   : > { %1356 = vst.msk [vmem:[#allocation2 + $0x20] sm:$0xf] %vm1347_vm1, %v9716_v51  ;;  %v9717_v20 = vpack.c.bf16 %v1140_v52, %v1140_v52  ;;  %v705_v17 = vadd.f32 %v12448_v44, %v704_v55  ;;  %v10225_v56 = vpop.f32.mrb[14].mxu0  ;;  %10295 = vmatpush3.bf16.msra.mxu0 %v11781_v46  ;;  %v11771_v62 = vld [vmem:[#allocation2 + $0x18] sm:$0xff]  }
 0x104   : > { %1359 = vst.msk [vmem:[#allocation2 + $0x2c] sm:$0xf] %vm1347_vm1, %v9719_v16  ;;  %v844_v18 = vmax.f32 %v713_v54, 0.0  ;;  %v716_v57 = vadd.f32 %v10225_v56, %v12448_v44  ;;  %v707_v58 = vpop.f32.mrb[15].mxu0  ;;  %v11770_v59 = vld [vmem:[#allocation2 + $0x10] sm:$0xff]   ;;  %10296 = vmatprep.subr.bf16.mxu0 %v11784_v19 }
 0x105   : > { %1357 = vst.msk [vmem:[#allocation2 + $0x24] sm:$0xf] %vm1347_vm1, %v9717_v20  ;;  %v842_v60 = vmax.f32 %v705_v17, 0.0  ;;  %v708_v61 = vadd.f32 %v12448_v44, %v707_v58  ;;  %10260 = vmatprep.mubr.msk.bf16.mxu0 %vm1578_vm2, %v11770_v59 }
 0x106   : > { %v1145_v14 = vmul.f32 %v12398_v23, %v844_v18  ;;  %v845_v0 = vmax.f32 %v716_v57, 0.0  ;;  %10261 = vmatmul.mubr.msk.bf16.gmra.mrb[48].mxu0 %vm1578_vm2, %v11771_v62  ;;  %v11788_v23 = vld [vmem:[%s14528_s5 + $0x20] sm:$0xff]  }
 0x107   : > { %v1143_v12 = vmul.f32 %v12394_v21, %v842_v60  ;;  %v843_v15 = vmax.f32 %v708_v61, 0.0  ;;  %10297 = vmatpush3.bf16.msra.mxu0 %v11784_v19 }
 0x108   : > { %v9722_v1 = vpack.c.bf16 %v1145_v14, %v1145_v14  ;;  %v1146_v13 = vmul.f32 %v12400_v24, %v845_v0  ;;  %10298 = vmatprep.subr.bf16.mxu0 %v11785_v63  ;;  %v11793_v0 = vld [vmem:[%s14528_s5 + $0x38] sm:$0xff]  }
 0x109   : > { %v9720_v2 = vpack.c.bf16 %v1143_v12, %v1143_v12  ;;  %v1144_v3 = vmul.f32 %v12396_v22, %v843_v15  ;;  %v10228_v4 = vpop.f32.mrb[16].mxu0 }
 0x10a   : > { %1362 = vst.msk [vmem:[#allocation2 + $0x38] sm:$0xf] %vm1347_vm1, %v9722_v1  ;;  %v9723_v31 = vpack.c.bf16 %v1146_v13, %v1146_v13  ;;  %v729_v21 = vadd.f32 %v10228_v4, %v12448_v44  ;;  %v720_v46 = vpop.f32.mrb[17].mxu0 }
 0x10b   : > { %1360 = vst.msk [vmem:[#allocation2 + $0x30] sm:$0xf] %vm1347_vm1, %v9720_v2  ;;  %v9721_v10 = vpack.c.bf16 %v1144_v3, %v1144_v3  ;;  %v721_v24 = vadd.f32 %v12448_v44, %v720_v46  ;;  %v10229_v47 = vpop.f32.mrb[18].mxu0  ;;  %10299 = vmatpush3.bf16.msra.mxu0 %v11785_v63  ;;  %v11773_v53 = vld [vmem:[#allocation2 + $0x28] sm:$0xff]  }
 0x10c   : > { %1363 = vst.msk [vmem:[#allocation2 + $0x3c] sm:$0xf] %vm1347_vm1, %v9723_v31  ;;  %v848_v22 = vmax.f32 %v729_v21, 0.0  ;;  %v732_v48 = vadd.f32 %v10229_v47, %v12448_v44  ;;  %v723_v11 = vpop.f32.mrb[19].mxu0  ;;  %v11772_v49 = vld [vmem:[#allocation2 + $0x20] sm:$0xff]   ;;  %10300 = vmatprep.subr.bf16.mxu0 %v11788_v23 }
 0x10d   : > { %1361 = vst.msk [vmem:[#allocation2 + $0x34] sm:$0xf] %vm1347_vm1, %v9721_v10  ;;  %v846_v51 = vmax.f32 %v721_v24, 0.0  ;;  %v724_v52 = vadd.f32 %v12448_v44, %v723_v11  ;;  %10264 = vmatprep.mubr.msk.bf16.mxu0 %vm1578_vm2, %v11772_v49 }
 0x10e   : > { %v1149_v19 = vmul.f32 %v12406_v27, %v848_v22  ;;  %v849_v16 = vmax.f32 %v732_v48, 0.0  ;;  %10265 = vmatmul.mubr.msk.bf16.gmra.mrb[52].mxu0 %vm1578_vm2, %v11773_v53  ;;  %v11792_v27 = vld [vmem:[%s14528_s5 + $0x30] sm:$0xff]  }
 0x10f   : > { %v1147_v54 = vmul.f32 %v12402_v25, %v846_v51  ;;  %v847_v55 = vmax.f32 %v724_v52, 0.0  ;;  %10301 = vmatpush3.bf16.msra.mxu0 %v11788_v23 }
 0x110   : > { %v9726_v20 = vpack.c.bf16 %v1149_v19, %v1149_v19  ;;  %v1150_v17 = vmul.f32 %v12408_v28, %v849_v16  ;;  %10302 = vmatprep.subr.bf16.mxu0 %v11789_v50 }
 0x111   : > { %v9724_v56 = vpack.c.bf16 %v1147_v54, %v1147_v54  ;;  %v1148_v18 = vmul.f32 %v12404_v26, %v847_v55  ;;  %v10232_v57 = vpop.f32.mrb[20].mxu0 }
 0x112   : > { %1366 = vst.msk [vmem:[#allocation2 + $0x48] sm:$0xf] %vm1347_vm1, %v9726_v20  ;;  %v9727_v58 = vpack.c.bf16 %v1150_v17, %v1150_v17  ;;  %v745_v25 = vadd.f32 %v10232_v57, %v12448_v44  ;;  %v736_v59 = vpop.f32.mrb[21].mxu0 }
 0x113   : > { %1364 = vst.msk [vmem:[#allocation2 + $0x40] sm:$0xf] %vm1347_vm1, %v9724_v56  ;;  %v9725_v60 = vpack.c.bf16 %v1148_v18, %v1148_v18  ;;  %v737_v28 = vadd.f32 %v12448_v44, %v736_v59  ;;  %v10233_v61 = vpop.f32.mrb[22].mxu0  ;;  %10303 = vmatpush3.bf16.msra.mxu0 %v11789_v50  ;;  %v11775_v1 = vld [vmem:[#allocation2 + $0x38] sm:$0xff]  }
 0x114   : > { %1367 = vst.msk [vmem:[#allocation2 + $0x4c] sm:$0xf] %vm1347_vm1, %v9727_v58  ;;  %v852_v26 = vmax.f32 %v745_v25, 0.0  ;;  %v748_v62 = vadd.f32 %v10233_v61, %v12448_v44  ;;  %v739_v63 = vpop.f32.mrb[23].mxu0  ;;  %v11774_v14 = vld [vmem:[#allocation2 + $0x30] sm:$0xff]   ;;  %10304 = vmatprep.subr.bf16.mxu0 %v11792_v27 }
 0x115   : > { %1365 = vst.msk [vmem:[#allocation2 + $0x44] sm:$0xf] %vm1347_vm1, %v9725_v60  ;;  %v850_v12 = vmax.f32 %v737_v28, 0.0  ;;  %v740_v15 = vadd.f32 %v12448_v44, %v739_v63  ;;  %10268 = vmatprep.mubr.msk.bf16.mxu0 %vm1578_vm2, %v11774_v14 }
 0x116   : > { %v1153_v13 = vmul.f32 %v12417_v32, %v852_v26  ;;  %v853_v2 = vmax.f32 %v748_v62, 0.0  ;;  %10269 = vmatmul.mubr.msk.bf16.gmra.mrb[56].mxu0 %vm1578_vm2, %v11775_v1  ;;  %v12549_v32 = vld [vmem:[%s14529_s6 + $0x8] sm:$0xff]  }
 0x117   : > { %v1151_v3 = vmul.f32 %v12410_v29, %v850_v12  ;;  %v851_v4 = vmax.f32 %v740_v15, 0.0  ;;  %10305 = vmatpush3.bf16.msra.mxu0 %v11792_v27 }
 0x118   : > { %v9730_v23 = vpack.c.bf16 %v1153_v13, %v1153_v13  ;;  %v1154_v31 = vmul.f32 %v12424_v34, %v853_v2  ;;  %10306 = vmatprep.subr.bf16.mxu0 %v11793_v0 }
 0x119   : > { %v9728_v21 = vpack.c.bf16 %v1151_v3, %v1151_v3  ;;  %v1152_v46 = vmul.f32 %v12412_v30, %v851_v4  ;;  %v10236_v10 = vpop.f32.mrb[24].mxu0 }
 0x11a   : > { %1370 = vst.msk [vmem:[#allocation2 + $0x58] sm:$0xf] %vm1347_vm1, %v9730_v23  ;;  %v9731_v29 = vpack.c.bf16 %v1154_v31, %v1154_v31  ;;  %v761_v24 = vadd.f32 %v10236_v10, %v12448_v44  ;;  %v752_v47 = vpop.f32.mrb[25].mxu0 }
 0x11b   : > { %1368 = vst.msk [vmem:[#allocation2 + $0x50] sm:$0xf] %vm1347_vm1, %v9728_v21  ;;  %v9729_v34 = vpack.c.bf16 %v1152_v46, %v1152_v46  ;;  %v753_v22 = vadd.f32 %v12448_v44, %v752_v47  ;;  %v10237_v48 = vpop.f32.mrb[26].mxu0  ;;  %10307 = vmatpush3.bf16.msra.mxu0 %v11793_v0  ;;  %v11777_v53 = vld [vmem:[#allocation2 + $0x48] sm:$0xff]  }
 0x11c   : > { %1371 = vst.msk [vmem:[#allocation2 + $0x5c] sm:$0xf] %vm1347_vm1, %v9731_v29  ;;  %v856_v30 = vmax.f32 %v761_v24, 0.0  ;;  %v764_v11 = vadd.f32 %v10237_v48, %v12448_v44  ;;  %v755_v49 = vpop.f32.mrb[27].mxu0  ;;  %v11776_v50 = vld [vmem:[#allocation2 + $0x40] sm:$0xff]   ;;  %10344 = vmatprep.subr.bf16.mxu0 %v12549_v32 }
 0x11d   : > { %1369 = vst.msk [vmem:[#allocation2 + $0x54] sm:$0xf] %vm1347_vm1, %v9729_v34  ;;  %v854_v51 = vmax.f32 %v753_v22, 0.0  ;;  %v756_v52 = vadd.f32 %v12448_v44, %v755_v49  ;;  %10272 = vmatprep.mubr.msk.bf16.mxu0 %vm1578_vm2, %v11776_v50 }
 0x11e   : > { %v1157_v19 = vmul.f32 %v12431_v37, %v856_v30  ;;  %v857_v16 = vmax.f32 %v764_v11, 0.0  ;;  %10273 = vmatmul.mubr.msk.bf16.gmra.mrb[60].mxu0 %vm1578_vm2, %v11777_v53 }
 0x11f   : > { %v1155_v54 = vmul.f32 %v12427_v35, %v854_v51  ;;  %v855_v55 = vmax.f32 %v756_v52, 0.0 }
 0x120   : > { %v9734_v20 = vpack.c.bf16 %v1157_v19, %v1157_v19  ;;  %v1158_v17 = vmul.f32 %v12433_v38, %v857_v16 }
 0x121   : > { %v9732_v56 = vpack.c.bf16 %v1155_v54, %v1155_v54  ;;  %v1156_v18 = vmul.f32 %v12429_v36, %v855_v55  ;;  %v10240_v57 = vpop.f32.mrb[28].mxu0 }
 0x122   : > { %1374 = vst.msk [vmem:[#allocation2 + $0x68] sm:$0xf] %vm1347_vm1, %v9734_v20  ;;  %v9735_v27 = vpack.c.bf16 %v1158_v17, %v1158_v17  ;;  %v777_v37 = vadd.f32 %v10240_v57, %v12448_v44  ;;  %v768_v58 = vpop.f32.mrb[29].mxu0 }
 0x123   : > { %1372 = vst.msk [vmem:[#allocation2 + $0x60] sm:$0xf] %vm1347_vm1, %v9732_v56  ;;  %v9733_v25 = vpack.c.bf16 %v1156_v18, %v1156_v18  ;;  %v769_v35 = vadd.f32 %v12448_v44, %v768_v58  ;;  %v10241_v59 = vpop.f32.mrb[30].mxu0  ;;  %v11779_v62 = vld [vmem:[#allocation2 + $0x58] sm:$0xff]   ;;  %v1114_v58 = vpop.permute.xlu1 %1113 }
 0x124   : > { %1375 = vst.msk [vmem:[#allocation2 + $0x6c] sm:$0xf] %vm1347_vm1, %v9735_v27  ;;  %v860_v60 = vmax.f32 %v777_v37, 0.0  ;;  %v780_v38 = vadd.f32 %v10241_v59, %v12448_v44  ;;  %v771_v28 = vpop.f32.mrb[31].mxu0  ;;  %v11778_v36 = vld [vmem:[#allocation2 + $0x50] sm:$0xff]   ;;  %v1119_v37 = vpop.permute.xlu0 %1118 }
 0x125   : > { %1373 = vst.msk [vmem:[#allocation2 + $0x64] sm:$0xf] %vm1347_vm1, %v9733_v25  ;;  %v858_v61 = vmax.f32 %v769_v35, 0.0  ;;  %v772_v26 = vadd.f32 %v12448_v44, %v771_v28  ;;  %10276 = vmatprep.mubr.msk.bf16.mxu0 %vm1578_vm2, %v11778_v36  ;;  %v12606_v28 = vld [vmem:[#allocation2 + $0xc] sm:$0xf] }
 0x126   : > { %v1161_v63 = vmul.f32 %v12439_v41, %v860_v60  ;;  %v861_v14 = vmax.f32 %v780_v38, 0.0  ;;  %10277 = vmatmul.mubr.msk.bf16.gmra.mrb[64].mxu0 %vm1578_vm2, %v11779_v62  ;;  %v3909_v38 = vld [vmem:[#allocation2 + $0x8] sm:$0xe] }
 0x127   : > { %v1159_v0 = vmul.f32 %v12435_v39, %v858_v61  ;;  %v859_v12 = vmax.f32 %v772_v26, 0.0  ;;  %v11802_v26 = vld [vmem:[#allocation2 + $0x10] sm:$0xff]  }
 0x128   : > { %v9738_v15 = vpack.c.bf16 %v1161_v63, %v1161_v63  ;;  %v1162_v1 = vmul.f32 %v12441_v42, %v861_v14 }
 0x129   : > { %v9736_v13 = vpack.c.bf16 %v1159_v0, %v1159_v0  ;;  %v1160_v2 = vmul.f32 %v12437_v40, %v859_v12  ;;  %v10244_v3 = vpop.f32.mrb[32].mxu0  ;;  %v12613_v12 = vcombine.low %v3909_v38, %v12606_v28 }
 0x12a   : > { %1378 = vst.msk [vmem:[#allocation2 + $0x78] sm:$0xf] %vm1347_vm1, %v9738_v15  ;;  %v9739_v4 = vpack.c.bf16 %v1162_v1, %v1162_v1  ;;  %v793_v41 = vadd.f32 %v10244_v3, %v12448_v44  ;;  %v784_v23 = vpop.f32.mrb[33].mxu0 }
 0x12b   : > { %1376 = vst.msk [vmem:[#allocation2 + $0x70] sm:$0xf] %vm1347_vm1, %v9736_v13  ;;  %v9737_v31 = vpack.c.bf16 %v1160_v2, %v1160_v2  ;;  %v785_v39 = vadd.f32 %v12448_v44, %v784_v23  ;;  %v10245_v21 = vpop.f32.mrb[34].mxu0  ;;  %v11783_v47 = vld [vmem:[#allocation2 + $0x68] sm:$0xff]   ;;  %14542 = vst [vmem:[#allocation3_spill] sm:$0xff] %v12613_v12  ;;  %v1129_v13 = vpop.permute.xlu0 %1128  ;;  %v4752_v23 = vshrl.u32 %v12613_v12, 16 }
 0x12c   : > { %1379 = vst.msk [vmem:[#allocation2 + $0x7c] sm:$0xf] %vm1347_vm1, %v9739_v4  ;;  %v864_v46 = vmax.f32 %v793_v41, 0.0  ;;  %v796_v42 = vadd.f32 %v10245_v21, %v12448_v44  ;;  %v787_v10 = vpop.f32.mrb[35].mxu0  ;;  %v11782_v40 = vld [vmem:[#allocation2 + $0x60] sm:$0xff]   ;;  %v4760_v4 = vshrl.u32 %v11802_v26, 16 }
 0x12d   : > { %1377 = vst.msk [vmem:[#allocation2 + $0x74] sm:$0xf] %vm1347_vm1, %v9737_v31  ;;  %v862_v29 = vmax.f32 %v785_v39, 0.0  ;;  %v788_v24 = vadd.f32 %v12448_v44, %v787_v10  ;;  %10280 = vmatprep.mubr.msk.bf16.mxu0 %vm1578_vm2, %v11782_v40  ;;  %v4763_v41 = vshll.u32 %v11802_v26, 16  ;;  %v1124_v31 = vpop.permute.xlu1 %1123  ;;  %v4755_v39 = vshll.u32 %v12613_v12, 16  ;;  %v11806_v21 = vld [vmem:[#allocation2 + $0x18] sm:$0xff]  }
 0x12e   : > { %v1165_v34 = vmul.f32 %v12362_v5, %v864_v46  ;;  %v865_v22 = vmax.f32 %v796_v42, 0.0  ;;  %10281 = vmatmul.mubr.msk.bf16.gmra.mrb[68].mxu0 %vm1578_vm2, %v11783_v47  ;;  %v4762_v10 = vrot.slane %v4760_v4, 1  ;;  %v11807_v40 = vld [vmem:[#allocation2 + $0x20] sm:$0xff]   ;;  %v11796_v47 = vld [vmem:[%s12271_s19 + $0x8] sm:$0xff]   ;;  %v11822_v31 = vld [vmem:[%s14528_s5 + $0x118] sm:$0xff]  }
 0x12f   : > { %v1163_v48 = vmul.f32 %v12443_v43, %v862_v29  ;;  %v863_v30 = vmax.f32 %v788_v24, 0.0  ;;  %v4765_v24 = vrot.slane %v4763_v41, 2 }
 0x130   : > { %v9742_v11 = vpack.c.bf16 %v1165_v34, %v1165_v34  ;;  %v1166_v49 = vmul.f32 %v12366_v7, %v865_v22  ;;  %v11803_v34 = vld [vmem:[%s12271_s19 + $0x10] sm:$0xff]  }
 0x131   : > { %v9740_v50 = vpack.c.bf16 %v1163_v48, %v1163_v48  ;;  %v1164_v51 = vmul.f32 %v12450_v45, %v863_v30  ;;  %v10248_v52 = vpop.f32.mrb[36].mxu0  ;;  %v4754_v48 = vrot.slane %v4752_v23, 1  ;;  %v4757_v30 = vrot.slane %v4755_v39, 2 }
 0x132   : > { %1382 = vst.msk [vmem:[#allocation2 + $0x88] sm:$0xf] %vm1347_vm1, %v9742_v11  ;;  %v9743_v53 = vpack.c.bf16 %v1166_v49, %v1166_v49  ;;  %v809_v5 = vadd.f32 %v10248_v52, %v12448_v44  ;;  %v800_v19 = vpop.f32.mrb[37].mxu0  ;;  %v4769_v11 = vshrl.u32 %v11806_v21, 16  ;;  %v4781_v52 = vshll.u32 %v11807_v40, 16 }
 0x133   : > { %1380 = vst.msk [vmem:[#allocation2 + $0x80] sm:$0xf] %vm1347_vm1, %v9740_v50  ;;  %v9741_v16 = vpack.c.bf16 %v1164_v51, %v1164_v51  ;;  %v801_v43 = vadd.f32 %v12448_v44, %v800_v19  ;;  %v10249_v54 = vpop.f32.mrb[38].mxu0  ;;  %v11787_v18 = vld [vmem:[#allocation2 + $0x78] sm:$0xff]   ;;  %v4772_v50 = vshll.u32 %v11806_v21, 16  ;;  %v4778_v51 = vshrl.u32 %v11807_v40, 16 }
 0x134   : > { %1383 = vst.msk [vmem:[#allocation2 + $0x8c] sm:$0xf] %vm1347_vm1, %v9743_v53  ;;  %v868_v55 = vmax.f32 %v809_v5, 0.0  ;;  %v812_v7 = vadd.f32 %v10249_v54, %v12448_v44  ;;  %v803_v20 = vpop.f32.mrb[39].mxu0  ;;  %v11786_v45 = vld [vmem:[#allocation2 + $0x70] sm:$0xff]   ;;  %v12633_v53 = vld [vmem:[%s14528_s5 + $0x40] sm:$0xff]  }
 0x135   : > { %1381 = vst.msk [vmem:[#allocation2 + $0x84] sm:$0xf] %vm1347_vm1, %v9741_v16  ;;  %v866_v17 = vmax.f32 %v801_v43, 0.0  ;;  %v804_v56 = vadd.f32 %v12448_v44, %v803_v20  ;;  %10284 = vmatprep.mubr.msk.bf16.mxu0 %vm1578_vm2, %v11786_v45  ;;  %v4766_v16 = vor.u32 %v4765_v24, %v4762_v10  ;;  %v4771_v20 = vrot.slane %v4769_v11, 1  ;;  %v11814_v24 = vld [vmem:[%s12271_s19 + $0x38] sm:$0xff]  }
 0x136   : > { %v1169_v57 = vmul.f32 %v12370_v9, %v868_v55  ;;  %v869_v27 = vmax.f32 %v812_v7, 0.0  ;;  %10285 = vmatmul.mubr.msk.bf16.gmra.mrb[72].mxu0 %vm1578_vm2, %v11787_v18  ;;  %v4758_v55 = vor.u32 %v4757_v30, %v4754_v48  ;;  %v11805_v7 = vld [vmem:[%s14528_s5 + $0x100] sm:$0xff]   ;;  %v4774_v45 = vrot.slane %v4772_v50, 2 }
 0x137   : > { %v1167_v25 = vmul.f32 %v12364_v6, %v866_v17  ;;  %v867_v35 = vmax.f32 %v804_v56, 0.0  ;;  %v11810_v17 = vld [vmem:[#allocation2 + $0x28] sm:$0xff]   ;;  %v4780_v18 = vrot.slane %v4778_v51, 1 }
 0x138   : > { %v9746_v59 = vpack.c.bf16 %v1169_v57, %v1169_v57  ;;  %v1170_v60 = vmul.f32 %v1114_v58, %v869_v27  ;;  %v4767_v56 = vsel %vm4750_vm4, %v4758_v55, %v4766_v16  ;;  %v4783_v57 = vrot.slane %v4781_v52, 2  ;;  %v11812_v27 = vld [vmem:[#allocation2 + $0x30] sm:$0xff]  }
 0x139   : > { %v9744_v36 = vpack.c.bf16 %v1167_v25, %v1167_v25  ;;  %v1168_v61 = vmul.f32 %v12368_v8, %v867_v35  ;;  %v10252_v9 = vpop.f32.mrb[40].mxu0  ;;  %v11795_v8 = vld [vmem:[%s12271_s19] sm:$0xff]   ;;  %v4775_v58 = vor.u32 %v4774_v45, %v4771_v20  ;;  %v4787_v25 = vshrl.u32 %v11810_v17, 16 }
 0x13a   : > { %1386 = vst.msk [vmem:[#allocation2 + $0x98] sm:$0xf] %vm1347_vm1, %v9746_v59  ;;  %v9747_v62 = vpack.c.bf16 %v1170_v60, %v1170_v60  ;;  %v816_v63 = vpop.f32.mrb[41].mxu0  ;;  %v4790_v35 = vshll.u32 %v11810_v17, 16  ;;  %v4784_v59 = vor.u32 %v4783_v57, %v4780_v18  ;;  %v4796_v60 = vshrl.u32 %v11812_v27, 16  ;;  %v11826_v45 = vld [vmem:[#allocation2 + $0x60] sm:$0xff]  }
 0x13b   : > { %1384 = vst.msk [vmem:[#allocation2 + $0x90] sm:$0xf] %vm1347_vm1, %v9744_v36  ;;  %v9745_v6 = vpack.c.bf16 %v1168_v61, %v1168_v61  ;;  %v817_v14 = vadd.f32 %v12448_v44, %v816_v63  ;;  %v10253_v0 = vpop.f32.mrb[42].mxu0  ;;  %v11791_v3 = vld [vmem:[#allocation2 + $0x88] sm:$0xff]   ;;  %v4799_v38 = vshll.u32 %v11812_v27, 16  ;;  %v4776_v61 = vsel %vm4750_vm4, %v4766_v16, %v4775_v58  ;;  %v11839_v18 = vld [vmem:[%s14528_s5 + $0x130] sm:$0xff]  }
 0x13c   : > { %1387 = vst.msk [vmem:[#allocation2 + $0x9c] sm:$0xf] %vm1347_vm1, %v9747_v62  ;;  %v819_v15 = vpop.f32.mrb[43].mxu0  ;;  %v11790_v1 = vld [vmem:[#allocation2 + $0x80] sm:$0xff]   ;;  %v12622_v42 = vld [vmem:[#allocation2 + $0x88] sm:$0xff]   ;;  %v4789_v9 = vrot.slane %v4787_v25, 1  ;;  %v4785_v63 = vsel %vm4750_vm4, %v4775_v58, %v4784_v59 }
 0x13d   : > { %1385 = vst.msk [vmem:[#allocation2 + $0x94] sm:$0xf] %vm1347_vm1, %v9745_v6  ;;  %v870_v2 = vmax.f32 %v817_v14, 0.0  ;;  %10288 = vmatprep.mubr.msk.bf16.mxu0 %vm1578_vm2, %v11790_v1  ;;  %14543 = vst [vmem:[#allocation4_spill] sm:$0xff] %v12622_v42  ;;  %v14534_v49 = vrot.slane %v12622_v42, 1  ;;  %v11811_v36 = vld [vmem:[%s14528_s5 + $0x108] sm:$0xff]  }
 0x13e   : > { %10289 = vmatmul.mubr.msk.bf16.gmra.mrb[76].mxu0 %vm1578_vm2, %v11791_v3  ;;  %v4792_v26 = vrot.slane %v4790_v35, 2  ;;  %v11816_v62 = vld [vmem:[#allocation2 + $0x40] sm:$0xff]   ;;  %v4798_v6 = vrot.slane %v4796_v60, 1  ;;  %v4801_v14 = vrot.slane %v4799_v38, 2  ;;  %v11809_v0 = vld [vmem:[%s12271_s19 + $0x28] sm:$0xff]   ;;  %v11813_v15 = vld [vmem:[%s12271_s19 + $0x30] sm:$0xff]  }
 0x13f   : > { %v1171_v44 = vmul.f32 %v1119_v37, %v870_v2  ;;  %10308 = vmatprep.mubr.bf16.mxu0 %v11795_v8  ;;  %v11804_v37 = vld [vmem:[%s12271_s19 + $0x18] sm:$0xff]   ;;  %v11817_v1 = vld [vmem:[%s14528_s5 + $0x110] sm:$0xff]   ;;  %v4814_v3 = vshrl.u32 %v11816_v62, 16  ;;  %v4817_v41 = vshll.u32 %v11816_v62, 16  ;;  %v11819_v17 = vld [vmem:[%s12271_s19 + $0x48] sm:$0xff]   ;;  %v4850_v58 = vshrl.u32 %v11826_v45, 16 }
 0x140   : > { %v4793_v2 = vor.u32 %v4792_v26, %v4789_v9  ;;  %v4802_v4 = vor.u32 %v4801_v14, %v4798_v6  ;;  %v4853_v25 = vshll.u32 %v11826_v45, 16  ;;  %v2198_v35 = vld [vmem:[#allocation2 + $0x4] sm:$0xf]  ;;  %v11830_v60 = vld [vmem:[#allocation2 + $0x68] sm:$0xff]   ;;  %v11824_v6 = vld [vmem:[%s12271_s19 + $0x58] sm:$0xff]   ;;  %v4898_v45 = vshll.u32 %v12622_v42, 16 }
 0x141   : > { %v9748_v46 = vpack.c.bf16 %v1171_v44, %v1171_v44  ;;  %v11800_v29 = vld [vmem:[#allocation2 + $0x98] ss:$0 sps:$4 sm:$0x11]   ;;  %v4816_v21 = vrot.slane %v4814_v3, 1  ;;  %v4819_v40 = vrot.slane %v4817_v41, 2  ;;  %v4852_v26 = vrot.slane %v4850_v58, 1 }
 0x142   : > { %v4077_v19 = vrot.slane %v11800_v29, 1  ;;  %v4794_v39 = vsel %vm4750_vm4, %v4784_v59, %v4793_v2  ;;  %v4803_v10 = vsel %vm4750_vm4, %v4793_v2, %v4802_v4  ;;  %v11821_v29 = vld [vmem:[#allocation2 + $0x50] sm:$0xff]   ;;  %v11845_v59 = vld [vmem:[%s14528_s5 + $0x138] sm:$0xff]   ;;  %v4855_v62 = vrot.slane %v4853_v25, 2  ;;  %v11828_v14 = vld [vmem:[%s12271_s19 + $0x60] sm:$0xff]  }
 0x143   : > { %1388 = vst.msk [vmem:[#allocation2 + $0xa0] sm:$0xf] %vm1347_vm1, %v9748_v46  ;;  %v11820_v46 = vld [vmem:[#allocation2 + $0x48] sm:$0xff]   ;;  %v4820_v50 = vor.u32 %v4819_v40, %v4816_v21  ;;  %v4832_v51 = vshrl.u32 %v11821_v29, 16  ;;  %v4835_v52 = vshll.u32 %v11821_v29, 16  ;;  %v12702_v21 = vld [vmem:[#allocation2 + $0x10] sm:$0xff]  }
 0x144   : > { %v12627_v22 = vld [vmem:[#allocation2 + $0x90] sm:$0xff]   ;;  %v4823_v30 = vshrl.u32 %v11820_v46, 16  ;;  %v4826_v11 = vshll.u32 %v11820_v46, 16  ;;  %v12700_v2 = vld [vmem:[%s14529_s6 + $0x28] sm:$0xff]  }
 0x145   : > { %v4075_v5 = vrot.slane %v12627_v22, 1  ;;  %v4837_v20 = vrot.slane %v4835_v52, 2  ;;  %v2347_v52 = vshll.u32 %v12702_v21, 16  ;;  %v11846_v58 = vld [vmem:[#allocation2 + $0x98] ss:$0 sps:$4 sm:$0x33]  }
 0x146   : > { %10309 = vmatmul.mubr.bf16.vlgmr.msra.gmra.mrb[44].mxu0 %v11796_v47  ;;  %v11818_v47 = vld [vmem:[%s12271_s19 + $0x40] sm:$0xff]   ;;  %v4825_v16 = vrot.slane %v4823_v30, 1  ;;  %v11829_v30 = vld [vmem:[%s12271_s19 + $0x68] sm:$0xff]  }
 0x147   : > { %v4076_v43 = vsel %vm3261_vm3, %v14534_v49, %v4075_v5  ;;  %v4078_v54 = vsel %vm3261_vm3, %v4075_v5, %v4077_v19  ;;  %10312 = vmatprep.mubr.bf16.mxu0 %v11803_v34  ;;  %10345 = vmatpush3.bf16.msra.mxu0 %v12549_v32  ;;  %v11808_v32 = vld [vmem:[%s12271_s19 + $0x20] sm:$0xff]   ;;  %v11833_v5 = vld [vmem:[%s14528_s5 + $0x128] sm:$0xff]  }
 0x148   : > { %10558 = vmatprep.mubr.msk.bf16.mxu1 %vm1578_vm2, %v4076_v43  ;;  %10382 = vmatprep.subr.bf16.mxu0 %v12633_v53  ;;  %v11827_v34 = vld [vmem:[%s14528_s5 + $0x120] sm:$0xff]   ;;  %v4828_v43 = vrot.slane %v4826_v11, 2  ;;  %v3856_v25 = vld [vmem:[%s12271_s19 + $0xc] sm:$0xf] }
 0x149   : > { %10559 = vmatmul.mubr.msk.bf16.vlgmr.msra.gmra.mrb[0].mxu1 %vm1578_vm2, %v4078_v54  ;;  %v11825_v54 = vld [vmem:[#allocation2 + $0x58] sm:$0xff]  }
 0x14a   : > { %10615 = vmatpush3.bf16.msra.mxu1 %v12422_v33  ;;  %10616 = vmatprep.mubr.msk.bf16.mxu1 %vm1578_vm2, %v4767_v56  ;;  %v11815_v33 = vld [vmem:[#allocation2 + $0x38] sm:$0xff]   ;;  %v11823_v56 = vld [vmem:[%s12271_s19 + $0x50] sm:$0xff]   ;;  %v4829_v57 = vor.u32 %v4828_v43, %v4825_v16  ;;  %v4841_v27 = vshrl.u32 %v11825_v54, 16  ;;  %v4895_v43 = vshrl.u32 %v12622_v42, 16 }
 0x14b   : > { %10652 = vmatprep.subr.bf16.mxu1 %v11805_v7  ;;  %v4805_v8 = vshrl.u32 %v11815_v33, 16  ;;  %v4808_v13 = vshll.u32 %v11815_v33, 16 }
 0x14c   : > { %v4830_v38 = vsel %vm4750_vm4, %v4820_v50, %v4829_v57 }
 0x14d   : > { %v4807_v44 = vrot.slane %v4805_v8, 1  ;;  %v4810_v23 = vrot.slane %v4808_v13, 2  ;;  %v4862_v8 = vshll.u32 %v11830_v60, 16  ;;  %v11841_v13 = vld [vmem:[#allocation2 + $0x8] sm:$0xff]  }
 0x14e   : > { %10313 = vmatmul.mubr.bf16.gmra.mrb[48].mxu0 %v11804_v37  ;;  %v4844_v37 = vshll.u32 %v11825_v54, 16  ;;  %v2339_v40 = vshll.u32 %v11841_v13, 16  ;;  %v12713_v54 = vld [vmem:[#allocation2 + $0x18] sm:$0xff]  }
 0x14f   : > { %10316 = vmatprep.mubr.bf16.mxu0 %v11808_v32  ;;  %v4811_v48 = vor.u32 %v4810_v23, %v4807_v44 }
 0x150   : > { %v4846_v33 = vrot.slane %v4844_v37, 2  ;;  %v2341_v16 = vrot.slane %v2339_v40, 1 }
 0x151   : > { %10617 = vmatmul.mubr.msk.bf16.vlgmr.msra.gmra.mrb[4].mxu1 %vm1578_vm2, %v4776_v61  ;;  %v4812_v19 = vsel %vm4750_vm4, %v4802_v4, %v4811_v48  ;;  %v4821_v55 = vsel %vm4750_vm4, %v4811_v48, %v4820_v50  ;;  %v2197_v61 = vld [vmem:[#allocation2] sm:$0xf]  ;;  %v4856_v4 = vor.u32 %v4855_v62, %v4852_v26  ;;  %v12720_v26 = vld [vmem:[#allocation2 + $0x8] sm:$0xc] }
 0x152   : > { %10653 = vmatpush3.bf16.msra.mxu1 %v11805_v7  ;;  %10620 = vmatprep.mubr.msk.bf16.mxu1 %vm1578_vm2, %v4785_v63  ;;  %v4834_v7 = vrot.slane %v4832_v51, 1  ;;  %v11831_v63 = vld [vmem:[#allocation2 + $0x70] sm:$0xff]  }
 0x153   : > { %10654 = vmatprep.subr.bf16.mxu1 %v11811_v36  ;;  %v4868_v41 = vshrl.u32 %v11831_v63, 16  ;;  %v4871_v44 = vshll.u32 %v11831_v63, 16  ;;  %v2351_v63 = vshrl.u32 %v12702_v21, 16  ;;  %v12743_v21 = vld [vmem:[#allocation2 + $0x28] sm:$0xff]  }
 0x154   : > { %v4838_v32 = vor.u32 %v4837_v20, %v4834_v7 }
 0x155   : > { %v4873_v48 = vrot.slane %v4871_v44, 2  ;;  %v4904_v44 = vshrl.u32 %v12627_v22, 16 }
 0x156   : > { %10317 = vmatmul.mubr.bf16.gmra.mrb[52].mxu0 %v11809_v0  ;;  %10655 = vmatpush3.bf16.msra.mxu1 %v11811_v36  ;;  %v4843_v36 = vrot.slane %v4841_v27, 1  ;;  %v4839_v9 = vsel %vm4750_vm4, %v4829_v57, %v4838_v32  ;;  %v11835_v0 = vld [vmem:[#allocation2 + $0x78] sm:$0xff]   ;;  %v3855_v57 = vld [vmem:[%s12271_s19 + $0x8] sm:$0xe] }
 0x157   : > { %10320 = vmatprep.mubr.bf16.mxu0 %v11813_v15  ;;  %10656 = vmatprep.subr.bf16.mxu1 %v11817_v1  ;;  %v9230_v15 = vcombine.low %v2197_v61, %v2198_v35  ;;  %v4877_v23 = vshrl.u32 %v11835_v0, 16  ;;  %v4900_v61 = vrot.slane %v4898_v45, 2  ;;  %v11855_v45 = vld [vmem:[%s12271_s19 + $0x20] sm:$0xff]  }
 0x158   : > { %v4847_v3 = vor.u32 %v4846_v33, %v4843_v36 }
 0x159   : > { %10621 = vmatmul.mubr.msk.bf16.gmra.mrb[8].mxu1 %vm1578_vm2, %v4794_v39  ;;  %v2334_v39 = vshll.u32 %v9230_v15, 16  ;;  %v4879_v11 = vrot.slane %v4877_v23, 1  ;;  %v2332_v20 = vshrl.u32 %v9230_v15, 16  ;;  %v11834_v15 = vld [vmem:[%s12271_s19 + $0x78] sm:$0xff]   ;;  %v4907_v23 = vshll.u32 %v12627_v22, 16 }
 0x15a   : > { %10624 = vmatprep.mubr.msk.bf16.mxu1 %vm1578_vm2, %v4803_v10  ;;  %10657 = vmatpush3.bf16.msra.mxu1 %v11817_v1  ;;  %v4859_v1 = vshrl.u32 %v11830_v60, 16  ;;  %v4864_v10 = vrot.slane %v4862_v8, 2  ;;  %v4848_v29 = vsel %vm4750_vm4, %v4838_v32, %v4847_v3  ;;  %v2349_v32 = vrot.slane %v2347_v52, 1 }
 0x15b   : > { %10658 = vmatprep.subr.bf16.mxu1 %v11822_v31  ;;  %v2336_v51 = vrot.slane %v2334_v39, 1  ;;  %v4897_v60 = vrot.slane %v4895_v43, 1  ;;  %v4916_v39 = vshll.u32 %v11846_v58, 16  ;;  %v4906_v52 = vrot.slane %v4904_v44, 1 }
 0x15c   : > { %v4861_v46 = vrot.slane %v4859_v1, 1  ;;  %v2375_v44 = vshrl.u32 %v12743_v21, 16 }
 0x15d   : > { %v2337_v37 = vor.u32 %v2336_v51, %v2332_v20 }
 0x15e   : > { %10321 = vmatmul.mubr.bf16.gmra.mrb[56].mxu0 %v11814_v24  ;;  %10659 = vmatpush3.bf16.msra.mxu1 %v11822_v31  ;;  %v4880_v31 = vshll.u32 %v11835_v0, 16  ;;  %v11836_v24 = vld [vmem:[#allocation2 + $0x80] sm:$0xff]   ;;  %v9490_v0 = vcombine.low %v12720_v26, %v12606_v28 }
 0x15f   : > { %10324 = vmatprep.mubr.bf16.mxu0 %v11818_v47  ;;  %10660 = vmatprep.subr.bf16.mxu1 %v11827_v34  ;;  %v4857_v47 = vsel %vm4750_vm4, %v4847_v3, %v4856_v4  ;;  %v4889_v7 = vshll.u32 %v11836_v24, 16  ;;  %v12734_v8 = vsel %vm2330_vm5, %v2337_v37, %v2341_v16  ;;  %v4913_v3 = vshrl.u32 %v11846_v58, 16  ;;  %v12752_v37 = vld [vmem:[#allocation2 + $0x38] sm:$0xff]  }
 0x160   : > { %v4882_v50 = vrot.slane %v4880_v31, 2  ;;  %v2353_v31 = vor.u32 %v2351_v63, %v2349_v32  ;;  %v5191_v63 = vshll.u32 %v11855_v45, 16 }
 0x161   : > { %10625 = vmatmul.mubr.msk.bf16.gmra.mrb[12].mxu1 %vm1578_vm2, %v4812_v19  ;;  %v11832_v19 = vld [vmem:[%s12271_s19 + $0x70] sm:$0xff]   ;;  %v4891_v33 = vrot.slane %v4889_v7, 2 }
 0x162   : > { %10628 = vmatprep.mubr.msk.bf16.mxu1 %vm1578_vm2, %v4821_v55  ;;  %10661 = vmatpush3.bf16.msra.mxu1 %v11827_v34  ;;  %v4870_v34 = vrot.slane %v4868_v41, 1  ;;  %v4886_v55 = vshrl.u32 %v11836_v24, 16  ;;  %v4883_v27 = vor.u32 %v4882_v50, %v4879_v11  ;;  %v11837_v41 = vld [vmem:[%s12271_s19 + $0x80] sm:$0xff]   ;;  %v11853_v24 = vld [vmem:[#allocation2 + $0x30] sm:$0xff]   ;;  %v4915_v11 = vrot.slane %v4913_v3, 1 }
 0x163   : > { %10662 = vmatprep.subr.bf16.mxu1 %v11833_v5  ;;  %v2379_v20 = vshll.u32 %v11853_v24, 16  ;;  %v2387_v3 = vshll.u32 %v12752_v37, 16 }
 0x164   : > { %v4888_v36 = vrot.slane %v4886_v55, 1  ;;  %v2359_v55 = vshrl.u32 %v12713_v54, 16 }
 0x166   : > { %10325 = vmatmul.mubr.bf16.gmra.mrb[60].mxu0 %v11819_v17  ;;  %10663 = vmatpush3.bf16.msra.mxu1 %v11833_v5  ;;  %v4865_v5 = vor.u32 %v4864_v10, %v4861_v46  ;;  %v11847_v17 = vld [vmem:[#allocation2 + $0x20] sm:$0xff]   ;;  %v4892_v46 = vor.u32 %v4891_v33, %v4888_v36  ;;  %v4901_v10 = vor.u32 %v4900_v61, %v4897_v60 }
 0x167   : > { %10328 = vmatprep.mubr.bf16.mxu0 %v11823_v56  ;;  %10664 = vmatprep.subr.bf16.mxu1 %v11839_v18  ;;  %v4874_v56 = vor.u32 %v4873_v48, %v4870_v34  ;;  %v2367_v50 = vshrl.u32 %v11847_v17, 16  ;;  %v11857_v33 = vld [vmem:[#allocation2 + $0x40] sm:$0xff]  }
 0x168   : > { %v4866_v35 = vsel %vm4750_vm4, %v4856_v4, %v4865_v5  ;;  %v11852_v4 = vld [vmem:[%s12271_s19 + $0x18] sm:$0xff]   ;;  %v4893_v43 = vsel %vm4750_vm4, %v4883_v27, %v4892_v46 }
 0x169   : > { %10629 = vmatmul.mubr.msk.bf16.gmra.mrb[16].mxu1 %vm1578_vm2, %v4830_v38  ;;  %v2355_v38 = vshll.u32 %v12713_v54, 16  ;;  %v4875_v62 = vsel %vm4750_vm4, %v4865_v5, %v4874_v56  ;;  %v4884_v1 = vsel %vm4750_vm4, %v4874_v56, %v4883_v27  ;;  %v5179_v22 = vshrl.u32 %v11852_v4, 16 }
 0x16a   : > { %10632 = vmatprep.mubr.msk.bf16.mxu1 %vm1578_vm2, %v4839_v9  ;;  %10665 = vmatpush3.bf16.msra.mxu1 %v11839_v18  ;;  %v2343_v18 = vshrl.u32 %v11841_v13, 16  ;;  %v2363_v9 = vshll.u32 %v11847_v17, 16  ;;  %v5182_v51 = vshll.u32 %v11852_v4, 16  ;;  %v4909_v5 = vrot.slane %v4907_v23, 2  ;;  %v11859_v4 = vld [vmem:[%s12271_s19 + $0x30] sm:$0xff]  }
 0x16b   : > { %10666 = vmatprep.subr.bf16.mxu1 %v11845_v59  ;;  %v2357_v40 = vrot.slane %v2355_v38, 1  ;;  %v5181_v54 = vrot.slane %v5179_v22, 1  ;;  %v2383_v23 = vshrl.u32 %v11853_v24, 16  ;;  %v5206_v24 = vshrl.u32 %v11859_v4, 16 }
 0x16c   : > { %v4910_v60 = vor.u32 %v4909_v5, %v4906_v52  ;;  %v5209_v22 = vshll.u32 %v11859_v4, 16 }
 0x16d   : > { %v12757_v58 = vsel %vm2330_vm5, %v2353_v31, %v2357_v40  ;;  %v2361_v27 = vor.u32 %v2359_v55, %v2357_v40 }
 0x16e   : > { %10329 = vmatmul.mubr.bf16.gmra.mrb[64].mxu0 %v11824_v6  ;;  %10667 = vmatpush3.bf16.msra.mxu1 %v11845_v59  ;;  %v2345_v59 = vor.u32 %v2343_v18, %v2341_v16  ;;  %v12725_v6 = vcombine.low %v3855_v57, %v3856_v25  ;;  %v2371_v16 = vshll.u32 %v12743_v21, 16  ;;  %v5184_v25 = vrot.slane %v5182_v51, 2  ;;  %v12777_v21 = vld [vmem:[#allocation2 + $0x50] sm:$0xff]   ;;  %v11863_v51 = vld [vmem:[%s12271_s19 + $0x40] sm:$0xff]  }
 0x16f   : > { %10332 = vmatprep.mubr.bf16.mxu0 %v11828_v14  ;;  %10704 = vmatprep.subr.bf16.mxu1 %v12700_v2  ;;  %v11850_v14 = vld [vmem:[%s12271_s19 + $0x10] sm:$0xff]  }
 0x170   : > { %14544 = vst [vmem:[#allocation5_spill] sm:$0xff] %v12725_v6  ;;  %v12737_v13 = vsel %vm2330_vm5, %v2345_v59, %v2349_v32  ;;  %v5165_v34 = vshll.u32 %v12725_v6, 16  ;;  %v5170_v48 = vshrl.u32 %v11850_v14, 16  ;;  %v11838_v32 = vld [vmem:[%s12271_s19 + $0x88] sm:$0xff]   ;;  %v4902_v59 = vsel %vm4750_vm4, %v4892_v46, %v4901_v10 }
 0x171   : > { %10633 = vmatmul.mubr.msk.bf16.gmra.mrb[20].mxu1 %vm1578_vm2, %v4848_v29  ;;  %v2365_v29 = vrot.slane %v2363_v9, 1  ;;  %v2373_v36 = vrot.slane %v2371_v16, 1  ;;  %v2381_v9 = vrot.slane %v2379_v20, 1  ;;  %v2391_v16 = vshrl.u32 %v12752_v37, 16 }
 0x172   : > { %10636 = vmatprep.mubr.msk.bf16.mxu1 %vm1578_vm2, %v4857_v47  ;;  %v5162_v47 = vshrl.u32 %v12725_v6, 16  ;;  %v5167_v56 = vrot.slane %v5165_v34, 2  ;;  %v5172_v18 = vrot.slane %v5170_v48, 1  ;;  %v5211_v37 = vrot.slane %v5209_v22, 2 }
 0x173   : > { %v2369_v7 = vor.u32 %v2367_v50, %v2365_v29  ;;  %v12762_v61 = vsel %vm2330_vm5, %v2361_v27, %v2365_v29  ;;  %v2395_v29 = vshll.u32 %v11857_v33, 16  ;;  %v2377_v34 = vor.u32 %v2375_v44, %v2373_v36  ;;  %v12775_v50 = vld [vmem:[#allocation2 + $0x48] sm:$0xff]   ;;  %v11868_v44 = vld [vmem:[%s12271_s19 + $0x50] sm:$0xff]  }
 0x174   : > { %v5164_v17 = vrot.slane %v5162_v47, 1  ;;  %v11860_v47 = vld [vmem:[%s12271_s19 + $0x38] sm:$0xff]   ;;  %v2385_v48 = vor.u32 %v2383_v23, %v2381_v9  ;;  %v2399_v27 = vshrl.u32 %v11857_v33, 16  ;;  %v11872_v23 = vld [vmem:[%s14528_s5 + $0x50] sm:$0xff]   ;;  %v5245_v22 = vshll.u32 %v11868_v44, 16 }
 0x175   : > { %v12787_v5 = vsel %vm2330_vm5, %v2377_v34, %v2381_v9  ;;  %v5215_v20 = vshrl.u32 %v11860_v47, 16  ;;  %v12803_v9 = vld [vmem:[#allocation2 + $0x60] sm:$0xff]  }
 0x176   : > { %10333 = vmatmul.mubr.bf16.gmra.mrb[68].mxu0 %v11829_v30  ;;  %v5173_v30 = vshll.u32 %v11850_v14, 16  ;;  %v12765_v14 = vsel %vm2330_vm5, %v2369_v7, %v2373_v36  ;;  %v2397_v7 = vrot.slane %v2395_v29, 1 }
 0x177   : > { %10336 = vmatprep.mubr.bf16.mxu0 %v11832_v19  ;;  %v4918_v19 = vrot.slane %v4916_v39, 2  ;;  %v4911_v39 = vsel %vm4750_vm4, %v4901_v10, %v4910_v60  ;;  %v2389_v10 = vrot.slane %v2387_v3, 1  ;;  %v2407_v3 = vshrl.u32 %v12775_v50, 16 }
 0x178   : > { %v5175_v57 = vrot.slane %v5173_v30, 2  ;;  %v2401_v33 = vor.u32 %v2399_v27, %v2397_v7  ;;  %v11874_v27 = vld [vmem:[%s12271_s19 + $0x60] sm:$0xff]  }
 0x179   : > { %10637 = vmatmul.mubr.msk.bf16.gmra.mrb[24].mxu1 %vm1578_vm2, %v4866_v35  ;;  %v11856_v35 = vld [vmem:[%s12271_s19 + $0x28] sm:$0xff]   ;;  %v4919_v38 = vor.u32 %v4918_v19, %v4915_v11  ;;  %v5193_v11 = vrot.slane %v5191_v63, 2  ;;  %v5217_v63 = vrot.slane %v5215_v20, 1 }
 0x17a   : > { %10640 = vmatprep.mubr.msk.bf16.mxu1 %vm1578_vm2, %v4875_v62  ;;  %v5188_v62 = vshrl.u32 %v11855_v45, 16  ;;  %v5197_v31 = vshrl.u32 %v11856_v35, 16  ;;  %v5200_v40 = vshll.u32 %v11856_v35, 16  ;;  %v5218_v45 = vshll.u32 %v11860_v47, 16 }
 0x17b   : > { %v4920_v46 = vsel %vm4750_vm4, %v4910_v60, %v4919_v38  ;;  %v5224_v35 = vshrl.u32 %v11863_v51, 16  ;;  %v5227_v60 = vshll.u32 %v11863_v51, 16  ;;  %v11876_v51 = vld [vmem:[%s14528_s5 + $0x58] sm:$0xff]  }
 0x17c   : > { %v5190_v30 = vrot.slane %v5188_v62, 1  ;;  %v5199_v19 = vrot.slane %v5197_v31, 1  ;;  %v5202_v55 = vrot.slane %v5200_v40, 2  ;;  %v2415_v31 = vshrl.u32 %v12777_v21, 16  ;;  %v12817_v40 = vld [vmem:[#allocation2 + $0x68] sm:$0xff]  }
 0x17d   : > { %v5229_v29 = vrot.slane %v5227_v60, 2  ;;  %v12865_v60 = vld [vmem:[#allocation2 + $0x78] sm:$0xff]  }
 0x17e   : > { %10337 = vmatmul.mubr.bf16.gmra.mrb[72].mxu0 %v11834_v15  ;;  %v5168_v15 = vor.u32 %v5167_v56, %v5164_v17  ;;  %v12792_v17 = vsel %vm2330_vm5, %v2385_v48, %v2389_v10  ;;  %v5194_v56 = vor.u32 %v5193_v11, %v5190_v30  ;;  %v5203_v62 = vor.u32 %v5202_v55, %v5199_v19 }
 0x17f   : > { %10340 = vmatprep.mubr.bf16.mxu0 %v11837_v41  ;;  %v5185_v41 = vor.u32 %v5184_v25, %v5181_v54  ;;  %v5208_v54 = vrot.slane %v5206_v24, 1  ;;  %v12799_v25 = vld [vmem:[#allocation2 + $0x58] sm:$0xff]   ;;  %v2427_v48 = vshll.u32 %v12803_v9, 16  ;;  %v5242_v24 = vshrl.u32 %v11868_v44, 16  ;;  %v12886_v44 = vld [vmem:[#allocation2 + $0x88] sm:$0xff]  }
 0x180   : > { %v12822_v30 = vsel %vm4750_vm4, %v5194_v56, %v5203_v62 }
 0x181   : > { %10641 = vmatmul.mubr.msk.bf16.gmra.mrb[28].mxu1 %vm1578_vm2, %v4884_v1  ;;  %v5176_v1 = vor.u32 %v5175_v57, %v5172_v18  ;;  %v2403_v18 = vshll.u32 %v12775_v50, 16  ;;  %v2411_v57 = vshll.u32 %v12777_v21, 16  ;;  %v12830_v21 = vld [vmem:[#allocation2 + $0x70] sm:$0xff]  }
 0x182   : > { %10644 = vmatprep.mubr.msk.bf16.mxu1 %vm1578_vm2, %v4893_v43  ;;  %v11864_v43 = vld [vmem:[%s12271_s19 + $0x48] sm:$0xff]  }
 0x183   : > { %v12784_v52 = vsel %vm4750_vm4, %v5176_v1, %v5185_v41  ;;  %v5233_v38 = vshrl.u32 %v11864_v43, 16  ;;  %v5236_v36 = vshll.u32 %v11864_v43, 16  ;;  %v2413_v4 = vrot.slane %v2411_v57, 1 }
 0x185   : > { %v5235_v47 = vrot.slane %v5233_v38, 1  ;;  %v5238_v34 = vrot.slane %v5236_v36, 2 }
 0x186   : > { %10341 = vmatmul.mubr.bf16.gmra.mrb[76].mxu0 %v11838_v32  ;;  %v11870_v32 = vld [vmem:[%s14528_s5 + $0x48] sm:$0xff]  }
 0x187   : > { %10346 = vmatprep.mubr.msk.bf16.mxu0 %vm1578_vm2, %v12734_v8  ;;  %v5177_v8 = vsel %vm4750_vm4, %v5168_v15, %v5176_v1  ;;  %v5220_v15 = vrot.slane %v5218_v45, 2  ;;  %v5195_v1 = vsel %vm4750_vm4, %v5185_v41, %v5194_v56  ;;  %v11869_v41 = vld [vmem:[%s12271_s19 + $0x58] sm:$0xff]   ;;  %v12841_v45 = vor.u32 %v5238_v34, %v5235_v47 }
 0x188   : > { %v5251_v43 = vshrl.u32 %v11869_v41, 16  ;;  %v5254_v55 = vshll.u32 %v11869_v41, 16  ;;  %v12843_v56 = vrot.slane %v2427_v48, 1  ;;  %v5263_v41 = vshll.u32 %v11874_v27, 16 }
 0x189   : > { %10645 = vmatmul.mubr.msk.bf16.gmra.mrb[32].mxu1 %vm1578_vm2, %v4902_v59  ;;  %v2393_v59 = vor.u32 %v2391_v16, %v2389_v10  ;;  %v5221_v50 = vor.u32 %v5220_v15, %v5217_v63  ;;  %v2435_v16 = vshll.u32 %v12817_v40, 16  ;;  %v12872_v63 = vld [vmem:[%s12271_s19 + $0x68] sm:$0xff]   ;;  %v3287_v47 = vrot.slane %v12817_v40, 1 }
 0x18a   : > { %10648 = vmatprep.mubr.msk.bf16.mxu1 %vm1578_vm2, %v4911_v39  ;;  %v2419_v39 = vshll.u32 %v12799_v25, 16 }
 0x18b   : > { %v2437_v36 = vrot.slane %v2435_v16, 1  ;;  %v5265_v16 = vrot.slane %v5263_v41, 2  ;;  %v11887_v41 = vld [vmem:[%s14528_s5 + $0x78] sm:$0xff]  }
 0x18c   : > { %v2421_v19 = vrot.slane %v2419_v39, 1 }
 0x18e   : > { %10347 = vmatmul.mubr.msk.bf16.vlgmr.msra.gmra.mrb[44].mxu0 %vm1578_vm2, %v12737_v13  ;;  %v2405_v13 = vrot.slane %v2403_v18, 1 }
 0x18f   : > { %10350 = vmatprep.mubr.msk.bf16.mxu0 %vm1578_vm2, %v12757_v58  ;;  %10383 = vmatpush3.bf16.msra.mxu0 %v12633_v53  ;;  %v5212_v58 = vor.u32 %v5211_v37, %v5208_v54  ;;  %v5226_v53 = vrot.slane %v5224_v35, 1  ;;  %v12859_v54 = vld [vmem:[%s14528_s5 + $0x140] sm:$0xff]   ;;  %v2431_v37 = vshrl.u32 %v12803_v9, 16  ;;  %v5244_v35 = vrot.slane %v5242_v24, 1 }
 0x190   : > { %10384 = vmatprep.subr.bf16.mxu0 %v11870_v32  ;;  %v12828_v11 = vsel %vm2330_vm5, %v2401_v33, %v2405_v13  ;;  %v2409_v10 = vor.u32 %v2407_v3, %v2405_v13  ;;  %v5256_v33 = vrot.slane %v5254_v55, 2  ;;  %v3291_v24 = vrot.slane %v12865_v60, 1  ;;  %v11884_v55 = vld [vmem:[%s14528_s5 + $0x70] sm:$0xff]  }
 0x191   : > { %10649 = vmatmul.mubr.msk.bf16.gmra.mrb[36].mxu1 %vm1578_vm2, %v4920_v46  ;;  %v12825_v46 = vsel %vm2330_vm5, %v2393_v59, %v2397_v7  ;;  %v12839_v7 = vsel %vm4750_vm4, %v5203_v62, %v5212_v58  ;;  %v5230_v20 = vor.u32 %v5229_v29, %v5226_v53  ;;  %v12848_v18 = vsel %vm4750_vm4, %v5212_v58, %v5221_v50  ;;  %v11882_v29 = vld [vmem:[%s14528_s5 + $0x68] sm:$0xff]  }
 0x192   : > { %10668 = vmatprep.mubr.bf16.mxu1 %v5177_v8  ;;  %v2417_v8 = vor.u32 %v2415_v31, %v2413_v4  ;;  %v12851_v57 = vsel %vm2330_vm5, %v2409_v10, %v2413_v4  ;;  %v5247_v59 = vrot.slane %v5245_v22, 2  ;;  %v5253_v62 = vrot.slane %v5251_v43, 1  ;;  %v12884_v4 = vld [vmem:[#allocation2 + $0x80] sm:$0xff]   ;;  %v11880_v43 = vld [vmem:[%s12271_s19 + $0x70] sm:$0xff]  }
 0x193   : > { %10385 = vmatpush3.bf16.msra.mxu0 %v11870_v32  ;;  %v2423_v32 = vshrl.u32 %v12799_v25, 16  ;;  %v11878_v25 = vld [vmem:[%s14528_s5 + $0x60] sm:$0xff]   ;;  %v12876_v15 = vsel %vm4750_vm4, %v5221_v50, %v5230_v20  ;;  %v12880_v13 = vsel %vm4750_vm4, %v5230_v20, %v12841_v45  ;;  %v2433_v3 = vor.u32 %v2431_v37, %v12843_v56 }
 0x194   : > { %10386 = vmatprep.subr.bf16.mxu0 %v11872_v23  ;;  %v14535_v31 = vrot.slane %v12803_v9, 1  ;;  %v5248_v39 = vor.u32 %v5247_v59, %v5244_v35  ;;  %v2451_v53 = vshll.u32 %v12865_v60, 16  ;;  %v12898_v34 = vor.u32 %v5256_v33, %v5253_v62  ;;  %v11881_v35 = vld [vmem:[%s12271_s19 + $0x78] sm:$0xff]   ;;  %v2143_v59 = vld [vmem:[%s12271_s19] sm:$0xf] }
 0x195   : > { %v2425_v38 = vor.u32 %v2423_v32, %v2421_v19  ;;  %v5269_v50 = vshrl.u32 %v12872_v63, 16  ;;  %v3289_v10 = vrot.slane %v12830_v21, 1  ;;  %v3295_v22 = vrot.slane %v12886_v44, 1  ;;  %v11885_v33 = vld [vmem:[%s12271_s19 + $0x80] sm:$0xff]  }
 0x196   : > { %10351 = vmatmul.mubr.msk.bf16.gmra.mrb[48].mxu0 %vm1578_vm2, %v12762_v61  ;;  %v2443_v61 = vshll.u32 %v12830_v21, 16  ;;  %v2453_v37 = vrot.slane %v2451_v53, 1  ;;  %v5278_v53 = vshrl.u32 %v11880_v43, 16 }
 0x197   : > { %10354 = vmatprep.mubr.msk.bf16.mxu0 %vm1578_vm2, %v12765_v14  ;;  %10387 = vmatpush3.bf16.msra.mxu0 %v11872_v23  ;;  %v12862_v14 = vsel %vm2330_vm5, %v2417_v8, %v2421_v19  ;;  %v12888_v23 = vld [vmem:[#allocation2 + $0x90] ss:$0 sps:$4 sm:$0x11]   ;;  %v12907_v8 = vsel %vm3261_vm3, %v14535_v31, %v3287_v47  ;;  %v11892_v31 = vld [vmem:[%s12271_s19 + $0x98] ss:$0 sps:$4 sm:$0x33]  }
 0x198   : > { %10388 = vmatprep.subr.bf16.mxu0 %v11876_v51  ;;  %v2445_v58 = vrot.slane %v2443_v61, 1  ;;  %v3297_v19 = vrot.slane %v12888_v23, 1  ;;  %v12934_v61 = vsel %vm2330_vm5, %v2425_v38, %v12843_v56  ;;  %v12952_v56 = vsel %vm4750_vm4, %v5248_v39, %v12898_v34 }
 0x199   : > { %10669 = vmatmul.mubr.bf16.vlgmr.msra.gmra.mrb[4].mxu1 %v12784_v52  ;;  %v2439_v52 = vshrl.u32 %v12817_v40, 16  ;;  %v3293_v40 = vrot.slane %v12884_v4, 1 }
 0x19a   : > { %10705 = vmatpush3.bf16.msra.mxu1 %v12700_v2  ;;  %10672 = vmatprep.mubr.bf16.mxu1 %v5195_v1  ;;  %v2447_v2 = vshrl.u32 %v12830_v21, 16  ;;  %v5260_v1 = vshrl.u32 %v11874_v27, 16  ;;  %v12937_v27 = vsel %vm2330_vm5, %v2433_v3, %v2437_v36  ;;  %v12943_v62 = vsel %vm3261_vm3, %v3295_v22, %v3297_v19  ;;  %v11886_v3 = vld [vmem:[%s12271_s19 + $0x88] sm:$0xff]   ;;  %v12983_v19 = vld [vmem:[%s12271_s19 + $0x10] sm:$0xff]  }
 0x19b   : > { %10389 = vmatpush3.bf16.msra.mxu0 %v11876_v51  ;;  %10742 = vmatprep.subr.bf16.mxu1 %v12859_v54  ;;  %v2441_v48 = vor.u32 %v2439_v52, %v2437_v36  ;;  %v12926_v20 = vsel %vm3261_vm3, %v3291_v24, %v3293_v40  ;;  %v12929_v32 = vsel %vm3261_vm3, %v3293_v40, %v3295_v22  ;;  %v5271_v36 = vrot.slane %v5269_v50, 1 }
 0x19c   : > { %10390 = vmatprep.subr.bf16.mxu0 %v11878_v25  ;;  %v2449_v51 = vor.u32 %v2447_v2, %v2445_v58  ;;  %v5262_v21 = vrot.slane %v5260_v1, 1  ;;  %v5272_v2 = vshll.u32 %v12872_v63, 16  ;;  %v12966_v1 = vld [vmem:[%s12271_s19 + $0x8] sm:$0xff]   ;;  %v5281_v63 = vshll.u32 %v11880_v43, 16 }
 0x19d   : > { %v12955_v38 = vsel %vm2330_vm5, %v2441_v48, %v2445_v58  ;;  %v2467_v58 = vshll.u32 %v12886_v44, 16  ;;  %v5287_v48 = vshrl.u32 %v11881_v35, 16  ;;  %v5296_v50 = vshrl.u32 %v11885_v33, 16 }
 0x19e   : > { %10355 = vmatmul.mubr.msk.bf16.gmra.mrb[52].mxu0 %vm1578_vm2, %v12787_v5  ;;  %v12915_v5 = vsel %vm3261_vm3, %v3287_v47, %v3289_v10  ;;  %v12960_v52 = vsel %vm2330_vm5, %v2449_v51, %v2453_v37  ;;  %v5308_v40 = vshll.u32 %v11886_v3, 16  ;;  %v5274_v22 = vrot.slane %v5272_v2, 2 }
 0x19f   : > { %10358 = vmatprep.mubr.msk.bf16.mxu0 %vm1578_vm2, %v12792_v17  ;;  %10391 = vmatpush3.bf16.msra.mxu0 %v11878_v25  ;;  %v12923_v17 = vsel %vm3261_vm3, %v3289_v10, %v3291_v24  ;;  %v2144_v25 = vld [vmem:[%s12271_s19 + $0x4] sm:$0xf]  ;;  %v5299_v10 = vshll.u32 %v11885_v33, 16  ;;  %v5305_v24 = vshrl.u32 %v11886_v3, 16  ;;  %v5280_v43 = vrot.slane %v5278_v53, 1 }
 0x1a0   : > { %10392 = vmatprep.subr.bf16.mxu0 %v11882_v29  ;;  %v12974_v47 = vcombine.low %v2143_v59, %v2144_v25  ;;  %v11891_v59 = vld [vmem:[%s12271_s19 + $0x90] sm:$0xff]   ;;  %v5298_v33 = vrot.slane %v5296_v50, 1  ;;  %v2821_v53 = vshrl.u32 %v12966_v1, 16  ;;  %v2825_v49 = vshll.u32 %v12983_v19, 16 }
 0x1a1   : > { %10673 = vmatmul.mubr.bf16.gmra.mrb[8].mxu1 %v12822_v30  ;;  %v12948_v30 = vsel %vm4750_vm4, %v12841_v45, %v5248_v39  ;;  %v2459_v45 = vshll.u32 %v12884_v4, 16  ;;  %v12968_v39 = vor.u32 %v5265_v16, %v5262_v21  ;;  %v2469_v16 = vrot.slane %v2467_v58, 1 }
 0x1a2   : > { %10676 = vmatprep.mubr.bf16.mxu1 %v12839_v7  ;;  %v2455_v7 = vshrl.u32 %v12865_v60, 16  ;;  %v2463_v60 = vshrl.u32 %v12884_v4, 16  ;;  %v2817_v4 = vshll.u32 %v12966_v1, 16  ;;  %v5301_v3 = vrot.slane %v5299_v10, 2 }
 0x1a3   : > { %10393 = vmatpush3.bf16.msra.mxu0 %v11882_v29  ;;  %v5290_v29 = vshll.u32 %v11881_v35, 16  ;;  %v2461_v21 = vrot.slane %v2459_v45, 1  ;;  %v2812_v35 = vshll.u32 %v12974_v47, 16  ;;  %v5307_v2 = vrot.slane %v5305_v24, 1 }
 0x1a4   : > { %10394 = vmatprep.subr.bf16.mxu0 %v11884_v55  ;;  %v2457_v51 = vor.u32 %v2455_v7, %v2453_v37  ;;  %v5289_v37 = vrot.slane %v5287_v48, 1  ;;  %v5310_v7 = vrot.slane %v5308_v40, 2  ;;  %v5275_v45 = vor.u32 %v5274_v22, %v5271_v36  ;;  %v6283_v40 = vld [vmem:[#allocation2 + $0x10] sm:$0xc] }
 0x1a5   : > { %v5292_v25 = vrot.slane %v5290_v29, 2  ;;  %v2819_v58 = vrot.slane %v2817_v4, 1  ;;  %v5314_v48 = vshrl.u32 %v11891_v59, 16  ;;  %v5317_v29 = vshll.u32 %v11891_v59, 16 }
 0x1a6   : > { %10359 = vmatmul.mubr.msk.bf16.gmra.mrb[56].mxu0 %vm1578_vm2, %v12825_v46  ;;  %v12988_v46 = vsel %vm4750_vm4, %v12898_v34, %v12968_v39  ;;  %v2475_v34 = vshll.u32 %v12888_v23, 16  ;;  %v13008_v23 = vsel %vm2330_vm5, %v2457_v51, %v2461_v21  ;;  %v2465_v36 = vor.u32 %v2463_v60, %v2461_v21 }
 0x1a7   : > { %10362 = vmatprep.mubr.msk.bf16.mxu0 %vm1578_vm2, %v12828_v11  ;;  %10395 = vmatpush3.bf16.msra.mxu0 %v11884_v55  ;;  %v12995_v11 = vld [vmem:[%s14529_s6 + $0x10] sm:$0xff]   ;;  %v5283_v55 = vrot.slane %v5281_v63, 2  ;;  %v2814_v63 = vrot.slane %v2812_v35, 1  ;;  %v2471_v1 = vshrl.u32 %v12886_v44, 16  ;;  %v5293_v50 = vor.u32 %v5292_v25, %v5289_v37  ;;  %v13049_v25 = vld [vmem:[#allocation2 + $0x20] sm:$0xff]  }
 0x1a8   : > { %10396 = vmatprep.subr.bf16.mxu0 %v11887_v41  ;;  %v5302_v10 = vor.u32 %v5301_v3, %v5298_v33  ;;  %v13013_v24 = vor.u32 %v5310_v7, %v5307_v2  ;;  %v2823_v4 = vor.u32 %v2821_v53, %v2819_v58  ;;  %v13017_v51 = vrot.slane %v2825_v49, 1  ;;  %v13061_v3 = vld [vmem:[%s12271_s19 + $0x18] sm:$0xff]  }
 0x1a9   : > { %10677 = vmatmul.mubr.bf16.gmra.mrb[12].mxu1 %v12848_v18  ;;  %v2810_v18 = vshrl.u32 %v12974_v47, 16  ;;  %v2477_v47 = vrot.slane %v2475_v34, 1  ;;  %v2473_v22 = vor.u32 %v2471_v1, %v2469_v16  ;;  %v5316_v21 = vrot.slane %v5314_v48, 1  ;;  %v13057_v34 = vld [vmem:[#allocation2 + $0x10] sm:$0xff]  }
 0x1aa   : > { %10680 = vmatprep.mubr.bf16.mxu1 %v12876_v15  ;;  %v13005_v15 = vld [vmem:[#allocation2 + $0x14] sm:$0xf]  ;;  %v13025_v35 = vsel %vm4750_vm4, %v12968_v39, %v5275_v45  ;;  %v5326_v59 = vshll.u32 %v11892_v31, 16  ;;  %v13043_v39 = vsel %vm4750_vm4, %v5293_v50, %v5302_v10  ;;  %v14536_v33 = vrot.slane %v13057_v34, 2 }
 0x1ab   : > { %10397 = vmatpush3.bf16.msra.mxu0 %v11887_v41  ;;  %v5284_v41 = vor.u32 %v5283_v55, %v5280_v43  ;;  %v13020_v60 = vcombine.low %v6283_v40, %v13005_v15  ;;  %v2815_v44 = vor.u32 %v2814_v63, %v2810_v18  ;;  %v5319_v43 = vrot.slane %v5317_v29, 2  ;;  %v13033_v55 = vld [vmem:[#allocation2 + $0x18] sm:$0xff]   ;;  %v13077_v29 = vld [vmem:[#allocation2 + $0x30] sm:$0xff]   ;;  %v13097_v40 = vld [vmem:[#allocation2 + $0x40] sm:$0xff]  }
 0x1ac   : > { %10434 = vmatprep.subr.bf16.mxu0 %v12995_v11  ;;  %v5636_v63 = vrot.slane %v9490_v0, 2  ;;  %v13075_v48 = vrot.slane %v5326_v59, 2  ;;  %v7134_v1 = vshrl.u32 %v13033_v55, 16  ;;  %v7146_v28 = vshll.u32 %v13049_v25, 16 }
 0x1ad   : > { %14545 = vst [vmem:[#allocation6_spill] sm:$0xff] %v13020_v60  ;;  %v13031_v49 = vsel %vm4750_vm4, %v5275_v45, %v5284_v41  ;;  %v13037_v37 = vsel %vm4750_vm4, %v5284_v41, %v5293_v50  ;;  %v7126_v2 = vshrl.u32 %v13020_v60, 16  ;;  %v7129_v7 = vshll.u32 %v13020_v60, 16 }
 0x1ae   : > { %10363 = vmatmul.mubr.msk.bf16.gmra.mrb[60].mxu0 %vm1578_vm2, %v12851_v57  ;;  %v5323_v57 = vshrl.u32 %v11892_v31, 16  ;;  %v13051_v31 = vld [vmem:[#allocation2 + $0x28] sm:$0xff]   ;;  %v13066_v45 = vsel %vm2330_vm5, %v2815_v44, %v2819_v58  ;;  %v13068_v53 = vor.u32 %v5319_v43, %v5316_v21  ;;  %v13082_v58 = vld [vmem:[#allocation2 + $0x38] sm:$0xff]   ;;  %v7137_v50 = vshll.u32 %v13033_v55, 16 }
 0x1af   : > { %10366 = vmatprep.mubr.msk.bf16.mxu0 %vm1578_vm2, %v12862_v14  ;;  %v13028_v14 = vsel %vm2330_vm5, %v2465_v36, %v2469_v16  ;;  %v13047_v16 = vsel %vm4750_vm4, %v5302_v10, %v13013_v24  ;;  %v7128_v36 = vrot.slane %v7126_v2, 2  ;;  %v7131_v41 = vrot.slane %v7129_v7, 3  ;;  %v13103_v2 = vld [vmem:[#allocation2 + $0x48] sm:$0xff]   ;;  %v13105_v7 = vld [vmem:[#allocation2 + $0x50] sm:$0xff]  }
 0x1b0   : > { %v13070_v18 = vrot.slane %v5323_v57, 1  ;;  %v7152_v26 = vshrl.u32 %v13051_v31, 16  ;;  %v13093_v0 = vsel %vm5635_vm6, %v5636_v63, %v14536_v33  ;;  %v7139_v44 = vrot.slane %v7137_v50, 3  ;;  %v13110_v50 = vld [vmem:[%s12271_s19 + $0x20] sm:$0xff]  }
 0x1b1   : > { %10681 = vmatmul.mubr.bf16.gmra.mrb[16].mxu1 %v12880_v13  ;;  %v13040_v13 = vsel %vm2330_vm5, %v2473_v22, %v2477_v47  ;;  %v7143_v47 = vshrl.u32 %v13049_v25, 16  ;;  %v7136_v22 = vrot.slane %v7134_v1, 2  ;;  %v7148_v43 = vrot.slane %v7146_v28, 3 }
 0x1b2   : > { %10684 = vmatprep.mubr.bf16.mxu1 %v12948_v30  ;;  %v13055_v30 = vsel %vm2330_vm5, %v2823_v4, %v13017_v51  ;;  %v7132_v4 = vor.u32 %v7131_v41, %v7128_v36  ;;  %v7155_v57 = vshll.u32 %v13051_v31, 16  ;;  %v7161_v59 = vshrl.u32 %v13077_v29, 16 }
 0x1b3   : > { %v7145_v21 = vrot.slane %v7143_v47, 2  ;;  %v7140_v63 = vor.u32 %v7139_v44, %v7136_v22  ;;  %v7164_v41 = vshll.u32 %v13077_v29, 16  ;;  %v7170_v1 = vshrl.u32 %v13082_v58, 16 }
 0x1b4   : > { %v7163_v47 = vrot.slane %v7161_v59, 2  ;;  %v7173_v28 = vshll.u32 %v13082_v58, 16  ;;  %v7188_v42 = vshrl.u32 %v13103_v2, 16 }
 0x1b5   : > { %v7149_v36 = vor.u32 %v7148_v43, %v7145_v21  ;;  %v7166_v22 = vrot.slane %v7164_v41, 3  ;;  %v7172_v44 = vrot.slane %v7170_v1, 2  ;;  %v2841_v41 = vshll.u32 %v13110_v50, 16  ;;  %v13132_v1 = vld [vmem:[#allocation2 + $0x60] sm:$0xff]  }
 0x1b6   : > { %10367 = vmatmul.mubr.msk.bf16.gmra.mrb[64].mxu0 %vm1578_vm2, %v12934_v61  ;;  %v7175_v43 = vrot.slane %v7173_v28, 3  ;;  %v7182_v61 = vshll.u32 %v13097_v40, 16 }
 0x1b7   : > { %10370 = vmatprep.mubr.msk.bf16.mxu0 %vm1578_vm2, %v12937_v27  ;;  %v7154_v27 = vrot.slane %v7152_v26, 2  ;;  %v7179_v26 = vshrl.u32 %v13097_v40, 16  ;;  %v13118_v33 = vsel %vm7124_vm7, %v7140_v63, %v7149_v36  ;;  %v7167_v59 = vor.u32 %v7166_v22, %v7163_v47 }
 0x1b8   : > { %14547 = vst [vmem:[#allocation8_spill] sm:$0xff] %v13118_v33  ;;  %v7176_v47 = vor.u32 %v7175_v43, %v7172_v44  ;;  %v7190_v22 = vrot.slane %v7188_v42, 2 }
 0x1b9   : > { %10685 = vmatmul.mubr.bf16.gmra.mrb[20].mxu1 %v12952_v56  ;;  %v7157_v56 = vrot.slane %v7155_v57, 3  ;;  %v7181_v10 = vrot.slane %v7179_v26, 2  ;;  %v13123_v57 = vld [vmem:[#allocation2 + $0x58] sm:$0xff]   ;;  %v7184_v26 = vrot.slane %v7182_v61, 3 }
 0x1ba   : > { %10688 = vmatprep.mubr.bf16.mxu1 %v12988_v46  ;;  %v13115_v46 = vsel %vm7124_vm7, %v7132_v4, %v7140_v63  ;;  %v7191_v4 = vshll.u32 %v13103_v2, 16  ;;  %v7197_v63 = vshrl.u32 %v13105_v7, 16  ;;  %v7206_v43 = vshrl.u32 %v13123_v57, 16 }
 0x1bb   : > { %14546 = vst [vmem:[#allocation7_spill] sm:$0xff] %v13115_v46  ;;  %v7158_v21 = vor.u32 %v7157_v56, %v7154_v27  ;;  %v13134_v56 = vld [vmem:[#allocation2 + $0x68] sm:$0xff]   ;;  %v7185_v42 = vor.u32 %v7184_v26, %v7181_v10  ;;  %v7218_v27 = vshll.u32 %v13132_v1, 16 }
 0x1bc   : > { %v7193_v33 = vrot.slane %v7191_v4, 3  ;;  %v7199_v44 = vrot.slane %v7197_v63, 2  ;;  %v7215_v4 = vshrl.u32 %v13132_v1, 16  ;;  %v7227_v6 = vshll.u32 %v13134_v56, 16 }
 0x1bd   : > { %v13140_v28 = vsel %vm7124_vm7, %v7158_v21, %v7167_v59  ;;  %v13163_v63 = vsel %vm7124_vm7, %v7176_v47, %v7185_v42 }
 0x1be   : > { %10371 = vmatmul.mubr.msk.bf16.gmra.mrb[68].mxu0 %vm1578_vm2, %v12955_v38  ;;  %v13137_v38 = vsel %vm7124_vm7, %v7149_v36, %v7158_v21  ;;  %14549 = vst [vmem:[#allocation10_spill] sm:$0xff] %v13140_v28  ;;  %v13151_v36 = vsel %vm7124_vm7, %v7167_v59, %v7176_v47  ;;  %v13154_v21 = vld [vmem:[#allocation2 + $0x70] sm:$0xff]   ;;  %v7194_v61 = vor.u32 %v7193_v33, %v7190_v22  ;;  %v7224_v59 = vshrl.u32 %v13134_v56, 16 }
 0x1bf   : > { %10374 = vmatprep.mubr.msk.bf16.mxu0 %vm1578_vm2, %v12960_v52  ;;  %14548 = vst [vmem:[#allocation9_spill] sm:$0xff] %v13137_v38  ;;  %v13146_v52 = vsel %vm4750_vm4, %v13013_v24, %v13068_v53  ;;  %14550 = vst [vmem:[#allocation11_spill] sm:$0xff] %v13151_v36  ;;  %v7209_v24 = vshll.u32 %v13123_v57, 16  ;;  %v7208_v33 = vrot.slane %v7206_v43, 2  ;;  %v7217_v22 = vrot.slane %v7215_v4, 2  ;;  %v13170_v38 = vld [vmem:[#allocation2 + $0x78] sm:$0xff]  }
 0x1c0   : > { %14551 = vst [vmem:[#allocation12_spill] sm:$0xff] %v13163_v63  ;;  %v7220_v36 = vrot.slane %v7218_v27, 3  ;;  %v7226_v28 = vrot.slane %v7224_v59, 2  ;;  %v7233_v47 = vshrl.u32 %v13154_v21, 16  ;;  %v7236_v63 = vshll.u32 %v13154_v21, 16  ;;  %v13183_v43 = vld [vmem:[#allocation2 + $0x80] sm:$0xff]  }
 0x1c1   : > { %10689 = vmatmul.mubr.bf16.gmra.mrb[24].mxu1 %v13025_v35  ;;  %v7200_v35 = vshll.u32 %v13105_v7, 16  ;;  %v7211_v26 = vrot.slane %v7209_v24, 3 }
 0x1c2   : > { %10692 = vmatprep.mubr.bf16.mxu1 %v13031_v49  ;;  %v13166_v49 = vsel %vm7124_vm7, %v7185_v42, %v7194_v61  ;;  %v14553_v42 = vshrl.u32 %v12983_v19, 16  ;;  %v7221_v4 = vor.u32 %v7220_v36, %v7217_v22  ;;  %v14555_v19 = vshll.u32 %v13061_v3, 16  ;;  %v13202_v36 = vld [vmem:[#allocation2 + $0x90] sm:$0xff]  }
 0x1c3   : > { %14552 = vst [vmem:[#allocation13_spill] sm:$0xff] %v13166_v49  ;;  %v7202_v10 = vrot.slane %v7200_v35, 3  ;;  %v13180_v35 = vld [vmem:[#allocation2 + $0x18] sm:$0xff]   ;;  %v7212_v24 = vor.u32 %v7211_v26, %v7208_v33  ;;  %v7235_v49 = vrot.slane %v7233_v47, 2  ;;  %v7245_v26 = vshll.u32 %v13170_v38, 16 }
 0x1c4   : > { %v2831_v27 = vor.u32 %v14553_v42, %v13017_v51  ;;  %v2835_v51 = vrot.slane %v14555_v19, 1  ;;  %v13193_v42 = vrot.slane %v2841_v41, 1  ;;  %v7251_v41 = vshrl.u32 %v13183_v43, 16 }
 0x1c5   : > { %v7203_v46 = vor.u32 %v7202_v10, %v7199_v44  ;;  %v13185_v44 = vld [vmem:[#allocation2 + $0x88] sm:$0xff]   ;;  %v7229_v10 = vrot.slane %v7227_v6, 3  ;;  %v13199_v33 = vsel %vm7124_vm7, %v7212_v24, %v7221_v4  ;;  %v13204_v6 = vld [vmem:[#allocation2 + $0x98] sm:$0xff]   ;;  %v7269_v12 = vshrl.u32 %v13202_v36, 16 }
 0x1c6   : > { %10375 = vmatmul.mubr.msk.bf16.gmra.mrb[72].mxu0 %vm1578_vm2, %v13008_v23  ;;  %14557 = vst [vmem:[#allocation16_spill] sm:$0xff] %v13199_v33  ;;  %v7260_v22 = vshrl.u32 %v13185_v44, 16  ;;  %v7263_v47 = vshll.u32 %v13185_v44, 16  ;;  %v7272_v60 = vshll.u32 %v13202_v36, 16 }
 0x1c7   : > { %10378 = vmatprep.mubr.msk.bf16.mxu0 %vm1578_vm2, %v13028_v14  ;;  %v13188_v59 = vsel %vm7124_vm7, %v7194_v61, %v7203_v46  ;;  %v7238_v14 = vrot.slane %v7236_v63, 3  ;;  %v13196_v23 = vsel %vm7124_vm7, %v7203_v46, %v7212_v24  ;;  %v7230_v61 = vor.u32 %v7229_v10, %v7226_v28  ;;  %v13213_v24 = vld [vmem:[%s12271_s19 + $0x28] sm:$0xff]  }
 0x1c8   : > { %14554 = vst [vmem:[#allocation14_spill] sm:$0xff] %v13188_v59  ;;  %14556 = vst [vmem:[#allocation15_spill] sm:$0xff] %v13196_v23  ;;  %v7242_v63 = vshrl.u32 %v13170_v38, 16  ;;  %v7254_v46 = vshll.u32 %v13183_v43, 16  ;;  %v7247_v10 = vrot.slane %v7245_v26, 3  ;;  %v7262_v33 = vrot.slane %v7260_v22, 2 }
 0x1c9   : > { %10693 = vmatmul.mubr.bf16.gmra.mrb[28].mxu1 %v13037_v37  ;;  %v7239_v37 = vor.u32 %v7238_v14, %v7235_v49  ;;  %v7253_v14 = vrot.slane %v7251_v41, 2  ;;  %v7265_v23 = vrot.slane %v7263_v47, 3  ;;  %v2845_v26 = vshrl.u32 %v13110_v50, 16 }
 0x1ca   : > { %10696 = vmatprep.mubr.bf16.mxu1 %v13043_v39  ;;  %v13216_v39 = vsel %vm7124_vm7, %v7221_v4, %v7230_v61  ;;  %v7244_v49 = vrot.slane %v7242_v63, 2  ;;  %v7256_v19 = vrot.slane %v7254_v46, 3  ;;  %v7278_v4 = vshrl.u32 %v13204_v6, 16 }
 0x1cb   : > { %v13219_v28 = vsel %vm7124_vm7, %v7230_v61, %v7239_v37  ;;  %v13227_v61 = vld [vmem:[#allocation2 + $0x20] sm:$0xff]   ;;  %v7266_v46 = vor.u32 %v7265_v23, %v7262_v33  ;;  %v2849_v22 = vshll.u32 %v13213_v24, 16  ;;  %v7271_v47 = vrot.slane %v7269_v12, 2 }
 0x1cc   : > { %v7248_v59 = vor.u32 %v7247_v10, %v7244_v49  ;;  %v7257_v41 = vor.u32 %v7256_v19, %v7253_v14  ;;  %v7274_v49 = vrot.slane %v7272_v60, 3  ;;  %v2836_v63 = vsel %vm2330_vm5, %v2831_v27, %v2835_v51  ;;  %v13254_v27 = vld [vmem:[%s12271_s19 + $0x30] sm:$0xff]  }
 0x1cd   : > { %v14562_v12 = vshrl.u32 %v13061_v3, 16  ;;  %v8011_v14 = vrot.slane %v13033_v55, 3  ;;  %v8013_v19 = vrot.slane %v13049_v25, 3  ;;  %v13262_v3 = vld [vmem:[%s14528_s5 + $0x80] sm:$0xff]   ;;  %v8015_v55 = vrot.slane %v13051_v31, 3 }
 0x1ce   : > { %10379 = vmatmul.mubr.msk.bf16.gmra.mrb[76].mxu0 %vm1578_vm2, %v13040_v13  ;;  %v13233_v13 = vsel %vm7124_vm7, %v7239_v37, %v7248_v59  ;;  %v13243_v23 = vsel %vm7124_vm7, %v7248_v59, %v7257_v41  ;;  %v13246_v33 = vsel %vm7124_vm7, %v7257_v41, %v7266_v46  ;;  %v7280_v37 = vrot.slane %v7278_v4, 2 }
 0x1cf   : > { %10398 = vmatprep.mubr.bf16.mxu0 %v13066_v45  ;;  %14558 = vst [vmem:[#allocation17_spill] sm:$0xff] %v13233_v13  ;;  %v14559_v45 = vor.u32 %v13075_v48, %v13070_v18  ;;  %14560 = vst [vmem:[#allocation18_spill] sm:$0xff] %v13243_v23  ;;  %v2839_v60 = vor.u32 %v14562_v12, %v2835_v51  ;;  %v7281_v18 = vshll.u32 %v13204_v6, 16  ;;  %v8002_v48 = vld [vmem:[#allocation2 + $0x10] sm:$0x8]  ;;  %v8017_v25 = vrot.slane %v13077_v29, 3 }
 0x1d0   : > { %14561 = vst [vmem:[#allocation19_spill] sm:$0xff] %v13246_v33  ;;  %v9667_v59 = vcombine.low %v8002_v48, %v13005_v15  ;;  %v13271_v15 = vsel %vm8009_vm8, %v8011_v14, %v8013_v19  ;;  %v2857_v12 = vshll.u32 %v13254_v27, 16  ;;  %v2861_v29 = vshrl.u32 %v13254_v27, 16  ;;  %v12069_v33 = vld [vmem:[%s12271_s19 + $0x98] ss:$0 sps:$4 sm:$0x33]  }
 0x1d1   : > { %10697 = vmatmul.mubr.bf16.gmra.mrb[32].mxu1 %v13047_v16  ;;  %v5330_v10 = vsel %vm4750_vm4, %v13068_v53, %v14559_v45  ;;  %v7275_v16 = vor.u32 %v7274_v49, %v7271_v47  ;;  %v2847_v53 = vor.u32 %v2845_v26, %v13193_v42  ;;  %v7283_v4 = vrot.slane %v7281_v18, 3  ;;  %v13268_v26 = vld [vmem:[%s12271_s19 + $0x38] sm:$0xff]   ;;  %14564 = vst [vmem:[#allocation21_spill] sm:$0xff] %v13271_v15  ;;  %v12033_v15 = vld [vmem:[#allocation2 + $0x88] sm:$0xff]  }
 0x1d2   : > { %10700 = vmatprep.mubr.bf16.mxu1 %v13146_v52  ;;  %v2851_v52 = vrot.slane %v2849_v22, 1  ;;  %v8010_v41 = vrot.slane %v9667_v59, 3  ;;  %v2853_v22 = vshrl.u32 %v13213_v24, 16  ;;  %v8021_v49 = vrot.slane %v13097_v40, 3 }
 0x1d3   : > { %v13265_v51 = vsel %vm7124_vm7, %v7266_v46, %v7275_v16  ;;  %v13277_v47 = vor.u32 %v7283_v4, %v7280_v37  ;;  %v8019_v46 = vrot.slane %v13082_v58, 3  ;;  %v2844_v45 = vsel %vm2330_vm5, %v2839_v60, %v13193_v42 }
 0x1d4   : > { %14563 = vst [vmem:[#allocation20_spill] sm:$0xff] %v13265_v51  ;;  %v13286_v31 = vsel %vm8009_vm8, %v8010_v41, %v8011_v14  ;;  %v13298_v40 = vsel %vm8009_vm8, %v8015_v55, %v8017_v25  ;;  %v8023_v37 = vrot.slane %v13103_v2, 3  ;;  %v8027_v18 = vrot.slane %v13123_v57, 3  ;;  %v13344_v41 = vld [vmem:[%s12271_s19 + $0x40] sm:$0xff]   ;;  %v13693_v51 = vld [vmem:[%s12271_s19 + $0x88] sm:$0xff]  }
 0x1d5   : > { %14565 = vst [vmem:[#allocation22_spill] sm:$0xff] %v13277_v47  ;;  %14566 = vst [vmem:[#allocation23_spill] sm:$0xff] %v13286_v31  ;;  %v13295_v58 = vsel %vm7124_vm7, %v7275_v16, %v13277_v47  ;;  %v13301_v42 = vsel %vm8009_vm8, %v8017_v25, %v8019_v46  ;;  %v13306_v60 = vsel %vm8009_vm8, %v8019_v46, %v8021_v49  ;;  %v8025_v16 = vrot.slane %v13105_v7, 3  ;;  %v12053_v47 = vld [vmem:[#allocation2 + $0x58] sm:$0xff]  }
 0x1d6   : > { %10399 = vmatmul.mubr.bf16.vlgmr.msra.gmra.mrb[44].mxu0 %v13055_v30  ;;  %v13289_v30 = vsel %vm8009_vm8, %v8013_v19, %v8015_v55  ;;  %14568 = vst [vmem:[#allocation25_spill] sm:$0xff] %v13295_v58  ;;  %14569 = vst [vmem:[#allocation26_spill] sm:$0xff] %v13298_v40  ;;  %v8029_v48 = vrot.slane %v13132_v1, 3  ;;  %v13316_v59 = vsel %vm8009_vm8, %v8021_v49, %v8023_v37  ;;  %v8033_v14 = vrot.slane %v13154_v21, 3 }
 0x1d7   : > { %10402 = vmatprep.mubr.bf16.mxu0 %v2836_v63  ;;  %10435 = vmatpush3.bf16.msra.mxu0 %v12995_v11  ;;  %14567 = vst [vmem:[#allocation24_spill] sm:$0xff] %v13289_v30  ;;  %14570 = vst [vmem:[#allocation27_spill] sm:$0xff] %v13301_v42  ;;  %v2852_v11 = vsel %vm2330_vm5, %v2847_v53, %v2851_v52  ;;  %v2865_v63 = vshll.u32 %v13268_v26, 16  ;;  %v11995_v53 = vld [vmem:[#allocation2 + $0xa0] ss:$0 sps:$4 sm:$0x77]   ;;  %v13325_v7 = vsel %vm8009_vm8, %v8025_v16, %v8027_v18 }
 0x1d8   : > { %10472 = vmatprep.subr.bf16.mxu0 %v13262_v3  ;;  %14571 = vst [vmem:[#allocation28_spill] sm:$0xff] %v13306_v60  ;;  %14572 = vst [vmem:[#allocation29_spill] sm:$0xff] %v13316_v59  ;;  %v8035_v2 = vrot.slane %v13170_v38, 3  ;;  %v8037_v19 = vrot.slane %v13183_v43, 3  ;;  %v13328_v57 = vsel %vm8009_vm8, %v8027_v18, %v8029_v48  ;;  %v8039_v43 = vrot.slane %v13185_v44, 3  ;;  %v11899_v44 = vld [vmem:[%s14528_s5 + $0x148] sm:$0xff]  }
 0x1d9   : > { %10701 = vmatmul.mubr.bf16.gmra.mrb[36].mxu1 %v5330_v10  ;;  %v8031_v10 = vrot.slane %v13134_v56, 3  ;;  %14574 = vst [vmem:[#allocation31_spill] sm:$0xff] %v13325_v7  ;;  %14575 = vst [vmem:[#allocation32_spill] sm:$0xff] %v13328_v57  ;;  %v2859_v4 = vrot.slane %v2857_v12, 1  ;;  %v8041_v55 = vrot.slane %v13202_v36, 3  ;;  %v8043_v25 = vrot.slane %v13204_v6, 3 }
 0x1da   : > { %10706 = vmatprep.mubr.msk.bf16.mxu1 %vm1578_vm2, %v13093_v0  ;;  %v13322_v0 = vsel %vm8009_vm8, %v8023_v37, %v8025_v16  ;;  %v13337_v21 = vsel %vm8009_vm8, %v8033_v14, %v8035_v2  ;;  %v13340_v38 = vsel %vm8009_vm8, %v8035_v2, %v8037_v19  ;;  %v14580_v46 = vrot.slane %v13180_v35, 2  ;;  %v11902_v35 = vld [vmem:[%s14528_s5 + $0x150] sm:$0xff]   ;;  %v13488_v57 = vld [vmem:[%s12271_s19 + $0x88] sm:$0xff]  }
 0x1db   : > { %14573 = vst [vmem:[#allocation30_spill] sm:$0xff] %v13322_v0  ;;  %v13331_v1 = vsel %vm8009_vm8, %v8029_v48, %v8031_v10  ;;  %v13334_v56 = vsel %vm8009_vm8, %v8031_v10, %v8033_v14  ;;  %14578 = vst [vmem:[#allocation35_spill] sm:$0xff] %v13337_v21  ;;  %v14581_v49 = vrot.slane %v13057_v34, 2  ;;  %v2855_v16 = vor.u32 %v2853_v22, %v2851_v52  ;;  %v13360_v48 = vld [vmem:[%s12271_s19 + $0x48] sm:$0xff]   ;;  %v13460_v21 = vld [vmem:[%s12271_s19 + $0x78] sm:$0xff]  }
 0x1dc   : > { %14576 = vst [vmem:[#allocation33_spill] sm:$0xff] %v13331_v1  ;;  %14577 = vst [vmem:[#allocation34_spill] sm:$0xff] %v13334_v56  ;;  %v8045_v12 = vrot.slane %v11995_v53, 3  ;;  %v2863_v18 = vor.u32 %v2861_v29, %v2859_v4  ;;  %v2867_v36 = vrot.slane %v2865_v63, 1  ;;  %v13363_v6 = vsel %vm8009_vm8, %v8039_v43, %v8041_v55  ;;  %v13385_v14 = vld [vmem:[#allocation2 + $0x28] sm:$0xff]  }
 0x1dd   : > { %14579 = vst [vmem:[#allocation36_spill] sm:$0xff] %v13340_v38  ;;  %v5640_v37 = vsel %vm5635_vm6, %v14581_v49, %v14580_v46  ;;  %14583 = vst [vmem:[#allocation38_spill] sm:$0xff] %v13363_v6  ;;  %v13366_v34 = vsel %vm8009_vm8, %v8041_v55, %v8043_v25  ;;  %v14585_v52 = vrot.slane %v13227_v61, 2  ;;  %v14586_v22 = vmov %v14580_v46  ;;  %v13391_v55 = vld [vmem:[#allocation2 + $0x30] sm:$0xff]   ;;  %v12032_v30 = vld [vmem:[#allocation2 + $0x8] sm:$0xff]  }
 0x1de   : > { %10403 = vmatmul.mubr.bf16.gmra.mrb[48].mxu0 %v2844_v45  ;;  %v13357_v45 = vsel %vm8009_vm8, %v8037_v19, %v8039_v43  ;;  %14584 = vst [vmem:[#allocation39_spill] sm:$0xff] %v13366_v34  ;;  %v13375_v10 = vsel %vm8009_vm8, %v8043_v25, %v8045_v12  ;;  %v2873_v29 = vshll.u32 %v13344_v41, 16  ;;  %v2860_v63 = vsel %vm2330_vm5, %v2855_v16, %v2859_v4  ;;  %v13395_v46 = vld [vmem:[%s12271_s19 + $0x50] sm:$0xff]   ;;  %v13432_v34 = vld [vmem:[%s12271_s19 + $0x68] sm:$0xff]  }
 0x1df   : > { %10406 = vmatprep.mubr.bf16.mxu0 %v2852_v11  ;;  %14582 = vst [vmem:[#allocation37_spill] sm:$0xff] %v13357_v45  ;;  %v5642_v11 = vsel %vm5635_vm6, %v14586_v22, %v14585_v52  ;;  %14587 = vst [vmem:[#allocation40_spill] sm:$0xff] %v13375_v10  ;;  %v2869_v53 = vshrl.u32 %v13268_v26, 16  ;;  %v5643_v2 = vrot.slane %v13385_v14, 2  ;;  %v2877_v19 = vshrl.u32 %v13344_v41, 16  ;;  %v13404_v22 = vld [vmem:[%s12271_s19 + $0x58] sm:$0xff]  }
 0x1e0   : > { %v2881_v43 = vshll.u32 %v13360_v48, 16  ;;  %v5645_v4 = vrot.slane %v13391_v55, 2  ;;  %v2875_v25 = vrot.slane %v2873_v29, 1  ;;  %v14588_v16 = vmov %v14585_v52  ;;  %v11908_v29 = vld [vmem:[%s14528_s5 + $0x160] sm:$0xff]  }
 0x1e1   : > { %10707 = vmatmul.mubr.msk.bf16.vlgmr.msra.gmra.mrb[4].mxu1 %vm1578_vm2, %v5640_v37  ;;  %v2871_v49 = vor.u32 %v2869_v53, %v2867_v36  ;;  %v11905_v37 = vld [vmem:[%s14528_s5 + $0x158] sm:$0xff]   ;;  %v5644_v12 = vsel %vm5635_vm6, %v14588_v16, %v5643_v2  ;;  %v2885_v61 = vshrl.u32 %v13360_v48, 16  ;;  %v2949_v42 = vshrl.u32 %v13488_v57, 16 }
 0x1e2   : > { %10743 = vmatpush3.bf16.msra.mxu1 %v12859_v54  ;;  %10710 = vmatprep.mubr.msk.bf16.mxu1 %vm1578_vm2, %v5642_v11  ;;  %v2868_v54 = vsel %vm2330_vm5, %v2863_v18, %v2867_v36  ;;  %v2879_v18 = vor.u32 %v2877_v19, %v2875_v25  ;;  %v2883_v52 = vrot.slane %v2881_v43, 1  ;;  %v2889_v36 = vshll.u32 %v13395_v46, 16  ;;  %v13421_v19 = vld [vmem:[#allocation2 + $0x40] sm:$0xff]  }
 0x1e3   : > { %10744 = vmatprep.subr.bf16.mxu1 %v11899_v44  ;;  %v2876_v11 = vsel %vm2330_vm5, %v2871_v49, %v2875_v25  ;;  %v5649_v43 = vrot.slane %v13421_v19, 2  ;;  %v13425_v49 = vld [vmem:[%s12271_s19 + $0x60] sm:$0xff]   ;;  %v5667_v31 = vrot.slane %v12033_v15, 2  ;;  %v12037_v15 = vld [vmem:[#allocation2 + $0x18] sm:$0xff]   ;;  %v3283_v58 = vrot.slane %v12053_v47, 1 }
 0x1e4   : > { %v2891_v25 = vrot.slane %v2889_v36, 1  ;;  %v2887_v16 = vor.u32 %v2885_v61, %v2883_v52  ;;  %v13443_v61 = vld [vmem:[#allocation2 + $0x48] sm:$0xff]   ;;  %v5948_v23 = vrot.slane %v12069_v33, 2  ;;  %v3548_v33 = vrot.slane %v13213_v24, 1 }
 0x1e5   : > { %v11937_v24 = vld [vmem:[%s14528_s5 + $0x188] sm:$0xff]  }
 0x1e6   : > { %10407 = vmatmul.mubr.bf16.gmra.mrb[52].mxu0 %v2860_v63  ;;  %10745 = vmatpush3.bf16.msra.mxu1 %v11899_v44  ;;  %v5646_v44 = vsel %vm5635_vm6, %v5643_v2, %v5645_v4  ;;  %v13415_v63 = vld [vmem:[#allocation2 + $0x38] sm:$0xff]   ;;  %v2884_v2 = vsel %vm2330_vm5, %v2879_v18, %v2883_v52  ;;  %v2892_v52 = vsel %vm2330_vm5, %v2887_v16, %v2891_v25 }
 0x1e7   : > { %10410 = vmatprep.mubr.bf16.mxu0 %v2868_v54  ;;  %10746 = vmatprep.subr.bf16.mxu1 %v11902_v35  ;;  %v5647_v53 = vrot.slane %v13415_v63, 2  ;;  %v2897_v54 = vshll.u32 %v13404_v22, 16 }
 0x1e9   : > { %10711 = vmatmul.mubr.msk.bf16.gmra.mrb[8].mxu1 %vm1578_vm2, %v5644_v12  ;;  %v11912_v12 = vld [vmem:[%s14528_s5 + $0x168] sm:$0xff]   ;;  %v5648_v18 = vsel %vm5635_vm6, %v5645_v4, %v5647_v53  ;;  %v2899_v10 = vrot.slane %v2897_v54, 1  ;;  %v5650_v36 = vsel %vm5635_vm6, %v5647_v53, %v5649_v43  ;;  %v11916_v4 = vld [vmem:[%s14528_s5 + $0x170] sm:$0xff]  }
 0x1ea   : > { %10714 = vmatprep.mubr.msk.bf16.mxu1 %vm1578_vm2, %v5646_v44  ;;  %10747 = vmatpush3.bf16.msra.mxu1 %v11902_v35  ;;  %v2893_v35 = vshrl.u32 %v13395_v46, 16  ;;  %v13449_v54 = vld [vmem:[#allocation2 + $0x50] sm:$0xff]  }
 0x1eb   : > { %10748 = vmatprep.subr.bf16.mxu1 %v11905_v37 }
 0x1ec   : > { %v2895_v44 = vor.u32 %v2893_v35, %v2891_v25  ;;  %v2909_v35 = vshrl.u32 %v13425_v49, 16  ;;  %v5653_v25 = vrot.slane %v13449_v54, 2 }
 0x1ee   : > { %10411 = vmatmul.mubr.bf16.gmra.mrb[56].mxu0 %v2876_v11  ;;  %10749 = vmatpush3.bf16.msra.mxu1 %v11905_v37  ;;  %v2905_v37 = vshll.u32 %v13425_v49, 16  ;;  %v2901_v11 = vshrl.u32 %v13404_v22, 16  ;;  %v2900_v53 = vsel %vm2330_vm5, %v2895_v44, %v2899_v10  ;;  %v11919_v44 = vld [vmem:[%s14528_s5 + $0x178] sm:$0xff]  }
 0x1ef   : > { %10414 = vmatprep.mubr.bf16.mxu0 %v2884_v2  ;;  %10750 = vmatprep.subr.bf16.mxu1 %v11908_v29  ;;  %v5651_v2 = vrot.slane %v13443_v61, 2 }
 0x1f0   : > { %v2907_v16 = vrot.slane %v2905_v37, 1 }
 0x1f1   : > { %10715 = vmatmul.mubr.msk.bf16.gmra.mrb[12].mxu1 %vm1578_vm2, %v5648_v18  ;;  %v13453_v18 = vld [vmem:[%s12271_s19 + $0x70] sm:$0xff]   ;;  %v5652_v6 = vsel %vm5635_vm6, %v5649_v43, %v5651_v2  ;;  %v5654_v37 = vsel %vm5635_vm6, %v5651_v2, %v5653_v25 }
 0x1f2   : > { %10718 = vmatprep.mubr.msk.bf16.mxu1 %vm1578_vm2, %v5650_v36  ;;  %10751 = vmatpush3.bf16.msra.mxu1 %v11908_v29  ;;  %v2913_v29 = vshll.u32 %v13432_v34, 16  ;;  %v2903_v36 = vor.u32 %v2901_v11, %v2899_v10  ;;  %v2911_v45 = vor.u32 %v2909_v35, %v2907_v16  ;;  %v2921_v10 = vshll.u32 %v13453_v18, 16  ;;  %v13471_v43 = vld [vmem:[%s14529_s6 + $0x30] sm:$0xff]   ;;  %v13473_v11 = vld [vmem:[#allocation2 + $0x58] sm:$0xff]   ;;  %v13479_v35 = vld [vmem:[#allocation2 + $0x60] sm:$0xff]  }
 0x1f3   : > { %10752 = vmatprep.subr.bf16.mxu1 %v11912_v12 }
 0x1f4   : > { %v2915_v38 = vrot.slane %v2913_v29, 1  ;;  %v5657_v29 = vrot.slane %v13479_v35, 2 }
 0x1f6   : > { %10415 = vmatmul.mubr.bf16.gmra.mrb[60].mxu0 %v2892_v52  ;;  %10753 = vmatpush3.bf16.msra.mxu1 %v11912_v12  ;;  %v2908_v12 = vsel %vm2330_vm5, %v2903_v36, %v2907_v16  ;;  %v2917_v52 = vshrl.u32 %v13432_v34, 16  ;;  %v2916_v2 = vsel %vm2330_vm5, %v2911_v45, %v2915_v38  ;;  %v2923_v16 = vrot.slane %v2921_v10, 1  ;;  %v13483_v36 = vld [vmem:[%s12271_s19 + $0x80] sm:$0xff]  }
 0x1f7   : > { %10418 = vmatprep.mubr.bf16.mxu0 %v2900_v53  ;;  %10754 = vmatprep.subr.bf16.mxu1 %v11916_v4  ;;  %v2925_v53 = vshrl.u32 %v13453_v18, 16  ;;  %v2937_v10 = vshll.u32 %v13483_v36, 16 }
 0x1f9   : > { %10719 = vmatmul.mubr.msk.bf16.gmra.mrb[16].mxu1 %vm1578_vm2, %v5652_v6  ;;  %v5655_v6 = vrot.slane %v13473_v11, 2  ;;  %v2927_v45 = vor.u32 %v2925_v53, %v2923_v16  ;;  %v2939_v53 = vrot.slane %v2937_v10, 1 }
 0x1fa   : > { %10722 = vmatprep.mubr.msk.bf16.mxu1 %vm1578_vm2, %v5654_v37  ;;  %10755 = vmatpush3.bf16.msra.mxu1 %v11916_v4  ;;  %v2929_v4 = vshll.u32 %v13460_v21, 16  ;;  %v2919_v37 = vor.u32 %v2917_v52, %v2915_v38  ;;  %v2933_v38 = vshrl.u32 %v13460_v21, 16 }
 0x1fb   : > { %10756 = vmatprep.subr.bf16.mxu1 %v11919_v44  ;;  %v5656_v56 = vsel %vm5635_vm6, %v5653_v25, %v5655_v6  ;;  %v5658_v7 = vsel %vm5635_vm6, %v5655_v6, %v5657_v29  ;;  %v13502_v6 = vld [vmem:[#allocation2 + $0x70] sm:$0xff]  }
 0x1fc   : > { %v2931_v1 = vrot.slane %v2929_v4, 1 }
 0x1fe   : > { %10419 = vmatmul.mubr.bf16.gmra.mrb[64].mxu0 %v2908_v12  ;;  %10757 = vmatpush3.bf16.msra.mxu1 %v11919_v44  ;;  %v2924_v44 = vsel %vm2330_vm5, %v2919_v37, %v2923_v16  ;;  %v13496_v12 = vld [vmem:[#allocation2 + $0x68] sm:$0xff]   ;;  %v2932_v52 = vsel %vm2330_vm5, %v2927_v45, %v2931_v1  ;;  %v2935_v4 = vor.u32 %v2933_v38, %v2931_v1  ;;  %v13506_v16 = vld [vmem:[%s12271_s19 + $0x90] ss:$0 sps:$4 sm:$0x11]   ;;  %v13519_v38 = vld [vmem:[#allocation2 + $0x80] sm:$0xff]  }
 0x1ff   : > { %10422 = vmatprep.mubr.bf16.mxu0 %v2916_v2  ;;  %10794 = vmatprep.subr.bf16.mxu1 %v13471_v43  ;;  %v5659_v25 = vrot.slane %v13496_v12, 2  ;;  %v2941_v2 = vshrl.u32 %v13483_v36, 16  ;;  %v2953_v10 = vshll.u32 %v13506_v16, 16 }
 0x200   : > { %v2940_v60 = vsel %vm2330_vm5, %v2935_v4, %v2939_v53 }
 0x201   : > { %10723 = vmatmul.mubr.msk.bf16.gmra.mrb[20].mxu1 %vm1578_vm2, %v5656_v56  ;;  %v2945_v56 = vshll.u32 %v13488_v57, 16  ;;  %v5660_v37 = vsel %vm5635_vm6, %v5657_v29, %v5659_v25  ;;  %v2943_v0 = vor.u32 %v2941_v2, %v2939_v53  ;;  %v3254_v2 = vld [vmem:[#allocation2] sm:$0xe]  ;;  %v2955_v4 = vrot.slane %v2953_v10, 1 }
 0x202   : > { %10726 = vmatprep.mubr.msk.bf16.mxu1 %vm1578_vm2, %v5658_v7  ;;  %v5661_v7 = vrot.slane %v13502_v6, 2 }
 0x203   : > { %v2947_v59 = vrot.slane %v2945_v56, 1 }
 0x204   : > { %v5662_v45 = vsel %vm5635_vm6, %v5659_v25, %v5661_v7  ;;  %v12031_v25 = vld [vmem:[#allocation2 + $0x4] sm:$0xf] }
 0x205   : > { %v2948_v29 = vsel %vm2330_vm5, %v2943_v0, %v2947_v59  ;;  %v9313_v56 = vcombine.low %v3254_v2, %v12031_v25  ;;  %v2951_v53 = vor.u32 %v2949_v42, %v2947_v59  ;;  %v5610_v2 = vld [vmem:[%s12271_s19 + $0x8] sm:$0xc] }
 0x206   : > { %10423 = vmatmul.mubr.bf16.gmra.mrb[68].mxu0 %v2924_v44  ;;  %v13515_v44 = vld [vmem:[#allocation2 + $0x78] sm:$0xff]  }
 0x207   : > { %10426 = vmatprep.mubr.bf16.mxu0 %v2932_v52  ;;  %v5663_v1 = vrot.slane %v13515_v44, 2  ;;  %v5665_v52 = vrot.slane %v13519_v38, 2  ;;  %v3262_v0 = vrot.slane %v9313_v56, 1  ;;  %v2956_v40 = vsel %vm2330_vm5, %v2951_v53, %v2955_v4 }
 0x208   : > { %v3267_v53 = vrot.slane %v12037_v15, 1  ;;  %v12041_v15 = vld [vmem:[#allocation2 + $0x28] sm:$0xff]  }
 0x209   : > { %10727 = vmatmul.mubr.msk.bf16.gmra.mrb[24].mxu1 %vm1578_vm2, %v5660_v37  ;;  %v5664_v37 = vsel %vm5635_vm6, %v5661_v7, %v5663_v1  ;;  %v12035_v7 = vld [vmem:[%s12271_s19 + $0xc] sm:$0xf] }
 0x20a   : > { %10730 = vmatprep.mubr.msk.bf16.mxu1 %vm1578_vm2, %v5662_v45  ;;  %v5666_v45 = vsel %vm5635_vm6, %v5663_v1, %v5665_v52  ;;  %v9510_v10 = vcombine.low %v5610_v2, %v12035_v7  ;;  %v5668_v1 = vsel %vm5635_vm6, %v5665_v52, %v5667_v31  ;;  %v11923_v52 = vld [vmem:[%s14528_s5 + $0x88] sm:$0xff]  }
 0x20c   : > { %v5913_v4 = vrot.slane %v9510_v10, 2 }
 0x20e   : > { %10427 = vmatmul.mubr.bf16.gmra.mrb[72].mxu0 %v2940_v60  ;;  %v3263_v60 = vrot.slane %v12032_v30, 1  ;;  %v12036_v30 = vld [vmem:[#allocation2 + $0x10] sm:$0xff]  }
 0x20f   : > { %10430 = vmatprep.mubr.bf16.mxu0 %v2948_v29  ;;  %v12034_v29 = vld [vmem:[#allocation2 + $0x90] sm:$0xff]   ;;  %v3265_v56 = vrot.slane %v12036_v30, 1  ;;  %v12040_v30 = vld [vmem:[#allocation2 + $0x20] sm:$0xff]  }
 0x210   : > { %v5669_v42 = vrot.slane %v12034_v29, 2  ;;  %v3264_v59 = vsel %vm3261_vm3, %v3262_v0, %v3263_v60 }
 0x211   : > { %10731 = vmatmul.mubr.msk.bf16.gmra.mrb[28].mxu1 %vm1578_vm2, %v5664_v37  ;;  %v3268_v29 = vsel %vm3261_vm3, %v3265_v56, %v3267_v53 }
 0x212   : > { %10734 = vmatprep.mubr.msk.bf16.mxu1 %vm1578_vm2, %v5666_v45  ;;  %v5670_v25 = vsel %vm5635_vm6, %v5667_v31, %v5669_v42  ;;  %v3266_v31 = vsel %vm3261_vm3, %v3263_v60, %v3265_v56  ;;  %v3269_v56 = vrot.slane %v12040_v30, 1 }
 0x216   : > { %10431 = vmatmul.mubr.bf16.gmra.mrb[76].mxu0 %v2956_v40  ;;  %v13536_v40 = vld [vmem:[%s12271_s19 + $0x10] sm:$0xff]  }
 0x217   : > { %10436 = vmatprep.mubr.msk.bf16.mxu0 %vm1578_vm2, %v3264_v59  ;;  %v5914_v37 = vrot.slane %v13536_v40, 2  ;;  %v12039_v59 = vld [vmem:[#allocation2 + $0x98] ss:$0 sps:$4 sm:$0x33]  }
 0x218   : > { %v5671_v7 = vrot.slane %v12039_v59, 2  ;;  %v13566_v59 = vld [vmem:[%s12271_s19 + $0x20] sm:$0xff]  }
 0x219   : > { %10735 = vmatmul.mubr.msk.bf16.gmra.mrb[32].mxu1 %vm1578_vm2, %v5668_v1  ;;  %v5915_v1 = vsel %vm5635_vm6, %v5913_v4, %v5914_v37 }
 0x21a   : > { %10738 = vmatprep.mubr.msk.bf16.mxu1 %vm1578_vm2, %v5670_v25  ;;  %v5672_v60 = vsel %vm5635_vm6, %v5669_v42, %v5671_v7  ;;  %v11924_v25 = vld [vmem:[%s14528_s5 + $0x90] sm:$0xff]   ;;  %v11925_v42 = vld [vmem:[%s14528_s5 + $0x98] sm:$0xff]   ;;  %v3270_v7 = vsel %vm3261_vm3, %v3267_v53, %v3269_v56  ;;  %v11926_v53 = vld [vmem:[%s14528_s5 + $0xa0] sm:$0xff]  }
 0x21c   : > { %v13539_v45 = vpop.f32.mrb[0].mxu1 }
 0x21d   : > { %14589 = vst [vmem:[#allocation41_spill] sm:$0xff] %v13539_v45  ;;  %v13544_v0 = vpop.f32.mrb[1].mxu1  ;;  %v13609_v45 = vld [vmem:[%s12271_s19 + $0x38] sm:$0xff]  }
 0x21e   : > { %14590 = vst [vmem:[#allocation42_spill] sm:$0xff] %v13544_v0  ;;  %10437 = vmatmul.mubr.msk.bf16.vlgmr.msra.gmra.mrb[44].mxu0 %vm1578_vm2, %v3266_v31  ;;  %v13548_v2 = vpop.f32.mrb[2].mxu1  ;;  %v3271_v31 = vrot.slane %v12041_v15, 1  ;;  %v12049_v0 = vld [vmem:[#allocation2 + $0x48] sm:$0xff]  }
 0x21f   : > { %14591 = vst [vmem:[#allocation43_spill] sm:$0xff] %v13548_v2  ;;  %10440 = vmatprep.mubr.msk.bf16.mxu0 %vm1578_vm2, %v3268_v29  ;;  %v13552_v10 = vpop.f32.mrb[3].mxu1  ;;  %10473 = vmatpush3.bf16.msra.mxu0 %v13262_v3  ;;  %v13562_v29 = vld [vmem:[%s12271_s19 + $0x18] sm:$0xff]   ;;  %v5918_v3 = vrot.slane %v13566_v59, 2  ;;  %v12048_v2 = vld [vmem:[#allocation2 + $0x40] sm:$0xff]  }
 0x220   : > { %14592 = vst [vmem:[#allocation44_spill] sm:$0xff] %v13552_v10  ;;  %10474 = vmatprep.subr.bf16.mxu0 %v11923_v52  ;;  %v5916_v4 = vrot.slane %v13562_v29, 2 }
 0x221   : > { %10739 = vmatmul.mubr.msk.bf16.gmra.mrb[36].mxu1 %vm1578_vm2, %v5672_v60 }
 0x222   : > { %10758 = vmatprep.mubr.bf16.mxu1 %v5915_v1  ;;  %v3272_v1 = vsel %vm3261_vm3, %v3269_v56, %v3271_v31  ;;  %v5917_v60 = vsel %vm5635_vm6, %v5914_v37, %v5916_v4  ;;  %v5919_v30 = vsel %vm5635_vm6, %v5916_v4, %v5918_v3  ;;  %v12044_v56 = vld [vmem:[#allocation2 + $0x30] sm:$0xff]   ;;  %v12045_v37 = vld [vmem:[#allocation2 + $0x38] sm:$0xff]   ;;  %v13588_v4 = vld [vmem:[%s12271_s19 + $0x28] sm:$0xff]  }
 0x223   : > { %10475 = vmatpush3.bf16.msra.mxu0 %v11923_v52  ;;  %v13581_v52 = vld [vmem:[%s14528_s5 + $0x180] sm:$0xff]   ;;  %v3273_v15 = vrot.slane %v12044_v56, 1 }
 0x224   : > { %10476 = vmatprep.subr.bf16.mxu0 %v11924_v25 }
 0x226   : > { %10441 = vmatmul.mubr.msk.bf16.gmra.mrb[48].mxu0 %vm1578_vm2, %v3270_v7  ;;  %v3275_v7 = vrot.slane %v12045_v37, 1  ;;  %v11928_v37 = vld [vmem:[%s14528_s5 + $0xb0] sm:$0xff]  }
 0x227   : > { %10444 = vmatprep.mubr.msk.bf16.mxu0 %vm1578_vm2, %v3272_v1  ;;  %10477 = vmatpush3.bf16.msra.mxu0 %v11924_v25  ;;  %v5920_v25 = vrot.slane %v13588_v4, 2  ;;  %v13592_v1 = vld [vmem:[%s12271_s19 + $0x30] sm:$0xff]  }
 0x228   : > { %10478 = vmatprep.subr.bf16.mxu0 %v11925_v42  ;;  %v5922_v10 = vrot.slane %v13592_v1, 2 }
 0x229   : > { %10759 = vmatmul.mubr.bf16.vlgmr.msra.gmra.mrb[4].mxu1 %v5917_v60  ;;  %v11927_v60 = vld [vmem:[%s14528_s5 + $0xa8] sm:$0xff]   ;;  %v5921_v56 = vsel %vm5635_vm6, %v5918_v3, %v5920_v25  ;;  %v5924_v3 = vrot.slane %v13609_v45, 2 }
 0x22a   : > { %10795 = vmatpush3.bf16.msra.mxu1 %v13471_v43  ;;  %10762 = vmatprep.mubr.bf16.mxu1 %v5919_v30  ;;  %v3274_v43 = vsel %vm3261_vm3, %v3271_v31, %v3273_v15  ;;  %v3276_v30 = vsel %vm3261_vm3, %v3273_v15, %v3275_v7  ;;  %v3277_v31 = vrot.slane %v12048_v2, 1  ;;  %v13613_v15 = vld [vmem:[%s12271_s19 + $0x40] sm:$0xff]  }
 0x22b   : > { %10479 = vmatpush3.bf16.msra.mxu0 %v11925_v42  ;;  %10832 = vmatprep.subr.bf16.mxu1 %v13581_v52  ;;  %v5923_v42 = vsel %vm5635_vm6, %v5920_v25, %v5922_v10  ;;  %v5926_v25 = vrot.slane %v13613_v15, 2 }
 0x22c   : > { %10480 = vmatprep.subr.bf16.mxu0 %v11926_v53  ;;  %v3278_v2 = vsel %vm3261_vm3, %v3275_v7, %v3277_v31  ;;  %v13626_v7 = vld [vmem:[%s12271_s19 + $0x48] sm:$0xff]  }
 0x22e   : > { %10445 = vmatmul.mubr.msk.bf16.gmra.mrb[52].mxu0 %vm1578_vm2, %v3274_v43  ;;  %v3279_v43 = vrot.slane %v12049_v0, 1 }
 0x22f   : > { %10448 = vmatprep.mubr.msk.bf16.mxu0 %vm1578_vm2, %v3276_v30  ;;  %10481 = vmatpush3.bf16.msra.mxu0 %v11926_v53  ;;  %v11929_v53 = vld [vmem:[%s14528_s5 + $0xb8] sm:$0xff]   ;;  %v5925_v30 = vsel %vm5635_vm6, %v5922_v10, %v5924_v3 }
 0x230   : > { %10482 = vmatprep.subr.bf16.mxu0 %v11927_v60  ;;  %v3280_v0 = vsel %vm3261_vm3, %v3277_v31, %v3279_v43  ;;  %v13630_v31 = vld [vmem:[%s12271_s19 + $0x50] sm:$0xff]  }
 0x231   : > { %10763 = vmatmul.mubr.bf16.gmra.mrb[8].mxu1 %v5921_v56  ;;  %v5927_v56 = vsel %vm5635_vm6, %v5924_v3, %v5926_v25  ;;  %v5930_v10 = vrot.slane %v13630_v31, 2 }
 0x232   : > { %10766 = vmatprep.mubr.bf16.mxu1 %v5923_v42 }
 0x233   : > { %10483 = vmatpush3.bf16.msra.mxu0 %v11927_v60  ;;  %v12052_v60 = vld [vmem:[#allocation2 + $0x50] sm:$0xff]  }
 0x234   : > { %10484 = vmatprep.subr.bf16.mxu0 %v11928_v37  ;;  %v3281_v42 = vrot.slane %v12052_v60, 1  ;;  %v13650_v60 = vld [vmem:[%s12271_s19 + $0x60] sm:$0xff]  }
 0x236   : > { %10449 = vmatmul.mubr.msk.bf16.gmra.mrb[56].mxu0 %vm1578_vm2, %v3278_v2  ;;  %v5928_v2 = vrot.slane %v13626_v7, 2  ;;  %v3282_v47 = vsel %vm3261_vm3, %v3279_v43, %v3281_v42  ;;  %v3284_v3 = vsel %vm3261_vm3, %v3281_v42, %v3283_v58  ;;  %v5934_v43 = vrot.slane %v13650_v60, 2 }
 0x237   : > { %10452 = vmatprep.mubr.msk.bf16.mxu0 %vm1578_vm2, %v3280_v0  ;;  %10485 = vmatpush3.bf16.msra.mxu0 %v11928_v37  ;;  %v13636_v37 = vld [vmem:[%s14529_s6 + $0x18] sm:$0xff]   ;;  %v14593_v42 = vrot.slane %v12803_v9, 1 }
 0x238   : > { %10486 = vmatprep.subr.bf16.mxu0 %v11929_v53  ;;  %v5929_v0 = vsel %vm5635_vm6, %v5926_v25, %v5928_v2 }
 0x239   : > { %10767 = vmatmul.mubr.bf16.gmra.mrb[12].mxu1 %v5925_v30  ;;  %v13646_v30 = vld [vmem:[%s12271_s19 + $0x58] sm:$0xff]   ;;  %v3286_v25 = vsel %vm3261_vm3, %v3283_v58, %v14593_v42  ;;  %v13666_v58 = vld [vmem:[%s12271_s19 + $0x70] sm:$0xff]  }
 0x23a   : > { %10770 = vmatprep.mubr.bf16.mxu1 %v5927_v56  ;;  %v5932_v56 = vrot.slane %v13646_v30, 2 }
 0x23b   : > { %10487 = vmatpush3.bf16.msra.mxu0 %v11929_v53  ;;  %v5931_v53 = vsel %vm5635_vm6, %v5928_v2, %v5930_v10 }
 0x23c   : > { %10524 = vmatprep.subr.bf16.mxu0 %v13636_v37  ;;  %v5933_v2 = vsel %vm5635_vm6, %v5930_v10, %v5932_v56 }
 0x23e   : > { %10453 = vmatmul.mubr.msk.bf16.gmra.mrb[60].mxu0 %vm1578_vm2, %v3282_v47  ;;  %v5935_v47 = vsel %vm5635_vm6, %v5932_v56, %v5934_v43  ;;  %v13677_v56 = vld [vmem:[%s12271_s19 + $0x78] sm:$0xff]  }
 0x23f   : > { %10456 = vmatprep.mubr.msk.bf16.mxu0 %vm1578_vm2, %v3284_v3  ;;  %v13662_v3 = vld [vmem:[%s12271_s19 + $0x68] sm:$0xff]   ;;  %v5940_v42 = vrot.slane %v13677_v56, 2 }
 0x240   : > { %v5936_v9 = vrot.slane %v13662_v3, 2 }
 0x241   : > { %10771 = vmatmul.mubr.bf16.gmra.mrb[16].mxu1 %v5929_v0  ;;  %v5938_v0 = vrot.slane %v13666_v58, 2 }
 0x242   : > { %10774 = vmatprep.mubr.bf16.mxu1 %v5931_v53  ;;  %v5937_v10 = vsel %vm5635_vm6, %v5934_v43, %v5936_v9  ;;  %v3236_v53 = vld [vmem:[%s12271_s19] sm:$0xe]  ;;  %v12063_v43 = vld [vmem:[%s12271_s19 + $0x4] sm:$0xf] }
 0x246   : > { %10457 = vmatmul.mubr.msk.bf16.gmra.mrb[64].mxu0 %vm1578_vm2, %v3286_v25  ;;  %v13681_v25 = vld [vmem:[%s12271_s19 + $0x80] sm:$0xff]  }
 0x247   : > { %10460 = vmatprep.mubr.msk.bf16.mxu0 %vm1578_vm2, %v12907_v8  ;;  %v5939_v8 = vsel %vm5635_vm6, %v5936_v9, %v5938_v0 }
 0x249   : > { %10775 = vmatmul.mubr.bf16.gmra.mrb[20].mxu1 %v5933_v2  ;;  %v9333_v2 = vcombine.low %v3236_v53, %v12063_v43  ;;  %v5944_v53 = vrot.slane %v13693_v51, 2 }
 0x24a   : > { %10778 = vmatprep.mubr.bf16.mxu1 %v5935_v47 }
 0x24b   : > { %v3539_v9 = vrot.slane %v9333_v2, 1 }
 0x24e   : > { %10461 = vmatmul.mubr.msk.bf16.gmra.mrb[68].mxu0 %vm1578_vm2, %v12915_v5  ;;  %v5942_v5 = vrot.slane %v13681_v25, 2 }
 0x24f   : > { %10464 = vmatprep.mubr.msk.bf16.mxu0 %vm1578_vm2, %v12923_v17  ;;  %v5941_v17 = vsel %vm5635_vm6, %v5938_v0, %v5940_v42 }
 0x250   : > { %v5943_v47 = vsel %vm5635_vm6, %v5940_v42, %v5942_v5  ;;  %v12067_v42 = vld [vmem:[%s12271_s19 + $0x10] sm:$0xff]  }
 0x251   : > { %10779 = vmatmul.mubr.bf16.gmra.mrb[24].mxu1 %v5937_v10  ;;  %v12064_v10 = vld [vmem:[%s12271_s19 + $0x8] sm:$0xff]   ;;  %v3542_v2 = vrot.slane %v12067_v42, 1  ;;  %v12070_v42 = vld [vmem:[#allocation2 + $0x18] sm:$0xff]  }
 0x252   : > { %10782 = vmatprep.mubr.bf16.mxu1 %v5939_v8  ;;  %v3540_v8 = vrot.slane %v12064_v10, 1 }
 0x254   : > { %v3541_v43 = vsel %vm3261_vm3, %v3539_v9, %v3540_v8  ;;  %v3543_v13 = vsel %vm3261_vm3, %v3540_v8, %v3542_v2 }
 0x256   : > { %10465 = vmatmul.mubr.msk.bf16.gmra.mrb[72].mxu0 %vm1578_vm2, %v12926_v20  ;;  %v13697_v20 = vld [vmem:[%s12271_s19 + $0x90] sm:$0xff]  }
 0x257   : > { %10468 = vmatprep.mubr.msk.bf16.mxu0 %vm1578_vm2, %v12929_v32  ;;  %v5946_v0 = vrot.slane %v13697_v20, 2  ;;  %v5945_v32 = vsel %vm5635_vm6, %v5942_v5, %v5944_v53  ;;  %v14594_v5 = vld [vmem:[#allocation6_spill] sm:$0xff] }
 0x259   : > { %10783 = vmatmul.mubr.bf16.gmra.mrb[28].mxu1 %v5941_v17  ;;  %v5947_v17 = vsel %vm5635_vm6, %v5944_v53, %v5946_v0  ;;  %v5949_v53 = vsel %vm5635_vm6, %v5946_v0, %v5948_v23 }
 0x25a   : > { %10786 = vmatprep.mubr.bf16.mxu1 %v5943_v47  ;;  %v12068_v47 = vld [vmem:[%s12271_s19 + $0x18] sm:$0xff]  }
 0x25b   : > { %v3544_v10 = vrot.slane %v12068_v47, 1  ;;  %v6417_v47 = vrot.slane %v12070_v42, 2 }
 0x25d   : > { %v3545_v9 = vsel %vm3261_vm3, %v3542_v2, %v3544_v10  ;;  %v12071_v2 = vld [vmem:[#allocation2 + $0x20] sm:$0xff]  }
 0x25e   : > { %10469 = vmatmul.mubr.msk.bf16.gmra.mrb[76].mxu0 %vm1578_vm2, %v12943_v62  ;;  %v13713_v62 = vld [vmem:[%s14528_s5 + $0xc0] sm:$0xff]   ;;  %v6419_v23 = vrot.slane %v12071_v2, 2 }
 0x25f   : > { %10488 = vmatprep.mubr.bf16.mxu0 %v3541_v43  ;;  %v6416_v43 = vrot.slane %v14594_v5, 2  ;;  %v3552_v5 = vrot.slane %v13268_v26, 1  ;;  %v12074_v26 = vld [vmem:[#allocation2 + $0x38] sm:$0xff]  }
 0x261   : > { %10787 = vmatmul.mubr.bf16.gmra.mrb[32].mxu1 %v5945_v32  ;;  %v3546_v32 = vrot.slane %v13110_v50, 1  ;;  %v6418_v8 = vsel %vm5635_vm6, %v6416_v43, %v6417_v47  ;;  %v3550_v50 = vrot.slane %v13254_v27, 1  ;;  %v11941_v27 = vld [vmem:[%s14528_s5 + $0x190] sm:$0xff]  }
 0x262   : > { %10790 = vmatprep.mubr.bf16.mxu1 %v5947_v17  ;;  %v12072_v17 = vld [vmem:[#allocation2 + $0x28] sm:$0xff]  }
 0x263   : > { %v3549_v0 = vsel %vm3261_vm3, %v3546_v32, %v3548_v33  ;;  %v3551_v43 = vsel %vm3261_vm3, %v3548_v33, %v3550_v50  ;;  %v11944_v33 = vld [vmem:[%s14528_s5 + $0x198] sm:$0xff]  }
 0x266   : > { %10489 = vmatmul.mubr.bf16.vlgmr.msra.gmra.mrb[44].mxu0 %v3543_v13  ;;  %v3547_v13 = vsel %vm3261_vm3, %v3544_v10, %v3546_v32  ;;  %v6425_v32 = vrot.slane %v12074_v26, 2  ;;  %v12078_v26 = vld [vmem:[#allocation2 + $0x58] sm:$0xff]  }
 0x267   : > { %10492 = vmatprep.mubr.bf16.mxu0 %v3545_v9  ;;  %10525 = vmatpush3.bf16.msra.mxu0 %v13636_v37  ;;  %v6421_v9 = vrot.slane %v12072_v17, 2  ;;  %v6420_v37 = vsel %vm5635_vm6, %v6417_v47, %v6419_v23  ;;  %v3553_v47 = vsel %vm3261_vm3, %v3550_v50, %v3552_v5  ;;  %v12076_v50 = vld [vmem:[#allocation2 + $0x48] sm:$0xff]  }
 0x268   : > { %10562 = vmatprep.subr.bf16.mxu0 %v13713_v62 }
 0x269   : > { %10791 = vmatmul.mubr.bf16.gmra.mrb[36].mxu1 %v5949_v53  ;;  %v6422_v10 = vsel %vm5635_vm6, %v6419_v23, %v6421_v9  ;;  %v12073_v53 = vld [vmem:[#allocation2 + $0x30] sm:$0xff]  }
 0x26a   : > { %10796 = vmatprep.mubr.msk.bf16.mxu1 %vm1578_vm2, %v6418_v8  ;;  %v6423_v42 = vrot.slane %v12073_v53, 2  ;;  %v12077_v53 = vld [vmem:[#allocation2 + $0x50] sm:$0xff]  }
 0x26c   : > { %v6424_v8 = vsel %vm5635_vm6, %v6421_v9, %v6423_v42  ;;  %v6426_v2 = vsel %vm5635_vm6, %v6423_v42, %v6425_v32  ;;  %v6431_v42 = vrot.slane %v12077_v53, 2  ;;  %v3572_v53 = vrot.slane %v13488_v57, 1 }
 0x26d   : > { %v3574_v57 = vrot.slane %v13506_v16, 1  ;;  %v12087_v16 = vld [vmem:[#allocation2 + $0x98] sm:$0xff]  }
 0x26e   : > { %10493 = vmatmul.mubr.bf16.gmra.mrb[48].mxu0 %v3547_v13  ;;  %v3556_v13 = vrot.slane %v13360_v48, 1  ;;  %v6429_v48 = vrot.slane %v12076_v50, 2 }
 0x26f   : > { %10496 = vmatprep.mubr.bf16.mxu0 %v3549_v0  ;;  %v12075_v0 = vld [vmem:[#allocation2 + $0x40] sm:$0xff]  }
 0x270   : > { %v6427_v17 = vrot.slane %v12075_v0, 2 }
 0x271   : > { %10797 = vmatmul.mubr.msk.bf16.vlgmr.msra.gmra.mrb[4].mxu1 %vm1578_vm2, %v6420_v37  ;;  %v11950_v37 = vld [vmem:[%s14528_s5 + $0x1a8] sm:$0xff]  }
 0x272   : > { %10833 = vmatpush3.bf16.msra.mxu1 %v13581_v52  ;;  %10800 = vmatprep.mubr.msk.bf16.mxu1 %vm1578_vm2, %v6422_v10  ;;  %v3554_v52 = vrot.slane %v13344_v41, 1  ;;  %v11947_v41 = vld [vmem:[%s14528_s5 + $0x1a0] sm:$0xff]   ;;  %v3560_v10 = vrot.slane %v13404_v22, 1  ;;  %v6433_v22 = vrot.slane %v12078_v26, 2 }
 0x273   : > { %10834 = vmatprep.subr.bf16.mxu1 %v11937_v24  ;;  %v12083_v26 = vld [vmem:[#allocation2 + $0x80] sm:$0xff]  }
 0x274   : > { %v3555_v23 = vsel %vm3261_vm3, %v3552_v5, %v3554_v52  ;;  %v3557_v9 = vsel %vm3261_vm3, %v3554_v52, %v3556_v13  ;;  %v6428_v5 = vsel %vm5635_vm6, %v6425_v32, %v6427_v17  ;;  %v3562_v32 = vrot.slane %v13425_v49, 1  ;;  %v11956_v52 = vld [vmem:[%s14528_s5 + $0x1b8] sm:$0xff]  }
 0x275   : > { %v13781_v49 = vld [vmem:[%s14529_s6 + $0x38] sm:$0xff]  }
 0x276   : > { %10497 = vmatmul.mubr.bf16.gmra.mrb[52].mxu0 %v3551_v43  ;;  %10835 = vmatpush3.bf16.msra.mxu1 %v11937_v24  ;;  %v3558_v24 = vrot.slane %v13395_v46, 1  ;;  %v6430_v43 = vsel %vm5635_vm6, %v6427_v17, %v6429_v48  ;;  %v11953_v46 = vld [vmem:[%s14528_s5 + $0x1b0] sm:$0xff]  }
 0x277   : > { %10500 = vmatprep.mubr.bf16.mxu0 %v3553_v47  ;;  %10836 = vmatprep.subr.bf16.mxu1 %v11941_v27 }
 0x278   : > { %v3561_v47 = vsel %vm3261_vm3, %v3558_v24, %v3560_v10 }
 0x279   : > { %10801 = vmatmul.mubr.msk.bf16.gmra.mrb[8].mxu1 %vm1578_vm2, %v6424_v8  ;;  %v3564_v8 = vrot.slane %v13432_v34, 1  ;;  %v12080_v34 = vld [vmem:[#allocation2 + $0x68] sm:$0xff]  }
 0x27a   : > { %10804 = vmatprep.mubr.msk.bf16.mxu1 %vm1578_vm2, %v6426_v2  ;;  %10837 = vmatpush3.bf16.msra.mxu1 %v11941_v27  ;;  %v3559_v27 = vsel %vm3261_vm3, %v3556_v13, %v3558_v24  ;;  %v6434_v13 = vsel %vm5635_vm6, %v6431_v42, %v6433_v22  ;;  %v3563_v2 = vsel %vm3261_vm3, %v3560_v10, %v3562_v32  ;;  %v6437_v17 = vrot.slane %v12080_v34, 2  ;;  %v12086_v34 = vld [vmem:[#allocation2 + $0x90] sm:$0xff]  }
 0x27b   : > { %10838 = vmatprep.subr.bf16.mxu1 %v11944_v33  ;;  %v3565_v0 = vsel %vm3261_vm3, %v3562_v32, %v3564_v8 }
 0x27e   : > { %10501 = vmatmul.mubr.bf16.gmra.mrb[56].mxu0 %v3555_v23  ;;  %10839 = vmatpush3.bf16.msra.mxu1 %v11944_v33  ;;  %v6432_v33 = vsel %vm5635_vm6, %v6429_v48, %v6431_v42  ;;  %v12079_v23 = vld [vmem:[#allocation2 + $0x60] sm:$0xff]   ;;  %v3568_v48 = vrot.slane %v13460_v21, 1 }
 0x27f   : > { %10504 = vmatprep.mubr.bf16.mxu0 %v3557_v9  ;;  %10840 = vmatprep.subr.bf16.mxu1 %v11947_v41  ;;  %v3566_v9 = vrot.slane %v13453_v18, 1 }
 0x281   : > { %10805 = vmatmul.mubr.msk.bf16.gmra.mrb[12].mxu1 %vm1578_vm2, %v6428_v5  ;;  %v12081_v5 = vld [vmem:[#allocation2 + $0x70] sm:$0xff]  }
 0x282   : > { %10808 = vmatprep.mubr.msk.bf16.mxu1 %vm1578_vm2, %v6430_v43  ;;  %10841 = vmatpush3.bf16.msra.mxu1 %v11947_v41  ;;  %v6435_v41 = vrot.slane %v12079_v23, 2  ;;  %v6439_v10 = vrot.slane %v12081_v5, 2  ;;  %v3569_v43 = vsel %vm3261_vm3, %v3566_v9, %v3568_v48  ;;  %v3575_v23 = vsel %vm3261_vm3, %v3572_v53, %v3574_v57  ;;  %v13818_v5 = vld [vmem:[%s12271_s19 + $0x18] sm:$0xff]  }
 0x283   : > { %10842 = vmatprep.subr.bf16.mxu1 %v11950_v37 }
 0x284   : > { %v6436_v50 = vsel %vm5635_vm6, %v6433_v22, %v6435_v41  ;;  %v6438_v24 = vsel %vm5635_vm6, %v6435_v41, %v6437_v17  ;;  %v6440_v21 = vsel %vm5635_vm6, %v6437_v17, %v6439_v10  ;;  %v6443_v22 = vrot.slane %v12083_v26, 2  ;;  %v14595_v41 = vld [vmem:[#allocation3_spill] sm:$0xff] }
 0x285   : > { %v6447_v17 = vrot.slane %v12086_v34, 2 }
 0x286   : > { %10505 = vmatmul.mubr.bf16.gmra.mrb[60].mxu0 %v3559_v27  ;;  %10843 = vmatpush3.bf16.msra.mxu1 %v11950_v37  ;;  %v3567_v37 = vsel %vm3261_vm3, %v3564_v8, %v3566_v9  ;;  %v12082_v27 = vld [vmem:[#allocation2 + $0x78] sm:$0xff]   ;;  %v6229_v9 = vld [vmem:[%s12271_s19 + $0x10] sm:$0xc] }
 0x287   : > { %10508 = vmatprep.mubr.bf16.mxu0 %v3561_v47  ;;  %10844 = vmatprep.subr.bf16.mxu1 %v11953_v46  ;;  %v6441_v18 = vrot.slane %v12082_v27, 2 }
 0x289   : > { %10809 = vmatmul.mubr.msk.bf16.gmra.mrb[16].mxu1 %vm1578_vm2, %v6432_v33  ;;  %v6442_v42 = vsel %vm5635_vm6, %v6439_v10, %v6441_v18  ;;  %v6444_v33 = vsel %vm5635_vm6, %v6441_v18, %v6443_v22  ;;  %v12088_v18 = vld [vmem:[#allocation2 + $0x18] sm:$0xff]  }
 0x28a   : > { %10812 = vmatprep.mubr.msk.bf16.mxu1 %vm1578_vm2, %v6434_v13  ;;  %10845 = vmatpush3.bf16.msra.mxu1 %v11953_v46  ;;  %v3570_v46 = vrot.slane %v13483_v36, 1  ;;  %v12085_v13 = vld [vmem:[#allocation2 + $0x10] sm:$0xff]  }
 0x28b   : > { %10846 = vmatprep.subr.bf16.mxu1 %v11956_v52 }
 0x28c   : > { %v3571_v47 = vsel %vm3261_vm3, %v3568_v48, %v3570_v46  ;;  %v3573_v32 = vsel %vm3261_vm3, %v3570_v46, %v3572_v53  ;;  %v6449_v48 = vrot.slane %v12087_v16, 2  ;;  %v4045_v46 = vrot.slane %v12088_v18, 1  ;;  %v13863_v16 = vld [vmem:[%s12271_s19 + $0x38] sm:$0xff]  }
 0x28d   : > { %v6792_v18 = vrot.slane %v13863_v16, 2 }
 0x28e   : > { %10509 = vmatmul.mubr.bf16.gmra.mrb[64].mxu0 %v3563_v2  ;;  %10847 = vmatpush3.bf16.msra.mxu1 %v11956_v52  ;;  %v12084_v52 = vld [vmem:[#allocation2 + $0x88] sm:$0xff]   ;;  %v4043_v2 = vrot.slane %v12085_v13, 1  ;;  %v6450_v27 = vsel %vm5635_vm6, %v6447_v17, %v6449_v48  ;;  %v11970_v13 = vld [vmem:[%s14528_s5 + $0xd0] sm:$0xff]  }
 0x28f   : > { %10512 = vmatprep.mubr.bf16.mxu0 %v3565_v0  ;;  %10884 = vmatprep.subr.bf16.mxu1 %v13781_v49  ;;  %v6445_v36 = vrot.slane %v12084_v52, 2  ;;  %v4042_v0 = vrot.slane %v14595_v41, 1 }
 0x291   : > { %10813 = vmatmul.mubr.msk.bf16.gmra.mrb[20].mxu1 %vm1578_vm2, %v6436_v50  ;;  %v6446_v8 = vsel %vm5635_vm6, %v6443_v22, %v6445_v36  ;;  %v13810_v50 = vld [vmem:[%s12271_s19 + $0x14] sm:$0xf]  ;;  %v6448_v10 = vsel %vm5635_vm6, %v6445_v36, %v6447_v17  ;;  %v11969_v22 = vld [vmem:[%s14528_s5 + $0xc8] sm:$0xff]   ;;  %v13833_v36 = vld [vmem:[%s12271_s19 + $0x20] sm:$0xff]  }
 0x292   : > { %10816 = vmatprep.mubr.msk.bf16.mxu1 %vm1578_vm2, %v6438_v24  ;;  %v4044_v24 = vsel %vm3261_vm3, %v4042_v0, %v4043_v2  ;;  %v6786_v41 = vrot.slane %v13833_v36, 2  ;;  %v11973_v0 = vld [vmem:[%s14528_s5 + $0xd8] sm:$0xff]  }
 0x296   : > { %10513 = vmatmul.mubr.bf16.gmra.mrb[68].mxu0 %v3567_v37  ;;  %v13815_v37 = vcombine.low %v6229_v9, %v13810_v50 }
 0x297   : > { %10516 = vmatprep.mubr.bf16.mxu0 %v3569_v43  ;;  %v11957_v43 = vld [vmem:[#allocation2 + $0xa0] ss:$0 sps:$4 sm:$0x33]  }
 0x298   : > { %v6451_v26 = vrot.slane %v11957_v43, 2  ;;  %v4055_v43 = vrot.slane %v13421_v19, 1 }
 0x299   : > { %10817 = vmatmul.mubr.msk.bf16.gmra.mrb[24].mxu1 %vm1578_vm2, %v6440_v21  ;;  %v12089_v21 = vld [vmem:[#allocation2 + $0x20] sm:$0xff]  }
 0x29a   : > { %10820 = vmatprep.mubr.msk.bf16.mxu1 %vm1578_vm2, %v6442_v42  ;;  %v4047_v53 = vrot.slane %v12089_v21, 1  ;;  %v6783_v42 = vrot.slane %v13815_v37, 2  ;;  %v13887_v21 = vld [vmem:[%s12271_s19 + $0x40] sm:$0xff]  }
 0x29c   : > { %v4048_v52 = vsel %vm3261_vm3, %v4045_v46, %v4047_v53 }
 0x29e   : > { %10517 = vmatmul.mubr.bf16.gmra.mrb[72].mxu0 %v3571_v47  ;;  %v6784_v47 = vrot.slane %v13818_v5, 2 }
 0x29f   : > { %10520 = vmatprep.mubr.bf16.mxu0 %v3573_v32  ;;  %v4046_v32 = vsel %vm3261_vm3, %v4043_v2, %v4045_v46  ;;  %v4049_v2 = vrot.slane %v13385_v14, 1  ;;  %v11977_v46 = vld [vmem:[%s14528_s5 + $0xe8] sm:$0xff]  }
 0x2a0   : > { %v6785_v57 = vsel %vm5635_vm6, %v6783_v42, %v6784_v47  ;;  %v6787_v14 = vsel %vm5635_vm6, %v6784_v47, %v6786_v41  ;;  %v13892_v42 = vld [vmem:[%s12271_s19 + $0x48] sm:$0xff]   ;;  %v11978_v47 = vld [vmem:[%s14528_s5 + $0xf0] sm:$0xff]  }
 0x2a1   : > { %10821 = vmatmul.mubr.msk.bf16.gmra.mrb[28].mxu1 %vm1578_vm2, %v6444_v33  ;;  %v13838_v33 = vld [vmem:[%s12271_s19 + $0x28] sm:$0xff]   ;;  %v4050_v34 = vsel %vm3261_vm3, %v4047_v53, %v4049_v2 }
 0x2a2   : > { %10824 = vmatprep.mubr.msk.bf16.mxu1 %vm1578_vm2, %v6446_v8  ;;  %v6452_v8 = vsel %vm5635_vm6, %v6449_v48, %v6451_v26  ;;  %v13868_v48 = vld [vmem:[%s14528_s5 + $0x1c0] sm:$0xff]   ;;  %v4057_v26 = vrot.slane %v13443_v61, 1 }
 0x2a6   : > { %10521 = vmatmul.mubr.bf16.gmra.mrb[76].mxu0 %v3575_v23  ;;  %v4051_v23 = vrot.slane %v13391_v55, 1  ;;  %v13858_v55 = vld [vmem:[%s12271_s19 + $0x30] sm:$0xff]  }
 0x2a7   : > { %10526 = vmatprep.mubr.msk.bf16.mxu0 %vm1578_vm2, %v4044_v24  ;;  %v11974_v24 = vld [vmem:[%s14528_s5 + $0xe0] sm:$0xff]  }
 0x2a8   : > { %v4052_v17 = vsel %vm3261_vm3, %v4049_v2, %v4051_v23 }
 0x2a9   : > { %10825 = vmatmul.mubr.msk.bf16.gmra.mrb[32].mxu1 %vm1578_vm2, %v6448_v10  ;;  %v4053_v10 = vrot.slane %v13415_v63, 1 }
 0x2aa   : > { %10828 = vmatprep.mubr.msk.bf16.mxu1 %vm1578_vm2, %v6450_v27  ;;  %v6790_v27 = vrot.slane %v13858_v55, 2 }
 0x2ab   : > { %v4054_v63 = vsel %vm3261_vm3, %v4051_v23, %v4053_v10  ;;  %v13914_v23 = vld [vmem:[%s12271_s19 + $0x58] sm:$0xff]  }
 0x2ac   : > { %v6793_v53 = vsel %vm5635_vm6, %v6790_v27, %v6792_v18 }
 0x2ae   : > { %10527 = vmatmul.mubr.msk.bf16.vlgmr.msra.gmra.mrb[44].mxu0 %vm1578_vm2, %v4046_v32  ;;  %v6794_v32 = vrot.slane %v13887_v21, 2 }
 0x2af   : > { %10530 = vmatprep.mubr.msk.bf16.mxu0 %vm1578_vm2, %v4048_v52  ;;  %10563 = vmatpush3.bf16.msra.mxu0 %v13713_v62  ;;  %v6788_v62 = vrot.slane %v13838_v33, 2  ;;  %v6796_v52 = vrot.slane %v13892_v42, 2 }
 0x2b0   : > { %10564 = vmatprep.subr.bf16.mxu0 %v11969_v22  ;;  %v6795_v61 = vsel %vm5635_vm6, %v6792_v18, %v6794_v32 }
 0x2b1   : > { %10829 = vmatmul.mubr.msk.bf16.gmra.mrb[36].mxu1 %vm1578_vm2, %v6452_v8  ;;  %v6789_v9 = vsel %vm5635_vm6, %v6786_v41, %v6788_v62  ;;  %v6791_v19 = vsel %vm5635_vm6, %v6788_v62, %v6790_v27  ;;  %v4058_v8 = vsel %vm3261_vm3, %v4055_v43, %v4057_v26  ;;  %v6797_v2 = vsel %vm5635_vm6, %v6794_v32, %v6796_v52 }
 0x2b2   : > { %10848 = vmatprep.mubr.bf16.mxu1 %v6785_v57  ;;  %v11981_v57 = vld [vmem:[%s14528_s5 + $0xf8] sm:$0xff]   ;;  %v4061_v41 = vrot.slane %v13473_v11, 1  ;;  %v4063_v62 = vrot.slane %v13479_v35, 1  ;;  %v13930_v35 = vld [vmem:[%s12271_s19 + $0x68] sm:$0xff]  }
 0x2b3   : > { %10565 = vmatpush3.bf16.msra.mxu0 %v11969_v22  ;;  %v4059_v22 = vrot.slane %v13449_v54, 1  ;;  %v13909_v54 = vld [vmem:[%s12271_s19 + $0x50] sm:$0xff]   ;;  %v6804_v18 = vrot.slane %v13930_v35, 2 }
 0x2b4   : > { %10566 = vmatprep.subr.bf16.mxu0 %v11970_v13 }
 0x2b6   : > { %10531 = vmatmul.mubr.msk.bf16.gmra.mrb[48].mxu0 %vm1578_vm2, %v4050_v34  ;;  %v6800_v34 = vrot.slane %v13914_v23, 2 }
 0x2b7   : > { %10534 = vmatprep.mubr.msk.bf16.mxu0 %vm1578_vm2, %v4052_v17  ;;  %10567 = vmatpush3.bf16.msra.mxu0 %v11970_v13  ;;  %v4060_v13 = vsel %vm3261_vm3, %v4057_v26, %v4059_v22  ;;  %v4062_v17 = vsel %vm3261_vm3, %v4059_v22, %v4061_v41 }
 0x2b8   : > { %10568 = vmatprep.subr.bf16.mxu0 %v11973_v0 }
 0x2b9   : > { %10849 = vmatmul.mubr.bf16.vlgmr.msra.gmra.mrb[4].mxu1 %v6787_v14  ;;  %v4064_v14 = vsel %vm3261_vm3, %v4061_v41, %v4063_v62 }
 0x2ba   : > { %10885 = vmatpush3.bf16.msra.mxu1 %v13781_v49  ;;  %10852 = vmatprep.mubr.bf16.mxu1 %v6789_v9  ;;  %v4056_v49 = vsel %vm3261_vm3, %v4053_v10, %v4055_v43  ;;  %v4065_v10 = vrot.slane %v13496_v12, 1  ;;  %v4067_v43 = vrot.slane %v13502_v6, 1  ;;  %v13946_v6 = vld [vmem:[%s12271_s19 + $0x78] sm:$0xff]  }
 0x2bb   : > { %10569 = vmatpush3.bf16.msra.mxu0 %v11973_v0  ;;  %10922 = vmatprep.subr.bf16.mxu1 %v13868_v48  ;;  %v6798_v0 = vrot.slane %v13909_v54, 2  ;;  %v6808_v22 = vrot.slane %v13946_v6, 2 }
 0x2bc   : > { %10570 = vmatprep.subr.bf16.mxu0 %v11974_v24 }
 0x2bd   : > { %v6799_v9 = vsel %vm5635_vm6, %v6796_v52, %v6798_v0  ;;  %v6801_v11 = vsel %vm5635_vm6, %v6798_v0, %v6800_v34 }
 0x2be   : > { %10535 = vmatmul.mubr.msk.bf16.gmra.mrb[52].mxu0 %vm1578_vm2, %v4054_v63  ;;  %v4068_v63 = vsel %vm3261_vm3, %v4065_v10, %v4067_v43 }
 0x2bf   : > { %10538 = vmatprep.mubr.msk.bf16.mxu0 %vm1578_vm2, %v4056_v49  ;;  %10571 = vmatpush3.bf16.msra.mxu0 %v11974_v24  ;;  %v13925_v24 = vld [vmem:[%s12271_s19 + $0x60] sm:$0xff]  }
 0x2c0   : > { %10572 = vmatprep.subr.bf16.mxu0 %v11977_v46  ;;  %v6802_v27 = vrot.slane %v13925_v24, 2 }
 0x2c1   : > { %10853 = vmatmul.mubr.bf16.gmra.mrb[8].mxu1 %v6791_v19  ;;  %v13941_v19 = vld [vmem:[%s12271_s19 + $0x70] sm:$0xff]  }
 0x2c2   : > { %10856 = vmatprep.mubr.bf16.mxu1 %v6793_v53  ;;  %v6803_v49 = vsel %vm5635_vm6, %v6800_v34, %v6802_v27  ;;  %v6805_v12 = vsel %vm5635_vm6, %v6802_v27, %v6804_v18  ;;  %v4069_v53 = vrot.slane %v13515_v44, 1  ;;  %v6806_v26 = vrot.slane %v13941_v19, 2  ;;  %v14597_v34 = vld [vmem:[#allocation4_spill] sm:$0xff] }
 0x2c3   : > { %10573 = vmatpush3.bf16.msra.mxu0 %v11977_v46  ;;  %v4066_v46 = vsel %vm3261_vm3, %v4063_v62, %v4065_v10  ;;  %v4414_v27 = vrot.slane %v13566_v59, 1  ;;  %v4418_v59 = vrot.slane %v13592_v1, 1 }
 0x2c4   : > { %10574 = vmatprep.subr.bf16.mxu0 %v11978_v47  ;;  %v4070_v32 = vsel %vm3261_vm3, %v4067_v43, %v4069_v53  ;;  %v6809_v44 = vsel %vm5635_vm6, %v6806_v26, %v6808_v22  ;;  %v13980_v43 = vld [vmem:[%s12271_s19 + $0x98] sm:$0xff]  }
 0x2c6   : > { %10539 = vmatmul.mubr.msk.bf16.gmra.mrb[56].mxu0 %vm1578_vm2, %v4058_v8  ;;  %v13957_v8 = vld [vmem:[%s12271_s19 + $0x80] sm:$0xff]  }
 0x2c7   : > { %10542 = vmatprep.mubr.msk.bf16.mxu0 %vm1578_vm2, %v4060_v13  ;;  %10575 = vmatpush3.bf16.msra.mxu0 %v11978_v47  ;;  %v4071_v47 = vrot.slane %v13519_v38, 1  ;;  %v13962_v38 = vld [vmem:[%s12271_s19 + $0x88] sm:$0xff]   ;;  %v14596_v13 = vld [vmem:[#allocation5_spill] sm:$0xff]  ;;  %v6810_v41 = vrot.slane %v13957_v8, 2 }
 0x2c8   : > { %10576 = vmatprep.subr.bf16.mxu0 %v11981_v57  ;;  %v6812_v62 = vrot.slane %v13962_v38, 2 }
 0x2c9   : > { %10857 = vmatmul.mubr.bf16.gmra.mrb[12].mxu1 %v6795_v61  ;;  %v4072_v52 = vsel %vm3261_vm3, %v4069_v53, %v4071_v47  ;;  %v4409_v61 = vrot.slane %v14596_v13, 1  ;;  %v4416_v53 = vrot.slane %v13588_v4, 1  ;;  %v14599_v4 = vld [vmem:[#allocation7_spill] sm:$0xff] }
 0x2ca   : > { %10860 = vmatprep.mubr.bf16.mxu1 %v6797_v2  ;;  %v4410_v2 = vrot.slane %v13536_v40, 1  ;;  %v4412_v40 = vrot.slane %v13562_v29, 1  ;;  %v6813_v10 = vsel %vm5635_vm6, %v6810_v41, %v6812_v62  ;;  %v11985_v29 = vld [vmem:[%s12271_s19 + $0xa0] ss:$0 sps:$4 sm:$0x33]  }
 0x2cb   : > { %10577 = vmatpush3.bf16.msra.mxu0 %v11981_v57  ;;  %v6807_v57 = vsel %vm5635_vm6, %v6804_v18, %v6806_v26  ;;  %v6818_v26 = vrot.slane %v11985_v29, 2  ;;  %v4438_v29 = vrot.slane %v13681_v25, 1  ;;  %v4440_v25 = vrot.slane %v13693_v51, 1  ;;  %v14609_v51 = vld [vmem:[#allocation17_spill] sm:$0xff] }
 0x2cc   : > { %v4411_v0 = vsel %vm3261_vm3, %v4409_v61, %v4410_v2  ;;  %v4424_v61 = vrot.slane %v13626_v7, 1  ;;  %v11988_v7 = vld [vmem:[%s14528_s5 + $0x1d0] sm:$0xff]  }
 0x2ce   : > { %10543 = vmatmul.mubr.msk.bf16.gmra.mrb[60].mxu0 %vm1578_vm2, %v4062_v17  ;;  %v14598_v17 = vrot.slane %v14597_v34, 1  ;;  %v4430_v34 = vrot.slane %v13650_v60, 1  ;;  %v4432_v60 = vrot.slane %v13662_v3, 1  ;;  %v11993_v3 = vld [vmem:[%s14528_s5 + $0x1f0] sm:$0xff]  }
 0x2cf   : > { %10546 = vmatprep.mubr.msk.bf16.mxu0 %vm1578_vm2, %v4064_v14 }
 0x2d0   : > { %v4074_v14 = vsel %vm3261_vm3, %v4071_v47, %v14598_v17  ;;  %v14602_v17 = vld [vmem:[#allocation10_spill] sm:$0xff] }
 0x2d1   : > { %10861 = vmatmul.mubr.bf16.gmra.mrb[16].mxu1 %v6799_v9  ;;  %v6811_v9 = vsel %vm5635_vm6, %v6808_v22, %v6810_v41  ;;  %v4417_v22 = vsel %vm3261_vm3, %v4414_v27, %v4416_v53  ;;  %v14600_v41 = vld [vmem:[#allocation8_spill] sm:$0xff] }
 0x2d2   : > { %10864 = vmatprep.mubr.bf16.mxu1 %v6801_v11  ;;  %v13975_v11 = vld [vmem:[%s12271_s19 + $0x90] sm:$0xff]  }
 0x2d3   : > { %v6814_v18 = vrot.slane %v13975_v11, 2 }
 0x2d6   : > { %10547 = vmatmul.mubr.msk.bf16.gmra.mrb[64].mxu0 %vm1578_vm2, %v4066_v46  ;;  %v4413_v46 = vsel %vm3261_vm3, %v4410_v2, %v4412_v40  ;;  %v11987_v2 = vld [vmem:[%s14528_s5 + $0x1c8] sm:$0xff]  }
 0x2d7   : > { %10550 = vmatprep.mubr.msk.bf16.mxu0 %vm1578_vm2, %v4068_v63  ;;  %v6816_v63 = vrot.slane %v13980_v43, 2 }
 0x2d9   : > { %10865 = vmatmul.mubr.bf16.gmra.mrb[20].mxu1 %v6803_v49  ;;  %v4415_v49 = vsel %vm3261_vm3, %v4412_v40, %v4414_v27  ;;  %v6817_v47 = vsel %vm5635_vm6, %v6814_v18, %v6816_v63  ;;  %v4434_v27 = vrot.slane %v13666_v58, 1  ;;  %v4436_v58 = vrot.slane %v13677_v56, 1  ;;  %v14057_v56 = vld [vmem:[%s14529_s6 + $0x40] sm:$0xff]  }
 0x2da   : > { %10868 = vmatprep.mubr.bf16.mxu1 %v6805_v12  ;;  %v6815_v12 = vsel %vm5635_vm6, %v6812_v62, %v6814_v18  ;;  %v14604_v18 = vld [vmem:[#allocation12_spill] sm:$0xff] }
 0x2de   : > { %10551 = vmatmul.mubr.msk.bf16.gmra.mrb[68].mxu0 %vm1578_vm2, %v4070_v32  ;;  %v4419_v32 = vsel %vm3261_vm3, %v4416_v53, %v4418_v59  ;;  %v14606_v53 = vld [vmem:[#allocation14_spill] sm:$0xff] }
 0x2df   : > { %10554 = vmatprep.mubr.msk.bf16.mxu0 %vm1578_vm2, %v4072_v52  ;;  %v6819_v52 = vsel %vm5635_vm6, %v6816_v63, %v6818_v26  ;;  %v4433_v63 = vsel %vm3261_vm3, %v4430_v34, %v4432_v60  ;;  %v4439_v26 = vsel %vm3261_vm3, %v4436_v58, %v4438_v29 }
 0x2e1   : > { %10869 = vmatmul.mubr.bf16.gmra.mrb[24].mxu1 %v6807_v57  ;;  %v4420_v57 = vrot.slane %v13609_v45, 1  ;;  %v4426_v45 = vrot.slane %v13630_v31, 1  ;;  %v4428_v31 = vrot.slane %v13646_v30, 1  ;;  %v11990_v30 = vld [vmem:[%s14528_s5 + $0x1e0] sm:$0xff]  }
 0x2e2   : > { %10872 = vmatprep.mubr.bf16.mxu1 %v6809_v44  ;;  %v4422_v44 = vrot.slane %v13613_v15, 1  ;;  %v14601_v15 = vld [vmem:[#allocation9_spill] sm:$0xff] }
 0x2e3   : > { %v4421_v1 = vsel %vm3261_vm3, %v4418_v59, %v4420_v57  ;;  %v4431_v40 = vsel %vm3261_vm3, %v4428_v31, %v4430_v34  ;;  %v4437_v59 = vsel %vm3261_vm3, %v4434_v27, %v4436_v58  ;;  %v14614_v58 = vld [vmem:[#allocation22_spill] sm:$0xff] }
 0x2e4   : > { %v4423_v13 = vsel %vm3261_vm3, %v4420_v57, %v4422_v44  ;;  %v4425_v62 = vsel %vm3261_vm3, %v4422_v44, %v4424_v61  ;;  %v11992_v57 = vld [vmem:[%s12271_s19 + $0x98] ss:$0 sps:$4 sm:$0x11]  }
 0x2e6   : > { %10555 = vmatmul.mubr.msk.bf16.gmra.mrb[72].mxu0 %vm1578_vm2, %v4074_v14  ;;  %v14603_v14 = vld [vmem:[#allocation11_spill] sm:$0xff] }
 0x2e7   : > { %10578 = vmatprep.mubr.bf16.mxu0 %v4411_v0  ;;  %v4427_v0 = vsel %vm3261_vm3, %v4424_v61, %v4426_v45  ;;  %v7539_v61 = vshll.u32 %v13815_v37, 16 }
 0x2e9   : > { %10873 = vmatmul.mubr.bf16.gmra.mrb[28].mxu1 %v6811_v9  ;;  %v4429_v9 = vsel %vm3261_vm3, %v4426_v45, %v4428_v31  ;;  %v12090_v45 = vld [vmem:[#allocation2 + $0xa0] ss:$0 sps:$4 sm:$0x77]  }
 0x2ea   : > { %10876 = vmatprep.mubr.bf16.mxu1 %v6813_v10  ;;  %v11991_v10 = vld [vmem:[%s14528_s5 + $0x1e8] sm:$0xff]  }
 0x2ee   : > { %10579 = vmatmul.mubr.bf16.vlgmr.msra.gmra.mrb[44].mxu0 %v4413_v46  ;;  %v14605_v46 = vld [vmem:[#allocation13_spill] sm:$0xff] }
 0x2ef   : > { %10582 = vmatprep.mubr.bf16.mxu0 %v4415_v49  ;;  %v4435_v49 = vsel %vm3261_vm3, %v4432_v60, %v4434_v27  ;;  %v7562_v60 = vshrl.u32 %v13838_v33, 16 }
 0x2f1   : > { %10877 = vmatmul.mubr.bf16.gmra.mrb[32].mxu1 %v6815_v12  ;;  %v11994_v12 = vld [vmem:[%s14528_s5 + $0x1f8] sm:$0xff]  }
 0x2f2   : > { %10880 = vmatprep.mubr.bf16.mxu1 %v6817_v47  ;;  %v14607_v47 = vld [vmem:[#allocation15_spill] sm:$0xff] }
 0x2f6   : > { %10583 = vmatmul.mubr.bf16.gmra.mrb[48].mxu0 %v4417_v22  ;;  %v4442_v22 = vrot.slane %v13697_v20, 1 }
 0x2f7   : > { %10586 = vmatprep.mubr.bf16.mxu0 %v4419_v32  ;;  %v14608_v32 = vld [vmem:[#allocation16_spill] sm:$0xff] }
 0x2f8   : > { %v4443_v44 = vsel %vm3261_vm3, %v4440_v25, %v4442_v22 }
 0x2f9   : > { %10881 = vmatmul.mubr.bf16.gmra.mrb[36].mxu1 %v6819_v52  ;;  %v4441_v52 = vsel %vm3261_vm3, %v4438_v29, %v4440_v25  ;;  %v7583_v25 = vshll.u32 %v13863_v16, 16 }
 0x2fa   : > { %10886 = vmatprep.mubr.msk.bf16.mxu1 %vm1578_vm2, %v14599_v4  ;;  %v4444_v4 = vrot.slane %v11992_v57, 1 }
 0x2fc   : > { %v4445_v20 = vsel %vm3261_vm3, %v4442_v22, %v4444_v4  ;;  %v7585_v4 = vrot.slane %v7583_v25, 3  ;;  %v7646_v25 = vshll.u32 %v13941_v19, 16 }
 0x2fe   : > { %10587 = vmatmul.mubr.bf16.gmra.mrb[52].mxu0 %v4421_v1  ;;  %v14610_v1 = vld [vmem:[#allocation18_spill] sm:$0xff] }
 0x2ff   : > { %10590 = vmatprep.mubr.bf16.mxu0 %v4423_v13  ;;  %v7536_v13 = vshrl.u32 %v13815_v37, 16  ;;  %v7553_v37 = vshrl.u32 %v13833_v36, 16 }
 0x301   : > { %10887 = vmatmul.mubr.msk.bf16.vlgmr.msra.gmra.mrb[4].mxu1 %vm1578_vm2, %v14600_v41  ;;  %v7287_v41 = vshrl.u32 %v12090_v45, 16 }
 0x302   : > { %10923 = vmatpush3.bf16.msra.mxu1 %v13868_v48  ;;  %10890 = vmatprep.mubr.msk.bf16.mxu1 %vm1578_vm2, %v14601_v15  ;;  %v11989_v48 = vld [vmem:[%s14528_s5 + $0x1d8] sm:$0xff]   ;;  %v7290_v15 = vshll.u32 %v12090_v45, 16 }
 0x303   : > { %10924 = vmatprep.subr.bf16.mxu1 %v11987_v2 }
 0x304   : > { %v7292_v34 = vrot.slane %v7290_v15, 3 }
 0x306   : > { %10591 = vmatmul.mubr.bf16.gmra.mrb[56].mxu0 %v4425_v62  ;;  %10925 = vmatpush3.bf16.msra.mxu1 %v11987_v2  ;;  %v7544_v2 = vshrl.u32 %v13818_v5, 16  ;;  %v7538_v62 = vrot.slane %v7536_v13, 2 }
 0x307   : > { %10594 = vmatprep.mubr.bf16.mxu0 %v4427_v0  ;;  %10926 = vmatprep.subr.bf16.mxu1 %v11988_v7 }
 0x308   : > { %v7546_v0 = vrot.slane %v7544_v2, 2  ;;  %v7601_v2 = vshll.u32 %v13892_v42, 16 }
 0x309   : > { %10891 = vmatmul.mubr.msk.bf16.gmra.mrb[8].mxu1 %vm1578_vm2, %v14602_v17  ;;  %v14612_v17 = vld [vmem:[#allocation20_spill] sm:$0xff] }
 0x30a   : > { %10894 = vmatprep.mubr.msk.bf16.mxu1 %vm1578_vm2, %v14603_v14  ;;  %10927 = vmatpush3.bf16.msra.mxu1 %v11988_v7  ;;  %v7541_v7 = vrot.slane %v7539_v61, 3  ;;  %v14613_v14 = vld [vmem:[#allocation25_spill] sm:$0xff]  ;;  %v7598_v61 = vshrl.u32 %v13892_v42, 16 }
 0x30b   : > { %10928 = vmatprep.subr.bf16.mxu1 %v11989_v48 }
 0x30e   : > { %10595 = vmatmul.mubr.bf16.gmra.mrb[60].mxu0 %v4429_v9  ;;  %10929 = vmatpush3.bf16.msra.mxu1 %v11989_v48  ;;  %v7289_v48 = vrot.slane %v7287_v41, 2  ;;  %v7556_v9 = vshll.u32 %v13833_v36, 16 }
 0x30f   : > { %10598 = vmatprep.mubr.bf16.mxu0 %v4431_v40  ;;  %10930 = vmatprep.subr.bf16.mxu1 %v11990_v30 }
 0x310   : > { %v7293_v27 = vor.u32 %v7292_v34, %v7289_v48  ;;  %v7616_v34 = vshrl.u32 %v13914_v23, 16 }
 0x311   : > { %10895 = vmatmul.mubr.msk.bf16.gmra.mrb[12].mxu1 %vm1578_vm2, %v14604_v18  ;;  %v7555_v18 = vrot.slane %v7553_v37, 2 }
 0x312   : > { %10898 = vmatprep.mubr.msk.bf16.mxu1 %vm1578_vm2, %v14605_v46  ;;  %10931 = vmatpush3.bf16.msra.mxu1 %v11990_v30  ;;  %v7542_v30 = vor.u32 %v7541_v7, %v7538_v62  ;;  %v7558_v46 = vrot.slane %v7556_v9, 3  ;;  %v7603_v62 = vrot.slane %v7601_v2, 3  ;;  %v7664_v2 = vshll.u32 %v13957_v8, 16 }
 0x313   : > { %10932 = vmatprep.subr.bf16.mxu1 %v11991_v10 }
 0x314   : > { %v7559_v29 = vor.u32 %v7558_v46, %v7555_v18  ;;  %v7628_v18 = vshll.u32 %v13925_v24, 16 }
 0x316   : > { %10599 = vmatmul.mubr.bf16.gmra.mrb[64].mxu0 %v4433_v63  ;;  %10933 = vmatpush3.bf16.msra.mxu1 %v11991_v10  ;;  %v7565_v10 = vshll.u32 %v13838_v33, 16 }
 0x317   : > { %10602 = vmatprep.mubr.bf16.mxu0 %v4435_v49  ;;  %10934 = vmatprep.subr.bf16.mxu1 %v11993_v3 }
 0x318   : > { %v7567_v49 = vrot.slane %v7565_v10, 3 }
 0x319   : > { %10899 = vmatmul.mubr.msk.bf16.gmra.mrb[16].mxu1 %vm1578_vm2, %v14606_v53  ;;  %v7571_v53 = vshrl.u32 %v13858_v55, 16 }
 0x31a   : > { %10902 = vmatprep.mubr.msk.bf16.mxu1 %vm1578_vm2, %v14607_v47  ;;  %10935 = vmatpush3.bf16.msra.mxu1 %v11993_v3  ;;  %v7564_v3 = vrot.slane %v7562_v60, 2  ;;  %v7574_v47 = vshll.u32 %v13858_v55, 16 }
 0x31b   : > { %10936 = vmatprep.subr.bf16.mxu1 %v11994_v12 }
 0x31e   : > { %10603 = vmatmul.mubr.bf16.gmra.mrb[68].mxu0 %v4437_v59  ;;  %10937 = vmatpush3.bf16.msra.mxu1 %v11994_v12  ;;  %v7294_v12 = vsel %vm7124_vm7, %v14614_v58, %v7293_v27  ;;  %v7568_v59 = vor.u32 %v7567_v49, %v7564_v3  ;;  %v7625_v27 = vshrl.u32 %v13925_v24, 16  ;;  %v7637_v3 = vshll.u32 %v13930_v35, 16 }
 0x31f   : > { %10606 = vmatprep.mubr.bf16.mxu0 %v4439_v26  ;;  %10974 = vmatprep.subr.bf16.mxu1 %v14057_v56  ;;  %v7580_v26 = vshrl.u32 %v13863_v16, 16 }
 0x320   : > { %v7569_v57 = vsel %vm7124_vm7, %v7559_v29, %v7568_v59  ;;  %v7627_v58 = vrot.slane %v7625_v27, 2 }
 0x321   : > { %10903 = vmatmul.mubr.msk.bf16.gmra.mrb[20].mxu1 %vm1578_vm2, %v14608_v32  ;;  %v7573_v32 = vrot.slane %v7571_v53, 2 }
 0x322   : > { %10906 = vmatprep.mubr.msk.bf16.mxu1 %vm1578_vm2, %v13216_v39  ;;  %v14611_v39 = vld [vmem:[#allocation19_spill] sm:$0xff] }
 0x326   : > { %10607 = vmatmul.mubr.bf16.gmra.mrb[72].mxu0 %v4441_v52  ;;  %v7576_v52 = vrot.slane %v7574_v47, 3  ;;  %v7639_v47 = vrot.slane %v7637_v3, 3  ;;  %v14615_v3 = vld [vmem:[#allocation41_spill] sm:$0xff] }
 0x327   : > { %10610 = vmatprep.mubr.bf16.mxu0 %v4443_v44  ;;  %v7582_v44 = vrot.slane %v7580_v26, 2  ;;  %v7643_v26 = vshrl.u32 %v13941_v19, 16 }
 0x329   : > { %10907 = vmatmul.mubr.msk.bf16.gmra.mrb[24].mxu1 %vm1578_vm2, %v13219_v28  ;;  %v7547_v28 = vshll.u32 %v13818_v5, 16  ;;  %v7586_v13 = vor.u32 %v7585_v4, %v7582_v44  ;;  %v7645_v44 = vrot.slane %v7643_v26, 2  ;;  %v7648_v4 = vrot.slane %v7646_v25, 3 }
 0x32a   : > { %10910 = vmatprep.mubr.msk.bf16.mxu1 %vm1578_vm2, %v14609_v51  ;;  %v14104_v51 = vld [vmem:[%s14528_s5 + $0x200] sm:$0xff]  }
 0x32b   : > { %v7549_v31 = vrot.slane %v7547_v28, 3 }
 0x32d   : > { %v7550_v40 = vor.u32 %v7549_v31, %v7546_v0  ;;  %v7607_v0 = vshrl.u32 %v13909_v54, 16  ;;  %v7610_v31 = vshll.u32 %v13909_v54, 16 }
 0x32e   : > { %10611 = vmatmul.mubr.bf16.gmra.mrb[80].mxu0 %v4445_v20  ;;  %v7577_v20 = vor.u32 %v7576_v52, %v7573_v32  ;;  %v7652_v32 = vshrl.u32 %v13946_v6, 16  ;;  %v7655_v52 = vshll.u32 %v13946_v6, 16 }
 0x32f   : > { %v7551_v63 = vsel %vm7124_vm7, %v7542_v30, %v7550_v40  ;;  %v7560_v22 = vsel %vm7124_vm7, %v7550_v40, %v7559_v29  ;;  %v7609_v37 = vrot.slane %v7607_v0, 2  ;;  %v7612_v9 = vrot.slane %v7610_v31, 3 }
 0x330   : > { %v7578_v28 = vsel %vm7124_vm7, %v7568_v59, %v7577_v20  ;;  %v7587_v15 = vsel %vm7124_vm7, %v7577_v20, %v7586_v13  ;;  %v7618_v40 = vrot.slane %v7616_v34, 2  ;;  %v7679_v34 = vshrl.u32 %v13975_v11, 16 }
 0x331   : > { %10911 = vmatmul.mubr.msk.bf16.gmra.mrb[28].mxu1 %vm1578_vm2, %v14610_v1  ;;  %v7589_v1 = vshrl.u32 %v13887_v21, 16  ;;  %v7613_v10 = vor.u32 %v7612_v9, %v7609_v37  ;;  %v7688_v37 = vshrl.u32 %v13980_v43, 16  ;;  %v7691_v9 = vshll.u32 %v13980_v43, 16 }
 0x332   : > { %10914 = vmatprep.mubr.msk.bf16.mxu1 %vm1578_vm2, %v14611_v39  ;;  %v7592_v39 = vshll.u32 %v13887_v21, 16 }
 0x333   : > { %v7591_v45 = vrot.slane %v7589_v1, 2  ;;  %v7654_v1 = vrot.slane %v7652_v32, 2 }
 0x334   : > { %v7594_v41 = vrot.slane %v7592_v39, 3  ;;  %v7657_v39 = vrot.slane %v7655_v52, 3 }
 0x336   : > { %v7595_v7 = vor.u32 %v7594_v41, %v7591_v45  ;;  %v7670_v45 = vshrl.u32 %v13962_v38, 16  ;;  %v7673_v41 = vshll.u32 %v13962_v38, 16 }
 0x338   : > { %v7672_v0 = vrot.slane %v7670_v45, 2  ;;  %v7675_v31 = vrot.slane %v7673_v41, 3  ;;  %v14620_v45 = vld [vmem:[#allocation21_spill] sm:$0xff]  ;;  %v14621_v41 = vld [vmem:[#allocation24_spill] sm:$0xff] }
 0x339   : > { %10915 = vmatmul.mubr.msk.bf16.gmra.mrb[32].mxu1 %vm1578_vm2, %v14612_v17  ;;  %v7619_v17 = vshll.u32 %v13914_v23, 16 }
 0x33a   : > { %10918 = vmatprep.mubr.msk.bf16.mxu1 %vm1578_vm2, %v14613_v14  ;;  %v7596_v14 = vsel %vm7124_vm7, %v7586_v13, %v7595_v7  ;;  %v7649_v13 = vor.u32 %v7648_v4, %v7645_v44 }
 0x33b   : > { %v7621_v60 = vrot.slane %v7619_v17, 3  ;;  %v7682_v17 = vshll.u32 %v13975_v11, 16 }
 0x33d   : > { %v7622_v46 = vor.u32 %v7621_v60, %v7618_v40  ;;  %v7681_v40 = vrot.slane %v7679_v34, 2  ;;  %v7684_v60 = vrot.slane %v7682_v17, 3  ;;  %v12004_v34 = vld [vmem:[%s14528_s5 + $0x228] sm:$0xff]   ;;  %v14624_v17 = vld [vmem:[#allocation28_spill] sm:$0xff] }
 0x33f   : > { %v7623_v29 = vsel %vm7124_vm7, %v7613_v10, %v7622_v46 }
 0x341   : > { %10919 = vmatmul.mubr.msk.bf16.gmra.mrb[36].mxu1 %vm1578_vm2, %v7294_v12  ;;  %v7630_v12 = vrot.slane %v7628_v18, 3  ;;  %v7690_v18 = vrot.slane %v7688_v37, 2  ;;  %v14625_v37 = vld [vmem:[#allocation29_spill] sm:$0xff] }
 0x342   : > { %10938 = vmatprep.mubr.bf16.mxu1 %v7551_v63  ;;  %v7634_v63 = vshrl.u32 %v13930_v35, 16 }
 0x343   : > { %v7631_v59 = vor.u32 %v7630_v12, %v7627_v58  ;;  %v7685_v12 = vor.u32 %v7684_v60, %v7681_v40  ;;  %v12006_v40 = vld [vmem:[%s14528_s5 + $0x238] sm:$0xff]   ;;  %v14626_v60 = vld [vmem:[#allocation30_spill] sm:$0xff] }
 0x344   : > { %v7636_v53 = vrot.slane %v7634_v63, 2 }
 0x349   : > { %10939 = vmatmul.mubr.bf16.vlgmr.msra.gmra.mrb[4].mxu1 %v7560_v22  ;;  %v7640_v22 = vor.u32 %v7639_v47, %v7636_v53  ;;  %v14616_v47 = vld [vmem:[#allocation42_spill] sm:$0xff] }
 0x34a   : > { %10975 = vmatpush3.bf16.msra.mxu1 %v14057_v56  ;;  %10942 = vmatprep.mubr.bf16.mxu1 %v7569_v57  ;;  %v7600_v56 = vrot.slane %v7598_v61, 2  ;;  %v7632_v57 = vsel %vm7124_vm7, %v7622_v46, %v7631_v59  ;;  %v7661_v61 = vshrl.u32 %v13957_v8, 16  ;;  %v7693_v46 = vrot.slane %v7691_v9, 3  ;;  %v12005_v9 = vld [vmem:[%s14528_s5 + $0x230] sm:$0xff]  }
 0x34b   : > { %11012 = vmatprep.subr.bf16.mxu1 %v14104_v51  ;;  %v7641_v20 = vsel %vm7124_vm7, %v7631_v59, %v7640_v22 }
 0x34c   : > { %v7604_v48 = vor.u32 %v7603_v62, %v7600_v56  ;;  %v7663_v56 = vrot.slane %v7661_v61, 2  ;;  %v7666_v62 = vrot.slane %v7664_v2, 3  ;;  %v7694_v25 = vor.u32 %v7693_v46, %v7690_v18  ;;  %v14619_v2 = vld [vmem:[#allocation23_spill] sm:$0xff] }
 0x34d   : > { %v14627_v18 = vld [vmem:[#allocation31_spill] sm:$0xff] }
 0x34e   : > { %v7605_v30 = vsel %vm7124_vm7, %v7595_v7, %v7604_v48  ;;  %v7614_v49 = vsel %vm7124_vm7, %v7604_v48, %v7613_v10  ;;  %v7667_v48 = vor.u32 %v7666_v62, %v7663_v56  ;;  %v14144_v10 = vld [vmem:[%s12271_s19 + $0xa0] ss:$0 sps:$4 sm:$0x77]   ;;  %v12002_v56 = vld [vmem:[%s14528_s5 + $0x218] sm:$0xff]   ;;  %v14622_v62 = vld [vmem:[#allocation26_spill] sm:$0xff] }
 0x34f   : > { %v7700_v53 = vshll.u32 %v14144_v10, 16  ;;  %v12014_v46 = vld [vmem:[%s14531_s8 + $0x30] sm:$0xff]  }
 0x351   : > { %10943 = vmatmul.mubr.bf16.gmra.mrb[8].mxu1 %v7578_v28  ;;  %v7658_v28 = vor.u32 %v7657_v39, %v7654_v1  ;;  %v7702_v1 = vrot.slane %v7700_v53, 3  ;;  %v7695_v39 = vsel %vm7124_vm7, %v7685_v12, %v7694_v25  ;;  %v14632_v53 = vld [vmem:[#allocation36_spill] sm:$0xff] }
 0x352   : > { %10946 = vmatprep.mubr.bf16.mxu1 %v7587_v15  ;;  %v7650_v15 = vsel %vm7124_vm7, %v7640_v22, %v7649_v13  ;;  %v14617_v22 = vld [vmem:[#allocation43_spill] sm:$0xff] }
 0x353   : > { %v7659_v7 = vsel %vm7124_vm7, %v7649_v13, %v7658_v28 }
 0x359   : > { %10947 = vmatmul.mubr.bf16.gmra.mrb[12].mxu1 %v7596_v14  ;;  %v7676_v14 = vor.u32 %v7675_v31, %v7672_v0  ;;  %v14623_v0 = vld [vmem:[#allocation27_spill] sm:$0xff]  ;;  %v12003_v31 = vld [vmem:[%s14528_s5 + $0x220] sm:$0xff]  }
 0x35a   : > { %10950 = vmatprep.mubr.bf16.mxu1 %v7605_v30  ;;  %v7668_v30 = vsel %vm7124_vm7, %v7658_v28, %v7667_v48  ;;  %v12000_v28 = vld [vmem:[%s14528_s5 + $0x208] sm:$0xff]  }
 0x35b   : > { %v7677_v27 = vsel %vm7124_vm7, %v7667_v48, %v7676_v14  ;;  %v7686_v4 = vsel %vm7124_vm7, %v7676_v14, %v7685_v12  ;;  %v12010_v48 = vld [vmem:[%s14531_s8 + $0x10] sm:$0xff]   ;;  %v12011_v14 = vld [vmem:[%s14531_s8 + $0x18] sm:$0xff]  }
 0x35c   : > { %v14631_v12 = vld [vmem:[#allocation35_spill] sm:$0xff] }
 0x361   : > { %10951 = vmatmul.mubr.bf16.gmra.mrb[16].mxu1 %v7614_v49 }
 0x362   : > { %10954 = vmatprep.mubr.bf16.mxu1 %v7623_v29  ;;  %v7697_v29 = vshrl.u32 %v14144_v10, 16 }
 0x369   : > { %10955 = vmatmul.mubr.bf16.gmra.mrb[20].mxu1 %v7632_v57  ;;  %v14618_v57 = vld [vmem:[#allocation44_spill] sm:$0xff] }
 0x36a   : > { %10958 = vmatprep.mubr.bf16.mxu1 %v7641_v20  ;;  %v7699_v20 = vrot.slane %v7697_v29, 2 }
 0x36c   : > { %v7703_v13 = vor.u32 %v7702_v1, %v7699_v20  ;;  %v14634_v20 = vld [vmem:[#allocation38_spill] sm:$0xff] }
 0x36e   : > { %v7704_v61 = vsel %vm7124_vm7, %v7694_v25, %v7703_v13 }
 0x371   : > { %10959 = vmatmul.mubr.bf16.gmra.mrb[24].mxu1 %v7650_v15  ;;  %v12001_v15 = vld [vmem:[%s14528_s5 + $0x210] sm:$0xff]  }
 0x372   : > { %10962 = vmatprep.mubr.bf16.mxu1 %v7659_v7  ;;  %v12009_v7 = vld [vmem:[%s14531_s8 + $0x8] sm:$0xff]  }
 0x379   : > { %v10522_v63 = vpop.f32.mrb[76].mxu0  ;;  %10963 = vmatmul.mubr.bf16.gmra.mrb[28].mxu1 %v7668_v30  ;;  %v12012_v30 = vld [vmem:[%s14531_s8 + $0x20] sm:$0xff]  }
 0x37a   : > { %v14148_v49 = vadd.f32 %v14615_v3, %v10522_v63  ;;  %v3804_v58 = vpop.f32.mrb[77].mxu0  ;;  %10966 = vmatprep.mubr.bf16.mxu1 %v7677_v27  ;;  %v12013_v27 = vld [vmem:[%s14531_s8 + $0x28] sm:$0xff]   ;;  %v14628_v63 = vld [vmem:[#allocation32_spill] sm:$0xff]  ;;  %v14629_v3 = vld [vmem:[#allocation33_spill] sm:$0xff] }
 0x37b   : > { %v14153_v59 = vadd.f32 %v14616_v47, %v3804_v58  ;;  %v10523_v26 = vpop.f32.mrb[78].mxu0  ;;  %v14630_v58 = vld [vmem:[#allocation34_spill] sm:$0xff] }
 0x37c   : > { %v14156_v32 = vadd.f32 %v14617_v22, %v10523_v26  ;;  %v3807_v52 = vpop.f32.mrb[79].mxu0  ;;  %v14633_v26 = vld [vmem:[#allocation37_spill] sm:$0xff] }
 0x37d   : > { %v14159_v44 = vadd.f32 %v14618_v57, %v3807_v52  ;;  %v7984_v52 = vld [vmem:[%s12271_s19 + $0x10] sm:$0x8] }
 0x37e   : > { %v9687_v57 = vcombine.low %v7984_v52, %v13810_v50 }
 0x381   : > { %10967 = vmatmul.mubr.bf16.gmra.mrb[32].mxu1 %v7686_v4 }
 0x382   : > { %10970 = vmatprep.mubr.bf16.mxu1 %v7695_v39  ;;  %v14635_v39 = vld [vmem:[#allocation39_spill] sm:$0xff] }
 0x389   : > { %10971 = vmatmul.mubr.bf16.gmra.mrb[36].mxu1 %v7704_v61  ;;  %v8287_v61 = vrot.slane %v9687_v57, 3  ;;  %v8306_v57 = vrot.slane %v13925_v24, 3  ;;  %v8312_v24 = vrot.slane %v13946_v6, 3  ;;  %v8316_v6 = vrot.slane %v13962_v38, 3 }
 0x38a   : > { %10976 = vmatprep.mubr.msk.bf16.mxu1 %vm1578_vm2, %v14619_v2  ;;  %v8288_v2 = vrot.slane %v13818_v5, 3 }
 0x391   : > { %10977 = vmatmul.mubr.msk.bf16.vlgmr.msra.gmra.mrb[4].mxu1 %vm1578_vm2, %v14620_v45  ;;  %v8289_v45 = vsel %vm8009_vm8, %v8287_v61, %v8288_v2 }
 0x392   : > { %11013 = vmatpush3.bf16.msra.mxu1 %v14104_v51  ;;  %10980 = vmatprep.mubr.msk.bf16.mxu1 %vm1578_vm2, %v14621_v41  ;;  %v12008_v51 = vld [vmem:[%s14531_s8] sm:$0xff]   ;;  %v14636_v41 = vld [vmem:[#allocation40_spill] sm:$0xff] }
 0x393   : > { %11014 = vmatprep.subr.bf16.mxu1 %v12000_v28  ;;  %11064 = vmatprep.subr.bf16.mxu0 %v12008_v51 }
 0x394   : > { %11065 = vmatpush3.bf16.msra.mxu0 %v12008_v51  ;;  %v8292_v51 = vrot.slane %v13838_v33, 3 }
 0x395   : > { %11066 = vmatprep.subr.bf16.mxu0 %v12009_v7 }
 0x396   : > { %11015 = vmatpush3.bf16.msra.mxu1 %v12000_v28 }
 0x397   : > { %11016 = vmatprep.subr.bf16.mxu1 %v12001_v15 }
 0x398   : > { %11067 = vmatpush3.bf16.msra.mxu0 %v12009_v7 }
 0x399   : > { %10981 = vmatmul.mubr.msk.bf16.gmra.mrb[8].mxu1 %vm1578_vm2, %v14622_v62  ;;  %11068 = vmatprep.subr.bf16.mxu0 %v12010_v48 }
 0x39a   : > { %10984 = vmatprep.mubr.msk.bf16.mxu1 %vm1578_vm2, %v14623_v0  ;;  %11017 = vmatpush3.bf16.msra.mxu1 %v12001_v15 }
 0x39b   : > { %11018 = vmatprep.subr.bf16.mxu1 %v12002_v56 }
 0x39c   : > { %11069 = vmatpush3.bf16.msra.mxu0 %v12010_v48 }
 0x39d   : > { %11070 = vmatprep.subr.bf16.mxu0 %v12011_v14 }
 0x39e   : > { %11019 = vmatpush3.bf16.msra.mxu1 %v12002_v56  ;;  %v8290_v56 = vrot.slane %v13833_v36, 3  ;;  %v8296_v36 = vrot.slane %v13863_v16, 3 }
 0x39f   : > { %11020 = vmatprep.subr.bf16.mxu1 %v12003_v31 }
 0x3a0   : > { %11071 = vmatpush3.bf16.msra.mxu0 %v12011_v14  ;;  %v8291_v5 = vsel %vm8009_vm8, %v8288_v2, %v8290_v56  ;;  %v8293_v0 = vsel %vm8009_vm8, %v8290_v56, %v8292_v51 }
 0x3a1   : > { %10985 = vmatmul.mubr.msk.bf16.gmra.mrb[12].mxu1 %vm1578_vm2, %v14624_v17  ;;  %11072 = vmatprep.subr.bf16.mxu0 %v12012_v30 }
 0x3a2   : > { %10988 = vmatprep.mubr.msk.bf16.mxu1 %vm1578_vm2, %v14625_v37  ;;  %11021 = vmatpush3.bf16.msra.mxu1 %v12003_v31 }
 0x3a3   : > { %11022 = vmatprep.subr.bf16.mxu1 %v12004_v34 }
 0x3a4   : > { %11073 = vmatpush3.bf16.msra.mxu0 %v12012_v30 }
 0x3a5   : > { %11074 = vmatprep.subr.bf16.mxu0 %v12013_v27 }
 0x3a6   : > { %11023 = vmatpush3.bf16.msra.mxu1 %v12004_v34  ;;  %v8294_v34 = vrot.slane %v13858_v55, 3  ;;  %v8300_v55 = vrot.slane %v13892_v42, 3 }
 0x3a7   : > { %11024 = vmatprep.subr.bf16.mxu1 %v12005_v9 }
 0x3a8   : > { %11075 = vmatpush3.bf16.msra.mxu0 %v12013_v27  ;;  %v8295_v33 = vsel %vm8009_vm8, %v8292_v51, %v8294_v34  ;;  %v8297_v37 = vsel %vm8009_vm8, %v8294_v34, %v8296_v36 }
 0x3a9   : > { %10989 = vmatmul.mubr.msk.bf16.gmra.mrb[16].mxu1 %vm1578_vm2, %v14626_v60  ;;  %11076 = vmatprep.subr.bf16.mxu0 %v12014_v46 }
 0x3aa   : > { %10992 = vmatprep.mubr.msk.bf16.mxu1 %vm1578_vm2, %v14627_v18  ;;  %11025 = vmatpush3.bf16.msra.mxu1 %v12005_v9 }
 0x3ab   : > { %11026 = vmatprep.subr.bf16.mxu1 %v12006_v40 }
 0x3ac   : > { %11077 = vmatpush3.bf16.msra.mxu0 %v12014_v46 }
 0x3ae   : > { %11027 = vmatpush3.bf16.msra.mxu1 %v12006_v40  ;;  %v8298_v40 = vrot.slane %v13887_v21, 3  ;;  %v8304_v21 = vrot.slane %v13914_v23, 3 }
 0x3b0   : > { %v8299_v16 = vsel %vm8009_vm8, %v8296_v36, %v8298_v40  ;;  %v8301_v18 = vsel %vm8009_vm8, %v8298_v40, %v8300_v55  ;;  %v8307_v23 = vsel %vm8009_vm8, %v8304_v21, %v8306_v57 }
 0x3b1   : > { %10993 = vmatmul.mubr.msk.bf16.gmra.mrb[20].mxu1 %vm1578_vm2, %v14628_v63 }
 0x3b2   : > { %10996 = vmatprep.mubr.msk.bf16.mxu1 %vm1578_vm2, %v14629_v3  ;;  %v8302_v3 = vrot.slane %v13909_v54, 3  ;;  %v8308_v54 = vrot.slane %v13930_v35, 3 }
 0x3b4   : > { %v8303_v42 = vsel %vm8009_vm8, %v8300_v55, %v8302_v3  ;;  %v8309_v61 = vsel %vm8009_vm8, %v8306_v57, %v8308_v54 }
 0x3b9   : > { %10997 = vmatmul.mubr.msk.bf16.gmra.mrb[24].mxu1 %vm1578_vm2, %v14630_v58 }
 0x3ba   : > { %11000 = vmatprep.mubr.msk.bf16.mxu1 %vm1578_vm2, %v14631_v12 }
 0x3c1   : > { %v14233_v29 = vpop.f32.mrb[44].mxu0  ;;  %11001 = vmatmul.mubr.msk.bf16.gmra.mrb[28].mxu1 %vm1578_vm2, %v14632_v53  ;;  %v8305_v53 = vsel %vm8009_vm8, %v8302_v3, %v8304_v21  ;;  %v12015_v21 = vld [vmem:[%s14531_s8 + $0x38] sm:$0xff]  }
 0x3c2   : > { %v14237_v47 = vpop.f32.mrb[45].mxu0  ;;  %11004 = vmatprep.mubr.msk.bf16.mxu1 %vm1578_vm2, %v14633_v26  ;;  %11078 = vmatprep.subr.bf16.mxu0 %v12015_v21 }
 0x3c3   : > { %v14241_v25 = vpop.f32.mrb[46].mxu0  ;;  %11079 = vmatpush3.bf16.msra.mxu0 %v12015_v21 }
 0x3c4   : > { %v14243_v22 = vpop.f32.mrb[47].mxu0 }
 0x3c9   : > { %v14247_v4 = vpop.f32.mrb[48].mxu0  ;;  %11005 = vmatmul.mubr.msk.bf16.gmra.mrb[32].mxu1 %vm1578_vm2, %v14634_v20 }
 0x3ca   : > { %v14251_v1 = vpop.f32.mrb[49].mxu0  ;;  %11008 = vmatprep.mubr.msk.bf16.mxu1 %vm1578_vm2, %v14635_v39 }
 0x3cb   : > { %v14255_v13 = vpop.f32.mrb[50].mxu0 }
 0x3cc   : > { %v14258_v28 = vpop.f32.mrb[51].mxu0 }
 0x3d1   : > { %v14261_v50 = vpop.f32.mrb[52].mxu0  ;;  %11009 = vmatmul.mubr.msk.bf16.gmra.mrb[36].mxu1 %vm1578_vm2, %v14636_v41  ;;  %v8310_v41 = vrot.slane %v13941_v19, 3 }
 0x3d2   : > { %v14265_v15 = vpop.f32.mrb[53].mxu0  ;;  %11028 = vmatprep.mubr.bf16.mxu1 %v8289_v45 }
 0x3d3   : > { %v14268_v62 = vpop.f32.mrb[54].mxu0  ;;  %v8311_v35 = vsel %vm8009_vm8, %v8308_v54, %v8310_v41 }
 0x3d4   : > { %v14271_v7 = vpop.f32.mrb[55].mxu0 }
 0x3d9   : > { %v14275_v31 = vpop.f32.mrb[56].mxu0  ;;  %11029 = vmatmul.mubr.bf16.vlgmr.msra.gmra.mrb[4].mxu1 %v8291_v5  ;;  %v8313_v5 = vsel %vm8009_vm8, %v8310_v41, %v8312_v24 }
 0x3da   : > { %v14277_v48 = vpop.f32.mrb[57].mxu0  ;;  %11032 = vmatprep.mubr.bf16.mxu1 %v8293_v0 }
 0x3db   : > { %v14280_v17 = vpop.f32.mrb[58].mxu0 }
 0x3dc   : > { %v14283_v14 = vpop.f32.mrb[59].mxu0 }
 0x3e1   : > { %v14287_v9 = vpop.f32.mrb[60].mxu0  ;;  %11033 = vmatmul.mubr.bf16.gmra.mrb[8].mxu1 %v8295_v33  ;;  %v8314_v33 = vrot.slane %v13957_v8, 3  ;;  %v8318_v8 = vrot.slane %v13975_v11, 3 }
 0x3e2   : > { %v14289_v30 = vpop.f32.mrb[61].mxu0  ;;  %11036 = vmatprep.mubr.bf16.mxu1 %v8297_v37 }
 0x3e3   : > { %v14292_v60 = vpop.f32.mrb[62].mxu0  ;;  %v8319_v3 = vsel %vm8009_vm8, %v8316_v6, %v8318_v8 }
 0x3e4   : > { %v14295_v27 = vpop.f32.mrb[63].mxu0 }
 0x3e9   : > { %v14299_v46 = vpop.f32.mrb[64].mxu0  ;;  %11037 = vmatmul.mubr.bf16.gmra.mrb[12].mxu1 %v8299_v16 }
 0x3ea   : > { %v14301_v63 = vpop.f32.mrb[65].mxu0  ;;  %11040 = vmatprep.mubr.bf16.mxu1 %v8301_v18  ;;  %v8317_v18 = vsel %vm8009_vm8, %v8314_v33, %v8316_v6 }
 0x3eb   : > { %v14304_v58 = vpop.f32.mrb[66].mxu0 }
 0x3ec   : > { %v14307_v12 = vpop.f32.mrb[67].mxu0 }
 0x3f1   : > { %v14311_v26 = vpop.f32.mrb[68].mxu0  ;;  %11041 = vmatmul.mubr.bf16.gmra.mrb[16].mxu1 %v8303_v42 }
 0x3f2   : > { %v14313_v52 = vpop.f32.mrb[69].mxu0  ;;  %11044 = vmatprep.mubr.bf16.mxu1 %v8305_v53 }
 0x3f3   : > { %v14316_v20 = vpop.f32.mrb[70].mxu0 }
 0x3f4   : > { %v14319_v39 = vpop.f32.mrb[71].mxu0 }
 0x3f9   : > { %v14323_v2 = vpop.f32.mrb[72].mxu0  ;;  %11045 = vmatmul.mubr.bf16.gmra.mrb[20].mxu1 %v8307_v23 }
 0x3fa   : > { %v14325_v45 = vpop.f32.mrb[73].mxu0  ;;  %11048 = vmatprep.mubr.bf16.mxu1 %v8309_v61 }
 0x3fb   : > { %v14328_v56 = vpop.f32.mrb[74].mxu0 }
 0x3fc   : > { %v14331_v51 = vpop.f32.mrb[75].mxu0 }
 0x401   : > { %v10612_v0 = vpop.f32.mrb[80].mxu0  ;;  %11049 = vmatmul.mubr.bf16.gmra.mrb[24].mxu1 %v8311_v35 }
 0x402   : > { %v14336_v34 = vadd.f32 %v14148_v49, %v10612_v0  ;;  %v4674_v36 = vpop.f32.mrb[81].mxu0  ;;  %11052 = vmatprep.mubr.bf16.mxu1 %v8313_v5  ;;  %v8315_v49 = vsel %vm8009_vm8, %v8312_v24, %v8314_v33 }
 0x403   : > { %v14340_v19 = vadd.f32 %v14153_v59, %v4674_v36  ;;  %v10613_v37 = vpop.f32.mrb[82].mxu0  ;;  %v8320_v59 = vrot.slane %v13980_v43, 3  ;;  %v14363_v43 = vld [vmem:[%s14530_s7] ss:$0 sm:$0xff] }
 0x404   : > { %v14344_v40 = vadd.f32 %v14156_v32, %v10613_v37  ;;  %v4677_v55 = vpop.f32.mrb[83].mxu0  ;;  %v8322_v32 = vrot.slane %v14144_v10, 3 }
 0x405   : > { %v14347_v16 = vadd.f32 %v14159_v44, %v4677_v55  ;;  %v8321_v38 = vsel %vm8009_vm8, %v8318_v8, %v8320_v59 }
 0x406   : > { %v8323_v44 = vsel %vm8009_vm8, %v8320_v59, %v8322_v32 }
 0x409   : > { %11053 = vmatmul.mubr.bf16.gmra.mrb[28].mxu1 %v8315_v49 }
 0x40a   : > { %11056 = vmatprep.mubr.bf16.mxu1 %v8317_v18 }
 0x411   : > { %11057 = vmatmul.mubr.bf16.gmra.mrb[32].mxu1 %v8319_v3 }
 0x412   : > { %11060 = vmatprep.mubr.bf16.mxu1 %v8321_v38 }
 0x419   : > { %11061 = vmatmul.mubr.bf16.gmra.mrb[36].mxu1 %v8323_v44 }
 0x4ac   : > { %v11030_v11 = vpop.f32.mrb[4].mxu1 }
 0x4ad   : > { %v11118_v42 = vadd.f32 %v11030_v11, %v14233_v29  ;;  %v8424_v53 = vpop.f32.mrb[5].mxu1 }
 0x4ae   : > { %v11119_v10 = vadd.f32 %v8424_v53, %v14237_v47  ;;  %v11031_v57 = vpop.f32.mrb[6].mxu1 }
 0x4af   : > { %v8612_v54 = vadd.f32 %v11118_v42, %v14363_v43  ;;  %v11120_v23 = vadd.f32 %v11031_v57, %v14241_v25  ;;  %v8427_v61 = vpop.f32.mrb[7].mxu1 }
 0x4b0   : > { %v8610_v41 = vadd.f32 %v11119_v10, %v14363_v43  ;;  %v11121_v24 = vadd.f32 %v8427_v61, %v14243_v22 }
 0x4b1   : > { %v8613_v35 = vadd.f32 %v11120_v23, %v14363_v43  ;;  %v8648_v0 = vmax.f32 %v8612_v54, 0.0 }
 0x4b2   : > { %v8611_v5 = vadd.f32 %v11121_v24, %v14363_v43  ;;  %v8646_v29 = vmax.f32 %v8610_v41, 0.0 }
 0x4b3   : > { %v8649_v36 = vmax.f32 %v8613_v35, 0.0 }
 0x4b4   : > { %v8647_v33 = vmax.f32 %v8611_v5, 0.0  ;;  %v11034_v37 = vpop.f32.mrb[8].mxu1 }
 0x4b5   : > { %v8683_v47 = vpack.c.bf16 %v8649_v36, %v8648_v0  ;;  %v11122_v6 = vadd.f32 %v11034_v37, %v14247_v4  ;;  %v8440_v55 = vpop.f32.mrb[9].mxu1 }
 0x4b6   : > { %v11123_v25 = vadd.f32 %v8440_v55, %v14251_v1  ;;  %v11035_v49 = vpop.f32.mrb[10].mxu1  ;;  %v8682_v18 = vpack.c.bf16 %v8647_v33, %v8646_v29 }
 0x4b7   : > { %v8616_v8 = vadd.f32 %v11122_v6, %v14363_v43  ;;  %v11124_v22 = vadd.f32 %v11035_v49, %v14255_v13  ;;  %v8443_v59 = vpop.f32.mrb[11].mxu1 }
 0x4b8   : > { %v8614_v3 = vadd.f32 %v11123_v25, %v14363_v43  ;;  %v11125_v38 = vadd.f32 %v8443_v59, %v14258_v28  ;;  %11080 = vmatprep.mubr.bf16.mxu0 %v8682_v18 }
 0x4b9   : > { %v8617_v32 = vadd.f32 %v11124_v22, %v14363_v43  ;;  %11081 = vmatmul.mubr.bf16.vlgmr.msra.gmra.mrb[84].mxu0 %v8683_v47  ;;  %v8652_v44 = vmax.f32 %v8616_v8, 0.0 }
 0x4ba   : > { %v8615_v4 = vadd.f32 %v11125_v38, %v14363_v43  ;;  %v8650_v1 = vmax.f32 %v8614_v3, 0.0 }
 0x4bb   : > { %v8653_v21 = vmax.f32 %v8617_v32, 0.0 }
 0x4bc   : > { %v8651_v11 = vmax.f32 %v8615_v4, 0.0  ;;  %v11038_v42 = vpop.f32.mrb[12].mxu1 }
 0x4bd   : > { %v11126_v53 = vadd.f32 %v11038_v42, %v14261_v50  ;;  %v8456_v10 = vpop.f32.mrb[13].mxu1  ;;  %v8685_v13 = vpack.c.bf16 %v8653_v21, %v8652_v44 }
 0x4be   : > { %v11127_v57 = vadd.f32 %v8456_v10, %v14265_v15  ;;  %v11039_v54 = vpop.f32.mrb[14].mxu1  ;;  %v8684_v23 = vpack.c.bf16 %v8651_v11, %v8650_v1 }
 0x4bf   : > { %v8620_v28 = vadd.f32 %v11126_v53, %v14363_v43  ;;  %v11128_v61 = vadd.f32 %v11039_v54, %v14268_v62  ;;  %v8459_v41 = vpop.f32.mrb[15].mxu1 }
 0x4c0   : > { %v8618_v24 = vadd.f32 %v11127_v57, %v14363_v43  ;;  %v11129_v35 = vadd.f32 %v8459_v41, %v14271_v7  ;;  %11084 = vmatprep.mubr.bf16.mxu0 %v8684_v23 }
 0x4c1   : > { %v8621_v5 = vadd.f32 %v11128_v61, %v14363_v43  ;;  %11085 = vmatmul.mubr.bf16.gmra.mrb[88].mxu0 %v8685_v13  ;;  %v8656_v0 = vmax.f32 %v8620_v28, 0.0 }
 0x4c2   : > { %v8619_v50 = vadd.f32 %v11129_v35, %v14363_v43  ;;  %v8654_v15 = vmax.f32 %v8618_v24, 0.0 }
 0x4c3   : > { %v8657_v36 = vmax.f32 %v8621_v5, 0.0 }
 0x4c4   : > { %v8655_v29 = vmax.f32 %v8619_v50, 0.0  ;;  %v11042_v33 = vpop.f32.mrb[16].mxu1 }
 0x4c5   : > { %v11130_v37 = vadd.f32 %v11042_v33, %v14275_v31  ;;  %v8472_v47 = vpop.f32.mrb[17].mxu1  ;;  %v8687_v62 = vpack.c.bf16 %v8657_v36, %v8656_v0 }
 0x4c6   : > { %v11131_v6 = vadd.f32 %v8472_v47, %v14277_v48  ;;  %v11043_v55 = vpop.f32.mrb[18].mxu1  ;;  %v8686_v25 = vpack.c.bf16 %v8655_v29, %v8654_v15 }
 0x4c7   : > { %v8624_v7 = vadd.f32 %v11130_v37, %v14363_v43  ;;  %v11132_v49 = vadd.f32 %v11043_v55, %v14280_v17  ;;  %v8475_v18 = vpop.f32.mrb[19].mxu1 }
 0x4c8   : > { %v8622_v8 = vadd.f32 %v11131_v6, %v14363_v43  ;;  %v11133_v22 = vadd.f32 %v8475_v18, %v14283_v14  ;;  %11088 = vmatprep.mubr.bf16.mxu0 %v8686_v25 }
 0x4c9   : > { %v8625_v59 = vadd.f32 %v11132_v49, %v14363_v43  ;;  %11089 = vmatmul.mubr.bf16.gmra.mrb[92].mxu0 %v8687_v62  ;;  %v8660_v3 = vmax.f32 %v8624_v7, 0.0 }
 0x4ca   : > { %v8623_v31 = vadd.f32 %v11133_v22, %v14363_v43  ;;  %v8658_v48 = vmax.f32 %v8622_v8, 0.0 }
 0x4cb   : > { %v8661_v38 = vmax.f32 %v8625_v59, 0.0 }
 0x4cc   : > { %v8659_v32 = vmax.f32 %v8623_v31, 0.0  ;;  %v11046_v4 = vpop.f32.mrb[20].mxu1 }
 0x4cd   : > { %v11134_v44 = vadd.f32 %v11046_v4, %v14287_v9  ;;  %v8488_v21 = vpop.f32.mrb[21].mxu1  ;;  %v8689_v17 = vpack.c.bf16 %v8661_v38, %v8660_v3 }
 0x4ce   : > { %v11135_v1 = vadd.f32 %v8488_v21, %v14289_v30  ;;  %v11047_v11 = vpop.f32.mrb[22].mxu1  ;;  %v8688_v42 = vpack.c.bf16 %v8659_v32, %v8658_v48 }
 0x4cf   : > { %v8628_v14 = vadd.f32 %v11134_v44, %v14363_v43  ;;  %v11136_v53 = vadd.f32 %v11047_v11, %v14292_v60  ;;  %v8491_v10 = vpop.f32.mrb[23].mxu1 }
 0x4d0   : > { %v8626_v13 = vadd.f32 %v11135_v1, %v14363_v43  ;;  %v11137_v57 = vadd.f32 %v8491_v10, %v14295_v27  ;;  %11092 = vmatprep.mubr.bf16.mxu0 %v8688_v42 }
 0x4d1   : > { %v8629_v54 = vadd.f32 %v11136_v53, %v14363_v43  ;;  %11093 = vmatmul.mubr.bf16.gmra.mrb[96].mxu0 %v8689_v17  ;;  %v8664_v23 = vmax.f32 %v8628_v14, 0.0 }
 0x4d2   : > { %v8627_v9 = vadd.f32 %v11137_v57, %v14363_v43  ;;  %v8662_v30 = vmax.f32 %v8626_v13, 0.0 }
 0x4d3   : > { %v8665_v28 = vmax.f32 %v8629_v54, 0.0 }
 0x4d4   : > { %v8663_v61 = vmax.f32 %v8627_v9, 0.0  ;;  %v11050_v41 = vpop.f32.mrb[24].mxu1 }
 0x4d5   : > { %v11138_v24 = vadd.f32 %v11050_v41, %v14299_v46  ;;  %v8504_v35 = vpop.f32.mrb[25].mxu1  ;;  %v8691_v60 = vpack.c.bf16 %v8665_v28, %v8664_v23 }
 0x4d6   : > { %v11139_v5 = vadd.f32 %v8504_v35, %v14301_v63  ;;  %v11051_v50 = vpop.f32.mrb[26].mxu1  ;;  %v8690_v0 = vpack.c.bf16 %v8663_v61, %v8662_v30 }
 0x4d7   : > { %v8632_v27 = vadd.f32 %v11138_v24, %v14363_v43  ;;  %v11140_v36 = vadd.f32 %v11051_v50, %v14304_v58  ;;  %v8507_v15 = vpop.f32.mrb[27].mxu1 }
 0x4d8   : > { %v8630_v29 = vadd.f32 %v11139_v5, %v14363_v43  ;;  %v11141_v33 = vadd.f32 %v8507_v15, %v14307_v12  ;;  %11096 = vmatprep.mubr.bf16.mxu0 %v8690_v0 }
 0x4d9   : > { %v8633_v37 = vadd.f32 %v11140_v36, %v14363_v43  ;;  %11097 = vmatmul.mubr.bf16.gmra.mrb[100].mxu0 %v8691_v60  ;;  %v8668_v47 = vmax.f32 %v8632_v27, 0.0 }
 0x4da   : > { %v8631_v46 = vadd.f32 %v11141_v33, %v14363_v43  ;;  %v8666_v63 = vmax.f32 %v8630_v29, 0.0 }
 0x4db   : > { %v8669_v62 = vmax.f32 %v8633_v37, 0.0 }
 0x4dc   : > { %v8667_v6 = vmax.f32 %v8631_v46, 0.0  ;;  %v11054_v55 = vpop.f32.mrb[28].mxu1 }
 0x4dd   : > { %v11142_v25 = vadd.f32 %v11054_v55, %v14311_v26  ;;  %v8520_v7 = vpop.f32.mrb[29].mxu1  ;;  %v8693_v58 = vpack.c.bf16 %v8669_v62, %v8668_v47 }
 0x4de   : > { %v11143_v49 = vadd.f32 %v8520_v7, %v14313_v52  ;;  %v11055_v18 = vpop.f32.mrb[30].mxu1  ;;  %v8692_v8 = vpack.c.bf16 %v8667_v6, %v8666_v63 }
 0x4df   : > { %v8636_v12 = vadd.f32 %v11142_v25, %v14363_v43  ;;  %v11144_v22 = vadd.f32 %v11055_v18, %v14316_v20  ;;  %v8523_v59 = vpop.f32.mrb[31].mxu1 }
 0x4e0   : > { %v8634_v31 = vadd.f32 %v11143_v49, %v14363_v43  ;;  %v11145_v3 = vadd.f32 %v8523_v59, %v14319_v39  ;;  %11100 = vmatprep.mubr.bf16.mxu0 %v8692_v8 }
 0x4e1   : > { %v8637_v38 = vadd.f32 %v11144_v22, %v14363_v43  ;;  %11101 = vmatmul.mubr.bf16.gmra.mrb[104].mxu0 %v8693_v58  ;;  %v8672_v48 = vmax.f32 %v8636_v12, 0.0 }
 0x4e2   : > { %v8635_v26 = vadd.f32 %v11145_v3, %v14363_v43  ;;  %v8670_v52 = vmax.f32 %v8634_v31, 0.0 }
 0x4e3   : > { %v8673_v32 = vmax.f32 %v8637_v38, 0.0 }
 0x4e4   : > { %v8671_v4 = vmax.f32 %v8635_v26, 0.0  ;;  %v11058_v44 = vpop.f32.mrb[32].mxu1 }
 0x4e5   : > { %v11146_v21 = vadd.f32 %v11058_v44, %v14323_v2  ;;  %v8536_v17 = vpop.f32.mrb[33].mxu1  ;;  %v8695_v20 = vpack.c.bf16 %v8673_v32, %v8672_v48 }
 0x4e6   : > { %v11147_v1 = vadd.f32 %v8536_v17, %v14325_v45  ;;  %v11059_v11 = vpop.f32.mrb[34].mxu1  ;;  %v8694_v42 = vpack.c.bf16 %v8671_v4, %v8670_v52 }
 0x4e7   : > { %v8640_v39 = vadd.f32 %v11146_v21, %v14363_v43  ;;  %v11148_v14 = vadd.f32 %v11059_v11, %v14328_v56  ;;  %v8539_v53 = vpop.f32.mrb[35].mxu1 }
 0x4e8   : > { %v8638_v10 = vadd.f32 %v11147_v1, %v14363_v43  ;;  %v11149_v13 = vadd.f32 %v8539_v53, %v14331_v51  ;;  %11104 = vmatprep.mubr.bf16.mxu0 %v8694_v42 }
 0x4e9   : > { %v8641_v57 = vadd.f32 %v11148_v14, %v14363_v43  ;;  %11105 = vmatmul.mubr.bf16.gmra.mrb[108].mxu0 %v8695_v20  ;;  %v8676_v54 = vmax.f32 %v8640_v39, 0.0 }
 0x4ea   : > { %v8639_v2 = vadd.f32 %v11149_v13, %v14363_v43  ;;  %v8674_v45 = vmax.f32 %v8638_v10, 0.0 }
 0x4eb   : > { %v8677_v9 = vmax.f32 %v8641_v57, 0.0 }
 0x4ec   : > { %v8675_v23 = vmax.f32 %v8639_v2, 0.0  ;;  %v11062_v28 = vpop.f32.mrb[36].mxu1 }
 0x4ed   : > { %v11152_v30 = vadd.f32 %v14336_v34, %v11062_v28  ;;  %v8552_v61 = vpop.f32.mrb[37].mxu1  ;;  %v8697_v56 = vpack.c.bf16 %v8677_v9, %v8676_v54 }
 0x4ee   : > { %v11155_v41 = vadd.f32 %v14340_v19, %v8552_v61  ;;  %v11063_v24 = vpop.f32.mrb[38].mxu1  ;;  %v8696_v35 = vpack.c.bf16 %v8675_v23, %v8674_v45 }
 0x4ef   : > { %v8644_v51 = vadd.f32 %v11152_v30, %v14363_v43  ;;  %v11158_v60 = vadd.f32 %v14344_v40, %v11063_v24  ;;  %v8555_v5 = vpop.f32.mrb[39].mxu1  ;;  %v14441_v40 = vld [vmem:[%s14532_s9] ss:$0 sm:$0xff] }
 0x4f0   : > { %v8642_v50 = vadd.f32 %v11155_v41, %v14363_v43  ;;  %v11161_v0 = vadd.f32 %v14347_v16, %v8555_v5  ;;  %11108 = vmatprep.mubr.bf16.mxu0 %v8696_v35 }
 0x4f1   : > { %v8645_v27 = vadd.f32 %v11158_v60, %v14363_v43  ;;  %11109 = vmatmul.mubr.bf16.gmra.mrb[112].mxu0 %v8697_v56  ;;  %v8680_v36 = vmax.f32 %v8644_v51, 0.0 }
 0x4f2   : > { %v8643_v34 = vadd.f32 %v11161_v0, %v14363_v43  ;;  %v8678_v15 = vmax.f32 %v8642_v50, 0.0 }
 0x4f3   : > { %v8681_v19 = vmax.f32 %v8645_v27, 0.0 }
 0x4f4   : > { %v8679_v29 = vmax.f32 %v8643_v34, 0.0 }
 0x4f5   : > { %v8699_v33 = vpack.c.bf16 %v8681_v19, %v8680_v36 }
 0x4f6   : > { %v8698_v37 = vpack.c.bf16 %v8679_v29, %v8678_v15 }
 0x4f8   : > { %11112 = vmatprep.mubr.bf16.mxu0 %v8698_v37 }
 0x4f9   : > { %11113 = vmatmul.mubr.bf16.gmra.mrb[116].mxu0 %v8699_v33 }
 0x58c   : > { %v11082_v16 = vpop.f32.mrb[84].mxu0 }
 0x58d   : > { %v8814_v43 = vadd.f32 %v11082_v16, %v14441_v40  ;;  %v8805_v46 = vpop.f32.mrb[85].mxu0 }
 0x58e   : > { %v8806_v47 = vadd.f32 %v14441_v40, %v8805_v46  ;;  %v11083_v62 = vpop.f32.mrb[86].mxu0 }
 0x58f   : > { %8950 = vst [vmem:[%s14446_s12 + $0x10] sm:$0xff] %v8814_v43  ;;  %v8817_v63 = vadd.f32 %v11083_v62, %v14441_v40  ;;  %v8808_v6 = vpop.f32.mrb[87].mxu0 }
 0x590   : > { %8948 = vst [vmem:[%s14446_s12] sm:$0xff] %v8806_v47  ;;  %v8809_v55 = vadd.f32 %v14441_v40, %v8808_v6 }
 0x591   : > { %8951 = vst [vmem:[%s14446_s12 + $0x18] sm:$0xff] %v8817_v63 }
 0x592   : > { %8949 = vst [vmem:[%s14446_s12 + $0x8] sm:$0xff] %v8809_v55 }
 0x594   : > { %v11086_v25 = vpop.f32.mrb[88].mxu0 }
 0x595   : > { %v8830_v7 = vadd.f32 %v11086_v25, %v14441_v40  ;;  %v8821_v58 = vpop.f32.mrb[89].mxu0 }
 0x596   : > { %v8822_v49 = vadd.f32 %v14441_v40, %v8821_v58  ;;  %v11087_v18 = vpop.f32.mrb[90].mxu0 }
 0x597   : > { %8954 = vst [vmem:[%s14446_s12 + $0x30] sm:$0xff] %v8830_v7  ;;  %v8833_v8 = vadd.f32 %v11087_v18, %v14441_v40  ;;  %v8824_v12 = vpop.f32.mrb[91].mxu0 }
 0x598   : > { %8952 = vst [vmem:[%s14446_s12 + $0x20] sm:$0xff] %v8822_v49  ;;  %v8825_v22 = vadd.f32 %v14441_v40, %v8824_v12 }
 0x599   : > { %8955 = vst [vmem:[%s14446_s12 + $0x38] sm:$0xff] %v8833_v8 }
 0x59a   : > { %8953 = vst [vmem:[%s14446_s12 + $0x28] sm:$0xff] %v8825_v22 }
 0x59c   : > { %v11090_v59 = vpop.f32.mrb[92].mxu0 }
 0x59d   : > { %v8846_v31 = vadd.f32 %v11090_v59, %v14441_v40  ;;  %v8837_v3 = vpop.f32.mrb[93].mxu0 }
 0x59e   : > { %v8838_v38 = vadd.f32 %v14441_v40, %v8837_v3  ;;  %v11091_v26 = vpop.f32.mrb[94].mxu0 }
 0x59f   : > { %8958 = vst [vmem:[%s14446_s12 + $0x50] sm:$0xff] %v8846_v31  ;;  %v8849_v48 = vadd.f32 %v11091_v26, %v14441_v40  ;;  %v8840_v32 = vpop.f32.mrb[95].mxu0 }
 0x5a0   : > { %8956 = vst [vmem:[%s14446_s12 + $0x40] sm:$0xff] %v8838_v38  ;;  %v8841_v52 = vadd.f32 %v14441_v40, %v8840_v32 }
 0x5a1   : > { %8959 = vst [vmem:[%s14446_s12 + $0x58] sm:$0xff] %v8849_v48 }
 0x5a2   : > { %8957 = vst [vmem:[%s14446_s12 + $0x48] sm:$0xff] %v8841_v52 }
 0x5a4   : > { %v11094_v4 = vpop.f32.mrb[96].mxu0 }
 0x5a5   : > { %v8862_v44 = vadd.f32 %v11094_v4, %v14441_v40  ;;  %v8853_v21 = vpop.f32.mrb[97].mxu0 }
 0x5a6   : > { %v8854_v17 = vadd.f32 %v14441_v40, %v8853_v21  ;;  %v11095_v20 = vpop.f32.mrb[98].mxu0 }
 0x5a7   : > { %8962 = vst [vmem:[%s14446_s12 + $0x70] sm:$0xff] %v8862_v44  ;;  %v8865_v1 = vadd.f32 %v11095_v20, %v14441_v40  ;;  %v8856_v11 = vpop.f32.mrb[99].mxu0 }
 0x5a8   : > { %8960 = vst [vmem:[%s14446_s12 + $0x60] sm:$0xff] %v8854_v17  ;;  %v8857_v42 = vadd.f32 %v14441_v40, %v8856_v11 }
 0x5a9   : > { %8963 = vst [vmem:[%s14446_s12 + $0x78] sm:$0xff] %v8865_v1 }
 0x5aa   : > { %8961 = vst [vmem:[%s14446_s12 + $0x68] sm:$0xff] %v8857_v42 }
 0x5ac   : > { %v11098_v39 = vpop.f32.mrb[100].mxu0 }
 0x5ad   : > { %v8878_v14 = vadd.f32 %v11098_v39, %v14441_v40  ;;  %v8869_v53 = vpop.f32.mrb[101].mxu0 }
 0x5ae   : > { %v8870_v10 = vadd.f32 %v14441_v40, %v8869_v53  ;;  %v11099_v13 = vpop.f32.mrb[102].mxu0 }
 0x5af   : > { %8966 = vst [vmem:[%s14446_s12 + $0x90] sm:$0xff] %v8878_v14  ;;  %v8881_v57 = vadd.f32 %v11099_v13, %v14441_v40  ;;  %v8872_v2 = vpop.f32.mrb[103].mxu0 }
 0x5b0   : > { %8964 = vst [vmem:[%s14446_s12 + $0x80] sm:$0xff] %v8870_v10  ;;  %v8873_v54 = vadd.f32 %v14441_v40, %v8872_v2 }
 0x5b1   : > { %8967 = vst [vmem:[%s14446_s12 + $0x98] sm:$0xff] %v8881_v57 }
 0x5b2   : > { %8965 = vst [vmem:[%s14446_s12 + $0x88] sm:$0xff] %v8873_v54 }
 0x5b4   : > { %v11102_v9 = vpop.f32.mrb[104].mxu0 }
 0x5b5   : > { %v8894_v45 = vadd.f32 %v11102_v9, %v14441_v40  ;;  %v8885_v23 = vpop.f32.mrb[105].mxu0 }
 0x5b6   : > { %v8886_v28 = vadd.f32 %v14441_v40, %v8885_v23  ;;  %v11103_v30 = vpop.f32.mrb[106].mxu0 }
 0x5b7   : > { %8970 = vst [vmem:[%s14446_s12 + $0xb0] sm:$0xff] %v8894_v45  ;;  %v8897_v61 = vadd.f32 %v11103_v30, %v14441_v40  ;;  %v8888_v56 = vpop.f32.mrb[107].mxu0 }
 0x5b8   : > { %8968 = vst [vmem:[%s14446_s12 + $0xa0] sm:$0xff] %v8886_v28  ;;  %v8889_v41 = vadd.f32 %v14441_v40, %v8888_v56 }
 0x5b9   : > { %8971 = vst [vmem:[%s14446_s12 + $0xb8] sm:$0xff] %v8897_v61 }
 0x5ba   : > { %8969 = vst [vmem:[%s14446_s12 + $0xa8] sm:$0xff] %v8889_v41 }
 0x5bc   : > { %v11106_v24 = vpop.f32.mrb[108].mxu0 }
 0x5bd   : > { %v8910_v35 = vadd.f32 %v11106_v24, %v14441_v40  ;;  %v8901_v51 = vpop.f32.mrb[109].mxu0 }
 0x5be   : > { %v8902_v60 = vadd.f32 %v14441_v40, %v8901_v51  ;;  %v11107_v5 = vpop.f32.mrb[110].mxu0 }
 0x5bf   : > { %8974 = vst [vmem:[%s14446_s12 + $0xd0] sm:$0xff] %v8910_v35  ;;  %v8913_v50 = vadd.f32 %v11107_v5, %v14441_v40  ;;  %v8904_v0 = vpop.f32.mrb[111].mxu0 }
 0x5c0   : > { %8972 = vst [vmem:[%s14446_s12 + $0xc0] sm:$0xff] %v8902_v60  ;;  %v8905_v27 = vadd.f32 %v14441_v40, %v8904_v0 }
 0x5c1   : > { %8975 = vst [vmem:[%s14446_s12 + $0xd8] sm:$0xff] %v8913_v50 }
 0x5c2   : > { %8973 = vst [vmem:[%s14446_s12 + $0xc8] sm:$0xff] %v8905_v27 }
 0x5c4   : > { %v11110_v34 = vpop.f32.mrb[112].mxu0 }
 0x5c5   : > { %v8926_v36 = vadd.f32 %v11110_v34, %v14441_v40  ;;  %v8917_v19 = vpop.f32.mrb[113].mxu0 }
 0x5c6   : > { %v8918_v15 = vadd.f32 %v14441_v40, %v8917_v19  ;;  %v11111_v29 = vpop.f32.mrb[114].mxu0 }
 0x5c7   : > { %8978 = vst [vmem:[%s14446_s12 + $0xf0] sm:$0xff] %v8926_v36  ;;  %v8929_v33 = vadd.f32 %v11111_v29, %v14441_v40  ;;  %v8920_v37 = vpop.f32.mrb[115].mxu0 }
 0x5c8   : > { %8976 = vst [vmem:[%s14446_s12 + $0xe0] sm:$0xff] %v8918_v15  ;;  %v8921_v16 = vadd.f32 %v14441_v40, %v8920_v37 }
 0x5c9   : > { %8979 = vst [vmem:[%s14446_s12 + $0xf8] sm:$0xff] %v8929_v33 }
 0x5ca   : > { %8977 = vst [vmem:[%s14446_s12 + $0xe8] sm:$0xff] %v8921_v16 }
 0x5cc   : > { %v11114_v43 = vpop.f32.mrb[116].mxu0 }
 0x5cd   : > { %v8942_v46 = vadd.f32 %v11114_v43, %v14441_v40  ;;  %v8933_v47 = vpop.f32.mrb[117].mxu0 }
 0x5ce   : > { %v8934_v62 = vadd.f32 %v14441_v40, %v8933_v47  ;;  %v11115_v63 = vpop.f32.mrb[118].mxu0 }
 0x5cf   : > { %8982 = vst [vmem:[%s14446_s12 + $0x110] sm:$0xff] %v8942_v46  ;;  %v8945_v6 = vadd.f32 %v11115_v63, %v14441_v40  ;;  %v8936_v55 = vpop.f32.mrb[119].mxu0 }
 0x5d0   : > { %8980 = vst [vmem:[%s14446_s12 + $0x100] sm:$0xff] %v8934_v62  ;;  %v8937_v25 = vadd.f32 %v14441_v40, %v8936_v55 }
 0x5d1   : > { %8983 = vst [vmem:[%s14446_s12 + $0x118] sm:$0xff] %v8945_v6 }
 0x5d2   : > { %8981 = vst [vmem:[%s14446_s12 + $0x108] sm:$0xff] %v8937_v25 }
 0x5d3 PF: > { %s20_s13 = sadd.s32 1, %s12097_s13  }
 0x5d4   : > { %p17_p4 = scmp.ge.s32.totalorder %s20_s13, 4  }
 0x5d6   :  { %19 = sbr.rel (!%p17_p4) target bundleno = 1 (0x1), region = 109 }

</bundles_post_ra>
